<compile_context>
chip_gen: v7x
topology: tpu7x:2x2x1
jax: 0.10.0
libtpu: 0.0.40
codegen_flags: <defaults>
</compile_context>

<pallas_src>
import jax
import jax.numpy as jnp
from jax.experimental import pallas as pl
from jax.experimental.pallas import tpu as pltpu

H = 64         # hidden width of per-point MLPs
F = 128        # per-point feature dim produced by GeoVote
ROT_H = 32     # hidden width of rotation head
ROT_OUT = 4    # rotation vector dim (axis + confidence, FS-Net convention)

# (name, shape) of the logical (unfused) parameters; biases kept 2D (1, C).
PARAM_SHAPES = [
    # GeoVote: per-point 3 -> 64 -> 64 -> 128, vote head 128 -> 3
    ("gv_w1", (3, H)),        ("gv_b1", (1, H)),
    ("gv_w2", (H, H)),        ("gv_b2", (1, H)),
    ("gv_w3", (H, F)),        ("gv_b3", (1, F)),
    ("gv_wv", (F, 3)),        ("gv_bv", (1, 3)),
    # Rot_green: per-point 128 -> 128 -> 64, global max-pool, FC 64 -> 32 -> 4
    ("rg_w1", (F, F)),        ("rg_b1", (1, F)),
    ("rg_w2", (F, H)),        ("rg_b2", (1, H)),
    ("rg_w3", (H, ROT_H)),    ("rg_b3", (1, ROT_H)),
    ("rg_w4", (ROT_H, ROT_OUT)), ("rg_b4", (1, ROT_OUT)),
    # Pose_T_v2: per-point 3 -> 64 -> 128, global max-pool, FC 128 -> 64 -> 3
    ("tr_w1", (3, H)),        ("tr_b1", (1, H)),
    ("tr_w2", (H, F)),        ("tr_b2", (1, F)),
    ("tr_w3", (F, H)),        ("tr_b3", (1, H)),
    ("tr_w4", (H, 3)),        ("tr_b4", (1, 3)),
]

# ----------------------------- slab layout ----------------------------------
COLS = 256                     # lane width of the packed parameter slab
OFF_W_IN = 0                   # rows 0:8   (3 real, K padded to 8): [gv_w1 | tr_w1] cols 0:128
OFF_BIAS = 8                   # rows 8:16  fused bias vectors (7 rows used)
OFF_W_A = 16                   # rows 16:144  blockdiag(gv_w2 -> cols 0:64, tr_w2 -> cols 128:256)
OFF_W_B = 144                  # rows 144:208 gv_w3 at cols 0:128
OFF_W_C = 208                  # rows 208:336 [rg_w1 -> cols 0:128 | gv_wv -> cols 128:131]
OFF_W_D = 336                  # rows 336:464 rg_w2 at cols 0:64
OFF_W_E = 464                  # rows 464:656 rg_w3 (rows 0:64 -> cols 0:32), tr_w3 (rows 64:192 -> cols 32:96)
OFF_W_F = 656                  # rows 656:784 rg_w4 (rows 0:32 -> cols 0:4), tr_w4 (rows 32:96 -> cols 4:7)
SLAB_ROWS = OFF_W_F + 128      # 784

MAX_ROWS_1TC = 8192            # rows (Bt*N) per grid step on 128-MiB v5e/v6e
MAX_ROWS_2TC = 4096            # rows per grid step on 64-MiB v7x


def pack_params(p):
    """Pack the 26 logical parameters into one zero-padded (784, 256) bf16 slab."""
    s = jnp.zeros((SLAB_ROWS, COLS), jnp.float32)
    # fused first layer [gv_w1 | tr_w1] : (3, 128), K zero-padded to 8 rows
    s = s.at[OFF_W_IN:OFF_W_IN + 3, 0:64].set(p["gv_w1"])
    s = s.at[OFF_W_IN:OFF_W_IN + 3, 64:128].set(p["tr_w1"])
    # fused biases, one per row
    b = OFF_BIAS
    s = s.at[b + 0, 0:64].set(p["gv_b1"][0]);  s = s.at[b + 0, 64:128].set(p["tr_b1"][0])
    s = s.at[b + 1, 0:64].set(p["gv_b2"][0]);  s = s.at[b + 1, 128:256].set(p["tr_b2"][0])
    s = s.at[b + 2, 0:128].set(p["gv_b3"][0])
    s = s.at[b + 3, 0:128].set(p["rg_b1"][0]); s = s.at[b + 3, 128:131].set(p["gv_bv"][0])
    s = s.at[b + 4, 0:64].set(p["rg_b2"][0])
    s = s.at[b + 5, 0:32].set(p["rg_b3"][0]);  s = s.at[b + 5, 32:96].set(p["tr_b3"][0])
    s = s.at[b + 6, 0:4].set(p["rg_b4"][0]);   s = s.at[b + 6, 4:7].set(p["tr_b4"][0])
    # W_A = blockdiag(gv_w2, tr_w2)
    s = s.at[OFF_W_A:OFF_W_A + 64, 0:64].set(p["gv_w2"])
    s = s.at[OFF_W_A + 64:OFF_W_A + 128, 128:256].set(p["tr_w2"])
    # W_B = gv_w3 (used via a 128-lane slice)
    s = s.at[OFF_W_B:OFF_W_B + 64, 0:128].set(p["gv_w3"])
    # W_C = [rg_w1 | gv_wv]
    s = s.at[OFF_W_C:OFF_W_C + 128, 0:128].set(p["rg_w1"])
    s = s.at[OFF_W_C:OFF_W_C + 128, 128:131].set(p["gv_wv"])
    # W_D = rg_w2 (used via a 128-lane slice)
    s = s.at[OFF_W_D:OFF_W_D + 128, 0:64].set(p["rg_w2"])
    # W_E over pooled = [rg_pool(64) | tr_pool(128)] : compacted to 96 real cols
    s = s.at[OFF_W_E:OFF_W_E + 64, 0:32].set(p["rg_w3"])
    s = s.at[OFF_W_E + 64:OFF_W_E + 192, 32:96].set(p["tr_w3"])
    # W_F over zE (rg at cols 0:32, tr at cols 32:96): compacted to 7 real cols
    s = s.at[OFF_W_F:OFF_W_F + 32, 0:4].set(p["rg_w4"])
    s = s.at[OFF_W_F + 32:OFF_W_F + 96, 4:7].set(p["tr_w4"])
    return s.astype(jnp.bfloat16)


def posenet_kernel(pts_ref, slab_ref, vote_ref, small_ref):
    """One grid step == Bt batch elements.  All per-point MLPs (fused, shared
    over Bt*N rows), per-sample poolings, FC heads, normalization and the
    mean-centering / Pred_T = T + mean happen in-kernel."""
    bt, n, _ = pts_ref.shape        # channel dim already zero-padded 3 -> 8
    m = bt * n

    pts = pts_ref[...]                                   # (bt, n, 8) f32
    centroid = jnp.mean(pts, axis=1, keepdims=True)      # points.mean(dim=1)
    c = (pts - centroid).reshape(m, 8)                   # centered, row-major

    bias = slab_ref[OFF_BIAS:OFF_BIAS + 8, :].astype(jnp.float32)   # (8, 256)

    def w(off, rows, cols):
        return slab_ref[off:off + rows, 0:cols]          # bf16 weight slice

    def bf(x):
        return x.astype(jnp.bfloat16)

    def mm(x, off, rows, cols):                          # MXU: bf16 x bf16 -> f32
        return jnp.dot(bf(x), w(off, rows, cols), preferred_element_type=jnp.float32)

    # ---- layer 1: single MXU matmul, K padded 3 -> 8, [gv_w1 | tr_w1] fused ----
    h1 = jnp.maximum(mm(c, OFF_W_IN, 8, 128) + bias[0:1, 0:128], 0.0)   # (m, 128)

    # ---- fused layer 2: blockdiag(gv_w2, tr_w2) ----
    zA = jnp.maximum(mm(h1, OFF_W_A, 128, 256) + bias[1:2, :], 0.0)     # (m, 256)
    gv_h2 = zA[:, 0:64]
    # Pool the Pose_T per-point features NOW so zA / tr_h2 die early.
    tr_pool = jnp.max(zA[:, 128:256].reshape(bt, n, 128), axis=1)       # (bt, 128)

    # ---- GeoVote layer 3 -> shared feature (128-lane sliced weight) ----
    feat = jnp.maximum(mm(gv_h2, OFF_W_B, 64, 128) + bias[2:3, 0:128], 0.0)   # (m, 128)

    # ---- fused [Rot_green layer 1 | vote head] on feat ----
    zC = mm(feat, OFF_W_C, 128, 256)                     # (m, 256)
    rg_h1 = jnp.maximum(zC[:, 0:128] + bias[3:4, 0:128], 0.0)
    vote = zC[:, 128:131] + bias[3:4, 128:131]           # (m, 3), no relu

    # ---- Rot_green layer 2 (128-lane sliced weight, 64-wide epilogue) ----
    zD = mm(rg_h1, OFF_W_D, 128, 128)                    # (m, 128), real cols 0:64
    rg_h2 = jnp.maximum(zD[:, 0:64] + bias[4:5, 0:64], 0.0)
    rg_pool = jnp.max(rg_h2.reshape(bt, n, 64), axis=1)  # (bt, 64)

    # ---- fused FC heads on pooled = [rg_pool | tr_pool] ----
    pooled = jnp.concatenate([rg_pool, tr_pool], axis=1)                # (bt, 192)
    zE = jnp.maximum(mm(pooled, OFF_W_E, 192, 128) + bias[5:6, 0:128], 0.0)   # (bt, 128)
    zF = mm(zE, OFF_W_F, 128, 128) + bias[6:7, 0:128]                   # (bt, 128)
    green_raw = zF[:, 0:4]                               # green_R_vec
    T = zF[:, 4:7]

    # p_green_R = green_R_vec / (||green_R_vec||_{dim=1} + 1e-6)
    norm = jnp.sqrt(jnp.sum(green_raw * green_raw, axis=1, keepdims=True))
    green = green_raw / (norm + 1e-6)
    pred_t = T + centroid[:, 0, 0:3]                     # Pred_T = T + mean

    # lane-dense vote store: (bt, 3, n) so the store lane dim is N (>=128)
    vote_ref[...] = jnp.transpose(vote.reshape(bt, n, 3), (0, 2, 1))
    small = jnp.concatenate([green, pred_t, jnp.zeros((bt, 1), jnp.float32)], axis=1)
    small_ref[...] = small[:, None, :]                   # (bt, 1, 8)


def _device_kind():
    try:
        return jax.devices()[0].device_kind.lower()
    except Exception:
        return ""


def _has_two_tensorcores():
    k = _device_kind()
    return ("v7" in k) or ("7x" in k)


def _vmem_limit_bytes():
    cap = 64 << 20
    try:
        info = pltpu.get_tpu_info()
        cap = int(getattr(info, "vmem_capacity_bytes", cap))
    except Exception:
        pass
    # 48 MiB on 64-MiB v7x, ~100 MiB on 128-MiB v5e/v6e, conservative fallback.
    return int(min(max(cap - (16 << 20), 32 << 20), 100 << 20))


def posenet_re(points, params, bt=None):
    B, N, _ = points.shape
    slab = pack_params(params)                           # (784, 256) bf16

    two_tc = _has_two_tensorcores()
    max_rows = MAX_ROWS_2TC if two_tc else MAX_ROWS_1TC
    if bt is None:
        bt = max(1, min(B, max_rows // N))
        if two_tc:
            # Keep >= 2 grid steps only when there are two TensorCores to feed.
            while bt > 1 and -(-B // bt) < 2:
                bt //= 2
    grid_b = -(-B // bt)
    Bp = grid_b * bt

    # Pad batch to a multiple of bt and the channel dim 3 -> 8 (K pad for MXU).
    pts = jnp.pad(points.astype(jnp.float32), ((0, Bp - B), (0, 0), (0, 5)))

    flops_pp = 2 * (8 * 128 + 128 * 256 + 64 * 128 + 128 * 256 + 128 * 128)
    flops_head = 2 * (192 * 128 + 128 * 128)
    flops = Bp * N * flops_pp + Bp * flops_head
    bytes_accessed = (4 * Bp * N * 8                     # points in (HBM, dense)
                      + 4 * Bp * (3 * N + 8)             # vote + small out
                      + 2 * SLAB_ROWS * COLS)            # bf16 slab, DMA'd once

    fn = pl.pallas_call(
        posenet_kernel,
        grid=(grid_b,),
        in_specs=[
            pl.BlockSpec((bt, N, 8), lambda i: (i, 0, 0)),
            # Constant block index -> the slab is DMA'd once for the whole grid.
            pl.BlockSpec((SLAB_ROWS, COLS), lambda i: (0, 0)),
        ],
        out_specs=[
            pl.BlockSpec((bt, 3, N), lambda i: (i, 0, 0)),
            pl.BlockSpec((bt, 1, 8), lambda i: (i, 0, 0)),
        ],
        out_shape=[
            jax.ShapeDtypeStruct((Bp, 3, N), jnp.float32),
            jax.ShapeDtypeStruct((Bp, 1, 8), jnp.float32),
        ],
        compiler_params=pltpu.CompilerParams(
            dimension_semantics=("parallel",),
            vmem_limit_bytes=_vmem_limit_bytes(),
        ),
        cost_estimate=pl.CostEstimate(
            flops=flops, transcendentals=0, bytes_accessed=bytes_accessed),
    )
    vote_t, small = fn(pts, slab)
    vote = jnp.transpose(vote_t[:B], (0, 2, 1))          # back to (B, N, 3)
    return vote, small[:B, 0, 0:ROT_OUT], small[:B, 0, ROT_OUT:ROT_OUT + 3]


def posenet_ref(points, params):
    """Pure-JAX f32 reference of the same synthetic network (unfused weights)."""
    def dense(x, w, b, relu=True):
        y = jnp.einsum("bnc,cd->bnd", x, w) + b
        return jnp.maximum(y, 0.0) if relu else y

    centroid = points.mean(axis=1, keepdims=True)
    c = points - centroid
    h = dense(c, params["gv_w1"], params["gv_b1"])
    h = dense(h, params["gv_w2"], params["gv_b2"])
    feat = dense(h, params["gv_w3"], params["gv_b3"])
    vote = dense(feat, params["gv_wv"], params["gv_bv"], relu=False)

    r = dense(feat, params["rg_w1"], params["rg_b1"])
    r = dense(r, params["rg_w2"], params["rg_b2"])
    r_pool = jnp.max(r, axis=1, keepdims=True)
    g = dense(r_pool, params["rg_w3"], params["rg_b3"])
    green = dense(g, params["rg_w4"], params["rg_b4"], relu=False)[:, 0, :]
    p_green = green / (jnp.linalg.norm(green, axis=1, keepdims=True) + 1e-6)

    t = dense(c, params["tr_w1"], params["tr_b1"])
    t = dense(t, params["tr_w2"], params["tr_b2"])
    t_pool = jnp.max(t, axis=1, keepdims=True)
    t2 = dense(t_pool, params["tr_w3"], params["tr_b3"])
    T = dense(t2, params["tr_w4"], params["tr_b4"], relu=False)[:, 0, :]
    pred_t = T + centroid[:, 0, :]
    return vote, p_green, pred_t


def init_params(key):
    params = {}
    for i, (name, shape) in enumerate(PARAM_SHAPES):
        k = jax.random.fold_in(key, i)
        params[name] = 0.1 * jax.random.normal(k, shape, jnp.float32)
    return params


if __name__ == "__main__":
    key = jax.random.PRNGKey(0)
    B, N = 4, 256
    points = jax.random.normal(jax.random.fold_in(key, 1000), (B, N, 3), jnp.float32)
    params = init_params(key)

    vote, p_green_r, pred_t = posenet_re(points, params)
    jax.block_until_ready((vote, p_green_r, pred_t))

    # Validate against the pure-JAX f32 reference.  Kernel weights / matmul
    # operands are bf16 (MXU-native), so a bf16-class tolerance is used.
    vote_r, green_r, pred_t_r = posenet_ref(points, params)
    assert vote.shape == (B, N, 3) and p_green_r.shape == (B, ROT_OUT) and pred_t.shape == (B, 3)
    assert jnp.allclose(vote, vote_r, rtol=2e-2, atol=2e-2)
    assert jnp.allclose(p_green_r, green_r, rtol=2e-2, atol=2e-2)
    assert jnp.allclose(pred_t, pred_t_r, rtol=2e-2, atol=2e-2)

    print("KERNEL_OK")
</pallas_src>

<mosaic_0001>
module attributes {stable_mosaic.version = 11 : i64} {
  func.func @posenet_kernel(%arg0: i32, %arg1: memref<4x256x8xf32, #tpu.memory_space<vmem>>, %arg2: memref<784x256xbf16, #tpu.memory_space<vmem>>, %arg3: memref<4x3x256xf32, #tpu.memory_space<vmem>>, %arg4: memref<4x1x8xf32, #tpu.memory_space<vmem>>) attributes {dimension_semantics = [#tpu.dimension_semantics<parallel>], iteration_bounds = array<i64: 1>, scalar_prefetch = 0 : i64, scratch_operands = 0 : i64, tpu.core_type = #tpu.core_type<tc>, window_params = [{transform_indices = @transform_0, window_bounds = array<i64: 4, 256, 8>}, {pipeline_mode = #tpu.pipeline_mode<synchronous>, transform_indices = @transform_1, window_bounds = array<i64: 784, 256>}, {transform_indices = @transform_2, window_bounds = array<i64: 4, 3, 256>}, {transform_indices = @transform_3, window_bounds = array<i64: 4, 1, 8>}]} {
    %c0 = arith.constant 0 : index
    %c0_0 = arith.constant 0 : index
    %c0_1 = arith.constant 0 : index
    %0 = vector.load %arg1[%c0, %c0_0, %c0_1] : memref<4x256x8xf32, #tpu.memory_space<vmem>>, vector<4x256x8xf32>
    %cst = arith.constant dense<0.000000e+00> : vector<4x8xf32>
    %1 = vector.multi_reduction <add>, %0, %cst [1] : vector<4x256x8xf32> to vector<4x8xf32>
    %2 = vector.shape_cast %1 : vector<4x8xf32> to vector<4x1x8xf32>
    %cst_2 = arith.constant 2.560000e+02 : f32
    %3 = vector.broadcast %cst_2 : f32 to vector<4x1x8xf32>
    %4 = arith.divf %2, %3 : vector<4x1x8xf32>
    %5 = vector.broadcast %4 : vector<4x1x8xf32> to vector<4x256x8xf32>
    %6 = arith.subf %0, %5 : vector<4x256x8xf32>
    %7 = vector.shape_cast %6 : vector<4x256x8xf32> to vector<1024x8xf32>
    %c8 = arith.constant 8 : index
    %c0_3 = arith.constant 0 : index
    %8 = vector.load %arg2[%c8, %c0_3] : memref<784x256xbf16, #tpu.memory_space<vmem>>, vector<8x256xbf16>
    %9 = arith.extf %8 : vector<8x256xbf16> to vector<8x256xf32>
    %10 = arith.truncf %7 : vector<1024x8xf32> to vector<1024x8xbf16>
    %c0_4 = arith.constant 0 : index
    %c0_5 = arith.constant 0 : index
    %11 = vector.load %arg2[%c0_4, %c0_5] : memref<784x256xbf16, #tpu.memory_space<vmem>>, vector<8x128xbf16>
    %cst_6 = arith.constant dense<0.000000e+00> : vector<1024x128xf32>
    %12 = tpu.matmul %10, %11, %cst_6 {dimension_numbers = #tpu.dot_dimension_numbers<[1], [0], [0], [1], [0, 0, 1, 1], [], []>} : vector<1024x8xbf16>, vector<8x128xbf16>, vector<1024x128xf32> -> vector<1024x128xf32>
    %13 = vector.extract_strided_slice %9 {offsets = [0, 0], sizes = [1, 128], strides = [1, 1]} : vector<8x256xf32> to vector<1x128xf32>
    %14 = vector.broadcast %13 : vector<1x128xf32> to vector<1024x128xf32>
    %15 = arith.addf %12, %14 : vector<1024x128xf32>
    %cst_7 = arith.constant 0.000000e+00 : f32
    %16 = vector.broadcast %cst_7 : f32 to vector<1024x128xf32>
    %17 = arith.maximumf %15, %16 : vector<1024x128xf32>
    %18 = arith.truncf %17 : vector<1024x128xf32> to vector<1024x128xbf16>
    %c16 = arith.constant 16 : index
    %c0_8 = arith.constant 0 : index
    %19 = vector.load %arg2[%c16, %c0_8] : memref<784x256xbf16, #tpu.memory_space<vmem>>, vector<128x256xbf16>
    %cst_9 = arith.constant dense<0.000000e+00> : vector<1024x256xf32>
    %20 = tpu.matmul %18, %19, %cst_9 {dimension_numbers = #tpu.dot_dimension_numbers<[1], [0], [0], [1], [0, 0, 1, 1], [], []>} : vector<1024x128xbf16>, vector<128x256xbf16>, vector<1024x256xf32> -> vector<1024x256xf32>
    %21 = vector.extract_strided_slice %9 {offsets = [1, 0], sizes = [1, 256], strides = [1, 1]} : vector<8x256xf32> to vector<1x256xf32>
    %22 = vector.broadcast %21 : vector<1x256xf32> to vector<1024x256xf32>
    %23 = arith.addf %20, %22 : vector<1024x256xf32>
    %cst_10 = arith.constant 0.000000e+00 : f32
    %24 = vector.broadcast %cst_10 : f32 to vector<1024x256xf32>
    %25 = arith.maximumf %23, %24 : vector<1024x256xf32>
    %26 = vector.extract_strided_slice %25 {offsets = [0, 0], sizes = [1024, 64], strides = [1, 1]} : vector<1024x256xf32> to vector<1024x64xf32>
    %27 = vector.extract_strided_slice %25 {offsets = [0, 128], sizes = [1024, 128], strides = [1, 1]} : vector<1024x256xf32> to vector<1024x128xf32>
    %28 = vector.shape_cast %27 : vector<1024x128xf32> to vector<4x256x128xf32>
    %cst_11 = arith.constant dense<0xFF800000> : vector<4x128xf32>
    %29 = vector.multi_reduction <maximumf>, %28, %cst_11 [1] : vector<4x256x128xf32> to vector<4x128xf32>
    %30 = arith.truncf %26 : vector<1024x64xf32> to vector<1024x64xbf16>
    %c144 = arith.constant 144 : index
    %c0_12 = arith.constant 0 : index
    %31 = vector.load %arg2[%c144, %c0_12] : memref<784x256xbf16, #tpu.memory_space<vmem>>, vector<64x128xbf16>
    %cst_13 = arith.constant dense<0.000000e+00> : vector<1024x128xf32>
    %32 = tpu.matmul %30, %31, %cst_13 {dimension_numbers = #tpu.dot_dimension_numbers<[1], [0], [0], [1], [0, 0, 1, 1], [], []>} : vector<1024x64xbf16>, vector<64x128xbf16>, vector<1024x128xf32> -> vector<1024x128xf32>
    %33 = vector.extract_strided_slice %9 {offsets = [2, 0], sizes = [1, 128], strides = [1, 1]} : vector<8x256xf32> to vector<1x128xf32>
    %34 = vector.broadcast %33 : vector<1x128xf32> to vector<1024x128xf32>
    %35 = arith.addf %32, %34 : vector<1024x128xf32>
    %cst_14 = arith.constant 0.000000e+00 : f32
    %36 = vector.broadcast %cst_14 : f32 to vector<1024x128xf32>
    %37 = arith.maximumf %35, %36 : vector<1024x128xf32>
    %38 = arith.truncf %37 : vector<1024x128xf32> to vector<1024x128xbf16>
    %c208 = arith.constant 208 : index
    %c0_15 = arith.constant 0 : index
    %39 = vector.load %arg2[%c208, %c0_15] : memref<784x256xbf16, #tpu.memory_space<vmem>>, vector<128x256xbf16>
    %cst_16 = arith.constant dense<0.000000e+00> : vector<1024x256xf32>
    %40 = tpu.matmul %38, %39, %cst_16 {dimension_numbers = #tpu.dot_dimension_numbers<[1], [0], [0], [1], [0, 0, 1, 1], [], []>} : vector<1024x128xbf16>, vector<128x256xbf16>, vector<1024x256xf32> -> vector<1024x256xf32>
    %41 = vector.extract_strided_slice %40 {offsets = [0, 0], sizes = [1024, 128], strides = [1, 1]} : vector<1024x256xf32> to vector<1024x128xf32>
    %42 = vector.extract_strided_slice %9 {offsets = [3, 0], sizes = [1, 128], strides = [1, 1]} : vector<8x256xf32> to vector<1x128xf32>
    %43 = vector.broadcast %42 : vector<1x128xf32> to vector<1024x128xf32>
    %44 = arith.addf %41, %43 : vector<1024x128xf32>
    %cst_17 = arith.constant 0.000000e+00 : f32
    %45 = vector.broadcast %cst_17 : f32 to vector<1024x128xf32>
    %46 = arith.maximumf %44, %45 : vector<1024x128xf32>
    %47 = vector.extract_strided_slice %40 {offsets = [0, 128], sizes = [1024, 3], strides = [1, 1]} : vector<1024x256xf32> to vector<1024x3xf32>
    %48 = vector.extract_strided_slice %9 {offsets = [3, 128], sizes = [1, 3], strides = [1, 1]} : vector<8x256xf32> to vector<1x3xf32>
    %49 = vector.broadcast %48 : vector<1x3xf32> to vector<1024x3xf32>
    %50 = arith.addf %47, %49 : vector<1024x3xf32>
    %51 = arith.truncf %46 : vector<1024x128xf32> to vector<1024x128xbf16>
    %c336 = arith.constant 336 : index
    %c0_18 = arith.constant 0 : index
    %52 = vector.load %arg2[%c336, %c0_18] : memref<784x256xbf16, #tpu.memory_space<vmem>>, vector<128x128xbf16>
    %cst_19 = arith.constant dense<0.000000e+00> : vector<1024x128xf32>
    %53 = tpu.matmul %51, %52, %cst_19 {dimension_numbers = #tpu.dot_dimension_numbers<[1], [0], [0], [1], [0, 0, 1, 1], [], []>} : vector<1024x128xbf16>, vector<128x128xbf16>, vector<1024x128xf32> -> vector<1024x128xf32>
    %54 = vector.extract_strided_slice %53 {offsets = [0, 0], sizes = [1024, 64], strides = [1, 1]} : vector<1024x128xf32> to vector<1024x64xf32>
    %55 = vector.extract_strided_slice %9 {offsets = [4, 0], sizes = [1, 64], strides = [1, 1]} : vector<8x256xf32> to vector<1x64xf32>
    %56 = vector.broadcast %55 : vector<1x64xf32> to vector<1024x64xf32>
    %57 = arith.addf %54, %56 : vector<1024x64xf32>
    %cst_20 = arith.constant 0.000000e+00 : f32
    %58 = vector.broadcast %cst_20 : f32 to vector<1024x64xf32>
    %59 = arith.maximumf %57, %58 : vector<1024x64xf32>
    %60 = vector.shape_cast %59 : vector<1024x64xf32> to vector<4x256x64xf32>
    %cst_21 = arith.constant dense<0xFF800000> : vector<4x64xf32>
    %61 = vector.multi_reduction <maximumf>, %60, %cst_21 [1] : vector<4x256x64xf32> to vector<4x64xf32>
    %62 = tpu.concatenate %61, %29 in 1 : vector<4x64xf32>, vector<4x128xf32> -> vector<4x192xf32>
    %63 = arith.truncf %62 : vector<4x192xf32> to vector<4x192xbf16>
    %c464 = arith.constant 464 : index
    %c0_22 = arith.constant 0 : index
    %64 = vector.load %arg2[%c464, %c0_22] : memref<784x256xbf16, #tpu.memory_space<vmem>>, vector<192x128xbf16>
    %cst_23 = arith.constant dense<0.000000e+00> : vector<4x128xf32>
    %65 = tpu.matmul %63, %64, %cst_23 {dimension_numbers = #tpu.dot_dimension_numbers<[1], [0], [0], [1], [0, 0, 1, 1], [], []>} : vector<4x192xbf16>, vector<192x128xbf16>, vector<4x128xf32> -> vector<4x128xf32>
    %66 = vector.extract_strided_slice %9 {offsets = [5, 0], sizes = [1, 128], strides = [1, 1]} : vector<8x256xf32> to vector<1x128xf32>
    %67 = vector.broadcast %66 : vector<1x128xf32> to vector<4x128xf32>
    %68 = arith.addf %65, %67 : vector<4x128xf32>
    %cst_24 = arith.constant 0.000000e+00 : f32
    %69 = vector.broadcast %cst_24 : f32 to vector<4x128xf32>
    %70 = arith.maximumf %68, %69 : vector<4x128xf32>
    %71 = arith.truncf %70 : vector<4x128xf32> to vector<4x128xbf16>
    %c656 = arith.constant 656 : index
    %c0_25 = arith.constant 0 : index
    %72 = vector.load %arg2[%c656, %c0_25] : memref<784x256xbf16, #tpu.memory_space<vmem>>, vector<128x128xbf16>
    %cst_26 = arith.constant dense<0.000000e+00> : vector<4x128xf32>
    %73 = tpu.matmul %71, %72, %cst_26 {dimension_numbers = #tpu.dot_dimension_numbers<[1], [0], [0], [1], [0, 0, 1, 1], [], []>} : vector<4x128xbf16>, vector<128x128xbf16>, vector<4x128xf32> -> vector<4x128xf32>
    %74 = vector.extract_strided_slice %9 {offsets = [6, 0], sizes = [1, 128], strides = [1, 1]} : vector<8x256xf32> to vector<1x128xf32>
    %75 = vector.broadcast %74 : vector<1x128xf32> to vector<4x128xf32>
    %76 = arith.addf %73, %75 : vector<4x128xf32>
    %77 = vector.extract_strided_slice %76 {offsets = [0, 0], sizes = [4, 4], strides = [1, 1]} : vector<4x128xf32> to vector<4x4xf32>
    %78 = vector.extract_strided_slice %76 {offsets = [0, 4], sizes = [4, 3], strides = [1, 1]} : vector<4x128xf32> to vector<4x3xf32>
    %79 = arith.mulf %77, %77 : vector<4x4xf32>
    %cst_27 = arith.constant dense<0.000000e+00> : vector<4xf32>
    %80 = vector.multi_reduction <add>, %79, %cst_27 [1] : vector<4x4xf32> to vector<4xf32>
    %81 = vector.shape_cast %80 : vector<4xf32> to vector<4x1xf32>
    %82 = math.sqrt %81 : vector<4x1xf32>
    %cst_28 = arith.constant 9.99999997E-7 : f32
    %83 = vector.broadcast %cst_28 : f32 to vector<4x1xf32>
    %84 = arith.addf %82, %83 : vector<4x1xf32>
    %85 = vector.broadcast %84 : vector<4x1xf32> to vector<4x4xf32>
    %86 = arith.divf %77, %85 : vector<4x4xf32>
    %87 = vector.extract_strided_slice %4 {offsets = [0, 0, 0], sizes = [4, 1, 3], strides = [1, 1, 1]} : vector<4x1x8xf32> to vector<4x1x3xf32>
    %88 = vector.shape_cast %87 : vector<4x1x3xf32> to vector<4x3xf32>
    %89 = arith.addf %78, %88 : vector<4x3xf32>
    %90 = vector.shape_cast %50 : vector<1024x3xf32> to vector<4x256x3xf32>
    %91 = tpu.transpose %90, [0, 2, 1] : vector<4x256x3xf32> -> vector<4x3x256xf32>
    %c0_29 = arith.constant 0 : index
    %c0_30 = arith.constant 0 : index
    %c0_31 = arith.constant 0 : index
    %92 = vector.load %arg3[%c0_29, %c0_30, %c0_31] : memref<4x3x256xf32, #tpu.memory_space<vmem>>, vector<4x3x256xf32>
    tpu.vector_store %arg3[%c0_29, %c0_30, %c0_31], %91 {strides = array<i32>} : memref<4x3x256xf32, #tpu.memory_space<vmem>>, vector<4x3x256xf32>,
    %cst_32 = arith.constant 0.000000e+00 : f32
    %93 = vector.broadcast %cst_32 : f32 to vector<4x1xf32>
    %94 = tpu.concatenate %86, %89, %93 in 1 : vector<4x4xf32>, vector<4x3xf32>, vector<4x1xf32> -> vector<4x8xf32>
    %95 = vector.shape_cast %94 : vector<4x8xf32> to vector<4x1x8xf32>
    %c0_33 = arith.constant 0 : index
    %c0_34 = arith.constant 0 : index
    %c0_35 = arith.constant 0 : index
    %96 = vector.load %arg4[%c0_33, %c0_34, %c0_35] : memref<4x1x8xf32, #tpu.memory_space<vmem>>, vector<4x1x8xf32>
    tpu.vector_store %arg4[%c0_33, %c0_34, %c0_35], %95 {strides = array<i32>} : memref<4x1x8xf32, #tpu.memory_space<vmem>>, vector<4x1x8xf32>,
    return
  }
  func.func @transform_0(%arg0: i32) -> (i32, i32, i32) {
    %c0_i32 = arith.constant 0 : i32
    %c0_i32_0 = arith.constant 0 : i32
    %c0_i32_1 = arith.constant 0 : i32
    return %arg0, %c0_i32, %c0_i32_0 : i32, i32, i32
  }
  func.func @transform_1(%arg0: i32) -> (i32, i32) {
    %c0_i32 = arith.constant 0 : i32
    %c0_i32_0 = arith.constant 0 : i32
    %c0_i32_1 = arith.constant 0 : i32
    return %c0_i32, %c0_i32_0 : i32, i32
  }
  func.func @transform_2(%arg0: i32) -> (i32, i32, i32) {
    %c0_i32 = arith.constant 0 : i32
    %c0_i32_0 = arith.constant 0 : i32
    %c0_i32_1 = arith.constant 0 : i32
    return %arg0, %c0_i32, %c0_i32_0 : i32, i32, i32
  }
  func.func @transform_3(%arg0: i32) -> (i32, i32, i32) {
    %c0_i32 = arith.constant 0 : i32
    %c0_i32_0 = arith.constant 0 : i32
    %c0_i32_1 = arith.constant 0 : i32
    return %arg0, %c0_i32, %c0_i32_0 : i32, i32, i32
  }
}

</mosaic_0001>

<bundles_post_ra>
// kernel: tpu_custom_call.1
= control target key start
LH: loop header
LB: loop body
LE: loop exit
PB: predicated region body
PF: predicated region fallthrough
CT: control target
= control target key end

     0   :  { %vm817_vm0 = vcmask 1043456   ;;  %vm143_vm1 = vcmask 64512   ;;  %s11019_s0 = inlined_call_operand.vmem [shape: f32[4,256,8], index: 0, kind: input, shape index: {}]   ;;  %s11020_s1 = inlined_call_operand.vmem [shape: bf16[784,256], index: 1, kind: input, shape index: {}]   ;;  %s11021_s2 = inlined_call_operand.vmem [shape: f32[4,3,256], index: 2, kind: output, shape index: {0}]   ;;  %s11022_s3 = inlined_call_operand.hbm [shape: f32[4,1,8], index: 3, kind: output, shape index: {1}]  }
   0x1   :  { %v620_v0 = vld [vmem:[%s11020_s1] sm:$0xf]  ;;  %v7798_v2 = vld [vmem:[%s11019_s0 + $0x8] sm:$0xff]  ;;  %v7803_v4 = vld [vmem:[%s11019_s0 + $0x10] sm:$0xff] }
   0x2   :  { %v7793_v1 = vld [vmem:[%s11019_s0] sm:$0xff]  ;;  %7615 = vmatprep.subr.msk.bf16.mxu0 %vm817_vm0, %v620_v0  ;;  %v819_v3 = vsel %vm817_vm0, %v620_v0, 0  ;;  %v7808_v5 = vld [vmem:[%s11019_s0 + $0x18] sm:$0xff]  ;;  %v145_v7 = vsel %vm143_vm1, %v7798_v2, 0.0  ;;  %7616 = vmatprep.subr.msk.bf16.mxu1 %vm817_vm0, %v620_v0  ;;  %v147_v10 = vsel %vm143_vm1, %v7803_v4, 0.0  ;;  %v7826_v12 = vld [vmem:[%s11019_s0 + $0x28] sm:$0xff] }
   0x3   :  { %v144_v6 = vsel %vm143_vm1, %v7793_v1, 0.0  ;;  %7184 = vmatpush3.bf16.msra.mxu0 %v819_v3  ;;  %v7817_v8 = vld [vmem:[%s11019_s0 + $0x20] sm:$0xff]  ;;  %7614 = vmatpush3.bf16.msra.mxu1 %v819_v3  ;;  %v149_v11 = vsel %vm143_vm1, %v7808_v5, 0.0  ;;  %v7833_v15 = vld [vmem:[%s11019_s0 + $0x30] sm:$0xff]  ;;  %v153_v17 = vsel %vm143_vm1, %v7826_v12, 0.0  ;;  %v7840_v18 = vld [vmem:[%s11019_s0 + $0x38] sm:$0xff] }
   0x4   :  { %v146_v9 = vadd.f32 %v145_v7, %v144_v6  ;;  %v151_v14 = vsel %vm143_vm1, %v7817_v8, 0.0  ;;  %v155_v20 = vsel %vm143_vm1, %v7833_v15, 0.0  ;;  %v7847_v21 = vld [vmem:[%s11019_s0 + $0x40] sm:$0xff]  ;;  %v157_v23 = vsel %vm143_vm1, %v7840_v18, 0.0  ;;  %v80_v25 = vld [vmem:[%s11019_s0 + $0x208] sm:$0xff]  ;;  %v81_v26 = vld [vmem:[%s11019_s0 + $0x210] sm:$0xff] }
   0x5   :  { %v79_v24 = vld [vmem:[%s11019_s0 + $0x200] sm:$0xff]  ;;  %v7863_v27 = vld [vmem:[%s11019_s0 + $0x48] sm:$0xff]  ;;  %v82_v29 = vld [vmem:[%s11019_s0 + $0x218] sm:$0xff]  ;;  %v283_v31 = vsel %vm143_vm1, %v80_v25, 0.0  ;;  %v285_v32 = vsel %vm143_vm1, %v81_v26, 0.0  ;;  %v159_v33 = vsel %vm143_vm1, %v7847_v21, 0.0 }
   0x6   :  { %v148_v13 = vadd.f32 %v147_v10, %v146_v9  ;;  %v282_v30 = vsel %vm143_vm1, %v79_v24, 0.0  ;;  %v83_v34 = vld [vmem:[%s11019_s0 + $0x220] sm:$0xff]  ;;  %v7879_v36 = vld [vmem:[%s11019_s0 + $0x50] sm:$0xff]  ;;  %v287_v38 = vsel %vm143_vm1, %v82_v29, 0.0  ;;  %v161_v39 = vsel %vm143_vm1, %v7863_v27, 0.0  ;;  %v84_v40 = vld [vmem:[%s11019_s0 + $0x228] sm:$0xff] }
   0x7   :  { %v284_v35 = vadd.f32 %v283_v31, %v282_v30  ;;  %v7890_v42 = vld [vmem:[%s11019_s0 + $0x58] sm:$0xff]  ;;  %v289_v44 = vsel %vm143_vm1, %v83_v34, 0.0  ;;  %v163_v45 = vsel %vm143_vm1, %v7879_v36, 0.0  ;;  %v85_v46 = vld [vmem:[%s11019_s0 + $0x230] sm:$0xff]  ;;  %v7901_v48 = vld [vmem:[%s11019_s0 + $0x60] sm:$0xff]  ;;  %v291_v50 = vsel %vm143_vm1, %v84_v40, 0.0 }
   0x8   :  { %v150_v16 = vadd.f32 %v149_v11, %v148_v13  ;;  %v7907_v51 = vld [vmem:[%s11019_s0 + $0x68] sm:$0xff]  ;;  %v7912_v52 = vld [vmem:[%s11019_s0 + $0x70] sm:$0xff]  ;;  %v165_v53 = vsel %vm143_vm1, %v7890_v42, 0.0  ;;  %v86_v54 = vld [vmem:[%s11019_s0 + $0x238] sm:$0xff]  ;;  %v293_v60 = vsel %vm143_vm1, %v85_v46, 0.0  ;;  %v167_v62 = vsel %vm143_vm1, %v7901_v48, 0.0 }
   0x9   :  { %v286_v41 = vadd.f32 %v285_v32, %v284_v35  ;;  %v7922_v56 = vld [vmem:[%s11019_s0 + $0x78] sm:$0xff]  ;;  %v7927_v57 = vld [vmem:[%s11019_s0 + $0x80] sm:$0xff]  ;;  %v7932_v58 = vld [vmem:[%s11019_s0 + $0x88] sm:$0xff]  ;;  %v169_v6 = vsel %vm143_vm1, %v7907_v51, 0.0  ;;  %v171_v7 = vsel %vm143_vm1, %v7912_v52, 0.0  ;;  %v295_v10 = vsel %vm143_vm1, %v86_v54, 0.0 }
   0xa   :  { %v152_v19 = vadd.f32 %v151_v14, %v150_v16  ;;  %v7938_v61 = vld [vmem:[%s11019_s0 + $0x90] sm:$0xff]  ;;  %v87_v63 = vld [vmem:[%s11019_s0 + $0x240] sm:$0xff]  ;;  %v88_v9 = vld [vmem:[%s11019_s0 + $0x248] sm:$0xff]  ;;  %v173_v13 = vsel %vm143_vm1, %v7922_v56, 0.0  ;;  %v175_v31 = vsel %vm143_vm1, %v7927_v57, 0.0  ;;  %v177_v32 = vsel %vm143_vm1, %v7932_v58, 0.0 }
   0xb   :  { %v288_v47 = vadd.f32 %v287_v38, %v286_v41  ;;  %11082 = vst [vmem:[#allocation5_spill] sm:$0xff] %v7938_v61  ;;  %v47_v11 = vld [vmem:[%s11019_s0 + $0x100] sm:$0xff]  ;;  %v7628_v16 = vld [vmem:[%s11020_s1 + $0x14] ss:$8 sps:$4 sm:$0xff]   ;;  %v297_v25 = vsel %vm143_vm1, %v87_v63, 0.0  ;;  %v7987_v30 = vld [vmem:[%s11019_s0 + $0xa8] sm:$0xff] }
   0xc   :  { %v154_v22 = vadd.f32 %v153_v17, %v152_v19  ;;  %v48_v17 = vld [vmem:[%s11019_s0 + $0x108] sm:$0xff]  ;;  %v49_v19 = vld [vmem:[%s11019_s0 + $0x110] sm:$0xff]  ;;  %v50_v26 = vld [vmem:[%s11019_s0 + $0x118] sm:$0xff]  ;;  %11085 = vst [vmem:[#allocation8_spill] sm:$0xff] %v7987_v30  ;;  %1662 = vmatprep.subr.bf16.mxu1 %v7628_v16  ;;  %v179_v41 = vsel %vm143_vm1, %v7938_v61, 0.0 }
   0xd   :  { %v290_v55 = vadd.f32 %v289_v44, %v288_v47  ;;  %v216_v29 = vsel %vm143_vm1, %v49_v19, 0.0  ;;  %v51_v35 = vld [vmem:[%s11019_s0 + $0x120] sm:$0xff]  ;;  %v8002_v38 = vld [vmem:[%s11019_s0 + $0xb0] sm:$0xff]  ;;  %v218_v44 = vsel %vm143_vm1, %v50_v26, 0.0 }
   0xe   :  { %v156_v28 = vadd.f32 %v155_v20, %v154_v22  ;;  %v213_v20 = vsel %vm143_vm1, %v47_v11, 0.0  ;;  %v7971_v22 = vld [vmem:[%s11019_s0 + $0x98] sm:$0xff]  ;;  %11086 = vst [vmem:[#allocation9_spill] sm:$0xff] %v8002_v38  ;;  %v53_v11 = vld [vmem:[%s11019_s0 + $0x130] sm:$0xff]  ;;  %v8072_v16 = vld [vmem:[%s11019_s0 + $0xe0] sm:$0xff] }
   0xf   :  { %v292_v0 = vadd.f32 %v291_v50, %v290_v55  ;;  %11083 = vst [vmem:[#allocation6_spill] sm:$0xff] %v7971_v22  ;;  %v8020_v46 = vsel %vm143_vm1, %v7971_v22, 0.0  ;;  %v8035_v55 = vld [vmem:[%s11019_s0 + $0xc8] sm:$0xff]  ;;  %11092 = vst [vmem:[#allocation15_spill] sm:$0xff] %v8072_v16  ;;  %v8088_v26 = vld [vmem:[%s11019_s0 + $0xf0] sm:$0xff] }
  0x10   :  { %v158_v37 = vadd.f32 %v157_v23, %v156_v28  ;;  %v7976_v23 = vld [vmem:[%s11019_s0 + $0xa0] sm:$0xff]  ;;  %v214_v28 = vsel %vm143_vm1, %v48_v17, 0.0  ;;  %11089 = vst [vmem:[#allocation12_spill] sm:$0xff] %v8035_v55  ;;  %v8077_v17 = vld [vmem:[%s11019_s0 + $0xe8] sm:$0xff]  ;;  %11094 = vst [vmem:[#allocation17_spill] sm:$0xff] %v8088_v26 }
  0x11   :  { %v294_v14 = vadd.f32 %v293_v60, %v292_v0  ;;  %11084 = vst [vmem:[#allocation7_spill] sm:$0xff] %v7976_v23  ;;  %v8024_v47 = vsel %vm143_vm1, %v7976_v23, 0.0  ;;  %v220_v0 = vsel %vm143_vm1, %v51_v35, 0.0  ;;  %11093 = vst [vmem:[#allocation16_spill] sm:$0xff] %v8077_v17 }
  0x12   :  { %v160_v43 = vadd.f32 %v159_v33, %v158_v37  ;;  %v89_v33 = vld [vmem:[%s11019_s0 + $0x250] sm:$0xff]  ;;  %v215_v37 = vadd.f32 %v214_v28, %v213_v20  ;;  %v8092_v28 = vsel %vm143_vm1, %v8035_v55, 0.0  ;;  %v8194_v55 = vld [vmem:[%s11019_s0 + $0x308] sm:$0xff] }
  0x13   :  { %v296_v34 = vadd.f32 %v295_v10, %v294_v14  ;;  %v301_v63 = vsel %vm143_vm1, %v89_v33, 0.0  ;;  %11098 = vst [vmem:[#allocation21_spill] sm:$0xff] %v8194_v55 }
  0x14   :  { %v162_v49 = vadd.f32 %v161_v39, %v160_v43  ;;  %v8007_v39 = vld [vmem:[%s11019_s0 + $0xb8] sm:$0xff]  ;;  %v299_v43 = vsel %vm143_vm1, %v88_v9, 0.0  ;;  %v217_v54 = vadd.f32 %v216_v29, %v215_v37  ;;  %v8064_v9 = vld [vmem:[%s11019_s0 + $0x260] sm:$0xff]  ;;  %v8101_v29 = vld [vmem:[%s11019_s0 + $0x268] sm:$0xff] }
  0x15   :  { %11087 = vst [vmem:[#allocation10_spill] sm:$0xff] %v8007_v39  ;;  %v298_v50 = vadd.f32 %v297_v25, %v296_v34  ;;  %v54_v34 = vld [vmem:[%s11019_s0 + $0x138] sm:$0xff] }
  0x16   :  { %v164_v59 = vadd.f32 %v163_v45, %v162_v49  ;;  %v8016_v45 = vld [vmem:[%s11019_s0 + $0xc0] sm:$0xff]  ;;  %v90_v49 = vld [vmem:[%s11019_s0 + $0x258] sm:$0xff]  ;;  %v219_v14 = vadd.f32 %v218_v44, %v217_v54  ;;  %v8118_v44 = vld [vmem:[%s11019_s0 + $0x270] sm:$0xff]  ;;  %v8134_v54 = vsel %vm143_vm1, %v8077_v17, 0.0  ;;  %v307_v17 = vsel %vm143_vm1, %v8101_v29, 0.0 }
  0x17   :  { %11088 = vst [vmem:[#allocation11_spill] sm:$0xff] %v8016_v45  ;;  %v300_v10 = vadd.f32 %v299_v43, %v298_v50  ;;  %v8081_v20 = vsel %vm143_vm1, %v8016_v45, 0.0  ;;  %v8109_v37 = vld [vmem:[%s11019_s0 + $0xf8] sm:$0xff]  ;;  %v305_v50 = vsel %vm143_vm1, %v8064_v9, 0.0 }
  0x18   :  { %v166_v3 = vadd.f32 %v165_v53, %v164_v59  ;;  %v52_v53 = vld [vmem:[%s11019_s0 + $0x128] sm:$0xff]  ;;  %v8040_v59 = vld [vmem:[%s11019_s0 + $0xd0] sm:$0xff]  ;;  %v221_v35 = vadd.f32 %v220_v0, %v219_v14  ;;  %11095 = vst [vmem:[#allocation18_spill] sm:$0xff] %v8109_v37  ;;  %v55_v0 = vld [vmem:[%s11019_s0 + $0x140] sm:$0xff]  ;;  %v8146_v14 = vsel %vm143_vm1, %v8088_v26, 0.0 }
  0x19   :  { %11090 = vst [vmem:[#allocation13_spill] sm:$0xff] %v8040_v59  ;;  %v222_v25 = vsel %vm143_vm1, %v52_v53, 0.0  ;;  %v302_v33 = vadd.f32 %v301_v63, %v300_v10  ;;  %v224_v53 = vsel %vm143_vm1, %v53_v11, 0.0 }
  0x1a   :  { %v168_v24 = vadd.f32 %v167_v62, %v166_v3  ;;  %v8044_v62 = vsel %vm143_vm1, %v7987_v30, 0.0  ;;  %v8051_v3 = vld [vmem:[%s11019_s0 + $0xd8] sm:$0xff]  ;;  %v223_v10 = vadd.f32 %v222_v25, %v221_v35  ;;  %v309_v35 = vsel %vm143_vm1, %v8118_v44, 0.0 }
  0x1b   :  { %11091 = vst [vmem:[#allocation14_spill] sm:$0xff] %v8051_v3  ;;  %v8113_v43 = vsel %vm143_vm1, %v8051_v3, 0.0  ;;  %v8173_v3 = vld [vmem:[%s11019_s0 + $0x298] sm:$0xff] }
  0x1c   :  { %v170_v40 = vadd.f32 %v169_v6, %v168_v24  ;;  %v8055_v6 = vsel %vm143_vm1, %v8002_v38, 0.0  ;;  %v303_v24 = vsel %vm143_vm1, %v90_v49, 0.0  ;;  %v8123_v49 = vld [vmem:[%s11019_s0 + $0x278] sm:$0xff]  ;;  %11096 = vst [vmem:[#allocation19_spill] sm:$0xff] %v8173_v3 }
  0x1d   :  { %v304_v63 = vadd.f32 %v303_v24, %v302_v33  ;;  %v56_v24 = vld [vmem:[%s11019_s0 + $0x148] sm:$0xff]  ;;  %v226_v33 = vsel %vm143_vm1, %v54_v34, 0.0  ;;  %v311_v34 = vsel %vm143_vm1, %v8123_v49, 0.0  ;;  %v8228_v38 = vld [vmem:[%s11019_s0 + $0x158] sm:$0xff] }
  0x1e   :  { %v172_v60 = vadd.f32 %v171_v7, %v170_v40  ;;  %v8059_v7 = vsel %vm143_vm1, %v8007_v39, 0.0  ;;  %11103 = vst [vmem:[#allocation26_spill] sm:$0xff] %v8228_v38  ;;  %v234_v61 = vsel %vm143_vm1, %v8228_v38, 0.0  ;;  %v8292_v38 = vld [vmem:[%s11019_s0 + $0x330] sm:$0xff] }
  0x1f   :  { %v306_v25 = vadd.f32 %v305_v50, %v304_v63  ;;  %11112 = vst [vmem:[#allocation35_spill] sm:$0xff] %v8292_v38 }
  0x20   :  { %v174_v19 = vadd.f32 %v173_v13, %v172_v60  ;;  %v8096_v13 = vsel %vm143_vm1, %v8040_v59, 0.0  ;;  %v8139_v60 = vld [vmem:[%s11019_s0 + $0x280] sm:$0xff] }
  0x21   :  { %v313_v50 = vsel %vm143_vm1, %v8139_v60, 0.0  ;;  %v308_v63 = vadd.f32 %v307_v17, %v306_v25  ;;  %v8189_v59 = vld [vmem:[%s11019_s0 + $0x300] sm:$0xff]  ;;  %v8199_v17 = vld [vmem:[%s11019_s0 + $0x310] sm:$0xff] }
  0x22   :  { %v176_v40 = vadd.f32 %v175_v31, %v174_v19  ;;  %v8130_v31 = vsel %vm143_vm1, %v8072_v16, 0.0  ;;  %v8151_v19 = vld [vmem:[%s11019_s0 + $0x288] sm:$0xff]  ;;  %v8168_v16 = vld [vmem:[%s11019_s0 + $0x290] sm:$0xff]  ;;  %11097 = vst [vmem:[#allocation20_spill] sm:$0xff] %v8189_v59  ;;  %11099 = vst [vmem:[#allocation22_spill] sm:$0xff] %v8199_v17  ;;  %v351_v25 = vsel %vm143_vm1, %v8189_v59, 0.0 }
  0x23   :  { %v354_v45 = vsel %vm143_vm1, %v8199_v17, 0.0  ;;  %v317_v39 = vsel %vm143_vm1, %v8168_v16, 0.0 }
  0x24   :  { %v178_v11 = vadd.f32 %v177_v32, %v176_v40  ;;  %v8161_v32 = vsel %vm143_vm1, %v8109_v37, 0.0  ;;  %v225_v40 = vadd.f32 %v224_v53, %v223_v10  ;;  %v228_v53 = vsel %vm143_vm1, %v55_v0, 0.0 }
  0x25   :  { %v315_v10 = vsel %vm143_vm1, %v8151_v19, 0.0  ;;  %v230_v37 = vsel %vm143_vm1, %v56_v24, 0.0  ;;  %v8205_v24 = vld [vmem:[%s11019_s0 + $0x2a0] sm:$0xff] }
  0x26   :  { %v180_v26 = vadd.f32 %v179_v41, %v178_v11  ;;  %v57_v41 = vld [vmem:[%s11019_s0 + $0x150] sm:$0xff]  ;;  %v227_v11 = vadd.f32 %v226_v33, %v225_v40  ;;  %11100 = vst [vmem:[#allocation23_spill] sm:$0xff] %v8205_v24  ;;  %v8210_v33 = vld [vmem:[%s11019_s0 + $0x318] sm:$0xff]  ;;  %v352_v40 = vsel %vm143_vm1, %v8194_v55, 0.0  ;;  %v8233_v55 = vld [vmem:[%s11019_s0 + $0x320] sm:$0xff] }
  0x27   :  { %11101 = vst [vmem:[#allocation24_spill] sm:$0xff] %v8210_v33  ;;  %11104 = vst [vmem:[#allocation27_spill] sm:$0xff] %v8233_v55  ;;  %v353_v17 = vadd.f32 %v352_v40, %v351_v25  ;;  %v232_v23 = vsel %vm143_vm1, %v57_v41, 0.0  ;;  %v8261_v41 = vld [vmem:[%s11019_s0 + $0x328] sm:$0xff] }
  0x28   :  { %v182_v0 = vadd.f32 %v8020_v46, %v180_v26  ;;  %v8221_v46 = vld [vmem:[%s11019_s0 + $0x2a8] sm:$0xff]  ;;  %v310_v26 = vadd.f32 %v309_v35, %v308_v63  ;;  %v229_v59 = vadd.f32 %v228_v53, %v227_v11  ;;  %v8239_v35 = vld [vmem:[%s11019_s0 + $0x2b0] sm:$0xff]  ;;  %v319_v63 = vsel %vm143_vm1, %v8173_v3, 0.0  ;;  %v8249_v11 = vld [vmem:[%s11019_s0 + $0x2b8] sm:$0xff]  ;;  %11108 = vst [vmem:[#allocation31_spill] sm:$0xff] %v8261_v41 }
  0x29   :  { %11102 = vst [vmem:[#allocation25_spill] sm:$0xff] %v8221_v46  ;;  %11105 = vst [vmem:[#allocation28_spill] sm:$0xff] %v8239_v35  ;;  %v356_v53 = vsel %vm143_vm1, %v8210_v33, 0.0  ;;  %v355_v33 = vadd.f32 %v354_v45, %v353_v17  ;;  %v8278_v45 = vld [vmem:[%s11019_s0 + $0x2c8] sm:$0xff] }
  0x2a   :  { %v184_v30 = vadd.f32 %v8024_v47, %v182_v0  ;;  %11106 = vst [vmem:[#allocation29_spill] sm:$0xff] %v8249_v11  ;;  %v312_v25 = vadd.f32 %v311_v34, %v310_v26  ;;  %v321_v47 = vsel %vm143_vm1, %v8205_v24, 0.0  ;;  %v8256_v0 = vld [vmem:[%s11019_s0 + $0x160] sm:$0xff]  ;;  %v231_v40 = vadd.f32 %v230_v37, %v229_v59  ;;  %11110 = vst [vmem:[#allocation33_spill] sm:$0xff] %v8278_v45  ;;  %v8287_v37 = vld [vmem:[%s11019_s0 + $0x168] sm:$0xff] }
  0x2b   :  { %11107 = vst [vmem:[#allocation30_spill] sm:$0xff] %v8256_v0  ;;  %v8267_v34 = vld [vmem:[%s11019_s0 + $0x2c0] sm:$0xff]  ;;  %v323_v26 = vsel %vm143_vm1, %v8221_v46, 0.0  ;;  %v358_v59 = vsel %vm143_vm1, %v8233_v55, 0.0  ;;  %11111 = vst [vmem:[#allocation34_spill] sm:$0xff] %v8287_v37  ;;  %v357_v55 = vadd.f32 %v356_v53, %v355_v33  ;;  %v8311_v33 = vld [vmem:[%s11019_s0 + $0x2d8] sm:$0xff] }
  0x2c   :  { %v186_v22 = vadd.f32 %v8044_v62, %v184_v30  ;;  %11109 = vst [vmem:[#allocation32_spill] sm:$0xff] %v8267_v34  ;;  %v314_v30 = vadd.f32 %v313_v50, %v312_v25  ;;  %v8282_v62 = vsel %vm143_vm1, %v8239_v35, 0.0  ;;  %v233_v17 = vadd.f32 %v232_v23, %v231_v40  ;;  %v8298_v50 = vld [vmem:[%s11019_s0 + $0x2d0] sm:$0xff]  ;;  %11114 = vst [vmem:[#allocation37_spill] sm:$0xff] %v8311_v33 }
  0x2d   :  { %11113 = vst [vmem:[#allocation36_spill] sm:$0xff] %v8298_v50  ;;  %v8302_v25 = vsel %vm143_vm1, %v8249_v11, 0.0  ;;  %v236_v23 = vsel %vm143_vm1, %v8256_v0, 0.0  ;;  %v360_v40 = vsel %vm143_vm1, %v8261_v41, 0.0  ;;  %v8320_v53 = vld [vmem:[%s11019_s0 + $0x170] sm:$0xff]  ;;  %v8325_v0 = vld [vmem:[%s11019_s0 + $0x338] sm:$0xff]  ;;  %v359_v41 = vadd.f32 %v358_v59, %v357_v55 }
  0x2e   :  { %v188_v46 = vadd.f32 %v8055_v6, %v186_v22  ;;  %v316_v22 = vadd.f32 %v315_v10, %v314_v30  ;;  %v8315_v6 = vsel %vm143_vm1, %v8267_v34, 0.0  ;;  %11115 = vst [vmem:[#allocation38_spill] sm:$0xff] %v8320_v53  ;;  %v235_v11 = vadd.f32 %v234_v61, %v233_v17  ;;  %11116 = vst [vmem:[#allocation39_spill] sm:$0xff] %v8325_v0  ;;  %v8331_v10 = vld [vmem:[%s11019_s0 + $0x2e0] sm:$0xff]  ;;  %v8336_v30 = vld [vmem:[%s11019_s0 + $0x2e8] sm:$0xff] }
  0x2f   :  { %v8341_v61 = vld [vmem:[%s11019_s0 + $0x2f0] sm:$0xff]  ;;  %v8345_v55 = vsel %vm143_vm1, %v8278_v45, 0.0  ;;  %v8353_v17 = vsel %vm143_vm1, %v8298_v50, 0.0  ;;  %v8358_v34 = vld [vmem:[%s11019_s0 + $0x178] sm:$0xff]  ;;  %v8363_v45 = vld [vmem:[%s11019_s0 + $0x340] sm:$0xff] }
  0x30   :  { %v190_v35 = vadd.f32 %v8059_v7, %v188_v46  ;;  %v238_v7 = vsel %vm143_vm1, %v8287_v37, 0.0  ;;  %v362_v46 = vsel %vm143_vm1, %v8292_v38, 0.0  ;;  %v318_v59 = vadd.f32 %v317_v39, %v316_v22  ;;  %11117 = vst [vmem:[#allocation40_spill] sm:$0xff] %v8358_v34  ;;  %11118 = vst [vmem:[#allocation41_spill] sm:$0xff] %v8363_v45  ;;  %v8373_v22 = vld [vmem:[%s11019_s0 + $0x180] sm:$0xff]  ;;  %v8391_v38 = vld [vmem:[%s11019_s0 + $0x348] sm:$0xff] }
  0x31   :  { %v237_v24 = vadd.f32 %v236_v23, %v235_v11  ;;  %v361_v37 = vadd.f32 %v360_v40, %v359_v41  ;;  %v8368_v39 = vsel %vm143_vm1, %v8311_v33, 0.0  ;;  %11119 = vst [vmem:[#allocation42_spill] sm:$0xff] %v8373_v22  ;;  %v8378_v11 = vld [vmem:[%s11019_s0 + $0x188] sm:$0xff]  ;;  %v240_v23 = vsel %vm143_vm1, %v8320_v53, 0.0  ;;  %11121 = vst [vmem:[#allocation44_spill] sm:$0xff] %v8391_v38 }
  0x32   :  { %v192_v3 = vadd.f32 %v8081_v20, %v190_v35  ;;  %11120 = vst [vmem:[#allocation43_spill] sm:$0xff] %v8378_v11  ;;  %v364_v20 = vsel %vm143_vm1, %v8325_v0, 0.0  ;;  %v320_v35 = vadd.f32 %v319_v63, %v318_v59  ;;  %v8386_v41 = vsel %vm143_vm1, %v8331_v10, 0.0  ;;  %v8403_v59 = vld [vmem:[%s11019_s0 + $0x350] sm:$0xff] }
  0x33   :  { %v239_v40 = vadd.f32 %v238_v7, %v237_v24  ;;  %v363_v33 = vadd.f32 %v362_v46, %v361_v37  ;;  %v8396_v53 = vsel %vm143_vm1, %v8336_v30, 0.0  ;;  %v242_v63 = vsel %vm143_vm1, %v8358_v34, 0.0  ;;  %11122 = vst [vmem:[#allocation45_spill] sm:$0xff] %v8403_v59  ;;  %v8415_v34 = vld [vmem:[%s11019_s0 + $0x2f8] sm:$0xff]  ;;  %v8420_v0 = vld [vmem:[%s11019_s0 + $0x190] sm:$0xff] }
  0x34   :  { %v194_v50 = vadd.f32 %v8092_v28, %v192_v3  ;;  %v366_v24 = vsel %vm143_vm1, %v8363_v45, 0.0  ;;  %v322_v7 = vadd.f32 %v321_v47, %v320_v35  ;;  %v8409_v37 = vsel %vm143_vm1, %v8341_v61, 0.0  ;;  %11123 = vst [vmem:[#allocation46_spill] sm:$0xff] %v8415_v34  ;;  %11124 = vst [vmem:[#allocation47_spill] sm:$0xff] %v8420_v0 }
  0x35   :  { %v241_v3 = vadd.f32 %v240_v23, %v239_v40  ;;  %v365_v28 = vadd.f32 %v364_v20, %v363_v33  ;;  %v244_v47 = vsel %vm143_vm1, %v8373_v22, 0.0  ;;  %v246_v35 = vsel %vm143_vm1, %v8378_v11, 0.0  ;;  %v8436_v23 = vld [vmem:[%s11019_s0 + $0x198] sm:$0xff]  ;;  %v8441_v20 = vld [vmem:[%s11019_s0 + $0x1a0] sm:$0xff] }
  0x36   :  { %v196_v46 = vadd.f32 %v8096_v13, %v194_v50  ;;  %v8429_v13 = vld [vmem:[%s11019_s0 + $0x358] sm:$0xff]  ;;  %v368_v50 = vsel %vm143_vm1, %v8391_v38, 0.0  ;;  %v324_v33 = vadd.f32 %v323_v26, %v322_v7  ;;  %11126 = vst [vmem:[#allocation49_spill] sm:$0xff] %v8436_v23  ;;  %11127 = vst [vmem:[#allocation50_spill] sm:$0xff] %v8441_v20  ;;  %v8446_v11 = vld [vmem:[%s11019_s0 + $0x360] sm:$0xff]  ;;  %v370_v26 = vsel %vm143_vm1, %v8403_v59, 0.0 }
  0x37   :  { %11125 = vst [vmem:[#allocation48_spill] sm:$0xff] %v8429_v13  ;;  %v243_v40 = vadd.f32 %v242_v63, %v241_v3  ;;  %11128 = vst [vmem:[#allocation51_spill] sm:$0xff] %v8446_v11  ;;  %v367_v22 = vadd.f32 %v366_v24, %v365_v28  ;;  %v8454_v38 = vld [vmem:[%s11019_s0 + $0x1a8] sm:$0xff]  ;;  %v8460_v63 = vld [vmem:[%s11019_s0 + $0x1b0] sm:$0xff]  ;;  %v372_v59 = vsel %vm143_vm1, %v8429_v13, 0.0 }
  0x38   :  { %v198_v7 = vadd.f32 %v8113_v43, %v196_v46  ;;  %11129 = vst [vmem:[#allocation52_spill] sm:$0xff] %v8454_v38  ;;  %v326_v45 = vadd.f32 %v8282_v62, %v324_v33  ;;  %11130 = vst [vmem:[#allocation53_spill] sm:$0xff] %v8460_v63  ;;  %v8465_v24 = vld [vmem:[%s11019_s0 + $0x1b8] sm:$0xff]  ;;  %v8471_v46 = vld [vmem:[%s11019_s0 + $0x1c0] sm:$0xff]  ;;  %v248_v62 = vsel %vm143_vm1, %v8420_v0, 0.0 }
  0x39   :  { %11131 = vst [vmem:[#allocation54_spill] sm:$0xff] %v8465_v24  ;;  %v245_v3 = vadd.f32 %v244_v47, %v243_v40  ;;  %v369_v28 = vadd.f32 %v368_v50, %v367_v22  ;;  %v8478_v33 = vld [vmem:[%s11019_s0 + $0x368] sm:$0xff]  ;;  %v8488_v50 = vld [vmem:[%s11019_s0 + $0x370] sm:$0xff]  ;;  %v260_v13 = vsel %vm143_vm1, %v8471_v46, 0.0 }
  0x3a   :  { %v200_v43 = vadd.f32 %v8130_v31, %v198_v7  ;;  %11132 = vst [vmem:[#allocation55_spill] sm:$0xff] %v8478_v33  ;;  %v328_v22 = vadd.f32 %v8302_v25, %v326_v45  ;;  %v343_v31 = vsel %vm143_vm1, %v8415_v34, 0.0  ;;  %v8494_v0 = vld [vmem:[%s11019_s0 + $0x1c8] sm:$0xff]  ;;  %v250_v45 = vsel %vm143_vm1, %v8436_v23, 0.0 }
  0x3b   :  { %v247_v47 = vadd.f32 %v246_v35, %v245_v3  ;;  %v371_v40 = vadd.f32 %v370_v26, %v369_v28  ;;  %11133 = vst [vmem:[#allocation56_spill] sm:$0xff] %v8494_v0  ;;  %v252_v25 = vsel %vm143_vm1, %v8441_v20, 0.0  ;;  %v374_v35 = vsel %vm143_vm1, %v8446_v11, 0.0  ;;  %v8518_v20 = vld [vmem:[%s11019_s0 + $0x380] sm:$0xff] }
  0x3c   :  { %v202_v7 = vadd.f32 %v8134_v54, %v200_v43  ;;  %v330_v3 = vadd.f32 %v8315_v6, %v328_v22  ;;  %v8506_v54 = vld [vmem:[%s11019_s0 + $0x1d0] sm:$0xff]  ;;  %v254_v28 = vsel %vm143_vm1, %v8454_v38, 0.0  ;;  %v8513_v43 = vld [vmem:[%s11019_s0 + $0x378] sm:$0xff]  ;;  %v256_v23 = vsel %vm143_vm1, %v8460_v63, 0.0 }
  0x3d   :  { %11134 = vst [vmem:[#allocation57_spill] sm:$0xff] %v8506_v54  ;;  %v249_v26 = vadd.f32 %v248_v62, %v247_v47  ;;  %v373_v6 = vadd.f32 %v372_v59, %v371_v40  ;;  %v258_v62 = vsel %vm143_vm1, %v8465_v24, 0.0  ;;  %v376_v47 = vsel %vm143_vm1, %v8478_v33, 0.0 }
  0x3e   :  { %v204_v22 = vadd.f32 %v8146_v14, %v202_v7  ;;  %v332_v38 = vadd.f32 %v8345_v55, %v330_v3  ;;  %v378_v14 = vsel %vm143_vm1, %v8488_v50, 0.0  ;;  %v262_v24 = vsel %vm143_vm1, %v8494_v0, 0.0 }
  0x3f   :  { %v251_v11 = vadd.f32 %v250_v45, %v249_v26  ;;  %v375_v34 = vadd.f32 %v374_v35, %v373_v6  ;;  %v264_v55 = vsel %vm143_vm1, %v8506_v54, 0.0  ;;  %v8541_v45 = vld [vmem:[%s11019_s0 + $0x388] sm:$0xff]  ;;  %v8555_v54 = vld [vmem:[%s11019_s0 + $0x1d8] sm:$0xff] }
  0x40   :  { %v206_v59 = vadd.f32 %v8161_v32, %v204_v22  ;;  %v334_v40 = vadd.f32 %v8353_v17, %v332_v38  ;;  %v380_v32 = vsel %vm143_vm1, %v8513_v43, 0.0  ;;  %v382_v38 = vsel %vm143_vm1, %v8518_v20, 0.0 }
  0x41   :  { %v253_v7 = vadd.f32 %v252_v25, %v251_v11  ;;  %v377_v63 = vadd.f32 %v376_v47, %v375_v34  ;;  %v384_v22 = vsel %vm143_vm1, %v8541_v45, 0.0 }
  0x42   :  { %v207_v33 = vrot.slane %v206_v59, 4  ;;  %v336_v17 = vadd.f32 %v8368_v39, %v334_v40  ;;  %v8560_v39 = vld [vmem:[%s11019_s0 + $0x390] sm:$0xff] }
  0x43   :  { %v255_v11 = vadd.f32 %v254_v28, %v253_v7  ;;  %v379_v25 = vadd.f32 %v378_v14, %v377_v63  ;;  %v8565_v63 = vld [vmem:[%s11019_s0 + $0x398] sm:$0xff]  ;;  %v8571_v28 = vld [vmem:[%s11019_s0 + $0x3a0] sm:$0xff]  ;;  %v266_v7 = vsel %vm143_vm1, %v8555_v54, 0.0 }
  0x44   :  { %v208_v34 = vadd.f32 %v207_v33, %v206_v59  ;;  %v338_v35 = vadd.f32 %v8386_v41, %v336_v17 }
  0x45   :  { %v257_v3 = vadd.f32 %v256_v23, %v255_v11  ;;  %v381_v26 = vadd.f32 %v380_v32, %v379_v25  ;;  %v386_v32 = vsel %vm143_vm1, %v8560_v39, 0.0 }
  0x46   :  { %v209_v6 = vrot.slane %v208_v34, 2  ;;  %v340_v47 = vadd.f32 %v8396_v53, %v338_v35 }
  0x47   :  { %v259_v0 = vadd.f32 %v258_v62, %v257_v3  ;;  %v383_v41 = vadd.f32 %v382_v38, %v381_v26  ;;  %v388_v38 = vsel %vm143_vm1, %v8565_v63, 0.0 }
  0x48   :  { %v210_v23 = vadd.f32 %v209_v6, %v208_v34  ;;  %v342_v53 = vadd.f32 %v8409_v37, %v340_v47  ;;  %v390_v37 = vsel %vm143_vm1, %v8571_v28, 0.0 }
  0x49   :  { %v261_v59 = vadd.f32 %v260_v13, %v259_v0  ;;  %v385_v14 = vadd.f32 %v384_v22, %v383_v41 }
  0x4a   :  { %v211_v33 = vrot.slane %v210_v23, 1  ;;  %v344_v62 = vadd.f32 %v343_v31, %v342_v53 }
  0x4b   :  { %v263_v25 = vadd.f32 %v262_v24, %v261_v59  ;;  %v387_v31 = vadd.f32 %v386_v32, %v385_v14 }
  0x4c   :  { %v212_v40 = vadd.f32 %v211_v33, %v210_v23  ;;  %v345_v11 = vrot.slane %v344_v62, 4 }
  0x4e   :  { %v8581_v17 = vmul.f32 0.00390625, %v212_v40 }
  0x50   :  { %v425_v0 = vsub.f32 %v7793_v1, %v8581_v17  ;;  %v426_v13 = vsub.f32 %v7798_v2, %v8581_v17  ;;  %v427_v34 = vsub.f32 %v7803_v4, %v8581_v17  ;;  %v428_v35 = vsub.f32 %v7808_v5, %v8581_v17  ;;  %v8598_v1 = vld [vmem:[%s11019_s0 + $0x1e0] sm:$0xff] }
  0x51   :  { %v429_v3 = vsub.f32 %v7817_v8, %v8581_v17  ;;  %v430_v26 = vsub.f32 %v7826_v12, %v8581_v17  ;;  %v265_v2 = vadd.f32 %v264_v55, %v263_v25  ;;  %v389_v4 = vadd.f32 %v388_v38, %v387_v31  ;;  %v8614_v55 = vld [vmem:[%s11019_s0 + $0x3a8] sm:$0xff] }
  0x52   :  { %v556_v24 = vpack.c.bf16 %v426_v13, %v425_v0  ;;  %v557_v6 = vpack.c.bf16 %v428_v35, %v427_v34  ;;  %v431_v5 = vsub.f32 %v7833_v15, %v8581_v17  ;;  %v432_v8 = vsub.f32 %v7840_v18, %v8581_v17 }
  0x53   :  { %v558_v22 = vpack.c.bf16 %v430_v26, %v429_v3  ;;  %v433_v12 = vsub.f32 %v7847_v21, %v8581_v17  ;;  %v434_v47 = vsub.f32 %v7863_v27, %v8581_v17 }
  0x54   :  { %7185 = vmatprep.mubr.msk.bf16.mxu0 %vm143_vm1, %v556_v24 }
  0x55   :  { %7186 = vmatmul.mubr.msk.bf16.vlgmr.msra.gmra.mrb[0].mxu0 %vm143_vm1, %v557_v6 }
  0x56   :  { %7189 = vmatprep.mubr.msk.bf16.mxu0 %vm143_vm1, %v558_v22 }
  0x57   :  { %9 = vsyncpa [#allocation3], 0  ;;  %v346_v41 = vadd.f32 %v345_v11, %v344_v62  ;;  %v267_v23 = vadd.f32 %v266_v7, %v265_v2  ;;  %v8619_v15 = vld [vmem:[%s11019_s0 + $0x1e8] sm:$0xff]  ;;  %v268_v18 = vsel %vm143_vm1, %v8598_v1, 0.0  ;;  %v8626_v21 = vld [vmem:[%s11019_s0 + $0x3b0] sm:$0xff]  ;;  %v391_v27 = vadd.f32 %v390_v37, %v389_v4  ;;  %s7759_s18 = smov 64  }
  0x58   :  { %v559_v53 = vpack.c.bf16 %v432_v8, %v431_v5  ;;  %v392_v33 = vsel %vm143_vm1, %v8614_v55, 0.0  ;;  %v560_v62 = vpack.c.bf16 %v434_v47, %v433_v12  ;;  %v8633_v59 = vld [vmem:[%s11019_s0 + $0x3b8] sm:$0xff]  ;;  %v270_v7 = vsel %vm143_vm1, %v8619_v15, 0.0  ;;  %v8642_v38 = vld [vmem:[%s11019_s0 + $0x1f0] sm:$0xff]  ;;  %s7760_s21 = smov 4  }
  0x59   :  { %v347_v14 = vrot.slane %v346_v41, 2  ;;  %v269_v40 = vadd.f32 %v268_v18, %v267_v23  ;;  %v394_v32 = vsel %vm143_vm1, %v8626_v21, 0.0  ;;  %v393_v37 = vadd.f32 %v392_v33, %v391_v27  ;;  %v8666_v24 = vld [vmem:[%s11019_s0 + $0x1f8] sm:$0xff] }
  0x5a   :  { %v435_v11 = vsub.f32 %v7879_v36, %v8581_v17  ;;  %v436_v25 = vsub.f32 %v7890_v42, %v8581_v17  ;;  %v396_v0 = vsel %vm143_vm1, %v8633_v59, 0.0  ;;  %v437_v13 = vsub.f32 %v7901_v48, %v8581_v17  ;;  %v8659_v36 = vld [vmem:[%s11019_s0 + $0x3c0] sm:$0xff]  ;;  %v8671_v48 = vld [vmem:[%s11019_s0 + $0x3c8] sm:$0xff] }
  0x5b   :  { %v348_v31 = vadd.f32 %v347_v14, %v346_v41  ;;  %v438_v34 = vsub.f32 %v7907_v51, %v8581_v17  ;;  %v271_v35 = vadd.f32 %v270_v7, %v269_v40  ;;  %v395_v3 = vadd.f32 %v394_v32, %v393_v37 }
  0x5c   :  { %v272_v26 = vsel %vm143_vm1, %v8642_v38, 0.0  ;;  %v561_v6 = vpack.c.bf16 %v436_v25, %v435_v11  ;;  %v398_v2 = vsel %vm143_vm1, %v8659_v36, 0.0  ;;  %v274_v12 = vsel %vm143_vm1, %v8666_v24, 0.0 }
  0x5d   :  { %7190 = vmatmul.mubr.msk.bf16.gmra.mrb[4].mxu0 %vm143_vm1, %v559_v53  ;;  %v349_v42 = vrot.slane %v348_v31, 1  ;;  %v397_v51 = vadd.f32 %v396_v0, %v395_v3  ;;  %v562_v4 = vpack.c.bf16 %v438_v34, %v437_v13  ;;  %v273_v5 = vadd.f32 %v272_v26, %v271_v35  ;;  %v8730_v34 = vld [vmem:[%s11019_s0 + $0x3e0] sm:$0xff]  ;;  %v11137_v35 = vld [vmem:[#allocation23_spill] sm:$0xff] }
  0x5e   :  { %7193 = vmatprep.mubr.msk.bf16.mxu0 %vm143_vm1, %v560_v62  ;;  %v400_v47 = vsel %vm143_vm1, %v8671_v48, 0.0  ;;  %v439_v41 = vsub.f32 %v7912_v52, %v8581_v17  ;;  %v440_v23 = vsub.f32 %v7922_v56, %v8581_v17  ;;  %v441_v18 = vsub.f32 %v7927_v57, %v8581_v17 }
  0x5f   :  { %v350_v22 = vadd.f32 %v349_v42, %v348_v31  ;;  %v399_v27 = vadd.f32 %v398_v2, %v397_v51  ;;  %v442_v56 = vsub.f32 %v7932_v58, %v8581_v17  ;;  %v275_v14 = vadd.f32 %v274_v12, %v273_v5  ;;  %v7631_v58 = vld [vmem:[%s11020_s1 + $0x24] ss:$8 sps:$4 sm:$0xff]   ;;  %v11136_v31 = vld [vmem:[#allocation19_spill] sm:$0xff] }
  0x60   :  { %v11138_v42 = vld [vmem:[#allocation25_spill] sm:$0xff]  ;;  %v7634_v51 = vld [vmem:[%s11020_s1 + $0x34] ss:$8 sps:$4 sm:$0xff]   ;;  %vm2839_vm2 = vcmask 523264   ;;  %vm6143_vm3 = vcmask 1041409   ;;  %vm6145_vm4 = vcmask 1042434  }
  0x61   :  { %v8675_v8 = vmul.f32 0.00390625, %v350_v22  ;;  %v401_v32 = vadd.f32 %v400_v47, %v399_v27  ;;  %v564_v11 = vpack.c.bf16 %v442_v56, %v441_v18  ;;  %v276_v13 = vrot.slane %v275_v14, 4  ;;  %v11139_v22 = vld [vmem:[#allocation5_spill] sm:$0xff]  ;;  %v11142_v18 = vld [vmem:[#allocation8_spill] sm:$0xff] }
  0x62   :  { %v443_v2 = vsub.f32 %v11139_v22, %v8581_v17  ;;  %v406_v47 = vsel %vm143_vm1, %v8730_v34, 0.0  ;;  %v446_v27 = vsub.f32 %v11142_v18, %v8581_v17  ;;  %vm6147_vm5 = vcmask 1043459  }
  0x63   :  { %11135 = vst [vmem:[#allocation58_spill] sm:$0xff] %v8675_v8  ;;  %v501_v53 = vsub.f32 %v8064_v9, %v8675_v8  ;;  %v502_v33 = vsub.f32 %v8101_v29, %v8675_v8  ;;  %v503_v62 = vsub.f32 %v8118_v44, %v8675_v8  ;;  %v504_v52 = vsub.f32 %v8123_v49, %v8675_v8  ;;  %v8706_v29 = vld [vmem:[%s11019_s0 + $0x3d0] sm:$0xff] }
  0x64   :  { %v505_v57 = vsub.f32 %v8139_v60, %v8675_v8  ;;  %v506_v9 = vsub.f32 %v8151_v19, %v8675_v8  ;;  %v7626_v49 = vld [vmem:[%s11020_s1 + $0x10] ss:$8 sps:$4 sm:$0xff]   ;;  %v563_v60 = vpack.c.bf16 %v440_v23, %v439_v41  ;;  %v402_v37 = vsel %vm143_vm1, %v8706_v29, 0.0 }
  0x65   :  { %7194 = vmatmul.mubr.msk.bf16.gmra.mrb[8].mxu0 %vm143_vm1, %v561_v6  ;;  %v594_v44 = vpack.c.bf16 %v502_v33, %v501_v53  ;;  %v595_v40 = vpack.c.bf16 %v504_v52, %v503_v62  ;;  %v8718_v19 = vld [vmem:[%s11019_s0 + $0x3d8] sm:$0xff]  ;;  %v507_v25 = vsub.f32 %v8168_v16, %v8675_v8  ;;  %v508_v0 = vsub.f32 %v11136_v31, %v8675_v8  ;;  %v7629_v16 = vld [vmem:[%s11020_s1 + $0x20] ss:$8 sps:$4 sm:$0xff]  }
  0x66   :  { %7197 = vmatprep.mubr.msk.bf16.mxu0 %vm143_vm1, %v562_v4  ;;  %v596_v7 = vpack.c.bf16 %v506_v9, %v505_v57  ;;  %v509_v3 = vsub.f32 %v11137_v35, %v8675_v8  ;;  %v510_v26 = vsub.f32 %v11138_v42, %v8675_v8  ;;  %v404_v6 = vsel %vm143_vm1, %v8718_v19, 0.0  ;;  %v11140_v4 = vld [vmem:[#allocation6_spill] sm:$0xff]  ;;  %v11141_v41 = vld [vmem:[#allocation7_spill] sm:$0xff]  ;;  %v11145_v31 = vld [vmem:[#allocation32_spill] sm:$0xff] }
  0x67   :  { %7261 = vmatprep.mubr.msk.bf16.mxu1 %vm143_vm1, %v594_v44  ;;  %v444_v5 = vsub.f32 %v11140_v4, %v8581_v17  ;;  %v403_v12 = vadd.f32 %v402_v37, %v401_v32  ;;  %v445_v23 = vsub.f32 %v11141_v41, %v8581_v17  ;;  %v597_v53 = vpack.c.bf16 %v508_v0, %v507_v25  ;;  %v8760_v62 = vld [vmem:[%s11019_s0 + $0x3e8] sm:$0xff]  ;;  %v7632_v57 = vld [vmem:[%s11020_s1 + $0x30] ss:$8 sps:$4 sm:$0xff]   ;;  %v7640_v4 = vld [vmem:[%s11020_s1 + $0x54] ss:$8 sps:$4 sm:$0xff]  }
  0x68   :  { %7262 = vmatmul.mubr.msk.bf16.vlgmr.msra.gmra.mrb[0].mxu1 %vm143_vm1, %v595_v40  ;;  %v277_v33 = vadd.f32 %v276_v13, %v275_v14  ;;  %v598_v52 = vpack.c.bf16 %v510_v26, %v509_v3  ;;  %v8768_v44 = vld [vmem:[%s11019_s0 + $0x3f0] sm:$0xff]  ;;  %v408_v40 = vsel %vm143_vm1, %v8760_v62, 0.0  ;;  %v11144_v37 = vld [vmem:[#allocation29_spill] sm:$0xff]  ;;  %v8783_v25 = vld [vmem:[%s11019_s0 + $0x3f8] sm:$0xff]  ;;  %v513_v0 = vsub.f32 %v11145_v31, %v8675_v8 }
  0x69   :  { %1663 = vmatpush1.bf16.msra.mxu1 %v7626_v49  ;;  %7265 = vmatprep.mubr.msk.bf16.mxu1 %vm143_vm1, %v596_v7  ;;  %v405_v56 = vadd.f32 %v404_v6, %v403_v12  ;;  %v565_v9 = vpack.c.bf16 %v444_v5, %v443_v2  ;;  %v7637_v49 = vld [vmem:[%s11020_s1 + $0x44] ss:$8 sps:$4 sm:$0xff]   ;;  %v566_v7 = vpack.c.bf16 %v446_v27, %v445_v23  ;;  %v410_v3 = vsel %vm143_vm1, %v8768_v44, 0.0  ;;  %v7635_v42 = vld [vmem:[%s11020_s1 + $0x40] ss:$8 sps:$4 sm:$0xff]   ;;  %v11149_v5 = vld [vmem:[#allocation11_spill] sm:$0xff] }
  0x6a   :  { %1664 = vmatprep.subr.bf16.mxu1 %v7631_v58  ;;  %v278_v58 = vrot.slane %v277_v33, 2  ;;  %v11146_v13 = vld [vmem:[#allocation33_spill] sm:$0xff]  ;;  %v412_v2 = vsel %vm143_vm1, %v8783_v25, 0.0  ;;  %v449_v12 = vsub.f32 %v11149_v5, %v8581_v17  ;;  %vm7762_vm6 = vmmov 0  }
  0x6b   :  { %v407_v14 = vadd.f32 %v406_v47, %v405_v56  ;;  %v514_v35 = vsub.f32 %v11146_v13, %v8675_v8  ;;  %v11147_v26 = vld [vmem:[#allocation9_spill] sm:$0xff]  ;;  %v11150_v47 = vld [vmem:[#allocation12_spill] sm:$0xff]  ;;  %v11154_v13 = vld [vmem:[#allocation14_spill] sm:$0xff]  ;;  %vm6417_vm7 = vcmask 27648   ;;  %vm6718_vm10 = vcmask 31744  }
  0x6c   :  { %v450_v41 = vsub.f32 %v11150_v47, %v8581_v17  ;;  %v279_v23 = vadd.f32 %v278_v58, %v277_v33  ;;  %v11151_v33 = vld [vmem:[#allocation36_spill] sm:$0xff]  ;;  %v11153_v31 = vld [vmem:[#allocation13_spill] sm:$0xff]  ;;  %vm6720_vm11 = vcmask 56320   ;;  %vm6751_vm12 = vcmask 57344  }
  0x6d   :  { %7198 = vmatmul.mubr.msk.bf16.gmra.mrb[12].mxu0 %vm143_vm1, %v563_v60  ;;  %1665 = vmatpush1.bf16.msra.mxu1 %v7629_v16  ;;  %v11143_v60 = vld [vmem:[#allocation28_spill] sm:$0xff]  ;;  %v447_v16 = vsub.f32 %v11147_v26, %v8581_v17  ;;  %v409_v22 = vadd.f32 %v408_v40, %v407_v14  ;;  %v600_v27 = vpack.c.bf16 %v514_v35, %v513_v0  ;;  %v7649_v47 = vld [vmem:[%s11020_s1 + $0x84] ss:$8 sps:$4 sm:$0xff]  }
  0x6e   :  { %7201 = vmatprep.mubr.msk.bf16.mxu0 %vm143_vm1, %v564_v11  ;;  %1666 = vmatprep.subr.bf16.mxu1 %v7634_v51  ;;  %v511_v32 = vsub.f32 %v11143_v60, %v8675_v8  ;;  %v512_v11 = vsub.f32 %v11144_v37, %v8675_v8  ;;  %v11148_v51 = vld [vmem:[#allocation10_spill] sm:$0xff]  ;;  %v568_v14 = vpack.c.bf16 %v450_v41, %v449_v12  ;;  %v280_v40 = vrot.slane %v279_v23, 1  ;;  %v11156_v26 = vld [vmem:[#allocation16_spill] sm:$0xff] }
  0x6f   :  { %v448_v6 = vsub.f32 %v11148_v51, %v8581_v17  ;;  %v517_v60 = vsub.f32 %v8331_v10, %v8675_v8  ;;  %v451_v0 = vsub.f32 %v11153_v31, %v8581_v17  ;;  %v452_v35 = vsub.f32 %v11154_v13, %v8581_v17  ;;  %v7646_v10 = vld [vmem:[%s11020_s1 + $0x74] ss:$8 sps:$4 sm:$0xff]  }
  0x70   :  { %7266 = vmatmul.mubr.msk.bf16.gmra.mrb[4].mxu1 %vm143_vm1, %v597_v53  ;;  %v599_v18 = vpack.c.bf16 %v512_v11, %v511_v32  ;;  %v411_v53 = vadd.f32 %v410_v3, %v409_v22  ;;  %v518_v32 = vsub.f32 %v8336_v30, %v8675_v8  ;;  %v7641_v11 = vld [vmem:[%s11020_s1 + $0x60] ss:$8 sps:$4 sm:$0xff]   ;;  %v11155_v30 = vld [vmem:[#allocation15_spill] sm:$0xff]  ;;  %v281_v51 = vadd.f32 %v280_v40, %v279_v23 }
  0x71   :  { %7269 = vmatprep.mubr.msk.bf16.mxu1 %vm143_vm1, %v598_v52  ;;  %1667 = vmatpush1.bf16.msra.mxu1 %v7632_v57  ;;  %v7638_v52 = vld [vmem:[%s11020_s1 + $0x50] ss:$8 sps:$4 sm:$0xff]   ;;  %v567_v56 = vpack.c.bf16 %v448_v6, %v447_v16  ;;  %v454_v16 = vsub.f32 %v11156_v26, %v8581_v17  ;;  %v569_v5 = vpack.c.bf16 %v452_v35, %v451_v0  ;;  %v11163_v0 = vld [vmem:[#allocation21_spill] sm:$0xff] }
  0x72   :  { %1668 = vmatprep.subr.bf16.mxu1 %v7637_v49  ;;  %v413_v57 = vadd.f32 %v412_v2, %v411_v53  ;;  %v515_v49 = vsub.f32 %v11151_v33, %v8675_v8  ;;  %v602_v22 = vpack.c.bf16 %v518_v32, %v517_v60  ;;  %v519_v23 = vsub.f32 %v8341_v61, %v8675_v8  ;;  %v7710_v33 = vld [vmem:[%s11019_s0 + $0x100] sm:$0xff] }
  0x74   :  { %v414_v37 = vrot.slane %v413_v57, 4 }
  0x75   :  { %7202 = vmatmul.mubr.msk.bf16.gmra.mrb[16].mxu0 %vm143_vm1, %v565_v9  ;;  %1669 = vmatpush1.bf16.msra.mxu1 %v7635_v42  ;;  %v7643_v9 = vld [vmem:[%s11020_s1 + $0x64] ss:$8 sps:$4 sm:$0xff]   ;;  %v453_v42 = vsub.f32 %v11155_v30, %v8581_v17  ;;  %v11165_v30 = vld [vmem:[#allocation24_spill] sm:$0xff] }
  0x76   :  { %7205 = vmatprep.mubr.msk.bf16.mxu0 %vm143_vm1, %v566_v7  ;;  %1670 = vmatprep.subr.bf16.mxu1 %v7640_v4  ;;  %v11152_v7 = vld [vmem:[#allocation37_spill] sm:$0xff]  ;;  %v415_v3 = vadd.f32 %v414_v37, %v413_v57  ;;  %v7644_v4 = vld [vmem:[%s11020_s1 + $0x70] ss:$8 sps:$4 sm:$0xff]  }
  0x77   :  { %v516_v58 = vsub.f32 %v11152_v7, %v8675_v8  ;;  %v570_v41 = vpack.c.bf16 %v454_v16, %v453_v42  ;;  %v11159_v57 = vld [vmem:[#allocation17_spill] sm:$0xff]  ;;  %v11166_v16 = vld [vmem:[#allocation27_spill] sm:$0xff] }
  0x78   :  { %7270 = vmatmul.mubr.msk.bf16.gmra.mrb[8].mxu1 %vm143_vm1, %v599_v18  ;;  %v416_v2 = vrot.slane %v415_v3, 2  ;;  %v8848_v18 = vmul.f32 0.00390625, %v281_v51  ;;  %v7711_v7 = vld [vmem:[%s11019_s0 + $0x108] sm:$0xff] }
  0x79   :  { %7273 = vmatprep.mubr.msk.bf16.mxu1 %vm143_vm1, %v600_v27  ;;  %1671 = vmatpush1.bf16.msra.mxu1 %v7638_v52  ;;  %v601_v6 = vpack.c.bf16 %v516_v58, %v515_v49  ;;  %v11158_v27 = vld [vmem:[#allocation46_spill] sm:$0xff] }
  0x7a   :  { %1672 = vmatprep.subr.bf16.mxu1 %v7643_v9  ;;  %v417_v12 = vadd.f32 %v416_v2, %v415_v3  ;;  %11157 = vst [vmem:[#allocation19_spill] sm:$0xff] %v8848_v18  ;;  %v520_v53 = vsub.f32 %v11158_v27, %v8675_v8  ;;  %v455_v9 = vsub.f32 %v11159_v57, %v8581_v17  ;;  %v11164_v3 = vld [vmem:[#allocation22_spill] sm:$0xff] }
  0x7b   :  { %v457_v49 = vsub.f32 %v7710_v33, %v8848_v18  ;;  %v458_v58 = vsub.f32 %v7711_v7, %v8848_v18  ;;  %v7712_v2 = vld [vmem:[%s11019_s0 + $0x110] sm:$0xff]  ;;  %v11170_v33 = vld [vmem:[#allocation41_spill] sm:$0xff]  ;;  %v11171_v7 = vld [vmem:[#allocation44_spill] sm:$0xff] }
  0x7c   :  { %v418_v52 = vrot.slane %v417_v12, 1  ;;  %v603_v60 = vpack.c.bf16 %v520_v53, %v519_v23  ;;  %v7715_v23 = vld [vmem:[%s11019_s0 + $0x128] sm:$0xff] }
  0x7d   :  { %7206 = vmatmul.mubr.msk.bf16.gmra.mrb[20].mxu0 %vm143_vm1, %v567_v56  ;;  %1673 = vmatpush1.bf16.msra.mxu1 %v7641_v11  ;;  %v7647_v56 = vld [vmem:[%s11020_s1 + $0x80] ss:$8 sps:$4 sm:$0xff]   ;;  %v572_v35 = vpack.c.bf16 %v458_v58, %v457_v49  ;;  %v462_v27 = vsub.f32 %v7715_v23, %v8848_v18  ;;  %v11176_v23 = vld [vmem:[#allocation26_spill] sm:$0xff] }
  0x7e   :  { %7209 = vmatprep.mubr.msk.bf16.mxu0 %vm143_vm1, %v568_v14  ;;  %1674 = vmatprep.subr.bf16.mxu1 %v7646_v10  ;;  %v11160_v14 = vld [vmem:[#allocation18_spill] sm:$0xff]  ;;  %v419_v61 = vadd.f32 %v418_v52, %v417_v12  ;;  %v11162_v11 = vld [vmem:[#allocation20_spill] sm:$0xff] }
  0x7f   :  { %v456_v40 = vsub.f32 %v11160_v14, %v8581_v17 }
  0x80   :  { %7274 = vmatmul.mubr.msk.bf16.gmra.mrb[12].mxu1 %vm143_vm1, %v601_v6  ;;  %v8873_v32 = vmul.f32 0.00390625, %v419_v61  ;;  %v11167_v6 = vld [vmem:[#allocation31_spill] sm:$0xff] }
  0x81   :  { %7277 = vmatprep.mubr.msk.bf16.mxu1 %vm143_vm1, %v602_v22  ;;  %1675 = vmatpush1.bf16.msra.mxu1 %v7644_v4  ;;  %v571_v37 = vpack.c.bf16 %v456_v40, %v455_v9  ;;  %v459_v4 = vsub.f32 %v7712_v2, %v8848_v18  ;;  %v11168_v9 = vld [vmem:[#allocation35_spill] sm:$0xff] }
  0x82   :  { %1676 = vmatprep.subr.bf16.mxu1 %v7649_v47  ;;  %11161 = vst [vmem:[#allocation23_spill] sm:$0xff] %v8873_v32  ;;  %v521_v31 = vsub.f32 %v11162_v11, %v8873_v32  ;;  %v522_v13 = vsub.f32 %v11163_v0, %v8873_v32  ;;  %v523_v10 = vsub.f32 %v11164_v3, %v8873_v32  ;;  %v7714_v47 = vld [vmem:[%s11019_s0 + $0x120] sm:$0xff]  ;;  %v11169_v40 = vld [vmem:[#allocation39_spill] sm:$0xff] }
  0x83   :  { %v524_v42 = vsub.f32 %v11165_v30, %v8873_v32  ;;  %v525_v51 = vsub.f32 %v11166_v16, %v8873_v32  ;;  %v526_v22 = vsub.f32 %v11167_v6, %v8873_v32  ;;  %v527_v14 = vsub.f32 %v11168_v9, %v8873_v32  ;;  %v7717_v11 = vld [vmem:[%s11019_s0 + $0x138] sm:$0xff]  ;;  %v7718_v0 = vld [vmem:[%s11019_s0 + $0x140] sm:$0xff] }
  0x84   :  { %v604_v26 = vpack.c.bf16 %v522_v13, %v521_v31  ;;  %v528_v61 = vsub.f32 %v11169_v40, %v8873_v32  ;;  %v529_v49 = vsub.f32 %v11170_v33, %v8873_v32  ;;  %v530_v58 = vsub.f32 %v11171_v7, %v8873_v32  ;;  %v11172_v16 = vld [vmem:[#allocation45_spill] sm:$0xff]  ;;  %v11173_v6 = vld [vmem:[#allocation48_spill] sm:$0xff]  ;;  %v11174_v2 = vld [vmem:[#allocation51_spill] sm:$0xff] }
  0x85   :  { %7210 = vmatmul.mubr.msk.bf16.gmra.mrb[24].mxu0 %vm143_vm1, %v569_v5  ;;  %1677 = vmatpush1.bf16.msra.mxu1 %v7647_v56  ;;  %v7713_v5 = vld [vmem:[%s11019_s0 + $0x118] sm:$0xff]  ;;  %v605_v53 = vpack.c.bf16 %v524_v42, %v523_v10  ;;  %v606_v52 = vpack.c.bf16 %v526_v22, %v525_v51  ;;  %v464_v31 = vsub.f32 %v7717_v11, %v8848_v18 }
  0x86   :  { %7213 = vmatprep.mubr.msk.bf16.mxu0 %vm143_vm1, %v570_v41  ;;  %v460_v12 = vsub.f32 %v7713_v5, %v8848_v18  ;;  %v461_v41 = vsub.f32 %v7714_v47, %v8848_v18  ;;  %v465_v13 = vsub.f32 %v7718_v0, %v8848_v18  ;;  %v607_v10 = vpack.c.bf16 %v528_v61, %v527_v14  ;;  %v11175_v5 = vld [vmem:[#allocation55_spill] sm:$0xff]  ;;  %v11180_v11 = vld [vmem:[#allocation40_spill] sm:$0xff] }
  0x87   :  { %v608_v30 = vpack.c.bf16 %v530_v58, %v529_v49  ;;  %v531_v51 = vsub.f32 %v11172_v16, %v8873_v32  ;;  %v532_v22 = vsub.f32 %v11173_v6, %v8873_v32  ;;  %v7720_v47 = vld [vmem:[%s11019_s0 + $0x150] sm:$0xff]  ;;  %v535_v33 = vsub.f32 %v8488_v50, %v8873_v32  ;;  %v11184_v6 = vld [vmem:[#allocation49_spill] sm:$0xff] }
  0x88   :  { %7278 = vmatmul.mubr.msk.bf16.gmra.mrb[16].mxu1 %vm143_vm1, %v603_v60  ;;  %v573_v56 = vpack.c.bf16 %v460_v12, %v459_v4  ;;  %v574_v57 = vpack.c.bf16 %v462_v27, %v461_v41  ;;  %v7716_v60 = vld [vmem:[%s11019_s0 + $0x130] sm:$0xff]  ;;  %v533_v4 = vsub.f32 %v11174_v2, %v8873_v32  ;;  %v534_v12 = vsub.f32 %v11175_v5, %v8873_v32 }
  0x89   :  { %7281 = vmatprep.mubr.msk.bf16.mxu1 %vm143_vm1, %v604_v26  ;;  %v467_v41 = vsub.f32 %v7720_v47, %v8848_v18  ;;  %v468_v27 = vsub.f32 %v11176_v23, %v8848_v18  ;;  %v536_v49 = vsub.f32 %v8513_v43, %v8873_v32  ;;  %v537_v7 = vsub.f32 %v8518_v20, %v8873_v32  ;;  %v11181_v43 = vld [vmem:[#allocation42_spill] sm:$0xff]  ;;  %v11183_v16 = vld [vmem:[#allocation47_spill] sm:$0xff] }
  0x8a   :  { %v610_v14 = vpack.c.bf16 %v534_v12, %v533_v4  ;;  %v538_v58 = vsub.f32 %v8541_v45, %v8873_v32  ;;  %v473_v0 = vsub.f32 %v11181_v43, %v8848_v18  ;;  %v539_v45 = vsub.f32 %v8560_v39, %v8873_v32  ;;  %v11186_v4 = vld [vmem:[#allocation52_spill] sm:$0xff] }
  0x8b   :  { %v577_v40 = vpack.c.bf16 %v468_v27, %v467_v41  ;;  %v611_v50 = vpack.c.bf16 %v536_v49, %v535_v33  ;;  %v476_v39 = vsub.f32 %v11184_v6, %v8848_v18  ;;  %v544_v47 = vsub.f32 %v8633_v59, %v8873_v32 }
  0x8c   :  { %v545_v23 = vsub.f32 %v8659_v36, %v8873_v32  ;;  %v546_v27 = vsub.f32 %v8671_v48, %v8873_v32  ;;  %v481_v59 = vsub.f32 %v8471_v46, %v8848_v18  ;;  %v547_v48 = vsub.f32 %v8706_v29, %v8873_v32 }
  0x8d   :  { %7214 = vmatmul.mubr.msk.bf16.gmra.mrb[28].mxu0 %vm143_vm1, %v571_v37  ;;  %v463_v37 = vsub.f32 %v7716_v60, %v8848_v18  ;;  %v11179_v60 = vld [vmem:[#allocation38_spill] sm:$0xff]  ;;  %v549_v49 = vsub.f32 %v8730_v34, %v8873_v32  ;;  %v550_v46 = vsub.f32 %v8760_v62, %v8873_v32  ;;  %v484_v29 = vsub.f32 %v8555_v54, %v8848_v18 }
  0x8e   :  { %7217 = vmatprep.mubr.msk.bf16.mxu0 %vm143_vm1, %v572_v35  ;;  %v7719_v35 = vld [vmem:[%s11019_s0 + $0x148] sm:$0xff]  ;;  %v486_v34 = vsub.f32 %v8619_v15, %v8848_v18  ;;  %v551_v62 = vsub.f32 %v8768_v44, %v8873_v32  ;;  %v488_v15 = vsub.f32 %v8666_v24, %v8848_v18  ;;  %v7721_v44 = vld [vmem:[%s11019_s0 + $0x200] sm:$0xff] }
  0x8f   :  { %v466_v3 = vsub.f32 %v7719_v35, %v8848_v18  ;;  %v575_v42 = vpack.c.bf16 %v464_v31, %v463_v37  ;;  %v471_v37 = vsub.f32 %v11179_v60, %v8848_v18  ;;  %v472_v31 = vsub.f32 %v11180_v11, %v8848_v18 }
  0x90   :  { %7282 = vmatmul.mubr.msk.bf16.gmra.mrb[20].mxu1 %vm143_vm1, %v605_v53  ;;  %v609_v53 = vpack.c.bf16 %v532_v22, %v531_v51  ;;  %v612_v35 = vpack.c.bf16 %v538_v58, %v537_v7  ;;  %v475_v51 = vsub.f32 %v11183_v16, %v8848_v18  ;;  %v11190_v7 = vld [vmem:[#allocation57_spill] sm:$0xff] }
  0x91   :  { %7285 = vmatprep.mubr.msk.bf16.mxu1 %vm143_vm1, %v606_v52  ;;  %v576_v26 = vpack.c.bf16 %v466_v3, %v465_v13  ;;  %v11177_v52 = vld [vmem:[#allocation30_spill] sm:$0xff]  ;;  %v11182_v13 = vld [vmem:[#allocation43_spill] sm:$0xff]  ;;  %v579_v3 = vpack.c.bf16 %v472_v31, %v471_v37  ;;  %v483_v58 = vsub.f32 %v11190_v7, %v8848_v18  ;;  %v618_v37 = vpack.c.bf16 %v550_v46, %v549_v49 }
  0x92   :  { %v474_v20 = vsub.f32 %v11182_v13, %v8848_v18  ;;  %v581_v12 = vpack.c.bf16 %v476_v39, %v475_v51  ;;  %v552_v31 = vsub.f32 %v8783_v25, %v8873_v32  ;;  %v489_v25 = vsub.f32 %v7721_v44, %v8675_v8  ;;  %v7727_v51 = vld [vmem:[%s11019_s0 + $0x230] sm:$0xff]  ;;  %v7728_v39 = vld [vmem:[%s11019_s0 + $0x238] sm:$0xff] }
  0x93   :  { %v585_v11 = vpack.c.bf16 %v484_v29, %v483_v58  ;;  %v11076_v13 = vmov 0   ;;  %v495_v6 = vsub.f32 %v7727_v51, %v8675_v8 }
  0x95   :  { %7218 = vmatmul.mubr.msk.bf16.gmra.mrb[32].mxu0 %vm143_vm1, %v573_v56  ;;  %v469_v56 = vsub.f32 %v11177_v52, %v8848_v18 }
  0x96   :  { %7221 = vmatprep.mubr.msk.bf16.mxu0 %vm143_vm1, %v574_v57  ;;  %v11178_v57 = vld [vmem:[#allocation34_spill] sm:$0xff] }
  0x97   :  { %v470_v9 = vsub.f32 %v11178_v57, %v8848_v18 }
  0x98   :  { %7286 = vmatmul.mubr.msk.bf16.gmra.mrb[24].mxu1 %vm143_vm1, %v607_v10  ;;  %v540_v10 = vsub.f32 %v8565_v63, %v8873_v32  ;;  %v11185_v63 = vld [vmem:[#allocation50_spill] sm:$0xff] }
  0x99   :  { %7289 = vmatprep.mubr.msk.bf16.mxu1 %vm143_vm1, %v608_v30  ;;  %v578_v61 = vpack.c.bf16 %v470_v9, %v469_v56  ;;  %v580_v30 = vpack.c.bf16 %v474_v20, %v473_v0  ;;  %v477_v2 = vsub.f32 %v11185_v63, %v8848_v18  ;;  %v11188_v56 = vld [vmem:[#allocation54_spill] sm:$0xff]  ;;  %v11189_v9 = vld [vmem:[#allocation56_spill] sm:$0xff] }
  0x9a   :  { %v613_v22 = vpack.c.bf16 %v540_v10, %v539_v45  ;;  %v482_v36 = vsub.f32 %v11189_v9, %v8848_v18  ;;  %v7722_v0 = vld [vmem:[%s11019_s0 + $0x208] sm:$0xff]  ;;  %v7723_v20 = vld [vmem:[%s11019_s0 + $0x210] sm:$0xff] }
  0x9c   :  { %v584_v33 = vpack.c.bf16 %v482_v36, %v481_v59 }
  0x9d   :  { %7222 = vmatmul.mubr.msk.bf16.gmra.mrb[36].mxu0 %vm143_vm1, %v575_v42  ;;  %v541_v42 = vsub.f32 %v8571_v28, %v8873_v32  ;;  %v478_v28 = vsub.f32 %v11186_v4, %v8848_v18  ;;  %v7729_v4 = vld [vmem:[%s11019_s0 + $0x240] sm:$0xff] }
  0x9e   :  { %7225 = vmatprep.mubr.msk.bf16.mxu0 %vm143_vm1, %v576_v26  ;;  %v542_v26 = vsub.f32 %v8614_v55, %v8873_v32  ;;  %v543_v55 = vsub.f32 %v8626_v21, %v8873_v32  ;;  %v480_v21 = vsub.f32 %v11188_v56, %v8848_v18 }
  0x9f   :  { %v582_v41 = vpack.c.bf16 %v478_v28, %v477_v2  ;;  %v497_v28 = vsub.f32 %v7729_v4, %v8675_v8 }
  0xa0   :  { %7290 = vmatmul.mubr.msk.bf16.gmra.mrb[28].mxu1 %vm143_vm1, %v609_v53  ;;  %v614_v5 = vpack.c.bf16 %v542_v26, %v541_v42  ;;  %v11187_v53 = vld [vmem:[#allocation53_spill] sm:$0xff]  ;;  %v615_v57 = vpack.c.bf16 %v544_v47, %v543_v55  ;;  %v7731_v55 = vld [vmem:[%s11019_s0 + $0x250] sm:$0xff] }
  0xa1   :  { %7293 = vmatprep.mubr.msk.bf16.mxu1 %vm143_vm1, %v610_v14  ;;  %v479_v52 = vsub.f32 %v11187_v53, %v8848_v18  ;;  %v616_v14 = vpack.c.bf16 %v546_v27, %v545_v23  ;;  %v7726_v26 = vld [vmem:[%s11019_s0 + $0x228] sm:$0xff]  ;;  %v499_v47 = vsub.f32 %v7731_v55, %v8675_v8 }
  0xa2   :  { %v494_v16 = vsub.f32 %v7726_v26, %v8675_v8 }
  0xa5   :  { %7226 = vmatmul.mubr.msk.bf16.gmra.mrb[40].mxu0 %vm143_vm1, %v577_v40  ;;  %v583_v40 = vpack.c.bf16 %v480_v21, %v479_v52  ;;  %v621_v52 = vlaneseq  ;;  %v553_v21 = vld [vmem:[%s11020_s1 + $0x8] sm:$0xff] }
  0xa6   :  { %7229 = vmatprep.mubr.msk.bf16.mxu0 %vm143_vm1, %v578_v61  ;;  %v548_v61 = vsub.f32 %v8718_v19, %v8873_v32  ;;  %v485_v19 = vsub.f32 %v8598_v1, %v8848_v18  ;;  %v487_v1 = vsub.f32 %v8642_v38, %v8848_v18  ;;  %v490_v38 = vsub.f32 %v7722_v0, %v8675_v8 }
  0xa7   :  { %v9106_v56 = vshrl.u32 %v621_v52, 7 }
  0xa8   :  { %7294 = vmatmul.mubr.msk.bf16.gmra.mrb[32].mxu1 %vm143_vm1, %v611_v50  ;;  %v617_v60 = vpack.c.bf16 %v548_v61, %v547_v48  ;;  %v586_v54 = vpack.c.bf16 %v486_v34, %v485_v19  ;;  %v619_v50 = vpack.c.bf16 %v552_v31, %v551_v62  ;;  %v587_v43 = vpack.c.bf16 %v488_v15, %v487_v1 }
  0xa9   :  { %7297 = vmatprep.mubr.msk.bf16.mxu1 %vm143_vm1, %v612_v35  ;;  %v588_v24 = vpack.c.bf16 %v490_v38, %v489_v25  ;;  %v491_v35 = vsub.f32 %v7723_v20, %v8675_v8  ;;  %v623_v59 = vsub.s32 0, %v9106_v56 }
  0xad   :  { %7230 = vmatmul.mubr.msk.bf16.gmra.mrb[44].mxu0 %vm143_vm1, %v579_v3  ;;  %v7724_v3 = vld [vmem:[%s11019_s0 + $0x218] sm:$0xff] }
  0xae   :  { %7233 = vmatprep.mubr.msk.bf16.mxu0 %vm143_vm1, %v580_v30  ;;  %v492_v45 = vsub.f32 %v7724_v3, %v8675_v8  ;;  %v7725_v30 = vld [vmem:[%s11019_s0 + $0x220] sm:$0xff] }
  0xaf   :  { %v493_v42 = vsub.f32 %v7725_v30, %v8675_v8 }
  0xb0   :  { %7298 = vmatmul.mubr.msk.bf16.gmra.mrb[36].mxu1 %vm143_vm1, %v613_v22  ;;  %v589_v10 = vpack.c.bf16 %v492_v45, %v491_v35  ;;  %v496_v22 = vsub.f32 %v7728_v39, %v8675_v8 }
  0xb1   :  { %7301 = vmatprep.mubr.msk.bf16.mxu1 %vm143_vm1, %v614_v5  ;;  %v590_v63 = vpack.c.bf16 %v494_v16, %v493_v42  ;;  %v7730_v5 = vld [vmem:[%s11019_s0 + $0x248] sm:$0xff] }
  0xb2   :  { %v591_v2 = vpack.c.bf16 %v496_v22, %v495_v6 }
  0xb5   :  { %7234 = vmatmul.mubr.msk.bf16.gmra.mrb[48].mxu0 %vm143_vm1, %v581_v12  ;;  %v498_v12 = vsub.f32 %v7730_v5, %v8675_v8 }
  0xb6   :  { %7237 = vmatprep.mubr.msk.bf16.mxu0 %vm143_vm1, %v582_v41  ;;  %v7732_v41 = vld [vmem:[%s11019_s0 + $0x258] sm:$0xff] }
  0xb7   :  { %v500_v23 = vsub.f32 %v7732_v41, %v8675_v8  ;;  %v592_v27 = vpack.c.bf16 %v498_v12, %v497_v28 }
  0xb8   :  { %7302 = vmatmul.mubr.msk.bf16.gmra.mrb[40].mxu1 %vm143_vm1, %v615_v57  ;;  %v9111_v57 = vunpack.c.l.bf16 %v553_v21 }
  0xb9   :  { %7305 = vmatprep.mubr.msk.bf16.mxu1 %vm143_vm1, %v616_v14  ;;  %v593_v53 = vpack.c.bf16 %v500_v23, %v499_v47 }
  0xba   :  { %v9115_v9 = vrot.slane %v9111_v57, %v623_v59 }
  0xbd   :  { %7238 = vmatmul.mubr.msk.bf16.gmra.mrb[52].mxu0 %vm143_vm1, %v583_v40 }
  0xbe   :  { %7241 = vmatprep.mubr.msk.bf16.mxu0 %vm143_vm1, %v584_v33 }
  0xc0   :  { %7306 = vmatmul.mubr.msk.bf16.gmra.mrb[44].mxu1 %vm143_vm1, %v617_v60 }
  0xc1   :  { %7309 = vmatprep.mubr.msk.bf16.mxu1 %vm143_vm1, %v618_v37 }
  0xc5   :  { %7242 = vmatmul.mubr.msk.bf16.gmra.mrb[56].mxu0 %vm143_vm1, %v585_v11 }
  0xc6   :  { %7245 = vmatprep.mubr.msk.bf16.mxu0 %vm143_vm1, %v586_v54 }
  0xc8   :  { %7310 = vmatmul.mubr.msk.bf16.gmra.mrb[48].mxu1 %vm143_vm1, %v619_v50 }
  0xc9   :  { %1694 = vmatprep.mubr.bf16.mxu1 %v11076_v13 }
  0xcd   :  { %7246 = vmatmul.mubr.msk.bf16.gmra.mrb[60].mxu0 %vm143_vm1, %v587_v43 }
  0xce   :  { %7249 = vmatprep.mubr.msk.bf16.mxu0 %vm143_vm1, %v588_v24 }
  0xd5   :  { %7250 = vmatmul.mubr.msk.bf16.gmra.mrb[64].mxu0 %vm143_vm1, %v589_v10 }
  0xd6   :  { %7253 = vmatprep.mubr.msk.bf16.mxu0 %vm143_vm1, %v590_v63 }
  0xdd   :  { %7254 = vmatmul.mubr.msk.bf16.gmra.mrb[68].mxu0 %vm143_vm1, %v591_v2 }
  0xde   :  { %7257 = vmatprep.mubr.msk.bf16.mxu0 %vm143_vm1, %v592_v27 }
  0xe5   :  { %7258 = vmatmul.mubr.msk.bf16.gmra.mrb[72].mxu0 %vm143_vm1, %v593_v53 }
 0x128   :  { %v7187_v36 = vpop.f32.mrb[0].mxu0 }
 0x129   :  { %v864_v14 = vadd.f32 %v7187_v36, %v9115_v9  ;;  %v855_v40 = vpop.f32.mrb[1].mxu0 }
 0x12a   :  { %v856_v48 = vadd.f32 %v855_v40, %v9115_v9  ;;  %v7188_v61 = vpop.f32.mrb[2].mxu0 }
 0x12b   :  { %v867_v33 = vadd.f32 %v7188_v61, %v9115_v9  ;;  %v858_v49 = vpop.f32.mrb[3].mxu0  ;;  %v1368_v7 = vmax.f32 %v864_v14, 0.0 }
 0x12c   :  { %v859_v46 = vadd.f32 %v858_v49, %v9115_v9  ;;  %v1366_v29 = vmax.f32 %v856_v48, 0.0 }
 0x12d   :  { %v1369_v58 = vmax.f32 %v867_v33, 0.0 }
 0x12e   :  { %v1367_v60 = vmax.f32 %v859_v46, 0.0 }
 0x12f   :  { %v1495_v19 = vpack.c.bf16 %v1369_v58, %v1368_v7 }
 0x130   :  { %v1494_v34 = vpack.c.bf16 %v1367_v60, %v1366_v29  ;;  %v7191_v37 = vpop.f32.mrb[4].mxu0 }
 0x131   :  { %v880_v11 = vadd.f32 %v7191_v37, %v9115_v9  ;;  %v871_v62 = vpop.f32.mrb[5].mxu0 }
 0x132   :  { %1695 = vmatmul.mubr.bf16.vlgmr.msra.gmra.mrb[52].mxu1 %v1494_v34  ;;  %v872_v31 = vadd.f32 %v871_v62, %v9115_v9  ;;  %v7192_v54 = vpop.f32.mrb[6].mxu0 }
 0x133   :  { %v1372_v1 = vmax.f32 %v880_v11, 0.0  ;;  %v883_v15 = vadd.f32 %v7192_v54, %v9115_v9  ;;  %v874_v50 = vpop.f32.mrb[7].mxu0  ;;  %1704 = vmatprep.mubr.bf16.mxu1 %v11076_v13 }
 0x134   :  { %v1370_v43 = vmax.f32 %v872_v31, 0.0  ;;  %v875_v44 = vadd.f32 %v874_v50, %v9115_v9 }
 0x135   :  { %v1373_v25 = vmax.f32 %v883_v15, 0.0 }
 0x136   :  { %v1371_v0 = vmax.f32 %v875_v44, 0.0 }
 0x137   :  { %v1497_v38 = vpack.c.bf16 %v1373_v25, %v1372_v1 }
 0x138   :  { %v1496_v24 = vpack.c.bf16 %v1371_v0, %v1370_v43  ;;  %v7195_v20 = vpop.f32.mrb[8].mxu0 }
 0x139   :  { %v896_v35 = vadd.f32 %v7195_v20, %v9115_v9  ;;  %v887_v3 = vpop.f32.mrb[9].mxu0 }
 0x13a   :  { %1705 = vmatmul.mubr.bf16.gmra.mrb[56].mxu1 %v1495_v19  ;;  %v888_v45 = vadd.f32 %v887_v3, %v9115_v9  ;;  %v7196_v10 = vpop.f32.mrb[10].mxu0 }
 0x13b   :  { %1714 = vmatprep.mubr.bf16.mxu1 %v11076_v13  ;;  %v1376_v30 = vmax.f32 %v896_v35, 0.0  ;;  %v899_v42 = vadd.f32 %v7196_v10, %v9115_v9  ;;  %v890_v26 = vpop.f32.mrb[11].mxu0  ;;  %v7263_v39 = vpop.f32.mrb[0].mxu1 }
 0x13c   :  { %v1374_v16 = vmax.f32 %v888_v45, 0.0  ;;  %v891_v51 = vadd.f32 %v890_v26, %v9115_v9  ;;  %v1168_v63 = vadd.f32 %v7263_v39, %v9115_v9  ;;  %v1159_v2 = vpop.f32.mrb[1].mxu1 }
 0x13d   :  { %v1377_v6 = vmax.f32 %v899_v42, 0.0  ;;  %v1160_v28 = vadd.f32 %v1159_v2, %v9115_v9  ;;  %v7264_v5 = vpop.f32.mrb[2].mxu1 }
 0x13e   :  { %v1375_v22 = vmax.f32 %v891_v51, 0.0  ;;  %v1444_v47 = vmax.f32 %v1168_v63, 0.0  ;;  %v1171_v41 = vadd.f32 %v7264_v5, %v9115_v9  ;;  %v1162_v23 = vpop.f32.mrb[3].mxu1 }
 0x13f   :  { %v9132_v4 = vpack.c.bf16 %v1377_v6, %v1376_v30  ;;  %v1442_v52 = vmax.f32 %v1160_v28, 0.0  ;;  %v1163_v21 = vadd.f32 %v1162_v23, %v9115_v9 }
 0x140   :  { %v9135_v12 = vpack.c.bf16 %v1375_v22, %v1374_v16  ;;  %v7199_v55 = vpop.f32.mrb[12].mxu0  ;;  %v1445_v14 = vmax.f32 %v1171_v41, 0.0 }
 0x141   :  { %v912_v27 = vadd.f32 %v7199_v55, %v9115_v9  ;;  %v903_v53 = vpop.f32.mrb[13].mxu0  ;;  %v1443_v33 = vmax.f32 %v1163_v21, 0.0 }
 0x142   :  { %1715 = vmatmul.mubr.bf16.gmra.mrb[60].mxu1 %v1496_v24  ;;  %v904_v59 = vadd.f32 %v903_v53, %v9115_v9  ;;  %v7200_v36 = vpop.f32.mrb[14].mxu0  ;;  %v9144_v7 = vpack.c.bf16 %v1445_v14, %v1444_v47 }
 0x143   :  { %1724 = vmatprep.mubr.bf16.mxu1 %v11076_v13  ;;  %v1380_v40 = vmax.f32 %v912_v27, 0.0  ;;  %v915_v48 = vadd.f32 %v7200_v36, %v9115_v9  ;;  %v906_v61 = vpop.f32.mrb[15].mxu0  ;;  %v7267_v29 = vpop.f32.mrb[4].mxu1  ;;  %v9146_v60 = vpack.c.bf16 %v1443_v33, %v1442_v52 }
 0x144   :  { %v1378_v49 = vmax.f32 %v904_v59, 0.0  ;;  %v907_v46 = vadd.f32 %v906_v61, %v9115_v9  ;;  %v1184_v34 = vadd.f32 %v7267_v29, %v9115_v9  ;;  %v1175_v37 = vpop.f32.mrb[5].mxu1 }
 0x145   :  { %v1381_v58 = vmax.f32 %v915_v48, 0.0  ;;  %v1176_v62 = vadd.f32 %v1175_v37, %v9115_v9  ;;  %v7268_v31 = vpop.f32.mrb[6].mxu1 }
 0x146   :  { %v1379_v19 = vmax.f32 %v907_v46, 0.0  ;;  %v1448_v15 = vmax.f32 %v1184_v34, 0.0  ;;  %v1187_v50 = vadd.f32 %v7268_v31, %v9115_v9  ;;  %v1178_v43 = vpop.f32.mrb[7].mxu1 }
 0x147   :  { %v9149_v11 = vpack.c.bf16 %v1381_v58, %v1380_v40  ;;  %v1446_v0 = vmax.f32 %v1176_v62, 0.0  ;;  %v1179_v24 = vadd.f32 %v1178_v43, %v9115_v9 }
 0x148   :  { %v9152_v54 = vpack.c.bf16 %v1379_v19, %v1378_v49  ;;  %v7203_v1 = vpop.f32.mrb[16].mxu0  ;;  %v1449_v3 = vmax.f32 %v1187_v50, 0.0 }
 0x149   :  { %v928_v44 = vadd.f32 %v7203_v1, %v9115_v9  ;;  %v919_v25 = vpop.f32.mrb[17].mxu0  ;;  %v1447_v42 = vmax.f32 %v1179_v24, 0.0 }
 0x14a   :  { %1725 = vmatmul.mubr.bf16.gmra.mrb[64].mxu1 %v1497_v38  ;;  %v920_v20 = vadd.f32 %v919_v25, %v9115_v9  ;;  %v7204_v35 = vpop.f32.mrb[18].mxu0  ;;  %v9161_v51 = vpack.c.bf16 %v1449_v3, %v1448_v15 }
 0x14b   :  { %1734 = vmatprep.mubr.bf16.mxu1 %v11076_v13  ;;  %v1384_v45 = vmax.f32 %v928_v44, 0.0  ;;  %v931_v10 = vadd.f32 %v7204_v35, %v9115_v9  ;;  %v922_v30 = vpop.f32.mrb[19].mxu0  ;;  %v7271_v39 = vpop.f32.mrb[8].mxu1  ;;  %v9163_v22 = vpack.c.bf16 %v1447_v42, %v1446_v0 }
 0x14c   :  { %v1382_v26 = vmax.f32 %v920_v20, 0.0  ;;  %v923_v16 = vadd.f32 %v922_v30, %v9115_v9  ;;  %v1200_v63 = vadd.f32 %v7271_v39, %v9115_v9  ;;  %v1191_v2 = vpop.f32.mrb[9].mxu1 }
 0x14d   :  { %v1385_v6 = vmax.f32 %v931_v10, 0.0  ;;  %v1192_v5 = vadd.f32 %v1191_v2, %v9115_v9  ;;  %v7272_v55 = vpop.f32.mrb[10].mxu1 }
 0x14e   :  { %v1383_v38 = vmax.f32 %v923_v16, 0.0  ;;  %v1452_v23 = vmax.f32 %v1200_v63, 0.0  ;;  %v1203_v27 = vadd.f32 %v7272_v55, %v9115_v9  ;;  %v1194_v53 = vpop.f32.mrb[11].mxu1 }
 0x14f   :  { %v9166_v28 = vpack.c.bf16 %v1385_v6, %v1384_v45  ;;  %v1450_v59 = vmax.f32 %v1192_v5, 0.0  ;;  %v1195_v36 = vadd.f32 %v1194_v53, %v9115_v9 }
 0x150   :  { %v9169_v47 = vpack.c.bf16 %v1383_v38, %v1382_v26  ;;  %v7207_v41 = vpop.f32.mrb[20].mxu0  ;;  %v1453_v48 = vmax.f32 %v1203_v27, 0.0 }
 0x151   :  { %v944_v52 = vadd.f32 %v7207_v41, %v9115_v9  ;;  %v935_v21 = vpop.f32.mrb[21].mxu0  ;;  %v1451_v46 = vmax.f32 %v1195_v36, 0.0 }
 0x152   :  { %1735 = vmatmul.mubr.bf16.gmra.mrb[68].mxu1 %v9135_v12  ;;  %v936_v14 = vadd.f32 %v935_v21, %v9115_v9  ;;  %v7208_v40 = vpop.f32.mrb[22].mxu0  ;;  %v9179_v19 = vpack.c.bf16 %v1453_v48, %v1452_v23 }
 0x153   :  { %1744 = vmatprep.mubr.bf16.mxu1 %v11076_v13  ;;  %v1388_v61 = vmax.f32 %v944_v52, 0.0  ;;  %v947_v33 = vadd.f32 %v7208_v40, %v9115_v9  ;;  %v938_v49 = vpop.f32.mrb[23].mxu0  ;;  %v7275_v37 = vpop.f32.mrb[12].mxu1  ;;  %v9181_v62 = vpack.c.bf16 %v1451_v46, %v1450_v59 }
 0x154   :  { %v1386_v58 = vmax.f32 %v936_v14, 0.0  ;;  %v939_v29 = vadd.f32 %v938_v49, %v9115_v9  ;;  %v1216_v31 = vadd.f32 %v7275_v37, %v9115_v9  ;;  %v1207_v1 = vpop.f32.mrb[13].mxu1 }
 0x155   :  { %v1389_v34 = vmax.f32 %v947_v33, 0.0  ;;  %v1208_v50 = vadd.f32 %v1207_v1, %v9115_v9  ;;  %v7276_v43 = vpop.f32.mrb[14].mxu1 }
 0x156   :  { %v1387_v12 = vmax.f32 %v939_v29, 0.0  ;;  %v1456_v0 = vmax.f32 %v1216_v31, 0.0  ;;  %v1219_v24 = vadd.f32 %v7276_v43, %v9115_v9  ;;  %v1210_v20 = vpop.f32.mrb[15].mxu1 }
 0x157   :  { %v9184_v15 = vpack.c.bf16 %v1389_v34, %v1388_v61  ;;  %v1454_v45 = vmax.f32 %v1208_v50, 0.0  ;;  %v1211_v10 = vadd.f32 %v1210_v20, %v9115_v9 }
 0x158   :  { %v9187_v44 = vpack.c.bf16 %v1387_v12, %v1386_v58  ;;  %v7211_v25 = vpop.f32.mrb[24].mxu0  ;;  %v1457_v26 = vmax.f32 %v1219_v24, 0.0 }
 0x159   :  { %v960_v35 = vadd.f32 %v7211_v25, %v9115_v9  ;;  %v951_v3 = vpop.f32.mrb[25].mxu0  ;;  %v1455_v38 = vmax.f32 %v1211_v10, 0.0 }
 0x15a   :  { %1745 = vmatmul.mubr.bf16.gmra.mrb[72].mxu1 %v9132_v4  ;;  %v952_v30 = vadd.f32 %v951_v3, %v9115_v9  ;;  %v7212_v42 = vpop.f32.mrb[26].mxu0  ;;  %v9197_v5 = vpack.c.bf16 %v1457_v26, %v1456_v0 }
 0x15b   :  { %1754 = vmatprep.mubr.bf16.mxu1 %v11076_v13  ;;  %v1392_v16 = vmax.f32 %v960_v35, 0.0  ;;  %v963_v6 = vadd.f32 %v7212_v42, %v9115_v9  ;;  %v954_v39 = vpop.f32.mrb[27].mxu0  ;;  %v7279_v41 = vpop.f32.mrb[16].mxu1  ;;  %v9199_v23 = vpack.c.bf16 %v1455_v38, %v1454_v45 }
 0x15c   :  { %v1390_v63 = vmax.f32 %v952_v30, 0.0  ;;  %v955_v2 = vadd.f32 %v954_v39, %v9115_v9  ;;  %v1232_v27 = vadd.f32 %v7279_v41, %v9115_v9  ;;  %v1223_v53 = vpop.f32.mrb[17].mxu1 }
 0x15d   :  { %v1393_v55 = vmax.f32 %v963_v6, 0.0  ;;  %v1224_v21 = vadd.f32 %v1223_v53, %v9115_v9  ;;  %v7280_v59 = vpop.f32.mrb[18].mxu1 }
 0x15e   :  { %v1391_v4 = vmax.f32 %v955_v2, 0.0  ;;  %v1460_v40 = vmax.f32 %v1232_v27, 0.0  ;;  %v1235_v48 = vadd.f32 %v7280_v59, %v9115_v9  ;;  %v1226_v61 = vpop.f32.mrb[19].mxu1 }
 0x15f   :  { %v9202_v52 = vpack.c.bf16 %v1393_v55, %v1392_v16  ;;  %v1458_v46 = vmax.f32 %v1224_v21, 0.0  ;;  %v1227_v58 = vadd.f32 %v1226_v61, %v9115_v9 }
 0x160   :  { %v9205_v36 = vpack.c.bf16 %v1391_v4, %v1390_v63  ;;  %v7215_v14 = vpop.f32.mrb[28].mxu0  ;;  %v1461_v37 = vmax.f32 %v1235_v48, 0.0 }
 0x161   :  { %v976_v33 = vadd.f32 %v7215_v14, %v9115_v9  ;;  %v967_v49 = vpop.f32.mrb[29].mxu0  ;;  %v1459_v50 = vmax.f32 %v1227_v58, 0.0 }
 0x162   :  { %1755 = vmatmul.mubr.bf16.gmra.mrb[76].mxu1 %v9152_v54  ;;  %v968_v29 = vadd.f32 %v967_v49, %v9115_v9  ;;  %v7216_v34 = vpop.f32.mrb[30].mxu0  ;;  %v9215_v0 = vpack.c.bf16 %v1461_v37, %v1460_v40 }
 0x163   :  { %1764 = vmatprep.mubr.bf16.mxu1 %v11076_v13  ;;  %v1396_v12 = vmax.f32 %v976_v33, 0.0  ;;  %v979_v31 = vadd.f32 %v7216_v34, %v9115_v9  ;;  %v970_v1 = vpop.f32.mrb[31].mxu0  ;;  %v7283_v20 = vpop.f32.mrb[20].mxu1  ;;  %v9217_v35 = vpack.c.bf16 %v1459_v50, %v1458_v46 }
 0x164   :  { %v1394_v43 = vmax.f32 %v968_v29, 0.0  ;;  %v971_v25 = vadd.f32 %v970_v1, %v9115_v9  ;;  %v1248_v3 = vadd.f32 %v7283_v20, %v9115_v9  ;;  %v1239_v45 = vpop.f32.mrb[21].mxu1 }
 0x165   :  { %v1397_v24 = vmax.f32 %v979_v31, 0.0  ;;  %v1240_v30 = vadd.f32 %v1239_v45, %v9115_v9  ;;  %v7284_v42 = vpop.f32.mrb[22].mxu1 }
 0x166   :  { %v1395_v54 = vmax.f32 %v971_v25, 0.0  ;;  %v1464_v6 = vmax.f32 %v1248_v3, 0.0  ;;  %v1251_v39 = vadd.f32 %v7284_v42, %v9115_v9  ;;  %v1242_v38 = vpop.f32.mrb[23].mxu1 }
 0x167   :  { %v9220_v10 = vpack.c.bf16 %v1397_v24, %v1396_v12  ;;  %v1462_v55 = vmax.f32 %v1240_v30, 0.0  ;;  %v1243_v41 = vadd.f32 %v1242_v38, %v9115_v9 }
 0x168   :  { %v9223_v26 = vpack.c.bf16 %v1395_v54, %v1394_v43  ;;  %v7219_v16 = vpop.f32.mrb[32].mxu0  ;;  %v1465_v53 = vmax.f32 %v1251_v39, 0.0 }
 0x169   :  { %v992_v63 = vadd.f32 %v7219_v16, %v9115_v9  ;;  %v983_v2 = vpop.f32.mrb[33].mxu0  ;;  %v1463_v40 = vmax.f32 %v1243_v41, 0.0 }
 0x16a   :  { %1765 = vmatmul.mubr.bf16.gmra.mrb[80].mxu1 %v9149_v11  ;;  %v984_v4 = vadd.f32 %v983_v2, %v9115_v9  ;;  %v7220_v27 = vpop.f32.mrb[34].mxu0  ;;  %v9233_v33 = vpack.c.bf16 %v1465_v53, %v1464_v6 }
 0x16b   :  { %1774 = vmatprep.mubr.bf16.mxu1 %v11076_v13  ;;  %v1400_v21 = vmax.f32 %v992_v63, 0.0  ;;  %v995_v59 = vadd.f32 %v7220_v27, %v9115_v9  ;;  %v986_v14 = vpop.f32.mrb[35].mxu0  ;;  %v7287_v46 = vpop.f32.mrb[24].mxu1  ;;  %v9235_v58 = vpack.c.bf16 %v1463_v40, %v1462_v55 }
 0x16c   :  { %v1398_v48 = vmax.f32 %v984_v4, 0.0  ;;  %v987_v61 = vadd.f32 %v986_v14, %v9115_v9  ;;  %v1264_v29 = vadd.f32 %v7287_v46, %v9115_v9  ;;  %v1255_v34 = vpop.f32.mrb[25].mxu1 }
 0x16d   :  { %v1401_v49 = vmax.f32 %v995_v59, 0.0  ;;  %v1256_v12 = vadd.f32 %v1255_v34, %v9115_v9  ;;  %v7288_v31 = vpop.f32.mrb[26].mxu1 }
 0x16e   :  { %v1399_v11 = vmax.f32 %v987_v61, 0.0  ;;  %v1468_v43 = vmax.f32 %v1264_v29, 0.0  ;;  %v1267_v25 = vadd.f32 %v7288_v31, %v9115_v9  ;;  %v1258_v24 = vpop.f32.mrb[27].mxu1 }
 0x16f   :  { %v9238_v37 = vpack.c.bf16 %v1401_v49, %v1400_v21  ;;  %v1466_v3 = vmax.f32 %v1256_v12, 0.0  ;;  %v1259_v45 = vadd.f32 %v1258_v24, %v9115_v9 }
 0x170   :  { %v9241_v1 = vpack.c.bf16 %v1399_v11, %v1398_v48  ;;  %v7223_v50 = vpop.f32.mrb[36].mxu0  ;;  %v1469_v16 = vmax.f32 %v1267_v25, 0.0 }
 0x171   :  { %v1008_v20 = vadd.f32 %v7223_v50, %v9115_v9  ;;  %v999_v54 = vpop.f32.mrb[37].mxu0  ;;  %v1467_v63 = vmax.f32 %v1259_v45, 0.0 }
 0x172   :  { %1775 = vmatmul.mubr.bf16.gmra.mrb[84].mxu1 %v9169_v47  ;;  %v1000_v30 = vadd.f32 %v999_v54, %v9115_v9  ;;  %v7224_v42 = vpop.f32.mrb[38].mxu0  ;;  %v9251_v41 = vpack.c.bf16 %v1469_v16, %v1468_v43 }
 0x173   :  { %1784 = vmatprep.mubr.bf16.mxu1 %v11076_v13  ;;  %v1404_v6 = vmax.f32 %v1008_v20, 0.0  ;;  %v1011_v39 = vadd.f32 %v7224_v42, %v9115_v9  ;;  %v1002_v38 = vpop.f32.mrb[39].mxu0  ;;  %v7291_v27 = vpop.f32.mrb[28].mxu1  ;;  %v9253_v53 = vpack.c.bf16 %v1467_v63, %v1466_v3 }
 0x174   :  { %v1402_v2 = vmax.f32 %v1000_v30, 0.0  ;;  %v1003_v55 = vadd.f32 %v1002_v38, %v9115_v9  ;;  %v1280_v21 = vadd.f32 %v7291_v27, %v9115_v9  ;;  %v1271_v59 = vpop.f32.mrb[29].mxu1 }
 0x175   :  { %v1405_v4 = vmax.f32 %v1011_v39, 0.0  ;;  %v1272_v40 = vadd.f32 %v1271_v59, %v9115_v9  ;;  %v7292_v48 = vpop.f32.mrb[30].mxu1 }
 0x176   :  { %v1403_v47 = vmax.f32 %v1003_v55, 0.0  ;;  %v1472_v46 = vmax.f32 %v1280_v21, 0.0  ;;  %v1283_v11 = vadd.f32 %v7292_v48, %v9115_v9  ;;  %v1274_v29 = vpop.f32.mrb[31].mxu1 }
 0x177   :  { %v9256_v14 = vpack.c.bf16 %v1405_v4, %v1404_v6  ;;  %v1470_v31 = vmax.f32 %v1272_v40, 0.0  ;;  %v1275_v50 = vadd.f32 %v1274_v29, %v9115_v9 }
 0x178   :  { %v9259_v61 = vpack.c.bf16 %v1403_v47, %v1402_v2  ;;  %v7227_v49 = vpop.f32.mrb[40].mxu0  ;;  %v1473_v24 = vmax.f32 %v1283_v11, 0.0 }
 0x179   :  { %v1024_v34 = vadd.f32 %v7227_v49, %v9115_v9  ;;  %v1015_v12 = vpop.f32.mrb[41].mxu0  ;;  %v1471_v45 = vmax.f32 %v1275_v50, 0.0 }
 0x17a   :  { %1785 = vmatmul.mubr.bf16.gmra.mrb[88].mxu1 %v9166_v28  ;;  %v1016_v43 = vadd.f32 %v1015_v12, %v9115_v9  ;;  %v7228_v25 = vpop.f32.mrb[42].mxu0  ;;  %v9269_v16 = vpack.c.bf16 %v1473_v24, %v1472_v46 }
 0x17b   :  { %1794 = vmatprep.mubr.bf16.mxu1 %v11076_v13  ;;  %v1408_v20 = vmax.f32 %v1024_v34, 0.0  ;;  %v1027_v54 = vadd.f32 %v7228_v25, %v9115_v9  ;;  %v1018_v3 = vpop.f32.mrb[43].mxu0  ;;  %v9271_v39 = vpack.c.bf16 %v1471_v45, %v1470_v31  ;;  %v7295_v28 = vpop.f32.mrb[32].mxu1 }
 0x17c   :  { %v1406_v30 = vmax.f32 %v1016_v43, 0.0  ;;  %v1019_v42 = vadd.f32 %v1018_v3, %v9115_v9  ;;  %v1296_v63 = vadd.f32 %v7295_v28, %v9115_v9  ;;  %v1287_v2 = vpop.f32.mrb[33].mxu1 }
 0x17d   :  { %v1409_v6 = vmax.f32 %v1027_v54, 0.0  ;;  %v1288_v4 = vadd.f32 %v1287_v2, %v9115_v9  ;;  %v7296_v27 = vpop.f32.mrb[34].mxu1 }
 0x17e   :  { %v1407_v38 = vmax.f32 %v1019_v42, 0.0  ;;  %v1476_v59 = vmax.f32 %v1296_v63, 0.0  ;;  %v1299_v40 = vadd.f32 %v7296_v27, %v9115_v9  ;;  %v1290_v48 = vpop.f32.mrb[35].mxu1 }
 0x17f   :  { %v9274_v55 = vpack.c.bf16 %v1409_v6, %v1408_v20  ;;  %v1474_v11 = vmax.f32 %v1288_v4, 0.0  ;;  %v1291_v29 = vadd.f32 %v1290_v48, %v9115_v9 }
 0x180   :  { %v9277_v47 = vpack.c.bf16 %v1407_v38, %v1406_v30  ;;  %v7231_v21 = vpop.f32.mrb[44].mxu0  ;;  %v1477_v31 = vmax.f32 %v1299_v40, 0.0 }
 0x181   :  { %v1040_v49 = vadd.f32 %v7231_v21, %v9115_v9  ;;  %v1031_v46 = vpop.f32.mrb[45].mxu0  ;;  %v1475_v24 = vmax.f32 %v1291_v29, 0.0 }
 0x182   :  { %1795 = vmatmul.mubr.bf16.gmra.mrb[92].mxu1 %v9187_v44  ;;  %v1032_v34 = vadd.f32 %v1031_v46, %v9115_v9  ;;  %v7232_v12 = vpop.f32.mrb[46].mxu0  ;;  %v9287_v3 = vpack.c.bf16 %v1477_v31, %v1476_v59  ;;  %v7650_v44 = vld [vmem:[%s11020_s1 + $0x90] ss:$8 sps:$4 sm:$0xff]  }
 0x183   :  { %1804 = vmatprep.mubr.bf16.mxu1 %v11076_v13  ;;  %v1412_v50 = vmax.f32 %v1040_v49, 0.0  ;;  %v1043_v43 = vadd.f32 %v7232_v12, %v9115_v9  ;;  %v1034_v25 = vpop.f32.mrb[47].mxu0  ;;  %v9292_v30 = vpack.c.bf16 %v1475_v24, %v1474_v11  ;;  %v7299_v42 = vpop.f32.mrb[36].mxu1  ;;  %7313 = vmatprep.subr.bf16.mxu0 %v7650_v44  ;;  %v7651_v49 = vld [vmem:[%s11020_s1 + $0xa0] ss:$8 sps:$4 sm:$0xff]  }
 0x184   :  { %v1410_v20 = vmax.f32 %v1032_v34, 0.0  ;;  %v1035_v54 = vadd.f32 %v1034_v25, %v9115_v9  ;;  %v1312_v28 = vadd.f32 %v7299_v42, %v9115_v9  ;;  %v1303_v38 = vpop.f32.mrb[37].mxu1  ;;  %7314 = vmatpush3.bf16.msra.mxu0 %v7650_v44 }
 0x185   :  { %v1413_v45 = vmax.f32 %v1043_v43, 0.0  ;;  %v1304_v63 = vadd.f32 %v1303_v38, %v9115_v9  ;;  %v7300_v2 = vpop.f32.mrb[38].mxu1  ;;  %7315 = vmatprep.subr.bf16.mxu0 %v7651_v49 }
 0x186   :  { %v1411_v6 = vmax.f32 %v1035_v54, 0.0  ;;  %v1480_v27 = vmax.f32 %v1312_v28, 0.0  ;;  %v1315_v59 = vadd.f32 %v7300_v2, %v9115_v9  ;;  %v1306_v48 = vpop.f32.mrb[39].mxu1 }
 0x187   :  { %v9296_v4 = vpack.c.bf16 %v1413_v45, %v1412_v50  ;;  %v1478_v46 = vmax.f32 %v1304_v63, 0.0  ;;  %v1307_v29 = vadd.f32 %v1306_v48, %v9115_v9 }
 0x188   :  { %v9298_v21 = vpack.c.bf16 %v1411_v6, %v1410_v20  ;;  %v7235_v40 = vpop.f32.mrb[48].mxu0  ;;  %v1481_v12 = vmax.f32 %v1315_v59, 0.0  ;;  %7316 = vmatpush3.bf16.msra.mxu0 %v7651_v49 }
 0x189   :  { %v1056_v11 = vadd.f32 %v7235_v40, %v9115_v9  ;;  %v1047_v34 = vpop.f32.mrb[49].mxu0  ;;  %v1479_v25 = vmax.f32 %v1307_v29, 0.0 }
 0x18a   :  { %1805 = vmatmul.mubr.bf16.gmra.mrb[96].mxu1 %v9184_v15  ;;  %v1048_v31 = vadd.f32 %v1047_v34, %v9115_v9  ;;  %v7236_v50 = vpop.f32.mrb[50].mxu0  ;;  %v9310_v54 = vpack.c.bf16 %v1481_v12, %v1480_v27  ;;  %v7652_v15 = vld [vmem:[%s11020_s1 + $0xb0] ss:$8 sps:$4 sm:$0xff]   ;;  %v7653_v34 = vld [vmem:[%s11020_s1 + $0xc0] ss:$8 sps:$4 sm:$0xff]  }
 0x18b   :  { %1814 = vmatprep.mubr.bf16.mxu1 %v11076_v13  ;;  %v1416_v43 = vmax.f32 %v1056_v11, 0.0  ;;  %v1059_v24 = vadd.f32 %v7236_v50, %v9115_v9  ;;  %v1050_v20 = vpop.f32.mrb[51].mxu0  ;;  %v9316_v42 = vpack.c.bf16 %v1479_v25, %v1478_v46  ;;  %v7303_v28 = vpop.f32.mrb[40].mxu1  ;;  %7317 = vmatprep.subr.bf16.mxu0 %v7652_v15 }
 0x18c   :  { %v1414_v44 = vmax.f32 %v1048_v31, 0.0  ;;  %v1051_v45 = vadd.f32 %v1050_v20, %v9115_v9  ;;  %v1328_v63 = vadd.f32 %v7303_v28, %v9115_v9  ;;  %v1319_v2 = vpop.f32.mrb[41].mxu1  ;;  %7318 = vmatpush3.bf16.msra.mxu0 %v7652_v15 }
 0x18d   :  { %v1417_v6 = vmax.f32 %v1059_v24, 0.0  ;;  %v1320_v59 = vadd.f32 %v1319_v2, %v9115_v9  ;;  %v7304_v27 = vpop.f32.mrb[42].mxu1  ;;  %7319 = vmatprep.subr.bf16.mxu0 %v7653_v34 }
 0x18e   :  { %v1415_v38 = vmax.f32 %v1051_v45, 0.0  ;;  %v1484_v48 = vmax.f32 %v1328_v63, 0.0  ;;  %v1331_v49 = vadd.f32 %v7304_v27, %v9115_v9  ;;  %v1322_v11 = vpop.f32.mrb[43].mxu1 }
 0x18f   :  { %v9320_v40 = vpack.c.bf16 %v1417_v6, %v1416_v43  ;;  %v1482_v12 = vmax.f32 %v1320_v59, 0.0  ;;  %v1323_v31 = vadd.f32 %v1322_v11, %v9115_v9 }
 0x190   :  { %v9323_v29 = vpack.c.bf16 %v1415_v38, %v1414_v44  ;;  %v7239_v46 = vpop.f32.mrb[52].mxu0  ;;  %v1485_v43 = vmax.f32 %v1331_v49, 0.0  ;;  %7320 = vmatpush3.bf16.msra.mxu0 %v7653_v34 }
 0x191   :  { %v1072_v50 = vadd.f32 %v7239_v46, %v9115_v9  ;;  %v1063_v25 = vpop.f32.mrb[53].mxu0  ;;  %v1483_v44 = vmax.f32 %v1323_v31, 0.0 }
 0x192   :  { %1815 = vmatmul.mubr.bf16.gmra.mrb[100].mxu1 %v9205_v36  ;;  %v1064_v24 = vadd.f32 %v1063_v25, %v9115_v9  ;;  %v7240_v20 = vpop.f32.mrb[54].mxu0  ;;  %v9334_v28 = vpack.c.bf16 %v1485_v43, %v1484_v48 }
 0x193   :  { %1824 = vmatprep.mubr.bf16.mxu1 %v11076_v13  ;;  %v1420_v45 = vmax.f32 %v1072_v50, 0.0  ;;  %v1075_v15 = vadd.f32 %v7240_v20, %v9115_v9  ;;  %v1066_v6 = vpop.f32.mrb[55].mxu0  ;;  %v9337_v2 = vpack.c.bf16 %v1483_v44, %v1482_v12  ;;  %v7307_v36 = vpop.f32.mrb[44].mxu1 }
 0x194   :  { %v1418_v38 = vmax.f32 %v1064_v24, 0.0  ;;  %v1067_v63 = vadd.f32 %v1066_v6, %v9115_v9  ;;  %v1344_v27 = vadd.f32 %v7307_v36, %v9115_v9  ;;  %v1335_v49 = vpop.f32.mrb[45].mxu1 }
 0x195   :  { %v1421_v59 = vmax.f32 %v1075_v15, 0.0  ;;  %v1336_v46 = vadd.f32 %v1335_v49, %v9115_v9  ;;  %v7308_v31 = vpop.f32.mrb[46].mxu1 }
 0x196   :  { %v1419_v11 = vmax.f32 %v1067_v63, 0.0  ;;  %v1488_v25 = vmax.f32 %v1344_v27, 0.0  ;;  %v1347_v48 = vadd.f32 %v7308_v31, %v9115_v9  ;;  %v1338_v34 = vpop.f32.mrb[47].mxu1 }
 0x197   :  { %v9341_v50 = vpack.c.bf16 %v1421_v59, %v1420_v45  ;;  %v1486_v12 = vmax.f32 %v1336_v46, 0.0  ;;  %v1339_v20 = vadd.f32 %v1338_v34, %v9115_v9 }
 0x198   :  { %v9344_v43 = vpack.c.bf16 %v1419_v11, %v1418_v38  ;;  %v7243_v24 = vpop.f32.mrb[56].mxu0  ;;  %v1489_v6 = vmax.f32 %v1347_v48, 0.0 }
 0x199   :  { %v1088_v44 = vadd.f32 %v7243_v24, %v9115_v9  ;;  %v1079_v15 = vpop.f32.mrb[57].mxu0  ;;  %v1487_v36 = vmax.f32 %v1339_v20, 0.0 }
 0x19a   :  { %1825 = vmatmul.mubr.bf16.gmra.mrb[104].mxu1 %v9202_v52  ;;  %v1080_v63 = vadd.f32 %v1079_v15, %v9115_v9  ;;  %v7244_v45 = vpop.f32.mrb[58].mxu0  ;;  %v9352_v49 = vpack.c.bf16 %v1489_v6, %v1488_v25 }
 0x19b   :  { %1834 = vmatprep.mubr.bf16.mxu1 %v11076_v13  ;;  %v1424_v59 = vmax.f32 %v1088_v44, 0.0  ;;  %v1091_v38 = vadd.f32 %v7244_v45, %v9115_v9  ;;  %v1082_v27 = vpop.f32.mrb[59].mxu0  ;;  %v9355_v31 = vpack.c.bf16 %v1487_v36, %v1486_v12  ;;  %v7311_v34 = vpop.f32.mrb[48].mxu1 }
 0x19c   :  { %v1422_v11 = vmax.f32 %v1080_v63, 0.0  ;;  %v1083_v46 = vadd.f32 %v1082_v27, %v9115_v9  ;;  %v1360_v48 = vadd.f32 %v7311_v34, %v9115_v9  ;;  %v1351_v24 = vpop.f32.mrb[49].mxu1 }
 0x19d   :  { %v1425_v52 = vmax.f32 %v1091_v38, 0.0  ;;  %v1352_v13 = vadd.f32 %v1351_v24, %v9115_v9  ;;  %v7312_v20 = vpop.f32.mrb[50].mxu1 }
 0x19e   :  { %v1423_v15 = vmax.f32 %v1083_v46, 0.0  ;;  %v1492_v45 = vmax.f32 %v1360_v48, 0.0  ;;  %v1363_v25 = vadd.f32 %v7312_v20, %v9115_v9  ;;  %v1354_v6 = vpop.f32.mrb[51].mxu1 }
 0x19f   :  { %v9359_v44 = vpack.c.bf16 %v1425_v52, %v1424_v59  ;;  %v1490_v12 = vmax.f32 %v1352_v13, 0.0  ;;  %v1355_v36 = vadd.f32 %v1354_v6, %v9115_v9  ;;  %v11191_v52 = vmov 0  }
 0x1a0   :  { %v9362_v63 = vpack.c.bf16 %v1423_v15, %v1422_v11  ;;  %v7247_v27 = vpop.f32.mrb[60].mxu0  ;;  %v1493_v46 = vmax.f32 %v1363_v25, 0.0 }
 0x1a1   :  { %v1104_v38 = vadd.f32 %v7247_v27, %v9115_v9  ;;  %v1095_v34 = vpop.f32.mrb[61].mxu0  ;;  %v1491_v48 = vmax.f32 %v1355_v36, 0.0 }
 0x1a2   :  { %1835 = vmatmul.mubr.bf16.gmra.mrb[108].mxu1 %v9223_v26  ;;  %v1096_v24 = vadd.f32 %v1095_v34, %v9115_v9  ;;  %v7248_v59 = vpop.f32.mrb[62].mxu0  ;;  %v9370_v32 = vpack.c.bf16 %v1493_v46, %v1492_v45 }
 0x1a3   :  { %1844 = vmatprep.mubr.bf16.mxu1 %v11191_v52  ;;  %v1428_v20 = vmax.f32 %v1104_v38, 0.0  ;;  %v1107_v11 = vadd.f32 %v7248_v59, %v9115_v9  ;;  %v1098_v15 = vpop.f32.mrb[63].mxu0  ;;  %v9373_v27 = vpack.c.bf16 %v1491_v48, %v1490_v12 }
 0x1a4   :  { %v1426_v13 = vmax.f32 %v1096_v24, 0.0  ;;  %v1099_v6 = vadd.f32 %v1098_v15, %v9115_v9 }
 0x1a5   :  { %v1429_v8 = vmax.f32 %v1107_v11, 0.0 }
 0x1a6   :  { %v1427_v26 = vmax.f32 %v1099_v6, 0.0 }
 0x1a7   :  { %v9375_v25 = vpack.c.bf16 %v1429_v8, %v1428_v20 }
 0x1a8   :  { %v9377_v34 = vpack.c.bf16 %v1427_v26, %v1426_v13  ;;  %v7251_v18 = vpop.f32.mrb[64].mxu0 }
 0x1a9   :  { %v1120_v36 = vadd.f32 %v7251_v18, %v9115_v9  ;;  %v1111_v38 = vpop.f32.mrb[65].mxu0 }
 0x1aa   :  { %1845 = vmatmul.mubr.bf16.gmra.mrb[112].mxu1 %v9220_v10  ;;  %v1112_v45 = vadd.f32 %v1111_v38, %v9115_v9  ;;  %v7252_v46 = vpop.f32.mrb[66].mxu0 }
 0x1ab   :  { %1854 = vmatprep.mubr.bf16.mxu1 %v11191_v52  ;;  %v1432_v24 = vmax.f32 %v1120_v36, 0.0  ;;  %v1123_v12 = vadd.f32 %v7252_v46, %v9115_v9  ;;  %v1114_v59 = vpop.f32.mrb[67].mxu0 }
 0x1ac   :  { %v1430_v48 = vmax.f32 %v1112_v45, 0.0  ;;  %v1115_v8 = vadd.f32 %v1114_v59, %v9115_v9 }
 0x1ad   :  { %v1433_v20 = vmax.f32 %v1123_v12, 0.0 }
 0x1ae   :  { %v1431_v11 = vmax.f32 %v1115_v8, 0.0 }
 0x1af   :  { %v9385_v15 = vpack.c.bf16 %v1433_v20, %v1432_v24 }
 0x1b0   :  { %v9387_v18 = vpack.c.bf16 %v1431_v11, %v1430_v48  ;;  %v7255_v10 = vpop.f32.mrb[68].mxu0 }
 0x1b1   :  { %v1136_v13 = vadd.f32 %v7255_v10, %v9115_v9  ;;  %v1127_v6 = vpop.f32.mrb[69].mxu0 }
 0x1b2   :  { %1855 = vmatmul.mubr.bf16.gmra.mrb[116].mxu1 %v9241_v1  ;;  %v7256_v26 = vpop.f32.mrb[70].mxu0  ;;  %v1128_v36 = vadd.f32 %v1127_v6, %v9115_v9 }
 0x1b3   :  { %1864 = vmatprep.mubr.bf16.mxu1 %v11191_v52  ;;  %v1130_v38 = vpop.f32.mrb[71].mxu0  ;;  %v1436_v45 = vmax.f32 %v1136_v13, 0.0  ;;  %v1139_v46 = vadd.f32 %v7256_v26, %v9115_v9 }
 0x1b4   :  { %v1131_v24 = vadd.f32 %v1130_v38, %v9115_v9  ;;  %v1434_v12 = vmax.f32 %v1128_v36, 0.0 }
 0x1b5   :  { %v1437_v1 = vmax.f32 %v1139_v46, 0.0 }
 0x1b6   :  { %v1435_v59 = vmax.f32 %v1131_v24, 0.0 }
 0x1b7   :  { %v9399_v8 = vpack.c.bf16 %v1437_v1, %v1436_v45 }
 0x1b8   :  { %v9397_v48 = vpack.c.bf16 %v1435_v59, %v1434_v12  ;;  %v7259_v20 = vpop.f32.mrb[72].mxu0 }
 0x1b9   :  { %v1152_v11 = vadd.f32 %v7259_v20, %v9115_v9  ;;  %v1143_v10 = vpop.f32.mrb[73].mxu0 }
 0x1ba   :  { %1865 = vmatmul.mubr.bf16.gmra.mrb[120].mxu1 %v9238_v37  ;;  %v7260_v13 = vpop.f32.mrb[74].mxu0  ;;  %v1144_v37 = vadd.f32 %v1143_v10, %v9115_v9 }
 0x1bb   :  { %1874 = vmatprep.mubr.bf16.mxu1 %v11191_v52  ;;  %v1146_v6 = vpop.f32.mrb[75].mxu0  ;;  %v1440_v26 = vmax.f32 %v1152_v11, 0.0  ;;  %v1155_v36 = vadd.f32 %v7260_v13, %v9115_v9 }
 0x1bc   :  { %v1147_v38 = vadd.f32 %v1146_v6, %v9115_v9  ;;  %v1438_v45 = vmax.f32 %v1144_v37, 0.0  ;;  %v1576_v9 = vsub.s32 1, %v9106_v56 }
 0x1be   :  { %v1439_v46 = vmax.f32 %v1147_v38, 0.0 }
 0x1c0   :  { %v9409_v24 = vpack.c.bf16 %v1439_v46, %v1438_v45 }
 0x1c2   :  { %1875 = vmatmul.mubr.bf16.gmra.mrb[124].mxu1 %v9259_v61  ;;  %v1441_v61 = vmax.f32 %v1155_v36, 0.0 }
 0x1c3   :  { %1884 = vmatprep.mubr.bf16.mxu1 %v11191_v52 }
 0x1c4   :  { %v9411_v12 = vpack.c.bf16 %v1441_v61, %v1440_v26 }
 0x1ca   :  { %1885 = vmatmul.mubr.bf16.gmra.mrb[128].mxu1 %v9256_v14  ;;  %v9429_v14 = vld [vmem:[%s11020_s1 + $0x8] sm:$0xff] }
 0x1cb   :  { %1894 = vmatprep.mubr.bf16.mxu1 %v11191_v52 }
 0x1d2   :  { %1895 = vmatmul.mubr.bf16.gmra.mrb[132].mxu1 %v9277_v47  ;;  %v9434_v47 = vrot.slane %v9111_v57, %v1576_v9 }
 0x1d3   :  { %1904 = vmatprep.mubr.bf16.mxu1 %v11191_v52 }
 0x1da   :  { %1905 = vmatmul.mubr.bf16.gmra.mrb[136].mxu1 %v9274_v55  ;;  %v11081_v55 = vunpack.c.h.bf16 %v9429_v14 }
 0x1db   :  { %1914 = vmatprep.mubr.bf16.mxu1 %v11191_v52 }
 0x1e2   :  { %1915 = vmatmul.mubr.bf16.gmra.mrb[140].mxu1 %v9298_v21 }
 0x1e3   :  { %1924 = vmatprep.mubr.bf16.mxu1 %v11191_v52 }
 0x1ea   :  { %1925 = vmatmul.mubr.bf16.gmra.mrb[144].mxu1 %v9296_v4  ;;  %v9438_v4 = vrot.slane %v11081_v55, %v1576_v9 }
 0x1eb   :  { %1934 = vmatprep.mubr.bf16.mxu1 %v11191_v52 }
 0x1f2   :  { %1935 = vmatmul.mubr.bf16.gmra.mrb[148].mxu1 %v9323_v29 }
 0x1f3   :  { %1944 = vmatprep.mubr.bf16.mxu1 %v11191_v52 }
 0x1fa   :  { %1945 = vmatmul.mubr.bf16.gmra.mrb[152].mxu1 %v9320_v40 }
 0x1fb   :  { %1954 = vmatprep.mubr.bf16.mxu1 %v11191_v52 }
 0x202   :  { %1955 = vmatmul.mubr.bf16.gmra.mrb[156].mxu1 %v9344_v43 }
 0x203   :  { %1964 = vmatprep.mubr.bf16.mxu1 %v11191_v52 }
 0x205   :  { %v1696_v21 = vpop.f32.mrb[52].mxu1 }
 0x206   :  { %v1697_v40 = vadd.f32 %v1696_v21, %v9434_v47  ;;  %v1698_v29 = vpop.f32.mrb[53].mxu1 }
 0x207   :  { %v1699_v1 = vadd.f32 %v1698_v29, %v9438_v4  ;;  %v1700_v59 = vpop.f32.mrb[54].mxu1 }
 0x208   :  { %v1701_v20 = vadd.f32 %v1700_v59, %v9434_v47  ;;  %v1702_v11 = vpop.f32.mrb[55].mxu1  ;;  %v2335_v10 = vmax.f32 %v1697_v40, 0.0 }
 0x209   :  { %v1703_v43 = vadd.f32 %v1702_v11, %v9438_v4  ;;  %v2336_v37 = vmax.f32 %v1699_v1, 0.0 }
 0x20a   :  { %v2337_v13 = vmax.f32 %v1701_v20, 0.0  ;;  %1965 = vmatmul.mubr.bf16.gmra.mrb[160].mxu1 %v9341_v50 }
 0x20b   :  { %v2338_v6 = vmax.f32 %v1703_v43, 0.0  ;;  %1974 = vmatprep.mubr.bf16.mxu1 %v11191_v52 }
 0x20c   :  { %v2739_v26 = vpack.c.bf16 %v2337_v13, %v2335_v10 }
 0x20d   :  { %v2591_v36 = vmax.f32 %v2336_v37, %v2338_v6  ;;  %v1706_v38 = vpop.f32.mrb[56].mxu1 }
 0x20e   :  { %v1707_v45 = vadd.f32 %v1706_v38, %v9434_v47  ;;  %v1708_v61 = vpop.f32.mrb[57].mxu1  ;;  %7321 = vmatprep.mubr.msk.bf16.mxu0 %vm2839_vm2, %v2739_v26 }
 0x20f   :  { %v1709_v46 = vadd.f32 %v1708_v61, %v9438_v4  ;;  %v1710_v9 = vpop.f32.mrb[58].mxu1 }
 0x210   :  { %v1711_v21 = vadd.f32 %v1710_v9, %v9434_v47  ;;  %v1712_v40 = vpop.f32.mrb[59].mxu1  ;;  %v2339_v1 = vmax.f32 %v1707_v45, 0.0 }
 0x211   :  { %v2340_v50 = vmax.f32 %v1709_v46, 0.0  ;;  %v1713_v29 = vadd.f32 %v1712_v40, %v9438_v4 }
 0x212   :  { %v2341_v59 = vmax.f32 %v1711_v21, 0.0  ;;  %1975 = vmatmul.mubr.bf16.gmra.mrb[164].mxu1 %v9362_v63 }
 0x213   :  { %v2592_v20 = vmax.f32 %v2591_v36, %v2340_v50  ;;  %v2342_v11 = vmax.f32 %v1713_v29, 0.0  ;;  %1984 = vmatprep.mubr.bf16.mxu1 %v11191_v52 }
 0x214   :  { %v2740_v43 = vpack.c.bf16 %v2341_v59, %v2339_v1 }
 0x215   :  { %v2593_v10 = vmax.f32 %v2592_v20, %v2342_v11  ;;  %v1716_v13 = vpop.f32.mrb[60].mxu1 }
 0x216   :  { %v1717_v37 = vadd.f32 %v1716_v13, %v9434_v47  ;;  %v1718_v6 = vpop.f32.mrb[61].mxu1  ;;  %7322 = vmatmul.mubr.msk.bf16.vlgmr.msra.gmra.mrb[76].mxu0 %vm2839_vm2, %v2740_v43 }
 0x217   :  { %v1719_v26 = vadd.f32 %v1718_v6, %v9438_v4  ;;  %v1720_v38 = vpop.f32.mrb[62].mxu1 }
 0x218   :  { %v1721_v45 = vadd.f32 %v1720_v38, %v9434_v47  ;;  %v1722_v61 = vpop.f32.mrb[63].mxu1  ;;  %v2343_v36 = vmax.f32 %v1717_v37, 0.0 }
 0x219   :  { %v2344_v46 = vmax.f32 %v1719_v26, 0.0  ;;  %v1723_v63 = vadd.f32 %v1722_v61, %v9438_v4 }
 0x21a   :  { %v2345_v9 = vmax.f32 %v1721_v45, 0.0  ;;  %1985 = vmatmul.mubr.bf16.gmra.mrb[168].mxu1 %v9359_v44 }
 0x21b   :  { %v2594_v21 = vmax.f32 %v2593_v10, %v2344_v46  ;;  %v2346_v40 = vmax.f32 %v1723_v63, 0.0  ;;  %1994 = vmatprep.mubr.bf16.mxu1 %v11191_v52 }
 0x21c   :  { %v2741_v50 = vpack.c.bf16 %v2345_v9, %v2343_v36 }
 0x21d   :  { %v2595_v29 = vmax.f32 %v2594_v21, %v2346_v40  ;;  %v1726_v1 = vpop.f32.mrb[64].mxu1 }
 0x21e   :  { %v1727_v59 = vadd.f32 %v1726_v1, %v9434_v47  ;;  %v1728_v20 = vpop.f32.mrb[65].mxu1  ;;  %7325 = vmatprep.mubr.msk.bf16.mxu0 %vm2839_vm2, %v2741_v50 }
 0x21f   :  { %v1729_v11 = vadd.f32 %v1728_v20, %v9438_v4  ;;  %v1730_v43 = vpop.f32.mrb[66].mxu1 }
 0x220   :  { %v1731_v13 = vadd.f32 %v1730_v43, %v9434_v47  ;;  %v1732_v37 = vpop.f32.mrb[67].mxu1  ;;  %v2347_v10 = vmax.f32 %v1727_v59, 0.0 }
 0x221   :  { %v2348_v6 = vmax.f32 %v1729_v11, 0.0  ;;  %v1733_v44 = vadd.f32 %v1732_v37, %v9438_v4 }
 0x222   :  { %v2349_v26 = vmax.f32 %v1731_v13, 0.0  ;;  %1995 = vmatmul.mubr.bf16.gmra.mrb[172].mxu1 %v9377_v34 }
 0x223   :  { %v2596_v38 = vmax.f32 %v2595_v29, %v2348_v6  ;;  %v2350_v45 = vmax.f32 %v1733_v44, 0.0  ;;  %2004 = vmatprep.mubr.bf16.mxu1 %v11191_v52 }
 0x224   :  { %v2742_v61 = vpack.c.bf16 %v2349_v26, %v2347_v10 }
 0x225   :  { %v2597_v46 = vmax.f32 %v2596_v38, %v2350_v45  ;;  %v1736_v63 = vpop.f32.mrb[68].mxu1 }
 0x226   :  { %v1737_v36 = vadd.f32 %v1736_v63, %v9434_v47  ;;  %v1738_v9 = vpop.f32.mrb[69].mxu1  ;;  %7326 = vmatmul.mubr.msk.bf16.gmra.mrb[80].mxu0 %vm2839_vm2, %v2742_v61 }
 0x227   :  { %v1739_v21 = vadd.f32 %v1738_v9, %v9438_v4  ;;  %v1740_v40 = vpop.f32.mrb[70].mxu1 }
 0x228   :  { %v1741_v50 = vadd.f32 %v1740_v40, %v9434_v47  ;;  %v1742_v1 = vpop.f32.mrb[71].mxu1  ;;  %v2351_v29 = vmax.f32 %v1737_v36, 0.0 }
 0x229   :  { %v2352_v59 = vmax.f32 %v1739_v21, 0.0  ;;  %v1743_v34 = vadd.f32 %v1742_v1, %v9438_v4 }
 0x22a   :  { %v2353_v20 = vmax.f32 %v1741_v50, 0.0  ;;  %2005 = vmatmul.mubr.bf16.gmra.mrb[176].mxu1 %v9375_v25 }
 0x22b   :  { %v2598_v11 = vmax.f32 %v2597_v46, %v2352_v59  ;;  %v2354_v43 = vmax.f32 %v1743_v34, 0.0  ;;  %2014 = vmatprep.mubr.bf16.mxu1 %v11191_v52 }
 0x22c   :  { %v2743_v13 = vpack.c.bf16 %v2353_v20, %v2351_v29 }
 0x22d   :  { %v2599_v37 = vmax.f32 %v2598_v11, %v2354_v43  ;;  %v1746_v6 = vpop.f32.mrb[72].mxu1 }
 0x22e   :  { %v1747_v44 = vadd.f32 %v1746_v6, %v9434_v47  ;;  %v1748_v10 = vpop.f32.mrb[73].mxu1  ;;  %7329 = vmatprep.mubr.msk.bf16.mxu0 %vm2839_vm2, %v2743_v13 }
 0x22f   :  { %v1749_v26 = vadd.f32 %v1748_v10, %v9438_v4  ;;  %v1750_v38 = vpop.f32.mrb[74].mxu1 }
 0x230   :  { %v1751_v45 = vadd.f32 %v1750_v38, %v9434_v47  ;;  %v1752_v61 = vpop.f32.mrb[75].mxu1  ;;  %v2355_v46 = vmax.f32 %v1747_v44, 0.0 }
 0x231   :  { %v2356_v63 = vmax.f32 %v1749_v26, 0.0  ;;  %v1753_v25 = vadd.f32 %v1752_v61, %v9438_v4 }
 0x232   :  { %v2357_v36 = vmax.f32 %v1751_v45, 0.0  ;;  %2015 = vmatmul.mubr.bf16.gmra.mrb[180].mxu1 %v9387_v18 }
 0x233   :  { %v2600_v9 = vmax.f32 %v2599_v37, %v2356_v63  ;;  %v2358_v21 = vmax.f32 %v1753_v25, 0.0  ;;  %2024 = vmatprep.mubr.bf16.mxu1 %v11191_v52 }
 0x234   :  { %v2744_v40 = vpack.c.bf16 %v2357_v36, %v2355_v46 }
 0x235   :  { %v2601_v50 = vmax.f32 %v2600_v9, %v2358_v21  ;;  %v1756_v1 = vpop.f32.mrb[76].mxu1 }
 0x236   :  { %v1757_v59 = vadd.f32 %v1756_v1, %v9434_v47  ;;  %v1758_v34 = vpop.f32.mrb[77].mxu1  ;;  %7330 = vmatmul.mubr.msk.bf16.gmra.mrb[84].mxu0 %vm2839_vm2, %v2744_v40 }
 0x237   :  { %v1759_v29 = vadd.f32 %v1758_v34, %v9438_v4  ;;  %v1760_v20 = vpop.f32.mrb[78].mxu1 }
 0x238   :  { %v1761_v11 = vadd.f32 %v1760_v20, %v9434_v47  ;;  %v1762_v43 = vpop.f32.mrb[79].mxu1  ;;  %v2359_v37 = vmax.f32 %v1757_v59, 0.0 }
 0x239   :  { %v2360_v13 = vmax.f32 %v1759_v29, 0.0  ;;  %v1763_v18 = vadd.f32 %v1762_v43, %v9438_v4 }
 0x23a   :  { %v2361_v6 = vmax.f32 %v1761_v11, 0.0  ;;  %2025 = vmatmul.mubr.bf16.gmra.mrb[184].mxu1 %v9385_v15 }
 0x23b   :  { %v2602_v44 = vmax.f32 %v2601_v50, %v2360_v13  ;;  %v2362_v10 = vmax.f32 %v1763_v18, 0.0  ;;  %2034 = vmatprep.mubr.bf16.mxu1 %v11191_v52 }
 0x23c   :  { %v2745_v26 = vpack.c.bf16 %v2361_v6, %v2359_v37 }
 0x23d   :  { %v2603_v38 = vmax.f32 %v2602_v44, %v2362_v10  ;;  %v1766_v45 = vpop.f32.mrb[80].mxu1 }
 0x23e   :  { %v1767_v61 = vadd.f32 %v1766_v45, %v9434_v47  ;;  %v1768_v63 = vpop.f32.mrb[81].mxu1  ;;  %7333 = vmatprep.mubr.msk.bf16.mxu0 %vm2839_vm2, %v2745_v26 }
 0x23f   :  { %v1769_v25 = vadd.f32 %v1768_v63, %v9438_v4  ;;  %v1770_v46 = vpop.f32.mrb[82].mxu1 }
 0x240   :  { %v1771_v36 = vadd.f32 %v1770_v46, %v9434_v47  ;;  %v1772_v9 = vpop.f32.mrb[83].mxu1  ;;  %v2363_v40 = vmax.f32 %v1767_v61, 0.0 }
 0x241   :  { %v2364_v21 = vmax.f32 %v1769_v25, 0.0  ;;  %v1773_v15 = vadd.f32 %v1772_v9, %v9438_v4 }
 0x242   :  { %v2365_v50 = vmax.f32 %v1771_v36, 0.0  ;;  %2035 = vmatmul.mubr.bf16.gmra.mrb[188].mxu1 %v9397_v48 }
 0x243   :  { %v2604_v1 = vmax.f32 %v2603_v38, %v2364_v21  ;;  %v2366_v59 = vmax.f32 %v1773_v15, 0.0  ;;  %2044 = vmatprep.mubr.bf16.mxu1 %v11191_v52 }
 0x244   :  { %v2746_v34 = vpack.c.bf16 %v2365_v50, %v2363_v40 }
 0x245   :  { %v2605_v29 = vmax.f32 %v2604_v1, %v2366_v59  ;;  %v1776_v20 = vpop.f32.mrb[84].mxu1 }
 0x246   :  { %v1777_v11 = vadd.f32 %v1776_v20, %v9434_v47  ;;  %v1778_v43 = vpop.f32.mrb[85].mxu1  ;;  %7334 = vmatmul.mubr.msk.bf16.gmra.mrb[88].mxu0 %vm2839_vm2, %v2746_v34 }
 0x247   :  { %v1779_v13 = vadd.f32 %v1778_v43, %v9438_v4  ;;  %v1780_v18 = vpop.f32.mrb[86].mxu1 }
 0x248   :  { %v1781_v37 = vadd.f32 %v1780_v18, %v9434_v47  ;;  %v1782_v6 = vpop.f32.mrb[87].mxu1  ;;  %v2367_v10 = vmax.f32 %v1777_v11, 0.0 }
 0x249   :  { %v2368_v44 = vmax.f32 %v1779_v13, 0.0  ;;  %v1783_v48 = vadd.f32 %v1782_v6, %v9438_v4 }
 0x24a   :  { %v2369_v26 = vmax.f32 %v1781_v37, 0.0  ;;  %2045 = vmatmul.mubr.bf16.gmra.mrb[192].mxu1 %v9399_v8 }
 0x24b   :  { %v2606_v38 = vmax.f32 %v2605_v29, %v2368_v44  ;;  %v2370_v45 = vmax.f32 %v1783_v48, 0.0  ;;  %2054 = vmatprep.mubr.bf16.mxu1 %v11191_v52 }
 0x24c   :  { %v2747_v61 = vpack.c.bf16 %v2369_v26, %v2367_v10 }
 0x24d   :  { %v2607_v63 = vmax.f32 %v2606_v38, %v2370_v45  ;;  %v1786_v25 = vpop.f32.mrb[88].mxu1 }
 0x24e   :  { %v1787_v46 = vadd.f32 %v1786_v25, %v9434_v47  ;;  %v1788_v36 = vpop.f32.mrb[89].mxu1  ;;  %7337 = vmatprep.mubr.msk.bf16.mxu0 %vm2839_vm2, %v2747_v61 }
 0x24f   :  { %v1789_v9 = vadd.f32 %v1788_v36, %v9438_v4  ;;  %v1790_v21 = vpop.f32.mrb[90].mxu1 }
 0x250   :  { %v1791_v15 = vadd.f32 %v1790_v21, %v9434_v47  ;;  %v1792_v40 = vpop.f32.mrb[91].mxu1  ;;  %v2371_v1 = vmax.f32 %v1787_v46, 0.0 }
 0x251   :  { %v2372_v50 = vmax.f32 %v1789_v9, 0.0  ;;  %v1793_v8 = vadd.f32 %v1792_v40, %v9438_v4 }
 0x252   :  { %v2373_v59 = vmax.f32 %v1791_v15, 0.0  ;;  %2055 = vmatmul.mubr.bf16.gmra.mrb[196].mxu1 %v9409_v24 }
 0x253   :  { %v2608_v34 = vmax.f32 %v2607_v63, %v2372_v50  ;;  %v2374_v29 = vmax.f32 %v1793_v8, 0.0  ;;  %2064 = vmatprep.mubr.bf16.mxu1 %v11191_v52 }
 0x254   :  { %v2748_v20 = vpack.c.bf16 %v2373_v59, %v2371_v1 }
 0x255   :  { %v2609_v11 = vmax.f32 %v2608_v34, %v2374_v29  ;;  %v1796_v43 = vpop.f32.mrb[92].mxu1 }
 0x256   :  { %v1797_v13 = vadd.f32 %v1796_v43, %v9434_v47  ;;  %v1798_v18 = vpop.f32.mrb[93].mxu1  ;;  %7338 = vmatmul.mubr.msk.bf16.gmra.mrb[92].mxu0 %vm2839_vm2, %v2748_v20 }
 0x257   :  { %v1799_v37 = vadd.f32 %v1798_v18, %v9438_v4  ;;  %v1800_v6 = vpop.f32.mrb[94].mxu1 }
 0x258   :  { %v1801_v44 = vadd.f32 %v1800_v6, %v9434_v47  ;;  %v1802_v48 = vpop.f32.mrb[95].mxu1  ;;  %v2375_v26 = vmax.f32 %v1797_v13, 0.0 }
 0x259   :  { %v2376_v10 = vmax.f32 %v1799_v37, 0.0  ;;  %v1803_v24 = vadd.f32 %v1802_v48, %v9438_v4 }
 0x25a   :  { %v2377_v38 = vmax.f32 %v1801_v44, 0.0  ;;  %2065 = vmatmul.mubr.bf16.gmra.mrb[200].mxu1 %v9411_v12 }
 0x25b   :  { %v2610_v45 = vmax.f32 %v2609_v11, %v2376_v10  ;;  %v2378_v61 = vmax.f32 %v1803_v24, 0.0  ;;  %2074 = vmatprep.mubr.bf16.mxu1 %v11191_v52 }
 0x25c   :  { %v2749_v63 = vpack.c.bf16 %v2377_v38, %v2375_v26 }
 0x25d   :  { %v2611_v25 = vmax.f32 %v2610_v45, %v2378_v61  ;;  %v1806_v46 = vpop.f32.mrb[96].mxu1 }
 0x25e   :  { %v1807_v36 = vadd.f32 %v1806_v46, %v9434_v47  ;;  %v1808_v9 = vpop.f32.mrb[97].mxu1  ;;  %7341 = vmatprep.mubr.msk.bf16.mxu0 %vm2839_vm2, %v2749_v63 }
 0x25f   :  { %v1809_v21 = vadd.f32 %v1808_v9, %v9438_v4  ;;  %v1810_v15 = vpop.f32.mrb[98].mxu1 }
 0x260   :  { %v1811_v40 = vadd.f32 %v1810_v15, %v9434_v47  ;;  %v1812_v50 = vpop.f32.mrb[99].mxu1  ;;  %v2379_v1 = vmax.f32 %v1807_v36, 0.0 }
 0x261   :  { %v2380_v8 = vmax.f32 %v1809_v21, 0.0  ;;  %v1813_v12 = vadd.f32 %v1812_v50, %v9438_v4 }
 0x262   :  { %v2381_v59 = vmax.f32 %v1811_v40, 0.0  ;;  %2075 = vmatmul.mubr.bf16.gmra.mrb[204].mxu1 %v9146_v60 }
 0x263   :  { %v2612_v34 = vmax.f32 %v2611_v25, %v2380_v8  ;;  %v2382_v29 = vmax.f32 %v1813_v12, 0.0  ;;  %2084 = vmatprep.mubr.bf16.mxu1 %v11191_v52 }
 0x264   :  { %v2750_v20 = vpack.c.bf16 %v2381_v59, %v2379_v1 }
 0x265   :  { %v2613_v11 = vmax.f32 %v2612_v34, %v2382_v29  ;;  %v1816_v43 = vpop.f32.mrb[100].mxu1 }
 0x266   :  { %v1817_v13 = vadd.f32 %v1816_v43, %v9434_v47  ;;  %v1818_v18 = vpop.f32.mrb[101].mxu1  ;;  %7342 = vmatmul.mubr.msk.bf16.gmra.mrb[96].mxu0 %vm2839_vm2, %v2750_v20 }
 0x267   :  { %v1819_v37 = vadd.f32 %v1818_v18, %v9438_v4  ;;  %v1820_v6 = vpop.f32.mrb[102].mxu1 }
 0x268   :  { %v1821_v44 = vadd.f32 %v1820_v6, %v9434_v47  ;;  %v1822_v48 = vpop.f32.mrb[103].mxu1  ;;  %v2383_v24 = vmax.f32 %v1817_v13, 0.0 }
 0x269   :  { %v2384_v10 = vmax.f32 %v1819_v37, 0.0  ;;  %v1823_v60 = vadd.f32 %v1822_v48, %v9438_v4 }
 0x26a   :  { %v2385_v26 = vmax.f32 %v1821_v44, 0.0  ;;  %2085 = vmatmul.mubr.bf16.gmra.mrb[208].mxu1 %v9144_v7 }
 0x26b   :  { %v2614_v38 = vmax.f32 %v2613_v11, %v2384_v10  ;;  %v2386_v45 = vmax.f32 %v1823_v60, 0.0  ;;  %2094 = vmatprep.mubr.bf16.mxu1 %v11191_v52 }
 0x26c   :  { %v2751_v61 = vpack.c.bf16 %v2385_v26, %v2383_v24 }
 0x26d   :  { %v2615_v63 = vmax.f32 %v2614_v38, %v2386_v45  ;;  %v1826_v25 = vpop.f32.mrb[104].mxu1 }
 0x26e   :  { %v1827_v46 = vadd.f32 %v1826_v25, %v9434_v47  ;;  %v1828_v36 = vpop.f32.mrb[105].mxu1  ;;  %7345 = vmatprep.mubr.msk.bf16.mxu0 %vm2839_vm2, %v2751_v61 }
 0x26f   :  { %v1829_v9 = vadd.f32 %v1828_v36, %v9438_v4  ;;  %v1830_v21 = vpop.f32.mrb[106].mxu1 }
 0x270   :  { %v1831_v15 = vadd.f32 %v1830_v21, %v9434_v47  ;;  %v1832_v40 = vpop.f32.mrb[107].mxu1  ;;  %v2387_v8 = vmax.f32 %v1827_v46, 0.0 }
 0x271   :  { %v2388_v50 = vmax.f32 %v1829_v9, 0.0  ;;  %v1833_v7 = vadd.f32 %v1832_v40, %v9438_v4 }
 0x272   :  { %v2389_v12 = vmax.f32 %v1831_v15, 0.0  ;;  %2095 = vmatmul.mubr.bf16.gmra.mrb[212].mxu1 %v9163_v22 }
 0x273   :  { %v2616_v1 = vmax.f32 %v2615_v63, %v2388_v50  ;;  %v2390_v59 = vmax.f32 %v1833_v7, 0.0  ;;  %2104 = vmatprep.mubr.bf16.mxu1 %v11191_v52 }
 0x274   :  { %v2752_v34 = vpack.c.bf16 %v2389_v12, %v2387_v8 }
 0x275   :  { %v2617_v29 = vmax.f32 %v2616_v1, %v2390_v59  ;;  %v1836_v20 = vpop.f32.mrb[108].mxu1 }
 0x276   :  { %v1837_v11 = vadd.f32 %v1836_v20, %v9434_v47  ;;  %v1838_v43 = vpop.f32.mrb[109].mxu1  ;;  %7346 = vmatmul.mubr.msk.bf16.gmra.mrb[100].mxu0 %vm2839_vm2, %v2752_v34 }
 0x277   :  { %v1839_v13 = vadd.f32 %v1838_v43, %v9438_v4  ;;  %v1840_v18 = vpop.f32.mrb[110].mxu1 }
 0x278   :  { %v1841_v37 = vadd.f32 %v1840_v18, %v9434_v47  ;;  %v1842_v6 = vpop.f32.mrb[111].mxu1  ;;  %v2391_v48 = vmax.f32 %v1837_v11, 0.0 }
 0x279   :  { %v2392_v44 = vmax.f32 %v1839_v13, 0.0  ;;  %v1843_v22 = vadd.f32 %v1842_v6, %v9438_v4 }
 0x27a   :  { %v2393_v10 = vmax.f32 %v1841_v37, 0.0  ;;  %2105 = vmatmul.mubr.bf16.gmra.mrb[216].mxu1 %v9161_v51 }
 0x27b   :  { %v2618_v60 = vmax.f32 %v2617_v29, %v2392_v44  ;;  %v2394_v24 = vmax.f32 %v1843_v22, 0.0  ;;  %2114 = vmatprep.mubr.bf16.mxu1 %v11191_v52 }
 0x27c   :  { %v2753_v26 = vpack.c.bf16 %v2393_v10, %v2391_v48 }
 0x27d   :  { %v2619_v38 = vmax.f32 %v2618_v60, %v2394_v24  ;;  %v1846_v45 = vpop.f32.mrb[112].mxu1 }
 0x27e   :  { %v1847_v61 = vadd.f32 %v1846_v45, %v9434_v47  ;;  %v1848_v63 = vpop.f32.mrb[113].mxu1  ;;  %7349 = vmatprep.mubr.msk.bf16.mxu0 %vm2839_vm2, %v2753_v26 }
 0x27f   :  { %v1849_v25 = vadd.f32 %v1848_v63, %v9438_v4  ;;  %v1850_v46 = vpop.f32.mrb[114].mxu1 }
 0x280   :  { %v1851_v36 = vadd.f32 %v1850_v46, %v9434_v47  ;;  %v1852_v9 = vpop.f32.mrb[115].mxu1  ;;  %v2395_v15 = vmax.f32 %v1847_v61, 0.0  ;;  %v7656_v61 = vld [vmem:[%s11020_s1 + $0xd4] ss:$8 sps:$4 sm:$0xff]  }
 0x281   :  { %v2396_v21 = vmax.f32 %v1849_v25, 0.0  ;;  %v1853_v51 = vadd.f32 %v1852_v9, %v9438_v4  ;;  %3865 = vmatprep.subr.bf16.mxu0 %v7656_v61 }
 0x282   :  { %v2397_v40 = vmax.f32 %v1851_v36, 0.0  ;;  %2115 = vmatmul.mubr.bf16.gmra.mrb[220].mxu1 %v9181_v62 }
 0x283   :  { %v2620_v50 = vmax.f32 %v2619_v38, %v2396_v21  ;;  %v2398_v7 = vmax.f32 %v1853_v51, 0.0  ;;  %2124 = vmatprep.mubr.bf16.mxu1 %v11191_v52 }
 0x284   :  { %v2754_v8 = vpack.c.bf16 %v2397_v40, %v2395_v15 }
 0x285   :  { %v9552_v12 = vmax.f32 %v2620_v50, %v2398_v7  ;;  %v1856_v1 = vpop.f32.mrb[116].mxu1 }
 0x286   :  { %v1857_v59 = vadd.f32 %v1856_v1, %v9434_v47  ;;  %v1858_v34 = vpop.f32.mrb[117].mxu1  ;;  %7350 = vmatmul.mubr.msk.bf16.gmra.mrb[104].mxu0 %vm2839_vm2, %v2754_v8 }
 0x287   :  { %v1859_v29 = vadd.f32 %v1858_v34, %v9438_v4  ;;  %v1860_v20 = vpop.f32.mrb[118].mxu1 }
 0x288   :  { %v1861_v11 = vadd.f32 %v1860_v20, %v9434_v47  ;;  %v1862_v43 = vpop.f32.mrb[119].mxu1  ;;  %v2399_v13 = vmax.f32 %v1857_v59, 0.0 }
 0x289   :  { %v1863_v62 = vadd.f32 %v1862_v43, %v9438_v4  ;;  %v2400_v37 = vmax.f32 %v1859_v29, 0.0 }
 0x28a   :  { %v2401_v18 = vmax.f32 %v1861_v11, 0.0  ;;  %2125 = vmatmul.mubr.bf16.gmra.mrb[224].mxu1 %v9179_v19  ;;  %v7654_v19 = vld [vmem:[%s11020_s1 + $0xd0] ss:$8 sps:$4 sm:$0xff]  }
 0x28b   :  { %v2402_v6 = vmax.f32 %v1863_v62, 0.0  ;;  %2134 = vmatprep.mubr.bf16.mxu1 %v11191_v52  ;;  %3866 = vmatpush1.bf16.msra.mxu0 %v7654_v19 }
 0x28c   :  { %v2755_v44 = vpack.c.bf16 %v2401_v18, %v2399_v13 }
 0x28d   :  { %v2628_v22 = vmax.f32 %v2400_v37, %v2402_v6  ;;  %v1866_v48 = vpop.f32.mrb[120].mxu1 }
 0x28e   :  { %v1867_v10 = vadd.f32 %v1866_v48, %v9434_v47  ;;  %v1868_v60 = vpop.f32.mrb[121].mxu1  ;;  %7353 = vmatprep.mubr.msk.bf16.mxu0 %vm2839_vm2, %v2755_v44 }
 0x28f   :  { %v1869_v24 = vadd.f32 %v1868_v60, %v9438_v4  ;;  %v1870_v26 = vpop.f32.mrb[122].mxu1 }
 0x290   :  { %v1871_v38 = vadd.f32 %v1870_v26, %v9434_v47  ;;  %v1872_v45 = vpop.f32.mrb[123].mxu1  ;;  %v2403_v46 = vmax.f32 %v1867_v10, 0.0 }
 0x291   :  { %v2404_v63 = vmax.f32 %v1869_v24, 0.0  ;;  %v1873_v25 = vadd.f32 %v1872_v45, %v9438_v4 }
 0x292   :  { %v2405_v36 = vmax.f32 %v1871_v38, 0.0  ;;  %2135 = vmatmul.mubr.bf16.gmra.mrb[228].mxu1 %v9199_v23 }
 0x293   :  { %v2629_v9 = vmax.f32 %v2628_v22, %v2404_v63  ;;  %v2406_v21 = vmax.f32 %v1873_v25, 0.0  ;;  %2144 = vmatprep.mubr.bf16.mxu1 %v11191_v52 }
 0x294   :  { %v2756_v51 = vpack.c.bf16 %v2405_v36, %v2403_v46 }
 0x295   :  { %v2630_v15 = vmax.f32 %v2629_v9, %v2406_v21  ;;  %v1876_v40 = vpop.f32.mrb[124].mxu1 }
 0x296   :  { %v1877_v50 = vadd.f32 %v1876_v40, %v9434_v47  ;;  %v1878_v7 = vpop.f32.mrb[125].mxu1  ;;  %7354 = vmatmul.mubr.msk.bf16.gmra.mrb[108].mxu0 %vm2839_vm2, %v2756_v51 }
 0x297   :  { %v1879_v8 = vadd.f32 %v1878_v7, %v9438_v4  ;;  %v1880_v1 = vpop.f32.mrb[126].mxu1 }
 0x298   :  { %v1881_v59 = vadd.f32 %v1880_v1, %v9434_v47  ;;  %v1882_v23 = vpop.f32.mrb[127].mxu1  ;;  %v2407_v20 = vmax.f32 %v1877_v50, 0.0 }
 0x299   :  { %v2408_v34 = vmax.f32 %v1879_v8, 0.0  ;;  %v1883_v29 = vadd.f32 %v1882_v23, %v9438_v4 }
 0x29a   :  { %v2409_v11 = vmax.f32 %v1881_v59, 0.0  ;;  %2145 = vmatmul.mubr.bf16.gmra.mrb[232].mxu1 %v9197_v5 }
 0x29b   :  { %v2631_v43 = vmax.f32 %v2630_v15, %v2408_v34  ;;  %v2410_v62 = vmax.f32 %v1883_v29, 0.0  ;;  %2154 = vmatprep.mubr.bf16.mxu1 %v11191_v52 }
 0x29c   :  { %v2757_v13 = vpack.c.bf16 %v2409_v11, %v2407_v20 }
 0x29d   :  { %v2632_v18 = vmax.f32 %v2631_v43, %v2410_v62  ;;  %v1886_v37 = vpop.f32.mrb[128].mxu1 }
 0x29e   :  { %v1887_v6 = vadd.f32 %v1886_v37, %v9434_v47  ;;  %v1888_v44 = vpop.f32.mrb[129].mxu1  ;;  %7357 = vmatprep.mubr.msk.bf16.mxu0 %vm2839_vm2, %v2757_v13 }
 0x29f   :  { %v1889_v22 = vadd.f32 %v1888_v44, %v9438_v4  ;;  %v1890_v48 = vpop.f32.mrb[130].mxu1 }
 0x2a0   :  { %v1891_v10 = vadd.f32 %v1890_v48, %v9434_v47  ;;  %v1892_v60 = vpop.f32.mrb[131].mxu1  ;;  %v2411_v26 = vmax.f32 %v1887_v6, 0.0 }
 0x2a1   :  { %v2412_v24 = vmax.f32 %v1889_v22, 0.0  ;;  %v1893_v5 = vadd.f32 %v1892_v60, %v9438_v4 }
 0x2a2   :  { %v2413_v38 = vmax.f32 %v1891_v10, 0.0  ;;  %2155 = vmatmul.mubr.bf16.gmra.mrb[236].mxu1 %v9217_v35 }
 0x2a3   :  { %v2633_v45 = vmax.f32 %v2632_v18, %v2412_v24  ;;  %v2414_v19 = vmax.f32 %v1893_v5, 0.0  ;;  %2164 = vmatprep.mubr.bf16.mxu1 %v11191_v52  ;;  %v7659_v18 = vld [vmem:[%s11020_s1 + $0xe4] ss:$8 sps:$4 sm:$0xff]  }
 0x2a4   :  { %v2758_v61 = vpack.c.bf16 %v2413_v38, %v2411_v26  ;;  %3867 = vmatprep.subr.bf16.mxu0 %v7659_v18 }
 0x2a5   :  { %v2634_v63 = vmax.f32 %v2633_v45, %v2414_v19  ;;  %v1896_v25 = vpop.f32.mrb[132].mxu1 }
 0x2a6   :  { %v1897_v46 = vadd.f32 %v1896_v25, %v9434_v47  ;;  %v1898_v36 = vpop.f32.mrb[133].mxu1  ;;  %7358 = vmatmul.mubr.msk.bf16.gmra.mrb[112].mxu0 %vm2839_vm2, %v2758_v61 }
 0x2a7   :  { %v1899_v9 = vadd.f32 %v1898_v36, %v9438_v4  ;;  %v1900_v21 = vpop.f32.mrb[134].mxu1 }
 0x2a8   :  { %v1901_v51 = vadd.f32 %v1900_v21, %v9434_v47  ;;  %v1902_v15 = vpop.f32.mrb[135].mxu1  ;;  %v2415_v50 = vmax.f32 %v1897_v46, 0.0 }
 0x2a9   :  { %v2416_v40 = vmax.f32 %v1899_v9, 0.0  ;;  %v1903_v35 = vadd.f32 %v1902_v15, %v9438_v4 }
 0x2aa   :  { %v2417_v7 = vmax.f32 %v1901_v51, 0.0  ;;  %2165 = vmatmul.mubr.bf16.gmra.mrb[240].mxu1 %v9215_v0  ;;  %v7657_v0 = vld [vmem:[%s11020_s1 + $0xe0] ss:$8 sps:$4 sm:$0xff]  }
 0x2ab   :  { %v2635_v8 = vmax.f32 %v2634_v63, %v2416_v40  ;;  %v2418_v1 = vmax.f32 %v1903_v35, 0.0  ;;  %2174 = vmatprep.mubr.bf16.mxu1 %v11191_v52  ;;  %3868 = vmatpush1.bf16.msra.mxu0 %v7657_v0 }
 0x2ac   :  { %v2759_v59 = vpack.c.bf16 %v2417_v7, %v2415_v50 }
 0x2ad   :  { %v2636_v23 = vmax.f32 %v2635_v8, %v2418_v1  ;;  %v1906_v34 = vpop.f32.mrb[136].mxu1 }
 0x2ae   :  { %v1907_v29 = vadd.f32 %v1906_v34, %v9434_v47  ;;  %v1908_v20 = vpop.f32.mrb[137].mxu1  ;;  %7361 = vmatprep.mubr.msk.bf16.mxu0 %vm2839_vm2, %v2759_v59 }
 0x2af   :  { %v1909_v11 = vadd.f32 %v1908_v20, %v9438_v4  ;;  %v1910_v43 = vpop.f32.mrb[138].mxu1 }
 0x2b0   :  { %v1911_v62 = vadd.f32 %v1910_v43, %v9434_v47  ;;  %v1912_v13 = vpop.f32.mrb[139].mxu1  ;;  %v2419_v44 = vmax.f32 %v1907_v29, 0.0 }
 0x2b1   :  { %v2420_v37 = vmax.f32 %v1909_v11, 0.0  ;;  %v1913_v6 = vadd.f32 %v1912_v13, %v9438_v4 }
 0x2b2   :  { %v2421_v22 = vmax.f32 %v1911_v62, 0.0  ;;  %2175 = vmatmul.mubr.bf16.gmra.mrb[244].mxu1 %v9235_v58 }
 0x2b3   :  { %v2637_v48 = vmax.f32 %v2636_v23, %v2420_v37  ;;  %v2422_v10 = vmax.f32 %v1913_v6, 0.0  ;;  %2184 = vmatprep.mubr.bf16.mxu1 %v11191_v52 }
 0x2b4   :  { %v2760_v60 = vpack.c.bf16 %v2421_v22, %v2419_v44 }
 0x2b5   :  { %v2638_v24 = vmax.f32 %v2637_v48, %v2422_v10  ;;  %v1916_v5 = vpop.f32.mrb[140].mxu1 }
 0x2b6   :  { %v1917_v26 = vadd.f32 %v1916_v5, %v9434_v47  ;;  %v1918_v38 = vpop.f32.mrb[141].mxu1  ;;  %7362 = vmatmul.mubr.msk.bf16.gmra.mrb[116].mxu0 %vm2839_vm2, %v2760_v60 }
 0x2b7   :  { %v1919_v45 = vadd.f32 %v1918_v38, %v9438_v4  ;;  %v1920_v19 = vpop.f32.mrb[142].mxu1 }
 0x2b8   :  { %v1921_v61 = vadd.f32 %v1920_v19, %v9434_v47  ;;  %v1922_v58 = vpop.f32.mrb[143].mxu1  ;;  %v2423_v46 = vmax.f32 %v1917_v26, 0.0 }
 0x2b9   :  { %v2424_v63 = vmax.f32 %v1919_v45, 0.0  ;;  %v1923_v25 = vadd.f32 %v1922_v58, %v9438_v4 }
 0x2ba   :  { %v2425_v36 = vmax.f32 %v1921_v61, 0.0  ;;  %2185 = vmatmul.mubr.bf16.gmra.mrb[248].mxu1 %v9233_v33 }
 0x2bb   :  { %v2639_v9 = vmax.f32 %v2638_v24, %v2424_v63  ;;  %v2426_v21 = vmax.f32 %v1923_v25, 0.0  ;;  %2194 = vmatprep.mubr.bf16.mxu1 %v11191_v52 }
 0x2bc   :  { %v2761_v51 = vpack.c.bf16 %v2425_v36, %v2423_v46  ;;  %v7662_v36 = vld [vmem:[%s11020_s1 + $0xf4] ss:$8 sps:$4 sm:$0xff]  }
 0x2bd   :  { %v2640_v15 = vmax.f32 %v2639_v9, %v2426_v21  ;;  %v1926_v40 = vpop.f32.mrb[144].mxu1  ;;  %3869 = vmatprep.subr.bf16.mxu0 %v7662_v36 }
 0x2be   :  { %v1927_v35 = vadd.f32 %v1926_v40, %v9434_v47  ;;  %v1928_v50 = vpop.f32.mrb[145].mxu1  ;;  %7365 = vmatprep.mubr.msk.bf16.mxu0 %vm2839_vm2, %v2761_v51 }
 0x2bf   :  { %v1929_v7 = vadd.f32 %v1928_v50, %v9438_v4  ;;  %v1930_v8 = vpop.f32.mrb[146].mxu1 }
 0x2c0   :  { %v1931_v1 = vadd.f32 %v1930_v8, %v9434_v47  ;;  %v1932_v59 = vpop.f32.mrb[147].mxu1  ;;  %v2427_v34 = vmax.f32 %v1927_v35, 0.0 }
 0x2c1   :  { %v2428_v23 = vmax.f32 %v1929_v7, 0.0  ;;  %v1933_v33 = vadd.f32 %v1932_v59, %v9438_v4 }
 0x2c2   :  { %v2429_v29 = vmax.f32 %v1931_v1, 0.0  ;;  %2195 = vmatmul.mubr.bf16.gmra.mrb[252].mxu1 %v9253_v53 }
 0x2c3   :  { %v2641_v20 = vmax.f32 %v2640_v15, %v2428_v23  ;;  %v2430_v11 = vmax.f32 %v1933_v33, 0.0  ;;  %2204 = vmatprep.mubr.bf16.mxu1 %v11191_v52 }
 0x2c4   :  { %v2762_v43 = vpack.c.bf16 %v2429_v29, %v2427_v34 }
 0x2c5   :  { %v2642_v62 = vmax.f32 %v2641_v20, %v2430_v11  ;;  %v1936_v13 = vpop.f32.mrb[148].mxu1 }
 0x2c6   :  { %v1937_v0 = vadd.f32 %v1936_v13, %v9434_v47  ;;  %v1938_v18 = vpop.f32.mrb[149].mxu1  ;;  %7366 = vmatmul.mubr.msk.bf16.gmra.mrb[120].mxu0 %vm2839_vm2, %v2762_v43 }
 0x2c7   :  { %v1939_v37 = vadd.f32 %v1938_v18, %v9438_v4  ;;  %v1940_v6 = vpop.f32.mrb[150].mxu1 }
 0x2c8   :  { %v1941_v44 = vadd.f32 %v1940_v6, %v9434_v47  ;;  %v1942_v22 = vpop.f32.mrb[151].mxu1  ;;  %v2431_v10 = vmax.f32 %v1937_v0, 0.0 }
 0x2c9   :  { %v2432_v48 = vmax.f32 %v1939_v37, 0.0  ;;  %v1943_v53 = vadd.f32 %v1942_v22, %v9438_v4 }
 0x2ca   :  { %v2433_v60 = vmax.f32 %v1941_v44, 0.0  ;;  %2205 = vmatmul.mubr.bf16.gmra.mrb[0].mxu1 %v9251_v41  ;;  %v7660_v41 = vld [vmem:[%s11020_s1 + $0xf0] ss:$8 sps:$4 sm:$0xff]  }
 0x2cb   :  { %v2643_v24 = vmax.f32 %v2642_v62, %v2432_v48  ;;  %v2434_v5 = vmax.f32 %v1943_v53, 0.0  ;;  %2214 = vmatprep.mubr.bf16.mxu1 %v11191_v52  ;;  %3870 = vmatpush1.bf16.msra.mxu0 %v7660_v41 }
 0x2cc   :  { %v2763_v26 = vpack.c.bf16 %v2433_v60, %v2431_v10 }
 0x2cd   :  { %v2644_v38 = vmax.f32 %v2643_v24, %v2434_v5  ;;  %v1946_v45 = vpop.f32.mrb[152].mxu1 }
 0x2ce   :  { %v1947_v19 = vadd.f32 %v1946_v45, %v9434_v47  ;;  %v1948_v61 = vpop.f32.mrb[153].mxu1  ;;  %7369 = vmatprep.mubr.msk.bf16.mxu0 %vm2839_vm2, %v2763_v26  ;;  %v2813_v26 = vsub.s32 2, %v9106_v56 }
 0x2cf   :  { %v1949_v58 = vadd.f32 %v1948_v61, %v9438_v4  ;;  %v1950_v63 = vpop.f32.mrb[154].mxu1 }
 0x2d0   :  { %v1951_v25 = vadd.f32 %v1950_v63, %v9434_v47  ;;  %v1952_v46 = vpop.f32.mrb[155].mxu1  ;;  %v2435_v51 = vmax.f32 %v1947_v19, 0.0 }
 0x2d1   :  { %v2436_v9 = vmax.f32 %v1949_v58, 0.0  ;;  %v1953_v21 = vadd.f32 %v1952_v46, %v9438_v4  ;;  %v9660_v46 = vrot.slane %v9111_v57, %v2813_v26 }
 0x2d2   :  { %v2437_v15 = vmax.f32 %v1951_v25, 0.0  ;;  %2215 = vmatmul.mubr.bf16.gmra.mrb[4].mxu1 %v9271_v39 }
 0x2d3   :  { %v2645_v40 = vmax.f32 %v2644_v38, %v2436_v9  ;;  %v2438_v35 = vmax.f32 %v1953_v21, 0.0  ;;  %2224 = vmatprep.mubr.bf16.mxu1 %v11191_v52 }
 0x2d4   :  { %v2764_v50 = vpack.c.bf16 %v2437_v15, %v2435_v51 }
 0x2d5   :  { %v2646_v7 = vmax.f32 %v2645_v40, %v2438_v35  ;;  %v1956_v8 = vpop.f32.mrb[156].mxu1 }
 0x2d6   :  { %v1957_v1 = vadd.f32 %v1956_v8, %v9434_v47  ;;  %v1958_v59 = vpop.f32.mrb[157].mxu1  ;;  %7370 = vmatmul.mubr.msk.bf16.gmra.mrb[124].mxu0 %vm2839_vm2, %v2764_v50 }
 0x2d7   :  { %v1959_v23 = vadd.f32 %v1958_v59, %v9438_v4  ;;  %v1960_v33 = vpop.f32.mrb[158].mxu1 }
 0x2d8   :  { %v1961_v34 = vadd.f32 %v1960_v33, %v9434_v47  ;;  %v1962_v39 = vpop.f32.mrb[159].mxu1  ;;  %v2439_v11 = vmax.f32 %v1957_v1, 0.0 }
 0x2d9   :  { %v2440_v29 = vmax.f32 %v1959_v23, 0.0  ;;  %v1963_v20 = vadd.f32 %v1962_v39, %v9438_v4 }
 0x2da   :  { %v2441_v43 = vmax.f32 %v1961_v34, 0.0  ;;  %2225 = vmatmul.mubr.bf16.gmra.mrb[8].mxu1 %v9269_v16 }
 0x2db   :  { %v2647_v62 = vmax.f32 %v2646_v7, %v2440_v29  ;;  %v2442_v13 = vmax.f32 %v1963_v20, 0.0  ;;  %2234 = vmatprep.mubr.bf16.mxu1 %v11191_v52 }
 0x2dc   :  { %v2765_v0 = vpack.c.bf16 %v2441_v43, %v2439_v11 }
 0x2dd   :  { %v2648_v18 = vmax.f32 %v2647_v62, %v2442_v13  ;;  %v1966_v37 = vpop.f32.mrb[160].mxu1 }
 0x2de   :  { %v1967_v6 = vadd.f32 %v1966_v37, %v9434_v47  ;;  %v1968_v44 = vpop.f32.mrb[161].mxu1  ;;  %7373 = vmatprep.mubr.msk.bf16.mxu0 %vm2839_vm2, %v2765_v0 }
 0x2df   :  { %v1969_v22 = vadd.f32 %v1968_v44, %v9438_v4  ;;  %v1970_v48 = vpop.f32.mrb[162].mxu1 }
 0x2e0   :  { %v1971_v53 = vadd.f32 %v1970_v48, %v9434_v47  ;;  %v1972_v10 = vpop.f32.mrb[163].mxu1  ;;  %v2443_v24 = vmax.f32 %v1967_v6, 0.0 }
 0x2e1   :  { %v2444_v60 = vmax.f32 %v1969_v22, 0.0  ;;  %v1973_v16 = vadd.f32 %v1972_v10, %v9438_v4 }
 0x2e2   :  { %v2445_v5 = vmax.f32 %v1971_v53, 0.0  ;;  %2235 = vmatmul.mubr.bf16.gmra.mrb[12].mxu1 %v9292_v30 }
 0x2e3   :  { %v2649_v38 = vmax.f32 %v2648_v18, %v2444_v60  ;;  %v2446_v45 = vmax.f32 %v1973_v16, 0.0  ;;  %2244 = vmatprep.mubr.bf16.mxu1 %v11191_v52  ;;  %v7663_v16 = vld [vmem:[%s11020_s1 + $0x100] ss:$8 sps:$4 sm:$0xff]  }
 0x2e4   :  { %v2766_v19 = vpack.c.bf16 %v2445_v5, %v2443_v24  ;;  %v7665_v24 = vld [vmem:[%s11020_s1 + $0x104] ss:$8 sps:$4 sm:$0xff]  }
 0x2e5   :  { %v2650_v61 = vmax.f32 %v2649_v38, %v2446_v45  ;;  %v1976_v58 = vpop.f32.mrb[164].mxu1  ;;  %3871 = vmatprep.subr.bf16.mxu0 %v7665_v24 }
 0x2e6   :  { %v1977_v63 = vadd.f32 %v1976_v58, %v9434_v47  ;;  %v1978_v25 = vpop.f32.mrb[165].mxu1  ;;  %7374 = vmatmul.mubr.msk.bf16.gmra.mrb[128].mxu0 %vm2839_vm2, %v2766_v19 }
 0x2e7   :  { %v1979_v41 = vadd.f32 %v1978_v25, %v9438_v4  ;;  %v1980_v30 = vpop.f32.mrb[166].mxu1  ;;  %3872 = vmatpush1.bf16.msra.mxu0 %v7663_v16 }
 0x2e8   :  { %v1981_v36 = vadd.f32 %v1980_v30, %v9434_v47  ;;  %v1982_v9 = vpop.f32.mrb[167].mxu1  ;;  %v2447_v40 = vmax.f32 %v1977_v63, 0.0 }
 0x2e9   :  { %v2448_v21 = vmax.f32 %v1979_v41, 0.0  ;;  %v1983_v51 = vadd.f32 %v1982_v9, %v9438_v4  ;;  %v7323_v15 = vpop.f32.mrb[76].mxu0 }
 0x2ea   :  { %v2449_v35 = vmax.f32 %v1981_v36, 0.0  ;;  %v3075_v50 = vadd.f32 %v7323_v15, %v9660_v46  ;;  %2245 = vmatmul.mubr.bf16.gmra.mrb[16].mxu1 %v9287_v3  ;;  %v3066_v7 = vpop.f32.mrb[77].mxu0 }
 0x2eb   :  { %v2651_v8 = vmax.f32 %v2650_v61, %v2448_v21  ;;  %v2450_v1 = vmax.f32 %v1983_v51, 0.0  ;;  %v3067_v59 = vadd.f32 %v3066_v7, %v9660_v46  ;;  %v7324_v23 = vpop.f32.mrb[78].mxu0  ;;  %2254 = vmatprep.mubr.bf16.mxu1 %v11191_v52 }
 0x2ec   :  { %v2767_v33 = vpack.c.bf16 %v2449_v35, %v2447_v40  ;;  %v3078_v34 = vadd.f32 %v7324_v23, %v9660_v46  ;;  %v3069_v39 = vpop.f32.mrb[79].mxu0  ;;  %v3579_v43 = vmax.f32 %v3075_v50, 0.0  ;;  %v2622_v23 = vrot.slane %v9552_v12, 4 }
 0x2ed   :  { %v2652_v29 = vmax.f32 %v2651_v8, %v2450_v1  ;;  %v3070_v20 = vadd.f32 %v3069_v39, %v9660_v46  ;;  %v1986_v11 = vpop.f32.mrb[168].mxu1  ;;  %v3577_v0 = vmax.f32 %v3067_v59, 0.0 }
 0x2ee   :  { %v3580_v62 = vmax.f32 %v3078_v34, 0.0  ;;  %v1987_v3 = vadd.f32 %v1986_v11, %v9434_v47  ;;  %v1988_v13 = vpop.f32.mrb[169].mxu1  ;;  %7377 = vmatprep.mubr.msk.bf16.mxu0 %vm2839_vm2, %v2767_v33 }
 0x2ef   :  { %v3578_v18 = vmax.f32 %v3070_v20, 0.0  ;;  %v1989_v37 = vadd.f32 %v1988_v13, %v9438_v4  ;;  %v1990_v6 = vpop.f32.mrb[170].mxu1 }
 0x2f0   :  { %v1991_v44 = vadd.f32 %v1990_v6, %v9434_v47  ;;  %v1992_v22 = vpop.f32.mrb[171].mxu1  ;;  %v9675_v48 = vpack.c.bf16 %v3580_v62, %v3579_v43  ;;  %v2451_v5 = vmax.f32 %v1987_v3, 0.0  ;;  %v2623_v6 = vmax.f32 %v9552_v12, %v2622_v23 }
 0x2f1   :  { %v9677_v53 = vpack.c.bf16 %v3578_v18, %v3577_v0  ;;  %v2452_v10 = vmax.f32 %v1989_v37, 0.0  ;;  %v1993_v60 = vadd.f32 %v1992_v22, %v9438_v4 }
 0x2f2   :  { %v2453_v26 = vmax.f32 %v1991_v44, 0.0  ;;  %2255 = vmatmul.mubr.bf16.gmra.mrb[20].mxu1 %v9316_v42 }
 0x2f3   :  { %v2653_v38 = vmax.f32 %v2652_v29, %v2452_v10  ;;  %v2454_v45 = vmax.f32 %v1993_v60, 0.0  ;;  %2264 = vmatprep.mubr.bf16.mxu1 %v11191_v52 }
 0x2f4   :  { %v2768_v19 = vpack.c.bf16 %v2453_v26, %v2451_v5 }
 0x2f5   :  { %v2654_v61 = vmax.f32 %v2653_v38, %v2454_v45  ;;  %v1996_v58 = vpop.f32.mrb[172].mxu1 }
 0x2f6   :  { %v1997_v63 = vadd.f32 %v1996_v58, %v9434_v47  ;;  %v1998_v25 = vpop.f32.mrb[173].mxu1  ;;  %7378 = vmatmul.mubr.msk.bf16.gmra.mrb[132].mxu0 %vm2839_vm2, %v2768_v19  ;;  %v2624_v19 = vrot.slane %v2623_v6, 2 }
 0x2f7   :  { %v1999_v41 = vadd.f32 %v1998_v25, %v9438_v4  ;;  %v2000_v30 = vpop.f32.mrb[174].mxu1 }
 0x2f8   :  { %v2001_v36 = vadd.f32 %v2000_v30, %v9434_v47  ;;  %v2002_v42 = vpop.f32.mrb[175].mxu1  ;;  %v2455_v15 = vmax.f32 %v1997_v63, 0.0 }
 0x2f9   :  { %v2456_v9 = vmax.f32 %v1999_v41, 0.0  ;;  %v2003_v21 = vadd.f32 %v2002_v42, %v9438_v4  ;;  %v7327_v51 = vpop.f32.mrb[80].mxu0  ;;  %v2625_v42 = vmax.f32 %v2623_v6, %v2624_v19  ;;  %v7666_v19 = vld [vmem:[%s11020_s1 + $0x110] ss:$8 sps:$4 sm:$0xff]  }
 0x2fa   :  { %v2457_v40 = vmax.f32 %v2001_v36, 0.0  ;;  %v3091_v35 = vadd.f32 %v7327_v51, %v9660_v46  ;;  %2265 = vmatmul.mubr.bf16.gmra.mrb[24].mxu1 %v9310_v54  ;;  %v3082_v50 = vpop.f32.mrb[81].mxu0 }
 0x2fb   :  { %v2655_v7 = vmax.f32 %v2654_v61, %v2456_v9  ;;  %v2458_v8 = vmax.f32 %v2003_v21, 0.0  ;;  %v3083_v1 = vadd.f32 %v3082_v50, %v9660_v46  ;;  %v7328_v59 = vpop.f32.mrb[82].mxu0  ;;  %2274 = vmatprep.mubr.bf16.mxu1 %v11191_v52 }
 0x2fc   :  { %v2769_v33 = vpack.c.bf16 %v2457_v40, %v2455_v15  ;;  %v3094_v34 = vadd.f32 %v7328_v59, %v9660_v46  ;;  %v3085_v39 = vpop.f32.mrb[83].mxu0  ;;  %v3583_v43 = vmax.f32 %v3091_v35, 0.0 }
 0x2fd   :  { %v2656_v29 = vmax.f32 %v2655_v7, %v2458_v8  ;;  %v3086_v20 = vadd.f32 %v3085_v39, %v9660_v46  ;;  %v2006_v11 = vpop.f32.mrb[176].mxu1  ;;  %v3581_v13 = vmax.f32 %v3083_v1, 0.0 }
 0x2fe   :  { %v3584_v54 = vmax.f32 %v3094_v34, 0.0  ;;  %v2007_v62 = vadd.f32 %v2006_v11, %v9434_v47  ;;  %v2008_v3 = vpop.f32.mrb[177].mxu1  ;;  %7381 = vmatprep.mubr.msk.bf16.mxu0 %vm2839_vm2, %v2769_v33 }
 0x2ff   :  { %v3582_v0 = vmax.f32 %v3086_v20, 0.0  ;;  %v2009_v18 = vadd.f32 %v2008_v3, %v9438_v4  ;;  %v2010_v37 = vpop.f32.mrb[178].mxu1  ;;  %v2626_v20 = vrot.slane %v2625_v42, 1 }
 0x300   :  { %v2011_v44 = vadd.f32 %v2010_v37, %v9434_v47  ;;  %v2012_v22 = vpop.f32.mrb[179].mxu1  ;;  %v9705_v10 = vpack.c.bf16 %v3584_v54, %v3583_v43  ;;  %v2459_v5 = vmax.f32 %v2007_v62, 0.0 }
 0x301   :  { %v2460_v60 = vmax.f32 %v2009_v18, 0.0  ;;  %v2013_v16 = vadd.f32 %v2012_v22, %v9438_v4  ;;  %v9708_v24 = vpack.c.bf16 %v3582_v0, %v3581_v13 }
 0x302   :  { %v2461_v26 = vmax.f32 %v2011_v44, 0.0  ;;  %2275 = vmatmul.mubr.bf16.gmra.mrb[28].mxu1 %v9337_v2 }
 0x303   :  { %v2657_v38 = vmax.f32 %v2656_v29, %v2460_v60  ;;  %v2462_v45 = vmax.f32 %v2013_v16, 0.0  ;;  %2284 = vmatprep.mubr.bf16.mxu1 %v11191_v52 }
 0x304   :  { %v2770_v12 = vpack.c.bf16 %v2461_v26, %v2459_v5  ;;  %v2627_v5 = vmax.f32 %v2625_v42, %v2626_v20 }
 0x305   :  { %v2658_v61 = vmax.f32 %v2657_v38, %v2462_v45  ;;  %v2016_v58 = vpop.f32.mrb[180].mxu1 }
 0x306   :  { %v2017_v63 = vadd.f32 %v2016_v58, %v9434_v47  ;;  %v2018_v25 = vpop.f32.mrb[181].mxu1  ;;  %7382 = vmatmul.mubr.msk.bf16.gmra.mrb[136].mxu0 %vm2839_vm2, %v2770_v12  ;;  %v7668_v12 = vld [vmem:[%s11020_s1 + $0x114] ss:$8 sps:$4 sm:$0xff]  }
 0x307   :  { %v2659_v41 = vrot.slane %v2658_v61, 4  ;;  %v2019_v30 = vadd.f32 %v2018_v25, %v9438_v4  ;;  %v2020_v36 = vpop.f32.mrb[182].mxu1  ;;  %3873 = vmatprep.subr.bf16.mxu0 %v7668_v12 }
 0x308   :  { %v2021_v2 = vadd.f32 %v2020_v36, %v9434_v47  ;;  %v2022_v9 = vpop.f32.mrb[183].mxu1  ;;  %v2463_v40 = vmax.f32 %v2017_v63, 0.0  ;;  %3874 = vmatpush1.bf16.msra.mxu0 %v7666_v19 }
 0x309   :  { %v2660_v21 = vmax.f32 %v2658_v61, %v2659_v41  ;;  %v2023_v51 = vadd.f32 %v2022_v9, %v9438_v4  ;;  %v7331_v15 = vpop.f32.mrb[84].mxu0  ;;  %v2464_v1 = vmax.f32 %v2019_v30, 0.0 }
 0x30a   :  { %v2465_v35 = vmax.f32 %v2021_v2, 0.0  ;;  %v3107_v50 = vadd.f32 %v7331_v15, %v9660_v46  ;;  %2285 = vmatmul.mubr.bf16.gmra.mrb[32].mxu1 %v9334_v28  ;;  %v3098_v7 = vpop.f32.mrb[85].mxu0 }
 0x30b   :  { %v2661_v8 = vrot.slane %v2660_v21, 2  ;;  %v2466_v59 = vmax.f32 %v2023_v51, 0.0  ;;  %v3099_v23 = vadd.f32 %v3098_v7, %v9660_v46  ;;  %v7332_v33 = vpop.f32.mrb[86].mxu0  ;;  %2294 = vmatprep.mubr.bf16.mxu1 %v11191_v52 }
 0x30c   :  { %v2771_v34 = vpack.c.bf16 %v2465_v35, %v2463_v40  ;;  %v3110_v39 = vadd.f32 %v7332_v33, %v9660_v46  ;;  %v3101_v29 = vpop.f32.mrb[87].mxu0  ;;  %v3587_v28 = vmax.f32 %v3107_v50, 0.0 }
 0x30d   :  { %v2662_v11 = vmax.f32 %v2660_v21, %v2661_v8  ;;  %v2665_v43 = vmax.f32 %v2464_v1, %v2466_v59  ;;  %v3102_v54 = vadd.f32 %v3101_v29, %v9660_v46  ;;  %v2026_v62 = vpop.f32.mrb[184].mxu1  ;;  %v3585_v18 = vmax.f32 %v3099_v23, 0.0 }
 0x30e   :  { %v3588_v3 = vmax.f32 %v3110_v39, 0.0  ;;  %v2027_v13 = vadd.f32 %v2026_v62, %v9434_v47  ;;  %v2028_v0 = vpop.f32.mrb[185].mxu1  ;;  %7385 = vmatprep.mubr.msk.bf16.mxu0 %vm2839_vm2, %v2771_v34 }
 0x30f   :  { %v3586_v37 = vmax.f32 %v3102_v54, 0.0  ;;  %v2029_v6 = vadd.f32 %v2028_v0, %v9438_v4  ;;  %v2030_v44 = vpop.f32.mrb[186].mxu1  ;;  %v2663_v22 = vrot.slane %v2662_v11, 1 }
 0x310   :  { %v2031_v60 = vadd.f32 %v2030_v44, %v9434_v47  ;;  %v2032_v16 = vpop.f32.mrb[187].mxu1  ;;  %v9727_v26 = vpack.c.bf16 %v3588_v3, %v3587_v28  ;;  %v2467_v63 = vmax.f32 %v2027_v13, 0.0 }
 0x311   :  { %v2468_v38 = vmax.f32 %v2029_v6, 0.0  ;;  %v2033_v45 = vadd.f32 %v2032_v16, %v9438_v4  ;;  %v2664_v61 = vmax.f32 %v2662_v11, %v2663_v22  ;;  %v9736_v58 = vpack.c.bf16 %v3586_v37, %v3585_v18 }
 0x312   :  { %v2469_v25 = vmax.f32 %v2031_v60, 0.0  ;;  %2295 = vmatmul.mubr.bf16.gmra.mrb[36].mxu1 %v9355_v31 }
 0x313   :  { %v2666_v41 = vmax.f32 %v2665_v43, %v2468_v38  ;;  %v2470_v30 = vmax.f32 %v2033_v45, 0.0  ;;  %2304 = vmatprep.mubr.bf16.mxu1 %v11191_v52  ;;  %v9741_v36 = vsel %vm6143_vm3, %v2664_v61, %v2627_v5 }
 0x314   :  { %v2772_v42 = vpack.c.bf16 %v2469_v25, %v2467_v63 }
 0x315   :  { %v2036_v2 = vpop.f32.mrb[188].mxu1  ;;  %v2667_v9 = vmax.f32 %v2666_v41, %v2470_v30 }
 0x316   :  { %v2037_v21 = vadd.f32 %v2036_v2, %v9434_v47  ;;  %v2038_v51 = vpop.f32.mrb[189].mxu1  ;;  %7386 = vmatmul.mubr.msk.bf16.gmra.mrb[140].mxu0 %vm2839_vm2, %v2772_v42 }
 0x317   :  { %v2039_v15 = vadd.f32 %v2038_v51, %v9438_v4  ;;  %v2040_v31 = vpop.f32.mrb[190].mxu1 }
 0x318   :  { %v2041_v40 = vadd.f32 %v2040_v31, %v9434_v47  ;;  %v2042_v35 = vpop.f32.mrb[191].mxu1  ;;  %v2471_v1 = vmax.f32 %v2037_v21, 0.0 }
 0x319   :  { %v2472_v50 = vmax.f32 %v2039_v15, 0.0  ;;  %v2043_v7 = vadd.f32 %v2042_v35, %v9438_v4  ;;  %v7335_v8 = vpop.f32.mrb[88].mxu0 }
 0x31a   :  { %v2473_v59 = vmax.f32 %v2041_v40, 0.0  ;;  %v3123_v23 = vadd.f32 %v7335_v8, %v9660_v46  ;;  %2305 = vmatmul.mubr.bf16.gmra.mrb[40].mxu1 %v9352_v49  ;;  %v3114_v33 = vpop.f32.mrb[89].mxu0 }
 0x31b   :  { %v2668_v34 = vmax.f32 %v2667_v9, %v2472_v50  ;;  %v2474_v39 = vmax.f32 %v2043_v7, 0.0  ;;  %v3115_v29 = vadd.f32 %v3114_v33, %v9660_v46  ;;  %v7336_v20 = vpop.f32.mrb[90].mxu0  ;;  %2314 = vmatprep.mubr.bf16.mxu1 %v11191_v52 }
 0x31c   :  { %v2773_v11 = vpack.c.bf16 %v2473_v59, %v2471_v1  ;;  %v3126_v43 = vadd.f32 %v7336_v20, %v9660_v46  ;;  %v3117_v54 = vpop.f32.mrb[91].mxu0  ;;  %v3591_v13 = vmax.f32 %v3123_v23, 0.0 }
 0x31d   :  { %v2669_v62 = vmax.f32 %v2668_v34, %v2474_v39  ;;  %v3118_v28 = vadd.f32 %v3117_v54, %v9660_v46  ;;  %v2046_v3 = vpop.f32.mrb[192].mxu1  ;;  %v3589_v37 = vmax.f32 %v3115_v29, 0.0 }
 0x31e   :  { %v3592_v0 = vmax.f32 %v3126_v43, 0.0  ;;  %v2047_v49 = vadd.f32 %v2046_v3, %v9434_v47  ;;  %v2048_v18 = vpop.f32.mrb[193].mxu1  ;;  %7389 = vmatprep.mubr.msk.bf16.mxu0 %vm2839_vm2, %v2773_v11 }
 0x31f   :  { %v3590_v6 = vmax.f32 %v3118_v28, 0.0  ;;  %v2049_v44 = vadd.f32 %v2048_v18, %v9438_v4  ;;  %v2050_v22 = vpop.f32.mrb[194].mxu1 }
 0x320   :  { %v2051_v60 = vadd.f32 %v2050_v22, %v9434_v47  ;;  %v2052_v16 = vpop.f32.mrb[195].mxu1  ;;  %v9758_v5 = vpack.c.bf16 %v3592_v0, %v3591_v13  ;;  %v2475_v12 = vmax.f32 %v2047_v49, 0.0 }
 0x321   :  { %v2476_v38 = vmax.f32 %v2049_v44, 0.0  ;;  %v2053_v45 = vadd.f32 %v2052_v16, %v9438_v4  ;;  %v9761_v19 = vpack.c.bf16 %v3590_v6, %v3589_v37  ;;  %v7669_v16 = vld [vmem:[%s11020_s1 + $0x120] ss:$8 sps:$4 sm:$0xff]  }
 0x322   :  { %v2477_v61 = vmax.f32 %v2051_v60, 0.0  ;;  %2315 = vmatmul.mubr.bf16.gmra.mrb[44].mxu1 %v9373_v27 }
 0x323   :  { %v2670_v63 = vmax.f32 %v2669_v62, %v2476_v38  ;;  %v2478_v25 = vmax.f32 %v2053_v45, 0.0  ;;  %2324 = vmatprep.mubr.bf16.mxu1 %v11191_v52  ;;  %v7671_v38 = vld [vmem:[%s11020_s1 + $0x124] ss:$8 sps:$4 sm:$0xff]  }
 0x324   :  { %v2774_v41 = vpack.c.bf16 %v2477_v61, %v2475_v12  ;;  %3875 = vmatprep.subr.bf16.mxu0 %v7671_v38 }
 0x325   :  { %v2671_v30 = vmax.f32 %v2670_v63, %v2478_v25  ;;  %v2056_v42 = vpop.f32.mrb[196].mxu1  ;;  %3876 = vmatpush1.bf16.msra.mxu0 %v7669_v16 }
 0x326   :  { %v2057_v2 = vadd.f32 %v2056_v42, %v9434_v47  ;;  %v2058_v9 = vpop.f32.mrb[197].mxu1  ;;  %7390 = vmatmul.mubr.msk.bf16.gmra.mrb[144].mxu0 %vm2839_vm2, %v2774_v41 }
 0x327   :  { %v2059_v21 = vadd.f32 %v2058_v9, %v9438_v4  ;;  %v2060_v51 = vpop.f32.mrb[198].mxu1 }
 0x328   :  { %v2061_v15 = vadd.f32 %v2060_v51, %v9434_v47  ;;  %v2062_v31 = vpop.f32.mrb[199].mxu1  ;;  %v2479_v50 = vmax.f32 %v2057_v2, 0.0 }
 0x329   :  { %v2480_v40 = vmax.f32 %v2059_v21, 0.0  ;;  %v2063_v27 = vadd.f32 %v2062_v31, %v9438_v4  ;;  %v7339_v35 = vpop.f32.mrb[92].mxu0 }
 0x32a   :  { %v2481_v7 = vmax.f32 %v2061_v15, 0.0  ;;  %v3139_v8 = vadd.f32 %v7339_v35, %v9660_v46  ;;  %2325 = vmatmul.mubr.bf16.gmra.mrb[48].mxu1 %v9370_v32  ;;  %v3130_v1 = vpop.f32.mrb[93].mxu0 }
 0x32b   :  { %v2672_v59 = vmax.f32 %v2671_v30, %v2480_v40  ;;  %v2482_v23 = vmax.f32 %v2063_v27, 0.0  ;;  %v3131_v33 = vadd.f32 %v3130_v1, %v9660_v46  ;;  %v7340_v34 = vpop.f32.mrb[94].mxu0 }
 0x32c   :  { %v2775_v39 = vpack.c.bf16 %v2481_v7, %v2479_v50  ;;  %v3142_v29 = vadd.f32 %v7340_v34, %v9660_v46  ;;  %v3133_v20 = vpop.f32.mrb[95].mxu0  ;;  %v3595_v62 = vmax.f32 %v3139_v8, 0.0 }
 0x32d   :  { %v2673_v11 = vmax.f32 %v2672_v59, %v2482_v23  ;;  %v3134_v43 = vadd.f32 %v3133_v20, %v9660_v46  ;;  %v2066_v54 = vpop.f32.mrb[200].mxu1  ;;  %v3593_v32 = vmax.f32 %v3131_v33, 0.0 }
 0x32e   :  { %v3596_v28 = vmax.f32 %v3142_v29, 0.0  ;;  %v2067_v3 = vadd.f32 %v2066_v54, %v9434_v47  ;;  %v2068_v13 = vpop.f32.mrb[201].mxu1  ;;  %7393 = vmatprep.mubr.msk.bf16.mxu0 %vm2839_vm2, %v2775_v39 }
 0x32f   :  { %v3594_v0 = vmax.f32 %v3134_v43, 0.0  ;;  %v2069_v49 = vadd.f32 %v2068_v13, %v9438_v4  ;;  %v2070_v18 = vpop.f32.mrb[202].mxu1 }
 0x330   :  { %v2071_v37 = vadd.f32 %v2070_v18, %v9434_v47  ;;  %v2072_v6 = vpop.f32.mrb[203].mxu1  ;;  %v9779_v44 = vpack.c.bf16 %v3596_v28, %v3595_v62  ;;  %v2483_v12 = vmax.f32 %v2067_v3, 0.0 }
 0x331   :  { %v2484_v22 = vmax.f32 %v2069_v49, 0.0  ;;  %v2073_v60 = vadd.f32 %v2072_v6, %v9438_v4  ;;  %v9788_v45 = vpack.c.bf16 %v3594_v0, %v3593_v32 }
 0x332   :  { %v2485_v61 = vmax.f32 %v2071_v37, 0.0 }
 0x333   :  { %v2674_v63 = vmax.f32 %v2673_v11, %v2484_v22  ;;  %v2486_v25 = vmax.f32 %v2073_v60, 0.0 }
 0x334   :  { %v2776_v41 = vpack.c.bf16 %v2485_v61, %v2483_v12 }
 0x335   :  { %v2675_v30 = vmax.f32 %v2674_v63, %v2486_v25  ;;  %v2076_v42 = vpop.f32.mrb[204].mxu1 }
 0x336   :  { %v2077_v2 = vadd.f32 %v2076_v42, %v9434_v47  ;;  %v2078_v9 = vpop.f32.mrb[205].mxu1  ;;  %7394 = vmatmul.mubr.msk.bf16.gmra.mrb[148].mxu0 %vm2839_vm2, %v2776_v41 }
 0x337   :  { %v2079_v21 = vadd.f32 %v2078_v9, %v9438_v4  ;;  %v2080_v51 = vpop.f32.mrb[206].mxu1 }
 0x338   :  { %v2081_v15 = vadd.f32 %v2080_v51, %v9434_v47  ;;  %v2082_v31 = vpop.f32.mrb[207].mxu1  ;;  %v2487_v50 = vmax.f32 %v2077_v2, 0.0 }
 0x339   :  { %v2488_v40 = vmax.f32 %v2079_v21, 0.0  ;;  %v2083_v27 = vadd.f32 %v2082_v31, %v9438_v4  ;;  %v7343_v35 = vpop.f32.mrb[96].mxu0 }
 0x33a   :  { %v2489_v7 = vmax.f32 %v2081_v15, 0.0  ;;  %v3155_v8 = vadd.f32 %v7343_v35, %v9660_v46  ;;  %v3146_v1 = vpop.f32.mrb[97].mxu0 }
 0x33b   :  { %v2676_v59 = vmax.f32 %v2675_v30, %v2488_v40  ;;  %v2490_v23 = vmax.f32 %v2083_v27, 0.0  ;;  %v3147_v33 = vadd.f32 %v3146_v1, %v9660_v46  ;;  %v7344_v34 = vpop.f32.mrb[98].mxu0 }
 0x33c   :  { %v2777_v39 = vpack.c.bf16 %v2489_v7, %v2487_v50  ;;  %v3158_v29 = vadd.f32 %v7344_v34, %v9660_v46  ;;  %v3149_v20 = vpop.f32.mrb[99].mxu0  ;;  %v3599_v62 = vmax.f32 %v3155_v8, 0.0 }
 0x33d   :  { %v2677_v11 = vmax.f32 %v2676_v59, %v2490_v23  ;;  %v3150_v43 = vadd.f32 %v3149_v20, %v9660_v46  ;;  %v2086_v54 = vpop.f32.mrb[208].mxu1  ;;  %v3597_v32 = vmax.f32 %v3147_v33, 0.0 }
 0x33e   :  { %v3600_v28 = vmax.f32 %v3158_v29, 0.0  ;;  %v2087_v3 = vadd.f32 %v2086_v54, %v9434_v47  ;;  %v2088_v13 = vpop.f32.mrb[209].mxu1  ;;  %7397 = vmatprep.mubr.msk.bf16.mxu0 %vm2839_vm2, %v2777_v39 }
 0x33f   :  { %v3598_v0 = vmax.f32 %v3150_v43, 0.0  ;;  %v2089_v49 = vadd.f32 %v2088_v13, %v9438_v4  ;;  %v2090_v18 = vpop.f32.mrb[210].mxu1 }
 0x340   :  { %v2091_v37 = vadd.f32 %v2090_v18, %v9434_v47  ;;  %v2092_v6 = vpop.f32.mrb[211].mxu1  ;;  %v9803_v22 = vpack.c.bf16 %v3600_v28, %v3599_v62  ;;  %v2491_v12 = vmax.f32 %v2087_v3, 0.0 }
 0x341   :  { %v2492_v60 = vmax.f32 %v2089_v49, 0.0  ;;  %v2093_v16 = vadd.f32 %v2092_v6, %v9438_v4  ;;  %v9806_v38 = vpack.c.bf16 %v3598_v0, %v3597_v32 }
 0x342   :  { %v2493_v61 = vmax.f32 %v2091_v37, 0.0 }
 0x343   :  { %v2678_v63 = vmax.f32 %v2677_v11, %v2492_v60  ;;  %v2494_v25 = vmax.f32 %v2093_v16, 0.0 }
 0x344   :  { %v2778_v41 = vpack.c.bf16 %v2493_v61, %v2491_v12  ;;  %v7672_v61 = vld [vmem:[%s11020_s1 + $0x130] ss:$8 sps:$4 sm:$0xff]  }
 0x345   :  { %v2679_v30 = vmax.f32 %v2678_v63, %v2494_v25  ;;  %v2096_v42 = vpop.f32.mrb[212].mxu1  ;;  %v7674_v63 = vld [vmem:[%s11020_s1 + $0x134] ss:$8 sps:$4 sm:$0xff]  }
 0x346   :  { %v2097_v2 = vadd.f32 %v2096_v42, %v9434_v47  ;;  %v2098_v9 = vpop.f32.mrb[213].mxu1  ;;  %7398 = vmatmul.mubr.msk.bf16.gmra.mrb[152].mxu0 %vm2839_vm2, %v2778_v41  ;;  %3877 = vmatprep.subr.bf16.mxu0 %v7674_v63 }
 0x347   :  { %v2099_v21 = vadd.f32 %v2098_v9, %v9438_v4  ;;  %v2100_v51 = vpop.f32.mrb[214].mxu1  ;;  %3878 = vmatpush1.bf16.msra.mxu0 %v7672_v61 }
 0x348   :  { %v2101_v15 = vadd.f32 %v2100_v51, %v9434_v47  ;;  %v2102_v31 = vpop.f32.mrb[215].mxu1  ;;  %v2495_v50 = vmax.f32 %v2097_v2, 0.0 }
 0x349   :  { %v2496_v40 = vmax.f32 %v2099_v21, 0.0  ;;  %v2103_v27 = vadd.f32 %v2102_v31, %v9438_v4  ;;  %v7347_v35 = vpop.f32.mrb[100].mxu0 }
 0x34a   :  { %v2497_v7 = vmax.f32 %v2101_v15, 0.0  ;;  %v3171_v8 = vadd.f32 %v7347_v35, %v9660_v46  ;;  %v3162_v1 = vpop.f32.mrb[101].mxu0 }
 0x34b   :  { %v2680_v59 = vmax.f32 %v2679_v30, %v2496_v40  ;;  %v2498_v23 = vmax.f32 %v2103_v27, 0.0  ;;  %v3163_v33 = vadd.f32 %v3162_v1, %v9660_v46  ;;  %v7348_v34 = vpop.f32.mrb[102].mxu0 }
 0x34c   :  { %v2779_v39 = vpack.c.bf16 %v2497_v7, %v2495_v50  ;;  %v3174_v29 = vadd.f32 %v7348_v34, %v9660_v46  ;;  %v3165_v20 = vpop.f32.mrb[103].mxu0  ;;  %v3603_v62 = vmax.f32 %v3171_v8, 0.0 }
 0x34d   :  { %v2681_v11 = vmax.f32 %v2680_v59, %v2498_v23  ;;  %v3166_v43 = vadd.f32 %v3165_v20, %v9660_v46  ;;  %v2106_v54 = vpop.f32.mrb[216].mxu1  ;;  %v3601_v32 = vmax.f32 %v3163_v33, 0.0 }
 0x34e   :  { %v3604_v28 = vmax.f32 %v3174_v29, 0.0  ;;  %v2107_v3 = vadd.f32 %v2106_v54, %v9434_v47  ;;  %v2108_v13 = vpop.f32.mrb[217].mxu1  ;;  %7401 = vmatprep.mubr.msk.bf16.mxu0 %vm2839_vm2, %v2779_v39 }
 0x34f   :  { %v3602_v0 = vmax.f32 %v3166_v43, 0.0  ;;  %v2109_v49 = vadd.f32 %v2108_v13, %v9438_v4  ;;  %v2110_v18 = vpop.f32.mrb[218].mxu1 }
 0x350   :  { %v9820_v37 = vpack.c.bf16 %v3604_v28, %v3603_v62  ;;  %v2111_v6 = vadd.f32 %v2110_v18, %v9434_v47  ;;  %v2112_v60 = vpop.f32.mrb[219].mxu1  ;;  %v2499_v41 = vmax.f32 %v2107_v3, 0.0 }
 0x351   :  { %v2500_v16 = vmax.f32 %v2109_v49, 0.0  ;;  %v2113_v12 = vadd.f32 %v2112_v60, %v9438_v4  ;;  %v9830_v25 = vpack.c.bf16 %v3602_v0, %v3601_v32 }
 0x352   :  { %v2501_v30 = vmax.f32 %v2111_v6, 0.0 }
 0x353   :  { %v2682_v42 = vmax.f32 %v2681_v11, %v2500_v16  ;;  %v2502_v2 = vmax.f32 %v2113_v12, 0.0 }
 0x354   :  { %v2780_v9 = vpack.c.bf16 %v2501_v30, %v2499_v41 }
 0x355   :  { %v2683_v21 = vmax.f32 %v2682_v42, %v2502_v2  ;;  %v2116_v51 = vpop.f32.mrb[220].mxu1 }
 0x356   :  { %v2117_v15 = vadd.f32 %v2116_v51, %v9434_v47  ;;  %v2118_v31 = vpop.f32.mrb[221].mxu1  ;;  %7402 = vmatmul.mubr.msk.bf16.gmra.mrb[156].mxu0 %vm2839_vm2, %v2780_v9 }
 0x357   :  { %v2119_v40 = vadd.f32 %v2118_v31, %v9438_v4  ;;  %v2120_v27 = vpop.f32.mrb[222].mxu1 }
 0x358   :  { %v2121_v35 = vadd.f32 %v2120_v27, %v9434_v47  ;;  %v2122_v50 = vpop.f32.mrb[223].mxu1  ;;  %v2503_v59 = vmax.f32 %v2117_v15, 0.0 }
 0x359   :  { %v2504_v7 = vmax.f32 %v2119_v40, 0.0  ;;  %v2123_v8 = vadd.f32 %v2122_v50, %v9438_v4  ;;  %v7351_v1 = vpop.f32.mrb[104].mxu0 }
 0x35a   :  { %v2505_v23 = vmax.f32 %v2121_v35, 0.0  ;;  %v3187_v33 = vadd.f32 %v7351_v1, %v9660_v46  ;;  %v3178_v34 = vpop.f32.mrb[105].mxu0 }
 0x35b   :  { %v2684_v39 = vmax.f32 %v2683_v21, %v2504_v7  ;;  %v2506_v29 = vmax.f32 %v2123_v8, 0.0  ;;  %v3179_v20 = vadd.f32 %v3178_v34, %v9660_v46  ;;  %v7352_v11 = vpop.f32.mrb[106].mxu0 }
 0x35c   :  { %v2781_v43 = vpack.c.bf16 %v2505_v23, %v2503_v59  ;;  %v3190_v54 = vadd.f32 %v7352_v11, %v9660_v46  ;;  %v3181_v62 = vpop.f32.mrb[107].mxu0  ;;  %v3607_v32 = vmax.f32 %v3187_v33, 0.0 }
 0x35d   :  { %v2685_v28 = vmax.f32 %v2684_v39, %v2506_v29  ;;  %v3182_v3 = vadd.f32 %v3181_v62, %v9660_v46  ;;  %v2126_v13 = vpop.f32.mrb[224].mxu1  ;;  %v3605_v6 = vmax.f32 %v3179_v20, 0.0 }
 0x35e   :  { %v3608_v0 = vmax.f32 %v3190_v54, 0.0  ;;  %v2127_v49 = vadd.f32 %v2126_v13, %v9434_v47  ;;  %v2128_v18 = vpop.f32.mrb[225].mxu1  ;;  %7405 = vmatprep.mubr.msk.bf16.mxu0 %vm2839_vm2, %v2781_v43 }
 0x35f   :  { %v3606_v60 = vmax.f32 %v3182_v3, 0.0  ;;  %v2129_v16 = vadd.f32 %v2128_v18, %v9438_v4  ;;  %v2130_v12 = vpop.f32.mrb[226].mxu1 }
 0x360   :  { %v9844_v61 = vpack.c.bf16 %v3608_v0, %v3607_v32  ;;  %v2131_v63 = vadd.f32 %v2130_v12, %v9434_v47  ;;  %v2132_v41 = vpop.f32.mrb[227].mxu1  ;;  %v2507_v9 = vmax.f32 %v2127_v49, 0.0 }
 0x361   :  { %v9847_v30 = vpack.c.bf16 %v3606_v60, %v3605_v6  ;;  %v2508_v42 = vmax.f32 %v2129_v16, 0.0  ;;  %v2133_v2 = vadd.f32 %v2132_v41, %v9438_v4  ;;  %v7675_v6 = vld [vmem:[%s11020_s1 + $0x150] ss:$8 sps:$4 sm:$0xff]  }
 0x362   :  { %v2509_v21 = vmax.f32 %v2131_v63, 0.0  ;;  %7449 = vmatprep.subr.bf16.mxu1 %v7675_v6 }
 0x363   :  { %v2686_v51 = vmax.f32 %v2685_v28, %v2508_v42  ;;  %v2510_v15 = vmax.f32 %v2133_v2, 0.0  ;;  %7450 = vmatpush3.bf16.msra.mxu1 %v7675_v6 }
 0x364   :  { %v2782_v31 = vpack.c.bf16 %v2509_v21, %v2507_v9 }
 0x365   :  { %v2687_v40 = vmax.f32 %v2686_v51, %v2510_v15  ;;  %v2136_v27 = vpop.f32.mrb[228].mxu1 }
 0x366   :  { %v2137_v35 = vadd.f32 %v2136_v27, %v9434_v47  ;;  %v2138_v50 = vpop.f32.mrb[229].mxu1  ;;  %7406 = vmatmul.mubr.msk.bf16.gmra.mrb[160].mxu0 %vm2839_vm2, %v2782_v31 }
 0x367   :  { %v2139_v7 = vadd.f32 %v2138_v50, %v9438_v4  ;;  %v2140_v8 = vpop.f32.mrb[230].mxu1  ;;  %v7678_v50 = vld [vmem:[%s11020_s1 + $0x144] ss:$8 sps:$4 sm:$0xff]  }
 0x368   :  { %v2141_v1 = vadd.f32 %v2140_v8, %v9434_v47  ;;  %v2142_v59 = vpop.f32.mrb[231].mxu1  ;;  %v2511_v39 = vmax.f32 %v2137_v35, 0.0  ;;  %v7676_v35 = vld [vmem:[%s11020_s1 + $0x140] ss:$8 sps:$4 sm:$0xff]   ;;  %3879 = vmatprep.subr.bf16.mxu0 %v7678_v50 }
 0x369   :  { %v2512_v23 = vmax.f32 %v2139_v7, 0.0  ;;  %v2143_v33 = vadd.f32 %v2142_v59, %v9438_v4  ;;  %v7355_v34 = vpop.f32.mrb[108].mxu0  ;;  %3880 = vmatpush1.bf16.msra.mxu0 %v7676_v35 }
 0x36a   :  { %v2513_v29 = vmax.f32 %v2141_v1, 0.0  ;;  %v3203_v20 = vadd.f32 %v7355_v34, %v9660_v46  ;;  %v3194_v11 = vpop.f32.mrb[109].mxu0 }
 0x36b   :  { %v2688_v43 = vmax.f32 %v2687_v40, %v2512_v23  ;;  %v2514_v54 = vmax.f32 %v2143_v33, 0.0  ;;  %v3195_v62 = vadd.f32 %v3194_v11, %v9660_v46  ;;  %v7356_v28 = vpop.f32.mrb[110].mxu0 }
 0x36c   :  { %v2783_v3 = vpack.c.bf16 %v2513_v29, %v2511_v39  ;;  %v3206_v13 = vadd.f32 %v7356_v28, %v9660_v46  ;;  %v3197_v32 = vpop.f32.mrb[111].mxu0  ;;  %v3611_v60 = vmax.f32 %v3203_v20, 0.0 }
 0x36d   :  { %v2689_v0 = vmax.f32 %v2688_v43, %v2514_v54  ;;  %v3198_v49 = vadd.f32 %v3197_v32, %v9660_v46  ;;  %v2146_v18 = vpop.f32.mrb[232].mxu1  ;;  %v3609_v41 = vmax.f32 %v3195_v62, 0.0 }
 0x36e   :  { %v3612_v16 = vmax.f32 %v3206_v13, 0.0  ;;  %v2147_v12 = vadd.f32 %v2146_v18, %v9434_v47  ;;  %v2148_v63 = vpop.f32.mrb[233].mxu1  ;;  %7409 = vmatprep.mubr.msk.bf16.mxu0 %vm2839_vm2, %v2783_v3 }
 0x36f   :  { %v3610_v42 = vmax.f32 %v3198_v49, 0.0  ;;  %v2149_v2 = vadd.f32 %v2148_v63, %v9438_v4  ;;  %v2150_v9 = vpop.f32.mrb[234].mxu1 }
 0x370   :  { %v9865_v21 = vpack.c.bf16 %v3612_v16, %v3611_v60  ;;  %v2151_v51 = vadd.f32 %v2150_v9, %v9434_v47  ;;  %v2152_v15 = vpop.f32.mrb[235].mxu1  ;;  %v2515_v7 = vmax.f32 %v2147_v12, 0.0 }
 0x371   :  { %v9868_v31 = vpack.c.bf16 %v3610_v42, %v3609_v41  ;;  %v2516_v40 = vmax.f32 %v2149_v2, 0.0  ;;  %v2153_v27 = vadd.f32 %v2152_v15, %v9438_v4 }
 0x372   :  { %v2517_v8 = vmax.f32 %v2151_v51, 0.0 }
 0x373   :  { %v2690_v1 = vmax.f32 %v2689_v0, %v2516_v40  ;;  %v2518_v59 = vmax.f32 %v2153_v27, 0.0 }
 0x374   :  { %v2784_v23 = vpack.c.bf16 %v2517_v8, %v2515_v7 }
 0x375   :  { %v2691_v33 = vmax.f32 %v2690_v1, %v2518_v59  ;;  %v2156_v34 = vpop.f32.mrb[236].mxu1 }
 0x376   :  { %v2157_v39 = vadd.f32 %v2156_v34, %v9434_v47  ;;  %v2158_v29 = vpop.f32.mrb[237].mxu1  ;;  %7410 = vmatmul.mubr.msk.bf16.gmra.mrb[164].mxu0 %vm2839_vm2, %v2784_v23 }
 0x377   :  { %v2159_v20 = vadd.f32 %v2158_v29, %v9438_v4  ;;  %v2160_v11 = vpop.f32.mrb[238].mxu1 }
 0x378   :  { %v2161_v43 = vadd.f32 %v2160_v11, %v9434_v47  ;;  %v2162_v54 = vpop.f32.mrb[239].mxu1  ;;  %v2519_v13 = vmax.f32 %v2157_v39, 0.0 }
 0x379   :  { %v2520_v62 = vmax.f32 %v2159_v20, 0.0  ;;  %v2163_v28 = vadd.f32 %v2162_v54, %v9438_v4  ;;  %v7359_v3 = vpop.f32.mrb[112].mxu0 }
 0x37a   :  { %v2521_v32 = vmax.f32 %v2161_v43, 0.0  ;;  %v3219_v0 = vadd.f32 %v7359_v3, %v9660_v46  ;;  %v3210_v49 = vpop.f32.mrb[113].mxu0 }
 0x37b   :  { %v2692_v18 = vmax.f32 %v2691_v33, %v2520_v62  ;;  %v2522_v6 = vmax.f32 %v2163_v28, 0.0  ;;  %v3211_v60 = vadd.f32 %v3210_v49, %v9660_v46  ;;  %v7360_v16 = vpop.f32.mrb[114].mxu0 }
 0x37c   :  { %v2785_v12 = vpack.c.bf16 %v2521_v32, %v2519_v13  ;;  %v3222_v63 = vadd.f32 %v7360_v16, %v9660_v46  ;;  %v3213_v41 = vpop.f32.mrb[115].mxu0  ;;  %v3615_v51 = vmax.f32 %v3219_v0, 0.0 }
 0x37d   :  { %v2693_v42 = vmax.f32 %v2692_v18, %v2522_v6  ;;  %v3214_v2 = vadd.f32 %v3213_v41, %v9660_v46  ;;  %v2166_v9 = vpop.f32.mrb[240].mxu1  ;;  %v3613_v35 = vmax.f32 %v3211_v60, 0.0 }
 0x37e   :  { %v3616_v15 = vmax.f32 %v3222_v63, 0.0  ;;  %v2167_v40 = vadd.f32 %v2166_v9, %v9434_v47  ;;  %v2168_v27 = vpop.f32.mrb[241].mxu1  ;;  %7413 = vmatprep.mubr.msk.bf16.mxu0 %vm2839_vm2, %v2785_v12 }
 0x37f   :  { %v3614_v50 = vmax.f32 %v3214_v2, 0.0  ;;  %v2169_v7 = vadd.f32 %v2168_v27, %v9438_v4  ;;  %v2170_v8 = vpop.f32.mrb[242].mxu1 }
 0x380   :  { %v9889_v1 = vpack.c.bf16 %v3616_v15, %v3615_v51  ;;  %v2171_v59 = vadd.f32 %v2170_v8, %v9434_v47  ;;  %v2172_v23 = vpop.f32.mrb[243].mxu1  ;;  %v2523_v29 = vmax.f32 %v2167_v40, 0.0 }
 0x381   :  { %v9892_v33 = vpack.c.bf16 %v3614_v50, %v3613_v35  ;;  %v2524_v34 = vmax.f32 %v2169_v7, 0.0  ;;  %v2173_v39 = vadd.f32 %v2172_v23, %v9438_v4 }
 0x382   :  { %v2525_v20 = vmax.f32 %v2171_v59, 0.0 }
 0x383   :  { %v2694_v11 = vmax.f32 %v2693_v42, %v2524_v34  ;;  %v2526_v43 = vmax.f32 %v2173_v39, 0.0 }
 0x384   :  { %v2786_v54 = vpack.c.bf16 %v2525_v20, %v2523_v29 }
 0x385   :  { %v2695_v62 = vmax.f32 %v2694_v11, %v2526_v43  ;;  %v2176_v28 = vpop.f32.mrb[244].mxu1 }
 0x386   :  { %v2177_v3 = vadd.f32 %v2176_v28, %v9434_v47  ;;  %v2178_v13 = vpop.f32.mrb[245].mxu1  ;;  %7414 = vmatmul.mubr.msk.bf16.gmra.mrb[168].mxu0 %vm2839_vm2, %v2786_v54 }
 0x387   :  { %v2696_v32 = vrot.slane %v2695_v62, 4  ;;  %v2179_v0 = vadd.f32 %v2178_v13, %v9438_v4  ;;  %v2180_v49 = vpop.f32.mrb[246].mxu1 }
 0x388   :  { %v2181_v18 = vadd.f32 %v2180_v49, %v9434_v47  ;;  %v2182_v6 = vpop.f32.mrb[247].mxu1  ;;  %v2527_v63 = vmax.f32 %v2177_v3, 0.0 }
 0x389   :  { %v2697_v60 = vmax.f32 %v2695_v62, %v2696_v32  ;;  %v2183_v16 = vadd.f32 %v2182_v6, %v9438_v4  ;;  %v7363_v12 = vpop.f32.mrb[116].mxu0  ;;  %v2528_v51 = vmax.f32 %v2179_v0, 0.0 }
 0x38a   :  { %v2529_v41 = vmax.f32 %v2181_v18, 0.0  ;;  %v3235_v42 = vadd.f32 %v7363_v12, %v9660_v46  ;;  %v3226_v2 = vpop.f32.mrb[117].mxu0 }
 0x38b   :  { %v2698_v9 = vrot.slane %v2697_v60, 2  ;;  %v2530_v15 = vmax.f32 %v2183_v16, 0.0  ;;  %v3227_v40 = vadd.f32 %v3226_v2, %v9660_v46  ;;  %v7364_v27 = vpop.f32.mrb[118].mxu0 }
 0x38c   :  { %v2787_v35 = vpack.c.bf16 %v2529_v41, %v2527_v63  ;;  %v3238_v50 = vadd.f32 %v7364_v27, %v9660_v46  ;;  %v3229_v7 = vpop.f32.mrb[119].mxu0  ;;  %v3619_v39 = vmax.f32 %v3235_v42, 0.0 }
 0x38d   :  { %v2699_v8 = vmax.f32 %v2697_v60, %v2698_v9  ;;  %v2702_v59 = vmax.f32 %v2528_v51, %v2530_v15  ;;  %v3230_v23 = vadd.f32 %v3229_v7, %v9660_v46  ;;  %v2186_v34 = vpop.f32.mrb[248].mxu1  ;;  %v3617_v54 = vmax.f32 %v3227_v40, 0.0 }
 0x38e   :  { %v3620_v29 = vmax.f32 %v3238_v50, 0.0  ;;  %v2187_v20 = vadd.f32 %v2186_v34, %v9434_v47  ;;  %v2188_v11 = vpop.f32.mrb[249].mxu1  ;;  %7417 = vmatprep.mubr.msk.bf16.mxu0 %vm2839_vm2, %v2787_v35 }
 0x38f   :  { %v2700_v43 = vrot.slane %v2699_v8, 1  ;;  %v3618_v62 = vmax.f32 %v3230_v23, 0.0  ;;  %v2189_v28 = vadd.f32 %v2188_v11, %v9438_v4  ;;  %v2190_v3 = vpop.f32.mrb[250].mxu1 }
 0x390   :  { %v9907_v13 = vpack.c.bf16 %v3620_v29, %v3619_v39  ;;  %v2191_v32 = vadd.f32 %v2190_v3, %v9434_v47  ;;  %v2192_v0 = vpop.f32.mrb[251].mxu1  ;;  %v2531_v16 = vmax.f32 %v2187_v20, 0.0 }
 0x391   :  { %v9910_v49 = vpack.c.bf16 %v3618_v62, %v3617_v54  ;;  %v2532_v18 = vmax.f32 %v2189_v28, 0.0  ;;  %v2193_v6 = vadd.f32 %v2192_v0, %v9438_v4  ;;  %v2701_v60 = vmax.f32 %v2699_v8, %v2700_v43 }
 0x392   :  { %v2533_v12 = vmax.f32 %v2191_v32, 0.0 }
 0x393   :  { %v2703_v63 = vmax.f32 %v2702_v59, %v2532_v18  ;;  %v2534_v41 = vmax.f32 %v2193_v6, 0.0  ;;  %v9915_v42 = vsel %vm6145_vm4, %v2701_v60, %v9741_v36 }
 0x394   :  { %v2788_v2 = vpack.c.bf16 %v2533_v12, %v2531_v16 }
 0x395   :  { %v2704_v9 = vmax.f32 %v2703_v63, %v2534_v41  ;;  %v2196_v51 = vpop.f32.mrb[252].mxu1 }
 0x396   :  { %v2197_v15 = vadd.f32 %v2196_v51, %v9434_v47  ;;  %v2198_v40 = vpop.f32.mrb[253].mxu1  ;;  %7418 = vmatmul.mubr.msk.bf16.gmra.mrb[172].mxu0 %vm2839_vm2, %v2788_v2 }
 0x397   :  { %v2199_v27 = vadd.f32 %v2198_v40, %v9438_v4  ;;  %v2200_v35 = vpop.f32.mrb[254].mxu1 }
 0x398   :  { %v2201_v50 = vadd.f32 %v2200_v35, %v9434_v47  ;;  %v2202_v7 = vpop.f32.mrb[255].mxu1  ;;  %v2535_v36 = vmax.f32 %v2197_v15, 0.0 }
 0x399   :  { %v2536_v8 = vmax.f32 %v2199_v27, 0.0  ;;  %v2203_v59 = vadd.f32 %v2202_v7, %v9438_v4  ;;  %v7367_v23 = vpop.f32.mrb[120].mxu0 }
 0x39a   :  { %v2537_v34 = vmax.f32 %v2201_v50, 0.0  ;;  %v3251_v39 = vadd.f32 %v7367_v23, %v9660_v46  ;;  %v3242_v29 = vpop.f32.mrb[121].mxu0 }
 0x39b   :  { %v2705_v20 = vmax.f32 %v2704_v9, %v2536_v8  ;;  %v2538_v11 = vmax.f32 %v2203_v59, 0.0  ;;  %v3243_v43 = vadd.f32 %v3242_v29, %v9660_v46  ;;  %v7368_v54 = vpop.f32.mrb[122].mxu0 }
 0x39c   :  { %v2789_v62 = vpack.c.bf16 %v2537_v34, %v2535_v36  ;;  %v3254_v28 = vadd.f32 %v7368_v54, %v9660_v46  ;;  %v3245_v3 = vpop.f32.mrb[123].mxu0  ;;  %v3623_v6 = vmax.f32 %v3251_v39, 0.0 }
 0x39d   :  { %v2706_v32 = vmax.f32 %v2705_v20, %v2538_v11  ;;  %v3246_v0 = vadd.f32 %v3245_v3, %v9660_v46  ;;  %v2206_v18 = vpop.f32.mrb[0].mxu1  ;;  %v3621_v63 = vmax.f32 %v3243_v43, 0.0 }
 0x39e   :  { %v3624_v60 = vmax.f32 %v3254_v28, 0.0  ;;  %v2207_v16 = vadd.f32 %v2206_v18, %v9434_v47  ;;  %v2208_v12 = vpop.f32.mrb[1].mxu1  ;;  %7421 = vmatprep.mubr.msk.bf16.mxu0 %vm2839_vm2, %v2789_v62 }
 0x39f   :  { %v3622_v41 = vmax.f32 %v3246_v0, 0.0  ;;  %v2209_v2 = vadd.f32 %v2208_v12, %v9438_v4  ;;  %v2210_v9 = vpop.f32.mrb[2].mxu1 }
 0x3a0   :  { %v9929_v51 = vpack.c.bf16 %v3624_v60, %v3623_v6  ;;  %v2211_v15 = vadd.f32 %v2210_v9, %v9434_v47  ;;  %v2212_v40 = vpop.f32.mrb[3].mxu1  ;;  %v2539_v7 = vmax.f32 %v2207_v16, 0.0 }
 0x3a1   :  { %v9932_v27 = vpack.c.bf16 %v3622_v41, %v3621_v63  ;;  %v2540_v35 = vmax.f32 %v2209_v2, 0.0  ;;  %v2213_v50 = vadd.f32 %v2212_v40, %v9438_v4  ;;  %v7679_v40 = vld [vmem:[%s11020_s1 + $0x160] ss:$8 sps:$4 sm:$0xff]  }
 0x3a2   :  { %v2541_v8 = vmax.f32 %v2211_v15, 0.0  ;;  %7451 = vmatprep.subr.bf16.mxu1 %v7679_v40 }
 0x3a3   :  { %v2707_v59 = vmax.f32 %v2706_v32, %v2540_v35  ;;  %v2542_v23 = vmax.f32 %v2213_v50, 0.0  ;;  %7452 = vmatpush3.bf16.msra.mxu1 %v7679_v40 }
 0x3a4   :  { %v2790_v36 = vpack.c.bf16 %v2541_v8, %v2539_v7 }
 0x3a5   :  { %v2708_v34 = vmax.f32 %v2707_v59, %v2542_v23  ;;  %v2216_v39 = vpop.f32.mrb[4].mxu1 }
 0x3a6   :  { %v2217_v29 = vadd.f32 %v2216_v39, %v9434_v47  ;;  %v2218_v20 = vpop.f32.mrb[5].mxu1  ;;  %7422 = vmatmul.mubr.msk.bf16.gmra.mrb[176].mxu0 %vm2839_vm2, %v2790_v36 }
 0x3a7   :  { %v2219_v11 = vadd.f32 %v2218_v20, %v9438_v4  ;;  %v2220_v43 = vpop.f32.mrb[6].mxu1 }
 0x3a8   :  { %v2221_v54 = vadd.f32 %v2220_v43, %v9434_v47  ;;  %v2222_v62 = vpop.f32.mrb[7].mxu1  ;;  %v2543_v32 = vmax.f32 %v2217_v29, 0.0 }
 0x3a9   :  { %v2544_v28 = vmax.f32 %v2219_v11, 0.0  ;;  %v2223_v3 = vadd.f32 %v2222_v62, %v9438_v4  ;;  %v7371_v0 = vpop.f32.mrb[124].mxu0 }
 0x3aa   :  { %v2545_v18 = vmax.f32 %v2221_v54, 0.0  ;;  %v3267_v6 = vadd.f32 %v7371_v0, %v9660_v46  ;;  %v3258_v60 = vpop.f32.mrb[125].mxu0 }
 0x3ab   :  { %v2709_v16 = vmax.f32 %v2708_v34, %v2544_v28  ;;  %v2546_v12 = vmax.f32 %v2223_v3, 0.0  ;;  %v3259_v63 = vadd.f32 %v3258_v60, %v9660_v46  ;;  %v7372_v41 = vpop.f32.mrb[126].mxu0 }
 0x3ac   :  { %v2791_v2 = vpack.c.bf16 %v2545_v18, %v2543_v32  ;;  %v3270_v9 = vadd.f32 %v7372_v41, %v9660_v46  ;;  %v3261_v15 = vpop.f32.mrb[127].mxu0  ;;  %v3627_v8 = vmax.f32 %v3267_v6, 0.0 }
 0x3ad   :  { %v2710_v35 = vmax.f32 %v2709_v16, %v2546_v12  ;;  %v3262_v50 = vadd.f32 %v3261_v15, %v9660_v46  ;;  %v2226_v7 = vpop.f32.mrb[8].mxu1  ;;  %v3625_v34 = vmax.f32 %v3259_v63, 0.0 }
 0x3ae   :  { %v3628_v59 = vmax.f32 %v3270_v9, 0.0  ;;  %v2227_v23 = vadd.f32 %v2226_v7, %v9434_v47  ;;  %v2228_v36 = vpop.f32.mrb[9].mxu1  ;;  %7425 = vmatprep.mubr.msk.bf16.mxu0 %vm2839_vm2, %v2791_v2 }
 0x3af   :  { %v3626_v39 = vmax.f32 %v3262_v50, 0.0  ;;  %v2229_v29 = vadd.f32 %v2228_v36, %v9438_v4  ;;  %v2230_v20 = vpop.f32.mrb[10].mxu1 }
 0x3b0   :  { %v9950_v11 = vpack.c.bf16 %v3628_v59, %v3627_v8  ;;  %v2231_v43 = vadd.f32 %v2230_v20, %v9434_v47  ;;  %v2232_v54 = vpop.f32.mrb[11].mxu1  ;;  %v2547_v0 = vmax.f32 %v2227_v23, 0.0 }
 0x3b1   :  { %v9953_v62 = vpack.c.bf16 %v3626_v39, %v3625_v34  ;;  %v2548_v28 = vmax.f32 %v2229_v29, 0.0  ;;  %v2233_v3 = vadd.f32 %v2232_v54, %v9438_v4 }
 0x3b2   :  { %v2549_v32 = vmax.f32 %v2231_v43, 0.0 }
 0x3b3   :  { %v2711_v18 = vmax.f32 %v2710_v35, %v2548_v28  ;;  %v2550_v6 = vmax.f32 %v2233_v3, 0.0 }
 0x3b4   :  { %v2792_v60 = vpack.c.bf16 %v2549_v32, %v2547_v0 }
 0x3b5   :  { %v2712_v16 = vmax.f32 %v2711_v18, %v2550_v6  ;;  %v2236_v12 = vpop.f32.mrb[12].mxu1 }
 0x3b6   :  { %v2237_v63 = vadd.f32 %v2236_v12, %v9434_v47  ;;  %v2238_v41 = vpop.f32.mrb[13].mxu1  ;;  %7426 = vmatmul.mubr.msk.bf16.gmra.mrb[180].mxu0 %vm2839_vm2, %v2792_v60 }
 0x3b7   :  { %v2239_v2 = vadd.f32 %v2238_v41, %v9438_v4  ;;  %v2240_v9 = vpop.f32.mrb[14].mxu1 }
 0x3b8   :  { %v2241_v15 = vadd.f32 %v2240_v9, %v9434_v47  ;;  %v2242_v40 = vpop.f32.mrb[15].mxu1  ;;  %v2551_v35 = vmax.f32 %v2237_v63, 0.0 }
 0x3b9   :  { %v2552_v50 = vmax.f32 %v2239_v2, 0.0  ;;  %v2243_v7 = vadd.f32 %v2242_v40, %v9438_v4  ;;  %v7375_v8 = vpop.f32.mrb[128].mxu0 }
 0x3ba   :  { %v2553_v59 = vmax.f32 %v2241_v15, 0.0  ;;  %v3283_v23 = vadd.f32 %v7375_v8, %v9660_v46  ;;  %v3274_v36 = vpop.f32.mrb[129].mxu0 }
 0x3bb   :  { %v2713_v34 = vmax.f32 %v2712_v16, %v2552_v50  ;;  %v2554_v39 = vmax.f32 %v2243_v7, 0.0  ;;  %v3275_v29 = vadd.f32 %v3274_v36, %v9660_v46  ;;  %v7376_v20 = vpop.f32.mrb[130].mxu0 }
 0x3bc   :  { %v2793_v43 = vpack.c.bf16 %v2553_v59, %v2551_v35  ;;  %v3286_v54 = vadd.f32 %v7376_v20, %v9660_v46  ;;  %v3277_v28 = vpop.f32.mrb[131].mxu0  ;;  %v3631_v18 = vmax.f32 %v3283_v23, 0.0 }
 0x3bd   :  { %v2714_v3 = vmax.f32 %v2713_v34, %v2554_v39  ;;  %v3278_v0 = vadd.f32 %v3277_v28, %v9660_v46  ;;  %v2246_v32 = vpop.f32.mrb[16].mxu1  ;;  %v3629_v16 = vmax.f32 %v3275_v29, 0.0 }
 0x3be   :  { %v3632_v6 = vmax.f32 %v3286_v54, 0.0  ;;  %v2247_v60 = vadd.f32 %v2246_v32, %v9434_v47  ;;  %v2248_v12 = vpop.f32.mrb[17].mxu1  ;;  %7429 = vmatprep.mubr.msk.bf16.mxu0 %vm2839_vm2, %v2793_v43 }
 0x3bf   :  { %v3630_v63 = vmax.f32 %v3278_v0, 0.0  ;;  %v2249_v41 = vadd.f32 %v2248_v12, %v9438_v4  ;;  %v2250_v2 = vpop.f32.mrb[18].mxu1 }
 0x3c0   :  { %v9968_v9 = vpack.c.bf16 %v3632_v6, %v3631_v18  ;;  %v2251_v15 = vadd.f32 %v2250_v2, %v9434_v47  ;;  %v2252_v40 = vpop.f32.mrb[19].mxu1  ;;  %v2555_v35 = vmax.f32 %v2247_v60, 0.0 }
 0x3c1   :  { %v9971_v50 = vpack.c.bf16 %v3630_v63, %v3629_v16  ;;  %v2556_v7 = vmax.f32 %v2249_v41, 0.0  ;;  %v2253_v8 = vadd.f32 %v2252_v40, %v9438_v4 }
 0x3c2   :  { %v2557_v59 = vmax.f32 %v2251_v15, 0.0 }
 0x3c3   :  { %v2715_v23 = vmax.f32 %v2714_v3, %v2556_v7  ;;  %v2558_v36 = vmax.f32 %v2253_v8, 0.0 }
 0x3c4   :  { %v2794_v34 = vpack.c.bf16 %v2557_v59, %v2555_v35 }
 0x3c5   :  { %v2716_v39 = vmax.f32 %v2715_v23, %v2558_v36  ;;  %v2256_v29 = vpop.f32.mrb[20].mxu1 }
 0x3c6   :  { %v2257_v20 = vadd.f32 %v2256_v29, %v9434_v47  ;;  %v2258_v43 = vpop.f32.mrb[21].mxu1  ;;  %7430 = vmatmul.mubr.msk.bf16.gmra.mrb[184].mxu0 %vm2839_vm2, %v2794_v34 }
 0x3c7   :  { %v2259_v54 = vadd.f32 %v2258_v43, %v9438_v4  ;;  %v2260_v28 = vpop.f32.mrb[22].mxu1 }
 0x3c8   :  { %v2261_v0 = vadd.f32 %v2260_v28, %v9434_v47  ;;  %v2262_v32 = vpop.f32.mrb[23].mxu1  ;;  %v2559_v3 = vmax.f32 %v2257_v20, 0.0 }
 0x3c9   :  { %v2560_v18 = vmax.f32 %v2259_v54, 0.0  ;;  %v2263_v6 = vadd.f32 %v2262_v32, %v9438_v4  ;;  %v7379_v60 = vpop.f32.mrb[132].mxu0 }
 0x3ca   :  { %v2561_v12 = vmax.f32 %v2261_v0, 0.0  ;;  %v3299_v16 = vadd.f32 %v7379_v60, %v9660_v46  ;;  %v3290_v63 = vpop.f32.mrb[133].mxu0 }
 0x3cb   :  { %v2717_v41 = vmax.f32 %v2716_v39, %v2560_v18  ;;  %v2562_v2 = vmax.f32 %v2263_v6, 0.0  ;;  %v3291_v15 = vadd.f32 %v3290_v63, %v9660_v46  ;;  %v7380_v40 = vpop.f32.mrb[134].mxu0 }
 0x3cc   :  { %v2795_v7 = vpack.c.bf16 %v2561_v12, %v2559_v3  ;;  %v3302_v8 = vadd.f32 %v7380_v40, %v9660_v46  ;;  %v3293_v35 = vpop.f32.mrb[135].mxu0  ;;  %v3635_v34 = vmax.f32 %v3299_v16, 0.0 }
 0x3cd   :  { %v2718_v59 = vmax.f32 %v2717_v41, %v2562_v2  ;;  %v3294_v23 = vadd.f32 %v3293_v35, %v9660_v46  ;;  %v2266_v36 = vpop.f32.mrb[24].mxu1  ;;  %v3633_v39 = vmax.f32 %v3291_v15, 0.0 }
 0x3ce   :  { %v3636_v29 = vmax.f32 %v3302_v8, 0.0  ;;  %v2267_v20 = vadd.f32 %v2266_v36, %v9434_v47  ;;  %v2268_v43 = vpop.f32.mrb[25].mxu1  ;;  %7433 = vmatprep.mubr.msk.bf16.mxu0 %vm2839_vm2, %v2795_v7 }
 0x3cf   :  { %v3634_v54 = vmax.f32 %v3294_v23, 0.0  ;;  %v2269_v28 = vadd.f32 %v2268_v43, %v9438_v4  ;;  %v2270_v0 = vpop.f32.mrb[26].mxu1 }
 0x3d0   :  { %v9986_v32 = vpack.c.bf16 %v3636_v29, %v3635_v34  ;;  %v2271_v18 = vadd.f32 %v2270_v0, %v9434_v47  ;;  %v2272_v6 = vpop.f32.mrb[27].mxu1  ;;  %v2563_v16 = vmax.f32 %v2267_v20, 0.0 }
 0x3d1   :  { %v9989_v60 = vpack.c.bf16 %v3634_v54, %v3633_v39  ;;  %v2564_v3 = vmax.f32 %v2269_v28, 0.0  ;;  %v2273_v12 = vadd.f32 %v2272_v6, %v9438_v4 }
 0x3d2   :  { %v2565_v63 = vmax.f32 %v2271_v18, 0.0 }
 0x3d3   :  { %v2719_v41 = vmax.f32 %v2718_v59, %v2564_v3  ;;  %v2566_v2 = vmax.f32 %v2273_v12, 0.0 }
 0x3d4   :  { %v2796_v40 = vpack.c.bf16 %v2565_v63, %v2563_v16 }
 0x3d5   :  { %v2720_v15 = vmax.f32 %v2719_v41, %v2566_v2  ;;  %v2276_v7 = vpop.f32.mrb[28].mxu1 }
 0x3d6   :  { %v2277_v8 = vadd.f32 %v2276_v7, %v9434_v47  ;;  %v2278_v35 = vpop.f32.mrb[29].mxu1  ;;  %7434 = vmatmul.mubr.msk.bf16.gmra.mrb[188].mxu0 %vm2839_vm2, %v2796_v40 }
 0x3d7   :  { %v2279_v23 = vadd.f32 %v2278_v35, %v9438_v4  ;;  %v2280_v36 = vpop.f32.mrb[30].mxu1 }
 0x3d8   :  { %v2281_v34 = vadd.f32 %v2280_v36, %v9434_v47  ;;  %v2282_v29 = vpop.f32.mrb[31].mxu1  ;;  %v2567_v59 = vmax.f32 %v2277_v8, 0.0 }
 0x3d9   :  { %v2568_v43 = vmax.f32 %v2279_v23, 0.0  ;;  %v2283_v20 = vadd.f32 %v2282_v29, %v9438_v4  ;;  %v7383_v39 = vpop.f32.mrb[136].mxu0 }
 0x3da   :  { %v2569_v54 = vmax.f32 %v2281_v34, 0.0  ;;  %v3315_v28 = vadd.f32 %v7383_v39, %v9660_v46  ;;  %v3306_v0 = vpop.f32.mrb[137].mxu0 }
 0x3db   :  { %v2721_v18 = vmax.f32 %v2720_v15, %v2568_v43  ;;  %v2570_v6 = vmax.f32 %v2283_v20, 0.0  ;;  %v3307_v3 = vadd.f32 %v3306_v0, %v9660_v46  ;;  %v7384_v12 = vpop.f32.mrb[138].mxu0 }
 0x3dc   :  { %v2797_v16 = vpack.c.bf16 %v2569_v54, %v2567_v59  ;;  %v3318_v63 = vadd.f32 %v7384_v12, %v9660_v46  ;;  %v3309_v41 = vpop.f32.mrb[139].mxu0  ;;  %v3639_v35 = vmax.f32 %v3315_v28, 0.0 }
 0x3dd   :  { %v2722_v2 = vmax.f32 %v2721_v18, %v2570_v6  ;;  %v3310_v40 = vadd.f32 %v3309_v41, %v9660_v46  ;;  %v2286_v7 = vpop.f32.mrb[32].mxu1  ;;  %v3637_v15 = vmax.f32 %v3307_v3, 0.0 }
 0x3de   :  { %v3640_v23 = vmax.f32 %v3318_v63, 0.0  ;;  %v2287_v8 = vadd.f32 %v2286_v7, %v9434_v47  ;;  %v2288_v36 = vpop.f32.mrb[33].mxu1  ;;  %7437 = vmatprep.mubr.msk.bf16.mxu0 %vm2839_vm2, %v2797_v16 }
 0x3df   :  { %v3638_v34 = vmax.f32 %v3310_v40, 0.0  ;;  %v2289_v29 = vadd.f32 %v2288_v36, %v9438_v4  ;;  %v2290_v43 = vpop.f32.mrb[34].mxu1 }
 0x3e0   :  { %v10004_v20 = vpack.c.bf16 %v3640_v23, %v3639_v35  ;;  %v2291_v39 = vadd.f32 %v2290_v43, %v9434_v47  ;;  %v2292_v59 = vpop.f32.mrb[35].mxu1  ;;  %v2571_v18 = vmax.f32 %v2287_v8, 0.0 }
 0x3e1   :  { %v10007_v54 = vpack.c.bf16 %v3638_v34, %v3637_v15  ;;  %v2572_v0 = vmax.f32 %v2289_v29, 0.0  ;;  %v2293_v28 = vadd.f32 %v2292_v59, %v9438_v4 }
 0x3e2   :  { %v2573_v6 = vmax.f32 %v2291_v39, 0.0 }
 0x3e3   :  { %v2723_v12 = vmax.f32 %v2722_v2, %v2572_v0  ;;  %v2574_v63 = vmax.f32 %v2293_v28, 0.0 }
 0x3e4   :  { %v2798_v16 = vpack.c.bf16 %v2573_v6, %v2571_v18 }
 0x3e5   :  { %v2724_v3 = vmax.f32 %v2723_v12, %v2574_v63  ;;  %v2296_v41 = vpop.f32.mrb[36].mxu1 }
 0x3e6   :  { %v2297_v40 = vadd.f32 %v2296_v41, %v9434_v47  ;;  %v2298_v7 = vpop.f32.mrb[37].mxu1  ;;  %7438 = vmatmul.mubr.msk.bf16.gmra.mrb[192].mxu0 %vm2839_vm2, %v2798_v16  ;;  %v7680_v41 = vld [vmem:[%s11020_s1 + $0x170] ss:$8 sps:$4 sm:$0xff]  }
 0x3e7   :  { %v2299_v35 = vadd.f32 %v2298_v7, %v9438_v4  ;;  %v2300_v23 = vpop.f32.mrb[38].mxu1  ;;  %7453 = vmatprep.subr.bf16.mxu1 %v7680_v41 }
 0x3e8   :  { %v2301_v36 = vadd.f32 %v2300_v23, %v9434_v47  ;;  %v2302_v15 = vpop.f32.mrb[39].mxu1  ;;  %v2575_v2 = vmax.f32 %v2297_v40, 0.0  ;;  %7454 = vmatpush3.bf16.msra.mxu1 %v7680_v41 }
 0x3e9   :  { %v2576_v34 = vmax.f32 %v2299_v35, 0.0  ;;  %v2303_v8 = vadd.f32 %v2302_v15, %v9438_v4  ;;  %v7387_v29 = vpop.f32.mrb[140].mxu0 }
 0x3ea   :  { %v2577_v43 = vmax.f32 %v2301_v36, 0.0  ;;  %v3331_v39 = vadd.f32 %v7387_v29, %v9660_v46  ;;  %v3322_v59 = vpop.f32.mrb[141].mxu0 }
 0x3eb   :  { %v2725_v0 = vmax.f32 %v2724_v3, %v2576_v34  ;;  %v2578_v28 = vmax.f32 %v2303_v8, 0.0  ;;  %v3323_v18 = vadd.f32 %v3322_v59, %v9660_v46  ;;  %v7388_v6 = vpop.f32.mrb[142].mxu0 }
 0x3ec   :  { %v2799_v12 = vpack.c.bf16 %v2577_v43, %v2575_v2  ;;  %v3334_v63 = vadd.f32 %v7388_v6, %v9660_v46  ;;  %v3325_v16 = vpop.f32.mrb[143].mxu0  ;;  %v3643_v23 = vmax.f32 %v3331_v39, 0.0 }
 0x3ed   :  { %v2726_v7 = vmax.f32 %v2725_v0, %v2578_v28  ;;  %v3326_v40 = vadd.f32 %v3325_v16, %v9660_v46  ;;  %v2306_v35 = vpop.f32.mrb[40].mxu1  ;;  %v3641_v34 = vmax.f32 %v3323_v18, 0.0 }
 0x3ee   :  { %v3644_v36 = vmax.f32 %v3334_v63, 0.0  ;;  %v2307_v3 = vadd.f32 %v2306_v35, %v9434_v47  ;;  %v2308_v15 = vpop.f32.mrb[41].mxu1  ;;  %7441 = vmatprep.mubr.msk.bf16.mxu0 %vm2839_vm2, %v2799_v12 }
 0x3ef   :  { %v3642_v8 = vmax.f32 %v3326_v40, 0.0  ;;  %v2309_v29 = vadd.f32 %v2308_v15, %v9438_v4  ;;  %v2310_v2 = vpop.f32.mrb[42].mxu1 }
 0x3f0   :  { %v10025_v43 = vpack.c.bf16 %v3644_v36, %v3643_v23  ;;  %v2311_v59 = vadd.f32 %v2310_v2, %v9434_v47  ;;  %v2312_v0 = vpop.f32.mrb[43].mxu1  ;;  %v2579_v63 = vmax.f32 %v2307_v3, 0.0 }
 0x3f1   :  { %v10028_v28 = vpack.c.bf16 %v3642_v8, %v3641_v34  ;;  %v2580_v39 = vmax.f32 %v2309_v29, 0.0  ;;  %v2313_v6 = vadd.f32 %v2312_v0, %v9438_v4 }
 0x3f2   :  { %11192 = vst [vmem:[#allocation25_spill] sm:$0xff] %v10025_v43  ;;  %v2581_v16 = vmax.f32 %v2311_v59, 0.0 }
 0x3f3   :  { %v2727_v12 = vmax.f32 %v2726_v7, %v2580_v39  ;;  %v2582_v35 = vmax.f32 %v2313_v6, 0.0 }
 0x3f4   :  { %v2800_v18 = vpack.c.bf16 %v2581_v16, %v2579_v63 }
 0x3f5   :  { %v2728_v40 = vmax.f32 %v2727_v12, %v2582_v35  ;;  %v2316_v55 = vpop.f32.mrb[44].mxu1 }
 0x3f6   :  { %v2317_v15 = vadd.f32 %v2316_v55, %v9434_v47  ;;  %v2318_v41 = vpop.f32.mrb[45].mxu1  ;;  %7442 = vmatmul.mubr.msk.bf16.gmra.mrb[196].mxu0 %vm2839_vm2, %v2800_v18 }
 0x3f7   :  { %v2319_v23 = vadd.f32 %v2318_v41, %v9438_v4  ;;  %v2320_v36 = vpop.f32.mrb[46].mxu1 }
 0x3f8   :  { %v2321_v34 = vadd.f32 %v2320_v36, %v9434_v47  ;;  %v2322_v8 = vpop.f32.mrb[47].mxu1  ;;  %v2583_v7 = vmax.f32 %v2317_v15, 0.0 }
 0x3f9   :  { %v2584_v29 = vmax.f32 %v2319_v23, 0.0  ;;  %v2323_v3 = vadd.f32 %v2322_v8, %v9438_v4  ;;  %v7391_v2 = vpop.f32.mrb[144].mxu0 }
 0x3fa   :  { %v2585_v59 = vmax.f32 %v2321_v34, 0.0  ;;  %v3347_v0 = vadd.f32 %v7391_v2, %v9660_v46  ;;  %v3338_v39 = vpop.f32.mrb[145].mxu0 }
 0x3fb   :  { %v2729_v6 = vmax.f32 %v2728_v40, %v2584_v29  ;;  %v2586_v55 = vmax.f32 %v2323_v3, 0.0  ;;  %v3339_v63 = vadd.f32 %v3338_v39, %v9660_v46  ;;  %v7392_v16 = vpop.f32.mrb[146].mxu0 }
 0x3fc   :  { %v2801_v12 = vpack.c.bf16 %v2585_v59, %v2583_v7  ;;  %v3350_v35 = vadd.f32 %v7392_v16, %v9660_v46  ;;  %v3341_v18 = vpop.f32.mrb[147].mxu0  ;;  %v3647_v8 = vmax.f32 %v3347_v0, 0.0 }
 0x3fd   :  { %v2730_v41 = vmax.f32 %v2729_v6, %v2586_v55  ;;  %v3342_v23 = vadd.f32 %v3341_v18, %v9660_v46  ;;  %v2326_v36 = vpop.f32.mrb[48].mxu1  ;;  %v3645_v40 = vmax.f32 %v3339_v63, 0.0 }
 0x3fe   :  { %v3648_v43 = vmax.f32 %v3350_v35, 0.0  ;;  %v2327_v15 = vadd.f32 %v2326_v36, %v9434_v47  ;;  %v2328_v34 = vpop.f32.mrb[49].mxu1  ;;  %7445 = vmatprep.mubr.msk.bf16.mxu0 %vm2839_vm2, %v2801_v12 }
 0x3ff   :  { %v3646_v29 = vmax.f32 %v3342_v23, 0.0  ;;  %v2329_v3 = vadd.f32 %v2328_v34, %v9438_v4  ;;  %v2330_v2 = vpop.f32.mrb[50].mxu1 }
 0x400   :  { %v10043_v7 = vpack.c.bf16 %v3648_v43, %v3647_v8  ;;  %v2331_v59 = vadd.f32 %v2330_v2, %v9434_v47  ;;  %v2332_v39 = vpop.f32.mrb[51].mxu1  ;;  %v2587_v16 = vmax.f32 %v2327_v15, 0.0 }
 0x401   :  { %v10046_v6 = vpack.c.bf16 %v3646_v29, %v3645_v40  ;;  %v2588_v55 = vmax.f32 %v2329_v3, 0.0  ;;  %v2333_v0 = vadd.f32 %v2332_v39, %v9438_v4 }
 0x402   :  { %v2589_v35 = vmax.f32 %v2331_v59, 0.0 }
 0x403   :  { %v2731_v18 = vmax.f32 %v2730_v41, %v2588_v55  ;;  %v2590_v36 = vmax.f32 %v2333_v0, 0.0 }
 0x404   :  { %v2802_v12 = vpack.c.bf16 %v2589_v35, %v2587_v16 }
 0x405   :  { %v2732_v63 = vmax.f32 %v2731_v18, %v2590_v36 }
 0x406   :  { %7446 = vmatmul.mubr.msk.bf16.gmra.mrb[200].mxu0 %vm2839_vm2, %v2802_v12 }
 0x407   :  { %v2733_v23 = vrot.slane %v2732_v63, 4  ;;  %3897 = vmatprep.mubr.bf16.mxu0 %v11191_v52 }
 0x409   :  { %v2734_v43 = vmax.f32 %v2732_v63, %v2733_v23  ;;  %v7395_v8 = vpop.f32.mrb[148].mxu0 }
 0x40a   :  { %v3363_v47 = vadd.f32 %v7395_v8, %v9660_v46  ;;  %v3354_v34 = vpop.f32.mrb[149].mxu0 }
 0x40b   :  { %v2735_v40 = vrot.slane %v2734_v43, 2  ;;  %v3355_v29 = vadd.f32 %v3354_v34, %v9660_v46  ;;  %v7396_v4 = vpop.f32.mrb[150].mxu0 }
 0x40c   :  { %v3366_v15 = vadd.f32 %v7396_v4, %v9660_v46  ;;  %v3357_v41 = vpop.f32.mrb[151].mxu0  ;;  %v3651_v59 = vmax.f32 %v3363_v47, 0.0 }
 0x40d   :  { %v3358_v3 = vadd.f32 %v3357_v41, %v9660_v46  ;;  %v2736_v2 = vmax.f32 %v2734_v43, %v2735_v40  ;;  %v3649_v55 = vmax.f32 %v3355_v29, 0.0 }
 0x40e   :  { %v3652_v39 = vmax.f32 %v3366_v15, 0.0  ;;  %3898 = vmatmul.mubr.bf16.vlgmr.msra.gmra.mrb[204].mxu0 %v9677_v53 }
 0x40f   :  { %v3650_v0 = vmax.f32 %v3358_v3, 0.0  ;;  %v2737_v16 = vrot.slane %v2736_v2, 1  ;;  %3907 = vmatprep.mubr.bf16.mxu0 %v11191_v52 }
 0x410   :  { %v10057_v35 = vpack.c.bf16 %v3652_v39, %v3651_v59 }
 0x411   :  { %v10059_v18 = vpack.c.bf16 %v3650_v0, %v3649_v55  ;;  %v2738_v36 = vmax.f32 %v2736_v2, %v2737_v16  ;;  %v7681_v16 = vld [vmem:[%s11020_s1 + $0x180] ss:$8 sps:$4 sm:$0xff]  }
 0x412   :  { %7455 = vmatprep.subr.bf16.mxu1 %v7681_v16 }
 0x413   :  { %v6156_v12 = vsel %vm6147_vm5, %v2738_v36, %v9915_v42  ;;  %7456 = vmatpush3.bf16.msra.mxu1 %v7681_v16 }
 0x414   :  { %6157 = vrot.lane.b32.xlu0 %v6156_v12, %s7759_s18 }
 0x416   :  { %3908 = vmatmul.mubr.bf16.gmra.mrb[208].mxu0 %v9675_v48 }
 0x417   :  { %3917 = vmatprep.mubr.bf16.mxu0 %v11191_v52 }
 0x419   :  { %v7399_v53 = vpop.f32.mrb[152].mxu0 }
 0x41a   :  { %v3379_v63 = vadd.f32 %v7399_v53, %v9660_v46  ;;  %v3370_v23 = vpop.f32.mrb[153].mxu0 }
 0x41b   :  { %v3371_v43 = vadd.f32 %v3370_v23, %v9660_v46  ;;  %v7400_v8 = vpop.f32.mrb[154].mxu0 }
 0x41c   :  { %v3382_v47 = vadd.f32 %v7400_v8, %v9660_v46  ;;  %v3373_v34 = vpop.f32.mrb[155].mxu0  ;;  %v3655_v29 = vmax.f32 %v3379_v63, 0.0 }
 0x41d   :  { %v3374_v40 = vadd.f32 %v3373_v34, %v9660_v46  ;;  %v3653_v4 = vmax.f32 %v3371_v43, 0.0 }
 0x41e   :  { %v3656_v42 = vmax.f32 %v3382_v47, 0.0  ;;  %3918 = vmatmul.mubr.bf16.gmra.mrb[212].mxu0 %v9708_v24  ;;  %v11193_v47 = vld [vmem:[#allocation19_spill] sm:$0xff] }
 0x41f   :  { %v3654_v48 = vmax.f32 %v3374_v40, 0.0  ;;  %3927 = vmatprep.mubr.bf16.mxu0 %v11191_v52  ;;  %v6435_v34 = vsel %vm6143_vm3, %v11193_v47, %v8581_v17 }
 0x420   :  { %v10071_v15 = vpack.c.bf16 %v3656_v42, %v3655_v29  ;;  %v11194_v29 = vld [vmem:[#allocation58_spill] sm:$0xff] }
 0x421   :  { %v10073_v41 = vpack.c.bf16 %v3654_v48, %v3653_v4  ;;  %v6436_v42 = vsel %vm6145_vm4, %v11194_v29, %v6435_v34 }
 0x426   :  { %3928 = vmatmul.mubr.bf16.gmra.mrb[216].mxu0 %v9705_v10 }
 0x427   :  { %3937 = vmatprep.mubr.bf16.mxu0 %v11191_v52 }
 0x429   :  { %v7403_v3 = vpop.f32.mrb[156].mxu0 }
 0x42a   :  { %v3395_v2 = vadd.f32 %v7403_v3, %v9660_v46  ;;  %v3386_v59 = vpop.f32.mrb[157].mxu0  ;;  %v11195_v3 = vld [vmem:[#allocation23_spill] sm:$0xff] }
 0x42b   :  { %v3387_v39 = vadd.f32 %v3386_v59, %v9660_v46  ;;  %v7404_v55 = vpop.f32.mrb[158].mxu0 }
 0x42c   :  { %v3398_v24 = vadd.f32 %v7404_v55, %v9660_v46  ;;  %v3389_v0 = vpop.f32.mrb[159].mxu0  ;;  %v3659_v12 = vmax.f32 %v3395_v2, 0.0  ;;  %v6437_v2 = vsel %vm6147_vm5, %v11195_v3, %v6436_v42 }
 0x42d   :  { %v3390_v36 = vadd.f32 %v3389_v0, %v9660_v46  ;;  %v3657_v53 = vmax.f32 %v3387_v39, 0.0  ;;  %6438 = vrot.lane.b32.xlu1 %v6437_v2, %s7760_s21  ;;  %s7764_s21 = smov [#allocation2]  }
 0x42e   :  { %v3660_v10 = vmax.f32 %v3398_v24, 0.0  ;;  %3938 = vmatmul.mubr.bf16.gmra.mrb[220].mxu0 %v9736_v58  ;;  %s6763_s22 = sshll.u32 %s7764_s21, 4  ;;  %s6764_s22 = int_to_ptr.vmem [resolvable:$true] %s6763_s22 }
 0x42f   :  { %v3658_v63 = vmax.f32 %v3390_v36, 0.0  ;;  %3947 = vmatprep.mubr.bf16.mxu0 %v11191_v52  ;;  %s7734_s23 = scalar_lea.vmem %s6764_s22, 64  ;;  %p7739_p1 = scmp.lt.s32.totalorder %s6764_s22, %s6764_s22 }
 0x430   :  { %v10086_v23 = vpack.c.bf16 %v3660_v10, %v3659_v12  ;;  %p7735_p0 = scmp.ne.s32.totalorder %s6764_s22, %s7734_s23  ;;  %p7740_p2 = scmp.lt.s32.totalorder %s7734_s23, %s7734_s23 }
 0x431   :  { %v10088_v43 = vpack.c.bf16 %v3658_v63, %v3657_v53 }
 0x432   :  { %p7741_p3 = por %p7740_p2, %p7739_p1 }
 0x434   :  { %p7742_p4 = pnand %p7741_p3, %p7735_p0 }
 0x436   :  { %3948 = vmatmul.mubr.bf16.gmra.mrb[224].mxu0 %v9727_v26 }
 0x437   :  { %3957 = vmatprep.mubr.bf16.mxu0 %v11191_v52 }
 0x439   :  { %v7407_v8 = vpop.f32.mrb[160].mxu0 }
 0x43a   :  { %v3411_v58 = vadd.f32 %v7407_v8, %v9660_v46  ;;  %v3402_v40 = vpop.f32.mrb[161].mxu0 }
 0x43b   :  { %v3403_v4 = vadd.f32 %v3402_v40, %v9660_v46  ;;  %v7408_v48 = vpop.f32.mrb[162].mxu0 }
 0x43c   :  { %v3414_v26 = vadd.f32 %v7408_v48, %v9660_v46  ;;  %v3405_v59 = vpop.f32.mrb[163].mxu0  ;;  %v3663_v17 = vmax.f32 %v3411_v58, 0.0 }
 0x43d   :  { %v3406_v39 = vadd.f32 %v3405_v59, %v9660_v46  ;;  %v3661_v24 = vmax.f32 %v3403_v4, 0.0 }
 0x43e   :  { %v3664_v55 = vmax.f32 %v3414_v26, 0.0  ;;  %3958 = vmatmul.mubr.bf16.gmra.mrb[228].mxu0 %v9761_v19 }
 0x43f   :  { %v3662_v0 = vmax.f32 %v3406_v39, 0.0  ;;  %3967 = vmatprep.mubr.bf16.mxu0 %v11191_v52 }
 0x440   :  { %v10105_v16 = vpack.c.bf16 %v3664_v55, %v3663_v17 }
 0x441   :  { %v10107_v36 = vpack.c.bf16 %v3662_v0, %v3661_v24 }
 0x446   :  { %3968 = vmatmul.mubr.bf16.gmra.mrb[232].mxu0 %v9758_v5 }
 0x447   :  { %3977 = vmatprep.mubr.bf16.mxu0 %v11191_v52 }
 0x449   :  { %v7411_v12 = vpop.f32.mrb[164].mxu0 }
 0x44a   :  { %v3427_v10 = vadd.f32 %v7411_v12, %v9660_v46  ;;  %v3418_v53 = vpop.f32.mrb[165].mxu0 }
 0x44b   :  { %v3419_v63 = vadd.f32 %v3418_v53, %v9660_v46  ;;  %v7412_v8 = vpop.f32.mrb[166].mxu0 }
 0x44c   :  { %v3430_v19 = vadd.f32 %v7412_v8, %v9660_v46  ;;  %v3421_v47 = vpop.f32.mrb[167].mxu0  ;;  %v3667_v58 = vmax.f32 %v3427_v10, 0.0  ;;  %v7682_v10 = vld [vmem:[%s11020_s1 + $0x190] ss:$8 sps:$4 sm:$0xff]  }
 0x44d   :  { %v3422_v34 = vadd.f32 %v3421_v47, %v9660_v46  ;;  %v3665_v29 = vmax.f32 %v3419_v63, 0.0  ;;  %7457 = vmatprep.subr.bf16.mxu1 %v7682_v10  ;;  %v7683_v63 = vld [vmem:[%s11020_s1 + $0x1a0] ss:$8 sps:$4 sm:$0xff]  }
 0x44e   :  { %v3668_v40 = vmax.f32 %v3430_v19, 0.0  ;;  %3978 = vmatmul.mubr.bf16.gmra.mrb[236].mxu0 %v9788_v45  ;;  %7458 = vmatpush3.bf16.msra.mxu1 %v7682_v10 }
 0x44f   :  { %v3666_v5 = vmax.f32 %v3422_v34, 0.0  ;;  %3987 = vmatprep.mubr.bf16.mxu0 %v11191_v52  ;;  %7459 = vmatprep.subr.bf16.mxu1 %v7683_v63 }
 0x450   :  { %v10117_v42 = vpack.c.bf16 %v3668_v40, %v3667_v58 }
 0x451   :  { %v10119_v4 = vpack.c.bf16 %v3666_v5, %v3665_v29  ;;  %v7685_v29 = vld [vmem:[%s11020_s1 + $0x1c0] ss:$8 sps:$4 sm:$0xff]  }
 0x452   :  { %7460 = vmatpush3.bf16.msra.mxu1 %v7683_v63 }
 0x456   :  { %3988 = vmatmul.mubr.bf16.gmra.mrb[240].mxu0 %v9779_v44 }
 0x457   :  { %3997 = vmatprep.mubr.bf16.mxu0 %v11191_v52 }
 0x459   :  { %v7415_v48 = vpop.f32.mrb[168].mxu0 }
 0x45a   :  { %v3443_v3 = vadd.f32 %v7415_v48, %v9660_v46  ;;  %v3434_v2 = vpop.f32.mrb[169].mxu0 }
 0x45b   :  { %v3435_v26 = vadd.f32 %v3434_v2, %v9660_v46  ;;  %v7416_v59 = vpop.f32.mrb[170].mxu0 }
 0x45c   :  { %v3446_v45 = vadd.f32 %v7416_v59, %v9660_v46  ;;  %v3437_v39 = vpop.f32.mrb[171].mxu0  ;;  %v3671_v55 = vmax.f32 %v3443_v3, 0.0 }
 0x45d   :  { %v3438_v17 = vadd.f32 %v3437_v39, %v9660_v46  ;;  %v3669_v0 = vmax.f32 %v3435_v26, 0.0 }
 0x45e   :  { %v3672_v24 = vmax.f32 %v3446_v45, 0.0  ;;  %3998 = vmatmul.mubr.bf16.gmra.mrb[244].mxu0 %v9806_v38  ;;  %v7684_v38 = vld [vmem:[%s11020_s1 + $0x1b0] ss:$8 sps:$4 sm:$0xff]  }
 0x45f   :  { %v3670_v44 = vmax.f32 %v3438_v17, 0.0  ;;  %4007 = vmatprep.mubr.bf16.mxu0 %v11191_v52  ;;  %7461 = vmatprep.subr.bf16.mxu1 %v7684_v38 }
 0x460   :  { %v10129_v12 = vpack.c.bf16 %v3672_v24, %v3671_v55  ;;  %7462 = vmatpush3.bf16.msra.mxu1 %v7684_v38 }
 0x461   :  { %v10134_v53 = vpack.c.bf16 %v3670_v44, %v3669_v0  ;;  %7463 = vmatprep.subr.bf16.mxu1 %v7685_v29 }
 0x464   :  { %7464 = vmatpush3.bf16.msra.mxu1 %v7685_v29 }
 0x465   :  { %6266 = vmatprep.subr.bf16.mxu1 %v11191_v52 }
 0x466   :  { %4008 = vmatmul.mubr.bf16.gmra.mrb[248].mxu0 %v9803_v22 }
 0x467   :  { %4017 = vmatprep.mubr.bf16.mxu0 %v11191_v52 }
 0x469   :  { %v7419_v8 = vpop.f32.mrb[172].mxu0 }
 0x46a   :  { %v3459_v19 = vadd.f32 %v7419_v8, %v9660_v46  ;;  %v3450_v47 = vpop.f32.mrb[173].mxu0 }
 0x46b   :  { %v3451_v34 = vadd.f32 %v3450_v47, %v9660_v46  ;;  %v7420_v58 = vpop.f32.mrb[174].mxu0 }
 0x46c   :  { %v3462_v40 = vadd.f32 %v7420_v58, %v9660_v46  ;;  %v3453_v22 = vpop.f32.mrb[175].mxu0  ;;  %v3675_v48 = vmax.f32 %v3459_v19, 0.0 }
 0x46d   :  { %v3454_v5 = vadd.f32 %v3453_v22, %v9660_v46  ;;  %v3673_v2 = vmax.f32 %v3451_v34, 0.0 }
 0x46e   :  { %v3676_v3 = vmax.f32 %v3462_v40, 0.0  ;;  %4018 = vmatmul.mubr.bf16.gmra.mrb[252].mxu0 %v9830_v25 }
 0x46f   :  { %v3674_v26 = vmax.f32 %v3454_v5, 0.0  ;;  %4027 = vmatprep.mubr.bf16.mxu0 %v11191_v52 }
 0x470   :  { %v10153_v59 = vpack.c.bf16 %v3676_v3, %v3675_v48 }
 0x471   :  { %v10156_v45 = vpack.c.bf16 %v3674_v26, %v3673_v2 }
 0x476   :  { %4028 = vmatmul.mubr.bf16.gmra.mrb[0].mxu0 %v9820_v37 }
 0x477   :  { %4037 = vmatprep.mubr.bf16.mxu0 %v11191_v52 }
 0x479   :  { %v7423_v39 = vpop.f32.mrb[176].mxu0 }
 0x47a   :  { %v3475_v17 = vadd.f32 %v7423_v39, %v9660_v46  ;;  %v3466_v25 = vpop.f32.mrb[177].mxu0 }
 0x47b   :  { %v3467_v55 = vadd.f32 %v3466_v25, %v9660_v46  ;;  %v7424_v24 = vpop.f32.mrb[178].mxu0 }
 0x47c   :  { %v3478_v0 = vadd.f32 %v7424_v24, %v9660_v46  ;;  %v3469_v44 = vpop.f32.mrb[179].mxu0  ;;  %v3679_v63 = vmax.f32 %v3475_v17, 0.0 }
 0x47d   :  { %v3470_v10 = vadd.f32 %v3469_v44, %v9660_v46  ;;  %v3677_v8 = vmax.f32 %v3467_v55, 0.0 }
 0x47e   :  { %v3680_v38 = vmax.f32 %v3478_v0, 0.0  ;;  %4038 = vmatmul.mubr.bf16.gmra.mrb[4].mxu0 %v9847_v30 }
 0x47f   :  { %v3678_v37 = vmax.f32 %v3470_v10, 0.0  ;;  %4047 = vmatprep.mubr.bf16.mxu0 %v11191_v52 }
 0x480   :  { %v10166_v19 = vpack.c.bf16 %v3680_v38, %v3679_v63 }
 0x481   :  { %v10168_v47 = vpack.c.bf16 %v3678_v37, %v3677_v8 }
 0x486   :  { %4048 = vmatmul.mubr.bf16.gmra.mrb[8].mxu0 %v9844_v61 }
 0x487   :  { %4057 = vmatprep.mubr.bf16.mxu0 %v11191_v52 }
 0x489   :  { %v7427_v34 = vpop.f32.mrb[180].mxu0 }
 0x48a   :  { %v3491_v58 = vadd.f32 %v7427_v34, %v9660_v46  ;;  %v3482_v40 = vpop.f32.mrb[181].mxu0 }
 0x48b   :  { %v3483_v22 = vadd.f32 %v3482_v40, %v9660_v46  ;;  %v7428_v29 = vpop.f32.mrb[182].mxu0 }
 0x48c   :  { %v3494_v30 = vadd.f32 %v7428_v29, %v9660_v46  ;;  %v3485_v5 = vpop.f32.mrb[183].mxu0  ;;  %v3683_v3 = vmax.f32 %v3491_v58, 0.0 }
 0x48d   :  { %v3486_v48 = vadd.f32 %v3485_v5, %v9660_v46  ;;  %v3681_v26 = vmax.f32 %v3483_v22, 0.0 }
 0x48e   :  { %v3684_v2 = vmax.f32 %v3494_v30, 0.0  ;;  %4058 = vmatmul.mubr.bf16.gmra.mrb[12].mxu0 %v9868_v31 }
 0x48f   :  { %v3682_v61 = vmax.f32 %v3486_v48, 0.0  ;;  %4067 = vmatprep.mubr.bf16.mxu0 %v11191_v52 }
 0x490   :  { %v10178_v39 = vpack.c.bf16 %v3684_v2, %v3683_v3 }
 0x491   :  { %v10180_v17 = vpack.c.bf16 %v3682_v61, %v3681_v26 }
 0x496   :  { %4068 = vmatmul.mubr.bf16.gmra.mrb[16].mxu0 %v9865_v21 }
 0x497   :  { %4077 = vmatprep.mubr.bf16.mxu0 %v11191_v52 }
 0x499   :  { %v7431_v25 = vpop.f32.mrb[184].mxu0 }
 0x49a   :  { %v3507_v55 = vadd.f32 %v7431_v25, %v9660_v46  ;;  %v3498_v24 = vpop.f32.mrb[185].mxu0 }
 0x49b   :  { %v3499_v0 = vadd.f32 %v3498_v24, %v9660_v46  ;;  %v7432_v44 = vpop.f32.mrb[186].mxu0 }
 0x49c   :  { %v3510_v31 = vadd.f32 %v7432_v44, %v9660_v46  ;;  %v3501_v10 = vpop.f32.mrb[187].mxu0  ;;  %v3687_v38 = vmax.f32 %v3507_v55, 0.0 }
 0x49d   :  { %v3502_v63 = vadd.f32 %v3501_v10, %v9660_v46  ;;  %v3685_v37 = vmax.f32 %v3499_v0, 0.0 }
 0x49e   :  { %v3688_v8 = vmax.f32 %v3510_v31, 0.0  ;;  %4078 = vmatmul.mubr.bf16.gmra.mrb[20].mxu0 %v9892_v33 }
 0x49f   :  { %v3686_v21 = vmax.f32 %v3502_v63, 0.0  ;;  %4087 = vmatprep.mubr.bf16.mxu0 %v11191_v52 }
 0x4a0   :  { %v10190_v34 = vpack.c.bf16 %v3688_v8, %v3687_v38 }
 0x4a1   :  { %v10192_v58 = vpack.c.bf16 %v3686_v21, %v3685_v37 }
 0x4a6   :  { %4088 = vmatmul.mubr.bf16.gmra.mrb[24].mxu0 %v9889_v1 }
 0x4a7   :  { %4097 = vmatprep.mubr.bf16.mxu0 %v11191_v52 }
 0x4a9   :  { %v7435_v40 = vpop.f32.mrb[188].mxu0 }
 0x4aa   :  { %v3523_v22 = vadd.f32 %v7435_v40, %v9660_v46  ;;  %v3514_v29 = vpop.f32.mrb[189].mxu0 }
 0x4ab   :  { %v3515_v30 = vadd.f32 %v3514_v29, %v9660_v46  ;;  %v7436_v5 = vpop.f32.mrb[190].mxu0 }
 0x4ac   :  { %v3526_v33 = vadd.f32 %v7436_v5, %v9660_v46  ;;  %v3517_v48 = vpop.f32.mrb[191].mxu0  ;;  %v3691_v2 = vmax.f32 %v3523_v22, 0.0 }
 0x4ad   :  { %v3518_v3 = vadd.f32 %v3517_v48, %v9660_v46  ;;  %v3689_v61 = vmax.f32 %v3515_v30, 0.0 }
 0x4ae   :  { %v3692_v26 = vmax.f32 %v3526_v33, 0.0  ;;  %4098 = vmatmul.mubr.bf16.gmra.mrb[28].mxu0 %v9910_v49 }
 0x4af   :  { %v3690_v1 = vmax.f32 %v3518_v3, 0.0  ;;  %4107 = vmatprep.mubr.bf16.mxu0 %v11191_v52 }
 0x4b0   :  { %v10202_v25 = vpack.c.bf16 %v3692_v26, %v3691_v2 }
 0x4b1   :  { %v10204_v55 = vpack.c.bf16 %v3690_v1, %v3689_v61 }
 0x4b6   :  { %4108 = vmatmul.mubr.bf16.gmra.mrb[32].mxu0 %v9907_v13 }
 0x4b7   :  { %4117 = vmatprep.mubr.bf16.mxu0 %v11191_v52 }
 0x4b9   :  { %v7439_v24 = vpop.f32.mrb[192].mxu0 }
 0x4ba   :  { %v3539_v0 = vadd.f32 %v7439_v24, %v9660_v46  ;;  %v3530_v44 = vpop.f32.mrb[193].mxu0 }
 0x4bb   :  { %v3531_v31 = vadd.f32 %v3530_v44, %v9660_v46  ;;  %v7440_v10 = vpop.f32.mrb[194].mxu0 }
 0x4bc   :  { %v3542_v49 = vadd.f32 %v7440_v10, %v9660_v46  ;;  %v3533_v63 = vpop.f32.mrb[195].mxu0  ;;  %v3695_v8 = vmax.f32 %v3539_v0, 0.0 }
 0x4bd   :  { %v3534_v38 = vadd.f32 %v3533_v63, %v9660_v46  ;;  %v3693_v21 = vmax.f32 %v3531_v31, 0.0 }
 0x4be   :  { %v3696_v37 = vmax.f32 %v3542_v49, 0.0  ;;  %4118 = vmatmul.mubr.bf16.gmra.mrb[36].mxu0 %v9932_v27  ;;  %v4540_v49 = vsub.s32 3, %v9106_v56 }
 0x4bf   :  { %v3694_v13 = vmax.f32 %v3534_v38, 0.0  ;;  %4127 = vmatprep.mubr.bf16.mxu0 %v11191_v52 }
 0x4c0   :  { %v10214_v40 = vpack.c.bf16 %v3696_v37, %v3695_v8 }
 0x4c1   :  { %v10216_v22 = vpack.c.bf16 %v3694_v13, %v3693_v21 }
 0x4c6   :  { %4128 = vmatmul.mubr.bf16.gmra.mrb[40].mxu0 %v9929_v51 }
 0x4c7   :  { %4137 = vmatprep.mubr.bf16.mxu0 %v11191_v52 }
 0x4c9   :  { %v7443_v29 = vpop.f32.mrb[196].mxu0 }
 0x4ca   :  { %v3555_v30 = vadd.f32 %v7443_v29, %v9660_v46  ;;  %v3546_v5 = vpop.f32.mrb[197].mxu0 }
 0x4cb   :  { %v3547_v33 = vadd.f32 %v3546_v5, %v9660_v46  ;;  %v7444_v48 = vpop.f32.mrb[198].mxu0  ;;  %v11196_v5 = vunpack.c.h.bf16 %v9429_v14 }
 0x4cc   :  { %v3558_v27 = vadd.f32 %v7444_v48, %v9660_v46  ;;  %v3549_v3 = vpop.f32.mrb[199].mxu0  ;;  %v3699_v26 = vmax.f32 %v3555_v30, 0.0 }
 0x4cd   :  { %v3550_v2 = vadd.f32 %v3549_v3, %v9660_v46  ;;  %v3697_v1 = vmax.f32 %v3547_v33, 0.0  ;;  %v10243_v33 = vrot.slane %v11196_v5, %v4540_v49 }
 0x4ce   :  { %v3700_v61 = vmax.f32 %v3558_v27, 0.0  ;;  %4138 = vmatmul.mubr.bf16.gmra.mrb[44].mxu0 %v9953_v62 }
 0x4cf   :  { %v3698_v51 = vmax.f32 %v3550_v2, 0.0  ;;  %4147 = vmatprep.mubr.bf16.mxu0 %v11191_v52 }
 0x4d0   :  { %v10226_v24 = vpack.c.bf16 %v3700_v61, %v3699_v26 }
 0x4d1   :  { %v10228_v0 = vpack.c.bf16 %v3698_v51, %v3697_v1 }
 0x4d6   :  { %4148 = vmatmul.mubr.bf16.gmra.mrb[48].mxu0 %v9950_v11  ;;  %v10239_v11 = vrot.slane %v9111_v57, %v4540_v49 }
 0x4d7   :  { %4157 = vmatprep.mubr.bf16.mxu0 %v11191_v52 }
 0x4d9   :  { %v7447_v44 = vpop.f32.mrb[200].mxu0 }
 0x4da   :  { %v3571_v31 = vadd.f32 %v7447_v44, %v9660_v46  ;;  %v3562_v10 = vpop.f32.mrb[201].mxu0 }
 0x4db   :  { %v3563_v62 = vadd.f32 %v3562_v10, %v9660_v46  ;;  %v7448_v63 = vpop.f32.mrb[202].mxu0 }
 0x4dc   :  { %v3574_v38 = vadd.f32 %v7448_v63, %v9660_v46  ;;  %v3565_v8 = vpop.f32.mrb[203].mxu0  ;;  %v3703_v21 = vmax.f32 %v3571_v31, 0.0 }
 0x4dd   :  { %v3566_v37 = vadd.f32 %v3565_v8, %v9660_v46  ;;  %v3701_v29 = vmax.f32 %v3563_v62, 0.0 }
 0x4de   :  { %v3704_v13 = vmax.f32 %v3574_v38, 0.0  ;;  %4158 = vmatmul.mubr.bf16.gmra.mrb[52].mxu0 %v9971_v50 }
 0x4df   :  { %v3702_v30 = vmax.f32 %v3566_v37, 0.0  ;;  %4167 = vmatprep.mubr.bf16.mxu0 %v11191_v52 }
 0x4e0   :  { %v10246_v48 = vpack.c.bf16 %v3704_v13, %v3703_v21 }
 0x4e1   :  { %v10248_v27 = vpack.c.bf16 %v3702_v30, %v3701_v29  ;;  %v3899_v46 = vpop.f32.mrb[204].mxu0 }
 0x4e2   :  { %v4542_v3 = vadd.f32 %v10239_v11, %v3899_v46  ;;  %v3901_v2 = vpop.f32.mrb[205].mxu0 }
 0x4e3   :  { %v4802_v50 = vadd.f32 %v10243_v33, %v3901_v2  ;;  %v3903_v26 = vpop.f32.mrb[206].mxu0 }
 0x4e4   :  { %v4543_v61 = vadd.f32 %v10239_v11, %v3903_v26  ;;  %v3905_v1 = vpop.f32.mrb[207].mxu0  ;;  %v4670_v14 = vmax.f32 %v4542_v3, 0.0 }
 0x4e5   :  { %6442 = vxpose.xlu1.b32.start [1/16] (narrow) %v4802_v50, 8  ;;  %v4803_v44 = vadd.f32 %v10243_v33, %v3905_v1 }
 0x4e6   :  { %v4671_v51 = vmax.f32 %v4543_v61, 0.0  ;;  %4168 = vmatmul.mubr.bf16.gmra.mrb[56].mxu0 %v9968_v9 }
 0x4e7   :  { %4177 = vmatprep.mubr.bf16.mxu0 %v11191_v52 }
 0x4e8   :  { %v4930_v31 = vpack.c.bf16 %v4671_v51, %v4670_v14 }
 0x4e9   :  { %6443 = vxpose.xlu1.b32.cont [2/16] (narrow) %v4803_v44, 8  ;;  %v3909_v10 = vpop.f32.mrb[208].mxu0 }
 0x4ea   :  { %v4544_v49 = vadd.f32 %v10239_v11, %v3909_v10  ;;  %v3911_v62 = vpop.f32.mrb[209].mxu0  ;;  %7465 = vmatprep.mubr.bf16.mxu1 %v4930_v31 }
 0x4eb   :  { %v4804_v63 = vadd.f32 %v10243_v33, %v3911_v62  ;;  %v3913_v38 = vpop.f32.mrb[210].mxu0 }
 0x4ec   :  { %v4545_v8 = vadd.f32 %v10239_v11, %v3913_v38  ;;  %v3915_v37 = vpop.f32.mrb[211].mxu0  ;;  %v4672_v21 = vmax.f32 %v4544_v49, 0.0 }
 0x4ed   :  { %6444 = vxpose.xlu1.b32.cont [3/16] (narrow) %v4804_v63, 8  ;;  %v4805_v13 = vadd.f32 %v10243_v33, %v3915_v37 }
 0x4ee   :  { %v4673_v9 = vmax.f32 %v4545_v8, 0.0  ;;  %4178 = vmatmul.mubr.bf16.gmra.mrb[60].mxu0 %v9989_v60 }
 0x4ef   :  { %4187 = vmatprep.mubr.bf16.mxu0 %v11191_v52 }
 0x4f0   :  { %v4931_v29 = vpack.c.bf16 %v4673_v9, %v4672_v21 }
 0x4f1   :  { %6445 = vxpose.xlu1.b32.cont [4/16] (narrow) %v4805_v13, 8  ;;  %v3919_v30 = vpop.f32.mrb[212].mxu0 }
 0x4f2   :  { %v4546_v5 = vadd.f32 %v10239_v11, %v3919_v30  ;;  %v3921_v46 = vpop.f32.mrb[213].mxu0  ;;  %7466 = vmatmul.mubr.bf16.vlgmr.msra.gmra.mrb[52].mxu1 %v4931_v29 }
 0x4f3   :  { %v4806_v3 = vadd.f32 %v10243_v33, %v3921_v46  ;;  %v3923_v2 = vpop.f32.mrb[214].mxu0 }
 0x4f4   :  { %v4547_v50 = vadd.f32 %v10239_v11, %v3923_v2  ;;  %v3925_v26 = vpop.f32.mrb[215].mxu0  ;;  %v4674_v61 = vmax.f32 %v4546_v5, 0.0 }
 0x4f5   :  { %6446 = vxpose.xlu1.b32.cont [5/16] (narrow) %v4806_v3, 8  ;;  %v4807_v1 = vadd.f32 %v10243_v33, %v3925_v26 }
 0x4f6   :  { %v4675_v60 = vmax.f32 %v4547_v50, 0.0  ;;  %4188 = vmatmul.mubr.bf16.gmra.mrb[64].mxu0 %v9986_v32 }
 0x4f7   :  { %4197 = vmatprep.mubr.bf16.mxu0 %v11191_v52 }
 0x4f8   :  { %v4932_v14 = vpack.c.bf16 %v4675_v60, %v4674_v61 }
 0x4f9   :  { %6447 = vxpose.xlu1.b32.cont [6/16] (narrow) %v4807_v1, 8  ;;  %v3929_v51 = vpop.f32.mrb[216].mxu0 }
 0x4fa   :  { %v4548_v44 = vadd.f32 %v10239_v11, %v3929_v51  ;;  %v3931_v31 = vpop.f32.mrb[217].mxu0  ;;  %7469 = vmatprep.mubr.bf16.mxu1 %v4932_v14 }
 0x4fb   :  { %v4808_v10 = vadd.f32 %v10243_v33, %v3931_v31  ;;  %v3933_v49 = vpop.f32.mrb[218].mxu0 }
 0x4fc   :  { %v4549_v62 = vadd.f32 %v10239_v11, %v3933_v49  ;;  %v3935_v63 = vpop.f32.mrb[219].mxu0  ;;  %v4676_v38 = vmax.f32 %v4548_v44, 0.0 }
 0x4fd   :  { %6448 = vxpose.xlu1.b32.cont [7/16] (narrow) %v4808_v10, 8  ;;  %v4809_v8 = vadd.f32 %v10243_v33, %v3935_v63 }
 0x4fe   :  { %v4677_v32 = vmax.f32 %v4549_v62, 0.0  ;;  %4198 = vmatmul.mubr.bf16.gmra.mrb[68].mxu0 %v10007_v54 }
 0x4ff   :  { %4207 = vmatprep.mubr.bf16.mxu0 %v11191_v52 }
 0x500   :  { %v4933_v37 = vpack.c.bf16 %v4677_v32, %v4676_v38 }
 0x501   :  { %6449 = vxpose.xlu1.b32.cont [8/16] (narrow) %v4809_v8, 8  ;;  %v3939_v21 = vpop.f32.mrb[220].mxu0 }
 0x502   :  { %v4550_v9 = vadd.f32 %v10239_v11, %v3939_v21  ;;  %v3941_v13 = vpop.f32.mrb[221].mxu0  ;;  %7470 = vmatmul.mubr.bf16.gmra.mrb[56].mxu1 %v4933_v37 }
 0x503   :  { %v4810_v29 = vadd.f32 %v10243_v33, %v3941_v13  ;;  %v3943_v30 = vpop.f32.mrb[222].mxu0  ;;  %v11197_v13 = vld [vmem:[#allocation25_spill] sm:$0xff] }
 0x504   :  { %v4551_v5 = vadd.f32 %v10239_v11, %v3943_v30  ;;  %v3945_v46 = vpop.f32.mrb[223].mxu0  ;;  %v4678_v3 = vmax.f32 %v4550_v9, 0.0 }
 0x505   :  { %6450 = vxpose.xlu1.b32.cont [9/16] (narrow) %v4810_v29, 8  ;;  %v4811_v2 = vadd.f32 %v10243_v33, %v3945_v46 }
 0x506   :  { %v4679_v54 = vmax.f32 %v4551_v5, 0.0  ;;  %4208 = vmatmul.mubr.bf16.gmra.mrb[72].mxu0 %v10004_v20 }
 0x507   :  { %4217 = vmatprep.mubr.bf16.mxu0 %v11191_v52 }
 0x508   :  { %v4934_v50 = vpack.c.bf16 %v4679_v54, %v4678_v3 }
 0x509   :  { %6451 = vxpose.xlu1.b32.cont [10/16] (narrow) %v4811_v2, 8  ;;  %v3949_v26 = vpop.f32.mrb[224].mxu0 }
 0x50a   :  { %v4552_v61 = vadd.f32 %v10239_v11, %v3949_v26  ;;  %v3951_v60 = vpop.f32.mrb[225].mxu0  ;;  %7473 = vmatprep.mubr.bf16.mxu1 %v4934_v50 }
 0x50b   :  { %v4812_v1 = vadd.f32 %v10243_v33, %v3951_v60  ;;  %v3953_v14 = vpop.f32.mrb[226].mxu0 }
 0x50c   :  { %v4553_v51 = vadd.f32 %v10239_v11, %v3953_v14  ;;  %v3955_v44 = vpop.f32.mrb[227].mxu0  ;;  %v4680_v31 = vmax.f32 %v4552_v61, 0.0 }
 0x50d   :  { %6452 = vxpose.xlu1.b32.cont [11/16] (narrow) %v4812_v1, 8  ;;  %v4813_v10 = vadd.f32 %v10243_v33, %v3955_v44 }
 0x50e   :  { %v4681_v20 = vmax.f32 %v4553_v51, 0.0  ;;  %4218 = vmatmul.mubr.bf16.gmra.mrb[76].mxu0 %v10028_v28 }
 0x50f   :  { %4227 = vmatprep.mubr.bf16.mxu0 %v11191_v52 }
 0x510   :  { %v4935_v49 = vpack.c.bf16 %v4681_v20, %v4680_v31 }
 0x511   :  { %6453 = vxpose.xlu1.b32.cont [12/16] (narrow) %v4813_v10, 8  ;;  %v3959_v62 = vpop.f32.mrb[228].mxu0 }
 0x512   :  { %v4554_v63 = vadd.f32 %v10239_v11, %v3959_v62  ;;  %v3961_v38 = vpop.f32.mrb[229].mxu0  ;;  %7474 = vmatmul.mubr.bf16.gmra.mrb[60].mxu1 %v4935_v49 }
 0x513   :  { %v4814_v32 = vadd.f32 %v10243_v33, %v3961_v38  ;;  %v3963_v8 = vpop.f32.mrb[230].mxu0 }
 0x514   :  { %v4555_v37 = vadd.f32 %v10239_v11, %v3963_v8  ;;  %v3965_v21 = vpop.f32.mrb[231].mxu0  ;;  %v4682_v9 = vmax.f32 %v4554_v63, 0.0 }
 0x515   :  { %6454 = vxpose.xlu1.b32.cont [13/16] (narrow) %v4814_v32, 8  ;;  %v4815_v29 = vadd.f32 %v10243_v33, %v3965_v21 }
 0x516   :  { %v4683_v28 = vmax.f32 %v4555_v37, 0.0  ;;  %4228 = vmatmul.mubr.bf16.gmra.mrb[80].mxu0 %v11197_v13 }
 0x517   :  { %4237 = vmatprep.mubr.bf16.mxu0 %v11191_v52 }
 0x518   :  { %v4936_v30 = vpack.c.bf16 %v4683_v28, %v4682_v9 }
 0x519   :  { %6455 = vxpose.xlu1.b32.cont [14/16] (narrow) %v4815_v29, 8  ;;  %v3969_v5 = vpop.f32.mrb[232].mxu0 }
 0x51a   :  { %v4556_v46 = vadd.f32 %v10239_v11, %v3969_v5  ;;  %v3971_v3 = vpop.f32.mrb[233].mxu0  ;;  %7477 = vmatprep.mubr.bf16.mxu1 %v4936_v30 }
 0x51b   :  { %v4816_v54 = vadd.f32 %v10243_v33, %v3971_v3  ;;  %v3973_v2 = vpop.f32.mrb[234].mxu0 }
 0x51c   :  { %v4557_v50 = vadd.f32 %v10239_v11, %v3973_v2  ;;  %v3975_v26 = vpop.f32.mrb[235].mxu0  ;;  %v4684_v61 = vmax.f32 %v4556_v46, 0.0 }
 0x51d   :  { %6456 = vxpose.xlu1.b32.cont [15/16] (narrow) %v4816_v54, 8  ;;  %v4817_v1 = vadd.f32 %v10243_v33, %v3975_v26 }
 0x51e   :  { %v4685_v60 = vmax.f32 %v4557_v50, 0.0  ;;  %4238 = vmatmul.mubr.bf16.gmra.mrb[84].mxu0 %v10046_v6 }
 0x51f   :  { %4247 = vmatprep.mubr.bf16.mxu0 %v11191_v52 }
 0x520   :  { %v4937_v14 = vpack.c.bf16 %v4685_v60, %v4684_v61 }
 0x521   :  { %6457 = vxpose.xlu1.b32.end [16/16] (narrow) %v4817_v1, 8  ;;  %v3979_v51 = vpop.f32.mrb[236].mxu0 }
 0x522   :  { %v4558_v44 = vadd.f32 %v10239_v11, %v3979_v51  ;;  %v3981_v31 = vpop.f32.mrb[237].mxu0  ;;  %7478 = vmatmul.mubr.bf16.gmra.mrb[64].mxu1 %v4937_v14 }
 0x523   :  { %v4818_v20 = vadd.f32 %v10243_v33, %v3981_v31  ;;  %v3983_v10 = vpop.f32.mrb[238].mxu0 }
 0x524   :  { %v4559_v49 = vadd.f32 %v10239_v11, %v3983_v10  ;;  %v3985_v62 = vpop.f32.mrb[239].mxu0  ;;  %v4686_v63 = vmax.f32 %v4558_v44, 0.0 }
 0x525   :  { %6474 = vxpose.xlu0.b32.start [1/16] (narrow) %v4818_v20, 8  ;;  %v4819_v38 = vadd.f32 %v10243_v33, %v3985_v62 }
 0x526   :  { %v4687_v6 = vmax.f32 %v4559_v49, 0.0  ;;  %4248 = vmatmul.mubr.bf16.gmra.mrb[88].mxu0 %v10043_v7 }
 0x527   :  { %4257 = vmatprep.mubr.bf16.mxu0 %v11191_v52 }
 0x528   :  { %v4938_v32 = vpack.c.bf16 %v4687_v6, %v4686_v63 }
 0x529   :  { %6475 = vxpose.xlu0.b32.cont [2/16] (narrow) %v4819_v38, 8  ;;  %v3989_v8 = vpop.f32.mrb[240].mxu0 }
 0x52a   :  { %v4560_v37 = vadd.f32 %v10239_v11, %v3989_v8  ;;  %v3991_v21 = vpop.f32.mrb[241].mxu0  ;;  %7481 = vmatprep.mubr.bf16.mxu1 %v4938_v32 }
 0x52b   :  { %v4820_v9 = vadd.f32 %v10243_v33, %v3991_v21  ;;  %v3993_v28 = vpop.f32.mrb[242].mxu0 }
 0x52c   :  { %v4561_v13 = vadd.f32 %v10239_v11, %v3993_v28  ;;  %v3995_v29 = vpop.f32.mrb[243].mxu0  ;;  %v4688_v30 = vmax.f32 %v4560_v37, 0.0 }
 0x52d   :  { %6476 = vxpose.xlu0.b32.cont [3/16] (narrow) %v4820_v9, 8  ;;  %v4821_v5 = vadd.f32 %v10243_v33, %v3995_v29 }
 0x52e   :  { %v4689_v7 = vmax.f32 %v4561_v13, 0.0  ;;  %4258 = vmatmul.mubr.bf16.gmra.mrb[92].mxu0 %v10059_v18 }
 0x52f   :  { %4267 = vmatprep.mubr.bf16.mxu0 %v11191_v52 }
 0x530   :  { %v4939_v46 = vpack.c.bf16 %v4689_v7, %v4688_v30 }
 0x531   :  { %6477 = vxpose.xlu0.b32.cont [4/16] (narrow) %v4821_v5, 8  ;;  %v3999_v3 = vpop.f32.mrb[244].mxu0 }
 0x532   :  { %v4562_v54 = vadd.f32 %v10239_v11, %v3999_v3  ;;  %v4001_v2 = vpop.f32.mrb[245].mxu0  ;;  %7482 = vmatmul.mubr.bf16.gmra.mrb[68].mxu1 %v4939_v46 }
 0x533   :  { %v4822_v50 = vadd.f32 %v10243_v33, %v4001_v2  ;;  %v4003_v26 = vpop.f32.mrb[246].mxu0 }
 0x534   :  { %v4563_v61 = vadd.f32 %v10239_v11, %v4003_v26  ;;  %v4005_v60 = vpop.f32.mrb[247].mxu0  ;;  %v4690_v1 = vmax.f32 %v4562_v54, 0.0 }
 0x535   :  { %6478 = vxpose.xlu0.b32.cont [5/16] (narrow) %v4822_v50, 8  ;;  %v4823_v14 = vadd.f32 %v10243_v33, %v4005_v60 }
 0x536   :  { %v4691_v18 = vmax.f32 %v4563_v61, 0.0  ;;  %4268 = vmatmul.mubr.bf16.gmra.mrb[96].mxu0 %v10057_v35 }
 0x537   :  { %4277 = vmatprep.mubr.bf16.mxu0 %v11191_v52 }
 0x538   :  { %v4940_v51 = vpack.c.bf16 %v4691_v18, %v4690_v1 }
 0x539   :  { %6479 = vxpose.xlu0.b32.cont [6/16] (narrow) %v4823_v14, 8  ;;  %v4009_v44 = vpop.f32.mrb[248].mxu0 }
 0x53a   :  { %v4564_v31 = vadd.f32 %v10239_v11, %v4009_v44  ;;  %v4011_v20 = vpop.f32.mrb[249].mxu0  ;;  %7485 = vmatprep.mubr.bf16.mxu1 %v4940_v51 }
 0x53b   :  { %v4824_v10 = vadd.f32 %v10243_v33, %v4011_v20  ;;  %v4013_v49 = vpop.f32.mrb[250].mxu0 }
 0x53c   :  { %v4565_v62 = vadd.f32 %v10239_v11, %v4013_v49  ;;  %v4015_v63 = vpop.f32.mrb[251].mxu0  ;;  %v4692_v6 = vmax.f32 %v4564_v31, 0.0 }
 0x53d   :  { %6480 = vxpose.xlu0.b32.cont [7/16] (narrow) %v4824_v10, 8  ;;  %v4825_v38 = vadd.f32 %v10243_v33, %v4015_v63 }
 0x53e   :  { %v4693_v35 = vmax.f32 %v4565_v62, 0.0  ;;  %4278 = vmatmul.mubr.bf16.gmra.mrb[100].mxu0 %v10073_v41 }
 0x53f   :  { %4287 = vmatprep.mubr.bf16.mxu0 %v11191_v52 }
 0x540   :  { %v4941_v32 = vpack.c.bf16 %v4693_v35, %v4692_v6 }
 0x541   :  { %6481 = vxpose.xlu0.b32.cont [8/16] (narrow) %v4825_v38, 8  ;;  %v4019_v8 = vpop.f32.mrb[252].mxu0 }
 0x542   :  { %v4566_v37 = vadd.f32 %v10239_v11, %v4019_v8  ;;  %v4021_v21 = vpop.f32.mrb[253].mxu0  ;;  %7486 = vmatmul.mubr.bf16.gmra.mrb[72].mxu1 %v4941_v32 }
 0x543   :  { %v4826_v9 = vadd.f32 %v10243_v33, %v4021_v21  ;;  %v4023_v28 = vpop.f32.mrb[254].mxu0 }
 0x544   :  { %v4567_v13 = vadd.f32 %v10239_v11, %v4023_v28  ;;  %v4025_v29 = vpop.f32.mrb[255].mxu0  ;;  %v4694_v30 = vmax.f32 %v4566_v37, 0.0 }
 0x545   :  { %6482 = vxpose.xlu0.b32.cont [9/16] (narrow) %v4826_v9, 8  ;;  %v4827_v7 = vadd.f32 %v10243_v33, %v4025_v29 }
 0x546   :  { %v4695_v41 = vmax.f32 %v4567_v13, 0.0  ;;  %4288 = vmatmul.mubr.bf16.gmra.mrb[104].mxu0 %v10071_v15 }
 0x547   :  { %4297 = vmatprep.mubr.bf16.mxu0 %v11191_v52 }
 0x548   :  { %v4942_v5 = vpack.c.bf16 %v4695_v41, %v4694_v30 }
 0x549   :  { %6483 = vxpose.xlu0.b32.cont [10/16] (narrow) %v4827_v7, 8  ;;  %v4029_v46 = vpop.f32.mrb[0].mxu0 }
 0x54a   :  { %v4568_v3 = vadd.f32 %v10239_v11, %v4029_v46  ;;  %v4031_v54 = vpop.f32.mrb[1].mxu0  ;;  %7489 = vmatprep.mubr.bf16.mxu1 %v4942_v5 }
 0x54b   :  { %v4828_v2 = vadd.f32 %v10243_v33, %v4031_v54  ;;  %v4033_v50 = vpop.f32.mrb[2].mxu0 }
 0x54c   :  { %v4569_v26 = vadd.f32 %v10239_v11, %v4033_v50  ;;  %v4035_v61 = vpop.f32.mrb[3].mxu0  ;;  %v4696_v60 = vmax.f32 %v4568_v3, 0.0 }
 0x54d   :  { %6484 = vxpose.xlu0.b32.cont [11/16] (narrow) %v4828_v2, 8  ;;  %v4829_v1 = vadd.f32 %v10243_v33, %v4035_v61 }
 0x54e   :  { %v4697_v15 = vmax.f32 %v4569_v26, 0.0  ;;  %4298 = vmatmul.mubr.bf16.gmra.mrb[108].mxu0 %v10088_v43 }
 0x54f   :  { %4307 = vmatprep.mubr.bf16.mxu0 %v11191_v52 }
 0x550   :  { %v4943_v18 = vpack.c.bf16 %v4697_v15, %v4696_v60 }
 0x551   :  { %6485 = vxpose.xlu0.b32.cont [12/16] (narrow) %v4829_v1, 8  ;;  %v4039_v14 = vpop.f32.mrb[4].mxu0 }
 0x552   :  { %v4570_v51 = vadd.f32 %v10239_v11, %v4039_v14  ;;  %v4041_v44 = vpop.f32.mrb[5].mxu0  ;;  %7490 = vmatmul.mubr.bf16.gmra.mrb[76].mxu1 %v4943_v18 }
 0x553   :  { %v4830_v31 = vadd.f32 %v10243_v33, %v4041_v44  ;;  %v4043_v20 = vpop.f32.mrb[6].mxu0 }
 0x554   :  { %v4571_v10 = vadd.f32 %v10239_v11, %v4043_v20  ;;  %v4045_v49 = vpop.f32.mrb[7].mxu0  ;;  %v4698_v62 = vmax.f32 %v4570_v51, 0.0 }
 0x555   :  { %6486 = vxpose.xlu0.b32.cont [13/16] (narrow) %v4830_v31, 8  ;;  %v4831_v63 = vadd.f32 %v10243_v33, %v4045_v49 }
 0x556   :  { %v4699_v43 = vmax.f32 %v4571_v10, 0.0  ;;  %4308 = vmatmul.mubr.bf16.gmra.mrb[112].mxu0 %v10086_v23 }
 0x557   :  { %4317 = vmatprep.mubr.bf16.mxu0 %v11191_v52 }
 0x558   :  { %v4944_v6 = vpack.c.bf16 %v4699_v43, %v4698_v62 }
 0x559   :  { %6487 = vxpose.xlu0.b32.cont [14/16] (narrow) %v4831_v63, 8  ;;  %v4049_v35 = vpop.f32.mrb[8].mxu0 }
 0x55a   :  { %v4572_v38 = vadd.f32 %v10239_v11, %v4049_v35  ;;  %v4051_v32 = vpop.f32.mrb[9].mxu0  ;;  %7493 = vmatprep.mubr.bf16.mxu1 %v4944_v6 }
 0x55b   :  { %v4832_v8 = vadd.f32 %v10243_v33, %v4051_v32  ;;  %v4053_v37 = vpop.f32.mrb[10].mxu0 }
 0x55c   :  { %v4573_v21 = vadd.f32 %v10239_v11, %v4053_v37  ;;  %v4055_v9 = vpop.f32.mrb[11].mxu0  ;;  %v4700_v28 = vmax.f32 %v4572_v38, 0.0 }
 0x55d   :  { %6488 = vxpose.xlu0.b32.cont [15/16] (narrow) %v4832_v8, 8  ;;  %v4833_v13 = vadd.f32 %v10243_v33, %v4055_v9 }
 0x55e   :  { %v4701_v23 = vmax.f32 %v4573_v21, 0.0  ;;  %4318 = vmatmul.mubr.bf16.gmra.mrb[116].mxu0 %v10107_v36 }
 0x55f   :  { %4327 = vmatprep.mubr.bf16.mxu0 %v11191_v52 }
 0x560   :  { %v4945_v29 = vpack.c.bf16 %v4701_v23, %v4700_v28 }
 0x561   :  { %6489 = vxpose.xlu0.b32.end [16/16] (narrow) %v4833_v13, 8  ;;  %v4059_v30 = vpop.f32.mrb[12].mxu0 }
 0x562   :  { %v4574_v41 = vadd.f32 %v10239_v11, %v4059_v30  ;;  %v4061_v7 = vpop.f32.mrb[13].mxu0  ;;  %7494 = vmatmul.mubr.bf16.gmra.mrb[80].mxu1 %v4945_v29 }
 0x563   :  { %v4834_v5 = vadd.f32 %v10243_v33, %v4061_v7  ;;  %v4063_v46 = vpop.f32.mrb[14].mxu0 }
 0x564   :  { %v4575_v3 = vadd.f32 %v10239_v11, %v4063_v46  ;;  %v4065_v54 = vpop.f32.mrb[15].mxu0  ;;  %v4702_v2 = vmax.f32 %v4574_v41, 0.0 }
 0x565   :  { %6506 = vxpose.xlu1.b32.start [1/16] (narrow) %v4834_v5, 8  ;;  %v4835_v50 = vadd.f32 %v10243_v33, %v4065_v54 }
 0x566   :  { %v4703_v36 = vmax.f32 %v4575_v3, 0.0  ;;  %4328 = vmatmul.mubr.bf16.gmra.mrb[120].mxu0 %v10105_v16 }
 0x567   :  { %4337 = vmatprep.mubr.bf16.mxu0 %v11191_v52 }
 0x568   :  { %v4946_v26 = vpack.c.bf16 %v4703_v36, %v4702_v2 }
 0x569   :  { %6507 = vxpose.xlu1.b32.cont [2/16] (narrow) %v4835_v50, 8  ;;  %v4069_v61 = vpop.f32.mrb[16].mxu0 }
 0x56a   :  { %v4576_v60 = vadd.f32 %v10239_v11, %v4069_v61  ;;  %v4071_v15 = vpop.f32.mrb[17].mxu0  ;;  %7497 = vmatprep.mubr.bf16.mxu1 %v4946_v26 }
 0x56b   :  { %v4836_v1 = vadd.f32 %v10243_v33, %v4071_v15  ;;  %v4073_v18 = vpop.f32.mrb[18].mxu0 }
 0x56c   :  { %v4577_v14 = vadd.f32 %v10239_v11, %v4073_v18  ;;  %v4075_v51 = vpop.f32.mrb[19].mxu0  ;;  %v4704_v44 = vmax.f32 %v4576_v60, 0.0 }
 0x56d   :  { %6508 = vxpose.xlu1.b32.cont [3/16] (narrow) %v4836_v1, 8  ;;  %v4837_v31 = vadd.f32 %v10243_v33, %v4075_v51 }
 0x56e   :  { %v4705_v16 = vmax.f32 %v4577_v14, 0.0  ;;  %4338 = vmatmul.mubr.bf16.gmra.mrb[124].mxu0 %v10119_v4 }
 0x56f   :  { %4347 = vmatprep.mubr.bf16.mxu0 %v11191_v52 }
 0x570   :  { %v4947_v20 = vpack.c.bf16 %v4705_v16, %v4704_v44 }
 0x571   :  { %6509 = vxpose.xlu1.b32.cont [4/16] (narrow) %v4837_v31, 8  ;;  %v4079_v10 = vpop.f32.mrb[20].mxu0 }
 0x572   :  { %v4578_v49 = vadd.f32 %v10239_v11, %v4079_v10  ;;  %v4081_v62 = vpop.f32.mrb[21].mxu0  ;;  %7498 = vmatmul.mubr.bf16.gmra.mrb[84].mxu1 %v4947_v20 }
 0x573   :  { %v4838_v43 = vadd.f32 %v10243_v33, %v4081_v62  ;;  %v4083_v63 = vpop.f32.mrb[22].mxu0 }
 0x574   :  { %v4579_v6 = vadd.f32 %v10239_v11, %v4083_v63  ;;  %v4085_v35 = vpop.f32.mrb[23].mxu0  ;;  %v4706_v38 = vmax.f32 %v4578_v49, 0.0 }
 0x575   :  { %6510 = vxpose.xlu1.b32.cont [5/16] (narrow) %v4838_v43, 8  ;;  %v4839_v32 = vadd.f32 %v10243_v33, %v4085_v35 }
 0x576   :  { %v4707_v4 = vmax.f32 %v4579_v6, 0.0  ;;  %4348 = vmatmul.mubr.bf16.gmra.mrb[128].mxu0 %v10117_v42 }
 0x577   :  { %4357 = vmatprep.mubr.bf16.mxu0 %v11191_v52 }
 0x578   :  { %v4948_v8 = vpack.c.bf16 %v4707_v4, %v4706_v38 }
 0x579   :  { %6511 = vxpose.xlu1.b32.cont [6/16] (narrow) %v4839_v32, 8  ;;  %v4089_v37 = vpop.f32.mrb[24].mxu0 }
 0x57a   :  { %v4580_v21 = vadd.f32 %v10239_v11, %v4089_v37  ;;  %v4091_v9 = vpop.f32.mrb[25].mxu0  ;;  %7501 = vmatprep.mubr.bf16.mxu1 %v4948_v8 }
 0x57b   :  { %v4840_v28 = vadd.f32 %v10243_v33, %v4091_v9  ;;  %v4093_v23 = vpop.f32.mrb[26].mxu0 }
 0x57c   :  { %v4581_v13 = vadd.f32 %v10239_v11, %v4093_v23  ;;  %v4095_v29 = vpop.f32.mrb[27].mxu0  ;;  %v4708_v30 = vmax.f32 %v4580_v21, 0.0 }
 0x57d   :  { %6512 = vxpose.xlu1.b32.cont [7/16] (narrow) %v4840_v28, 8  ;;  %v4841_v41 = vadd.f32 %v10243_v33, %v4095_v29 }
 0x57e   :  { %v4709_v42 = vmax.f32 %v4581_v13, 0.0  ;;  %4358 = vmatmul.mubr.bf16.gmra.mrb[132].mxu0 %v10134_v53 }
 0x57f   :  { %4367 = vmatprep.mubr.bf16.mxu0 %v11191_v52 }
 0x580   :  { %v4949_v7 = vpack.c.bf16 %v4709_v42, %v4708_v30 }
 0x581   :  { %6513 = vxpose.xlu1.b32.cont [8/16] (narrow) %v4841_v41, 8  ;;  %v4099_v5 = vpop.f32.mrb[28].mxu0 }
 0x582   :  { %v4582_v46 = vadd.f32 %v10239_v11, %v4099_v5  ;;  %v4101_v3 = vpop.f32.mrb[29].mxu0  ;;  %7502 = vmatmul.mubr.bf16.gmra.mrb[88].mxu1 %v4949_v7 }
 0x583   :  { %v4842_v54 = vadd.f32 %v10243_v33, %v4101_v3  ;;  %v4103_v2 = vpop.f32.mrb[30].mxu0 }
 0x584   :  { %v4583_v36 = vadd.f32 %v10239_v11, %v4103_v2  ;;  %v4105_v50 = vpop.f32.mrb[31].mxu0  ;;  %v4710_v26 = vmax.f32 %v4582_v46, 0.0 }
 0x585   :  { %6514 = vxpose.xlu1.b32.cont [9/16] (narrow) %v4842_v54, 8  ;;  %v4843_v61 = vadd.f32 %v10243_v33, %v4105_v50 }
 0x586   :  { %v4711_v53 = vmax.f32 %v4583_v36, 0.0  ;;  %4368 = vmatmul.mubr.bf16.gmra.mrb[136].mxu0 %v10129_v12 }
 0x587   :  { %4377 = vmatprep.mubr.bf16.mxu0 %v11191_v52 }
 0x588   :  { %v4950_v60 = vpack.c.bf16 %v4711_v53, %v4710_v26 }
 0x589   :  { %6515 = vxpose.xlu1.b32.cont [10/16] (narrow) %v4843_v61, 8  ;;  %v4109_v15 = vpop.f32.mrb[32].mxu0 }
 0x58a   :  { %v4584_v1 = vadd.f32 %v10239_v11, %v4109_v15  ;;  %v4111_v18 = vpop.f32.mrb[33].mxu0  ;;  %7505 = vmatprep.mubr.bf16.mxu1 %v4950_v60 }
 0x58b   :  { %v4844_v14 = vadd.f32 %v10243_v33, %v4111_v18  ;;  %v4113_v51 = vpop.f32.mrb[34].mxu0 }
 0x58c   :  { %v4585_v44 = vadd.f32 %v10239_v11, %v4113_v51  ;;  %v4115_v16 = vpop.f32.mrb[35].mxu0  ;;  %v4712_v31 = vmax.f32 %v4584_v1, 0.0 }
 0x58d   :  { %6516 = vxpose.xlu1.b32.cont [11/16] (narrow) %v4844_v14, 8  ;;  %v4845_v20 = vadd.f32 %v10243_v33, %v4115_v16 }
 0x58e   :  { %v4713_v12 = vmax.f32 %v4585_v44, 0.0  ;;  %4378 = vmatmul.mubr.bf16.gmra.mrb[140].mxu0 %v10156_v45 }
 0x58f   :  { %4387 = vmatprep.mubr.bf16.mxu0 %v11191_v52 }
 0x590   :  { %v4951_v10 = vpack.c.bf16 %v4713_v12, %v4712_v31 }
 0x591   :  { %6517 = vxpose.xlu1.b32.cont [12/16] (narrow) %v4845_v20, 8  ;;  %v4119_v49 = vpop.f32.mrb[36].mxu0 }
 0x592   :  { %v4586_v62 = vadd.f32 %v10239_v11, %v4119_v49  ;;  %v4121_v43 = vpop.f32.mrb[37].mxu0  ;;  %7506 = vmatmul.mubr.bf16.gmra.mrb[92].mxu1 %v4951_v10 }
 0x593   :  { %v4846_v63 = vadd.f32 %v10243_v33, %v4121_v43  ;;  %v4123_v6 = vpop.f32.mrb[38].mxu0 }
 0x594   :  { %v4587_v35 = vadd.f32 %v10239_v11, %v4123_v6  ;;  %v4125_v38 = vpop.f32.mrb[39].mxu0  ;;  %v4714_v4 = vmax.f32 %v4586_v62, 0.0 }
 0x595   :  { %6518 = vxpose.xlu1.b32.cont [13/16] (narrow) %v4846_v63, 8  ;;  %v4847_v32 = vadd.f32 %v10243_v33, %v4125_v38 }
 0x596   :  { %v4715_v45 = vmax.f32 %v4587_v35, 0.0  ;;  %4388 = vmatmul.mubr.bf16.gmra.mrb[144].mxu0 %v10153_v59 }
 0x597   :  { %4397 = vmatprep.mubr.bf16.mxu0 %v11191_v52 }
 0x598   :  { %v4952_v8 = vpack.c.bf16 %v4715_v45, %v4714_v4 }
 0x599   :  { %6519 = vxpose.xlu1.b32.cont [14/16] (narrow) %v4847_v32, 8  ;;  %v4129_v37 = vpop.f32.mrb[40].mxu0 }
 0x59a   :  { %v4588_v21 = vadd.f32 %v10239_v11, %v4129_v37  ;;  %v4131_v9 = vpop.f32.mrb[41].mxu0  ;;  %7509 = vmatprep.mubr.bf16.mxu1 %v4952_v8 }
 0x59b   :  { %v4848_v28 = vadd.f32 %v10243_v33, %v4131_v9  ;;  %v4133_v23 = vpop.f32.mrb[42].mxu0 }
 0x59c   :  { %v4589_v13 = vadd.f32 %v10239_v11, %v4133_v23  ;;  %v4135_v29 = vpop.f32.mrb[43].mxu0  ;;  %v4716_v30 = vmax.f32 %v4588_v21, 0.0 }
 0x59d   :  { %6520 = vxpose.xlu1.b32.cont [15/16] (narrow) %v4848_v28, 8  ;;  %v4849_v42 = vadd.f32 %v10243_v33, %v4135_v29 }
 0x59e   :  { %v4717_v59 = vmax.f32 %v4589_v13, 0.0  ;;  %4398 = vmatmul.mubr.bf16.gmra.mrb[148].mxu0 %v10168_v47  ;;  %v5605_v13 = vsub.s32 4, %v9106_v56 }
 0x59f   :  { %4407 = vmatprep.mubr.bf16.mxu0 %v11191_v52 }
 0x5a0   :  { %v4953_v41 = vpack.c.bf16 %v4717_v59, %v4716_v30 }
 0x5a1   :  { %6521 = vxpose.xlu1.b32.end [16/16] (narrow) %v4849_v42, 8  ;;  %v4139_v7 = vpop.f32.mrb[44].mxu0 }
 0x5a2   :  { %v4590_v5 = vadd.f32 %v10239_v11, %v4139_v7  ;;  %v4141_v46 = vpop.f32.mrb[45].mxu0  ;;  %7510 = vmatmul.mubr.bf16.gmra.mrb[96].mxu1 %v4953_v41 }
 0x5a3   :  { %v4850_v3 = vadd.f32 %v10243_v33, %v4141_v46  ;;  %v4143_v54 = vpop.f32.mrb[46].mxu0 }
 0x5a4   :  { %v4591_v2 = vadd.f32 %v10239_v11, %v4143_v54  ;;  %v4145_v36 = vpop.f32.mrb[47].mxu0  ;;  %v4718_v50 = vmax.f32 %v4590_v5, 0.0  ;;  %v10422_v5 = vrot.slane %v9111_v57, %v5605_v13 }
 0x5a5   :  { %6538 = vxpose.xlu0.b32.start [1/16] (narrow) %v4850_v3, 8  ;;  %v4851_v26 = vadd.f32 %v10243_v33, %v4145_v36 }
 0x5a6   :  { %v4719_v47 = vmax.f32 %v4591_v2, 0.0  ;;  %4408 = vmatmul.mubr.bf16.gmra.mrb[152].mxu0 %v10166_v19 }
 0x5a7   :  { %4417 = vmatprep.mubr.bf16.mxu0 %v11191_v52 }
 0x5a8   :  { %v4954_v53 = vpack.c.bf16 %v4719_v47, %v4718_v50 }
 0x5a9   :  { %6539 = vxpose.xlu0.b32.cont [2/16] (narrow) %v4851_v26, 8  ;;  %v4149_v61 = vpop.f32.mrb[48].mxu0 }
 0x5aa   :  { %v4592_v60 = vadd.f32 %v10239_v11, %v4149_v61  ;;  %v4151_v15 = vpop.f32.mrb[49].mxu0  ;;  %7513 = vmatprep.mubr.bf16.mxu1 %v4954_v53 }
 0x5ab   :  { %v4852_v1 = vadd.f32 %v10243_v33, %v4151_v15  ;;  %v4153_v18 = vpop.f32.mrb[50].mxu0 }
 0x5ac   :  { %v4593_v14 = vadd.f32 %v10239_v11, %v4153_v18  ;;  %v4155_v51 = vpop.f32.mrb[51].mxu0  ;;  %v4720_v44 = vmax.f32 %v4592_v60, 0.0 }
 0x5ad   :  { %6540 = vxpose.xlu0.b32.cont [3/16] (narrow) %v4852_v1, 8  ;;  %v4853_v16 = vadd.f32 %v10243_v33, %v4155_v51 }
 0x5ae   :  { %v4721_v19 = vmax.f32 %v4593_v14, 0.0  ;;  %4418 = vmatmul.mubr.bf16.gmra.mrb[156].mxu0 %v10180_v17 }
 0x5af   :  { %4427 = vmatprep.mubr.bf16.mxu0 %v11191_v52 }
 0x5b0   :  { %v4955_v31 = vpack.c.bf16 %v4721_v19, %v4720_v44 }
 0x5b1   :  { %6541 = vxpose.xlu0.b32.cont [4/16] (narrow) %v4853_v16, 8  ;;  %v4159_v12 = vpop.f32.mrb[52].mxu0 }
 0x5b2   :  { %v4594_v20 = vadd.f32 %v10239_v11, %v4159_v12  ;;  %v4161_v10 = vpop.f32.mrb[53].mxu0  ;;  %7514 = vmatmul.mubr.bf16.gmra.mrb[100].mxu1 %v4955_v31 }
 0x5b3   :  { %v4854_v49 = vadd.f32 %v10243_v33, %v4161_v10  ;;  %v4163_v62 = vpop.f32.mrb[54].mxu0 }
 0x5b4   :  { %v4595_v43 = vadd.f32 %v10239_v11, %v4163_v62  ;;  %v4165_v63 = vpop.f32.mrb[55].mxu0  ;;  %v4722_v6 = vmax.f32 %v4594_v20, 0.0 }
 0x5b5   :  { %6542 = vxpose.xlu0.b32.cont [5/16] (narrow) %v4854_v49, 8  ;;  %v4855_v35 = vadd.f32 %v10243_v33, %v4165_v63 }
 0x5b6   :  { %v4723_v17 = vmax.f32 %v4595_v43, 0.0  ;;  %4428 = vmatmul.mubr.bf16.gmra.mrb[160].mxu0 %v10178_v39 }
 0x5b7   :  { %4437 = vmatprep.mubr.bf16.mxu0 %v11191_v52 }
 0x5b8   :  { %v4956_v38 = vpack.c.bf16 %v4723_v17, %v4722_v6 }
 0x5b9   :  { %6543 = vxpose.xlu0.b32.cont [6/16] (narrow) %v4855_v35, 8  ;;  %v4169_v4 = vpop.f32.mrb[56].mxu0 }
 0x5ba   :  { %v4596_v45 = vadd.f32 %v10239_v11, %v4169_v4  ;;  %v4171_v32 = vpop.f32.mrb[57].mxu0  ;;  %7517 = vmatprep.mubr.bf16.mxu1 %v4956_v38 }
 0x5bb   :  { %v4856_v8 = vadd.f32 %v10243_v33, %v4171_v32  ;;  %v4173_v37 = vpop.f32.mrb[58].mxu0 }
 0x5bc   :  { %v4597_v21 = vadd.f32 %v10239_v11, %v4173_v37  ;;  %v4175_v9 = vpop.f32.mrb[59].mxu0  ;;  %v4724_v28 = vmax.f32 %v4596_v45, 0.0 }
 0x5bd   :  { %6544 = vxpose.xlu0.b32.cont [7/16] (narrow) %v4856_v8, 8  ;;  %v4857_v23 = vadd.f32 %v10243_v33, %v4175_v9 }
 0x5be   :  { %v4725_v39 = vmax.f32 %v4597_v21, 0.0  ;;  %4438 = vmatmul.mubr.bf16.gmra.mrb[164].mxu0 %v10192_v58 }
 0x5bf   :  { %4447 = vmatprep.mubr.bf16.mxu0 %v11191_v52 }
 0x5c0   :  { %v4957_v29 = vpack.c.bf16 %v4725_v39, %v4724_v28 }
 0x5c1   :  { %6545 = vxpose.xlu0.b32.cont [8/16] (narrow) %v4857_v23, 8  ;;  %v4179_v30 = vpop.f32.mrb[60].mxu0 }
 0x5c2   :  { %v4598_v59 = vadd.f32 %v10239_v11, %v4179_v30  ;;  %v4181_v42 = vpop.f32.mrb[61].mxu0  ;;  %7518 = vmatmul.mubr.bf16.gmra.mrb[104].mxu1 %v4957_v29 }
 0x5c3   :  { %v4858_v41 = vadd.f32 %v10243_v33, %v4181_v42  ;;  %v4183_v7 = vpop.f32.mrb[62].mxu0 }
 0x5c4   :  { %v4599_v58 = vadd.f32 %v10239_v11, %v4183_v7  ;;  %v4185_v46 = vpop.f32.mrb[63].mxu0  ;;  %v4726_v54 = vmax.f32 %v4598_v59, 0.0 }
 0x5c5   :  { %v7467_v3 = vpop.f32.mrb[52].mxu1  ;;  %6546 = vxpose.xlu0.b32.cont [9/16] (narrow) %v4858_v41, 8  ;;  %v4859_v50 = vadd.f32 %v10243_v33, %v4185_v46 }
 0x5c6   :  { %v4727_v2 = vmax.f32 %v4599_v58, 0.0  ;;  %4448 = vmatmul.mubr.bf16.gmra.mrb[168].mxu0 %v10190_v34  ;;  %v5092_v36 = vpop.f32.mrb[53].mxu1  ;;  %v5609_v47 = vadd.f32 %v7467_v3, %v10422_v5 }
 0x5c7   :  { %v5607_v26 = vadd.f32 %v10422_v5, %v5092_v36  ;;  %v7468_v53 = vpop.f32.mrb[54].mxu1  ;;  %4457 = vmatprep.mubr.bf16.mxu0 %v11191_v52 }
 0x5c8   :  { %v4958_v61 = vpack.c.bf16 %v4727_v2, %v4726_v54  ;;  %v5095_v60 = vpop.f32.mrb[55].mxu1  ;;  %v5610_v1 = vadd.f32 %v7468_v53, %v10422_v5  ;;  %v5737_v44 = vmax.f32 %v5609_v47, 0.0 }
 0x5c9   :  { %v5735_v15 = vmax.f32 %v5607_v26, 0.0  ;;  %v5608_v18 = vadd.f32 %v10422_v5, %v5095_v60  ;;  %6547 = vxpose.xlu0.b32.cont [10/16] (narrow) %v4859_v50, 8  ;;  %v4189_v14 = vpop.f32.mrb[64].mxu0 }
 0x5ca   :  { %v4600_v34 = vadd.f32 %v10239_v11, %v4189_v14  ;;  %v4191_v51 = vpop.f32.mrb[65].mxu0  ;;  %7521 = vmatprep.mubr.bf16.mxu1 %v4958_v61  ;;  %v5738_v49 = vmax.f32 %v5610_v1, 0.0  ;;  %v5866_v17 = vsel %vm2839_vm2, %v5737_v44, -inf }
 0x5cb   :  { %v5736_v19 = vmax.f32 %v5608_v18, 0.0  ;;  %v4860_v16 = vadd.f32 %v10243_v33, %v4191_v51  ;;  %v4193_v31 = vpop.f32.mrb[66].mxu0  ;;  %v5863_v10 = vsel %vm2839_vm2, %v5735_v15, -inf }
 0x5cc   :  { %v4601_v12 = vadd.f32 %v10239_v11, %v4193_v31  ;;  %v4195_v20 = vpop.f32.mrb[67].mxu0  ;;  %v4728_v63 = vmax.f32 %v4600_v34, 0.0  ;;  %v5868_v45 = vsel %vm2839_vm2, %v5738_v49, -inf }
 0x5cd   :  { %v5864_v62 = vsel %vm2839_vm2, %v5736_v19, -inf  ;;  %6548 = vxpose.xlu0.b32.cont [11/16] (narrow) %v4860_v16, 8  ;;  %v4861_v35 = vadd.f32 %v10243_v33, %v4195_v20 }
 0x5ce   :  { %v5865_v43 = vmax.f32 %v5863_v10, %v5864_v62  ;;  %v4729_v6 = vmax.f32 %v4601_v12, 0.0  ;;  %4458 = vmatmul.mubr.bf16.gmra.mrb[172].mxu0 %v10204_v55 }
 0x5cf   :  { %4467 = vmatprep.mubr.bf16.mxu0 %v11191_v52 }
 0x5d0   :  { %v5867_v38 = vmax.f32 %v5865_v43, %v5866_v17  ;;  %v4959_v4 = vpack.c.bf16 %v4729_v6, %v4728_v63 }
 0x5d1   :  { %6549 = vxpose.xlu0.b32.cont [12/16] (narrow) %v4861_v35, 8  ;;  %v4199_v32 = vpop.f32.mrb[68].mxu0 }
 0x5d2   :  { %v4602_v8 = vadd.f32 %v10239_v11, %v4199_v32  ;;  %v4201_v37 = vpop.f32.mrb[69].mxu0  ;;  %7522 = vmatmul.mubr.bf16.gmra.mrb[108].mxu1 %v4959_v4  ;;  %v5869_v21 = vmax.f32 %v5867_v38, %v5868_v45 }
 0x5d3   :  { %v4862_v9 = vadd.f32 %v10243_v33, %v4201_v37  ;;  %v4203_v55 = vpop.f32.mrb[70].mxu0 }
 0x5d4   :  { %v4603_v28 = vadd.f32 %v10239_v11, %v4203_v55  ;;  %v4205_v39 = vpop.f32.mrb[71].mxu0  ;;  %v4730_v13 = vmax.f32 %v4602_v8, 0.0 }
 0x5d5   :  { %v7471_v23 = vpop.f32.mrb[56].mxu1  ;;  %6550 = vxpose.xlu0.b32.cont [13/16] (narrow) %v4862_v9, 8  ;;  %v4863_v59 = vadd.f32 %v10243_v33, %v4205_v39 }
 0x5d6   :  { %v4731_v29 = vmax.f32 %v4603_v28, 0.0  ;;  %4468 = vmatmul.mubr.bf16.gmra.mrb[176].mxu0 %v10202_v25  ;;  %v5108_v30 = vpop.f32.mrb[57].mxu1  ;;  %v5613_v42 = vadd.f32 %v7471_v23, %v10422_v5 }
 0x5d7   :  { %v5611_v41 = vadd.f32 %v10422_v5, %v5108_v30  ;;  %v7472_v7 = vpop.f32.mrb[58].mxu1  ;;  %4477 = vmatprep.mubr.bf16.mxu0 %v11191_v52 }
 0x5d8   :  { %v4960_v58 = vpack.c.bf16 %v4731_v29, %v4730_v13  ;;  %v5111_v46 = vpop.f32.mrb[59].mxu1  ;;  %v5614_v54 = vadd.f32 %v7472_v7, %v10422_v5  ;;  %v5741_v47 = vmax.f32 %v5613_v42, 0.0 }
 0x5d9   :  { %v5739_v3 = vmax.f32 %v5611_v41, 0.0  ;;  %v5612_v2 = vadd.f32 %v10422_v5, %v5111_v46  ;;  %6551 = vxpose.xlu0.b32.cont [14/16] (narrow) %v4863_v59, 8  ;;  %v4209_v36 = vpop.f32.mrb[72].mxu0 }
 0x5da   :  { %v4604_v25 = vadd.f32 %v10239_v11, %v4209_v36  ;;  %v4211_v50 = vpop.f32.mrb[73].mxu0  ;;  %7525 = vmatprep.mubr.bf16.mxu1 %v4960_v58  ;;  %v5742_v14 = vmax.f32 %v5614_v54, 0.0  ;;  %v5874_v16 = vsel %vm2839_vm2, %v5741_v47, -inf }
 0x5db   :  { %v5870_v26 = vsel %vm2839_vm2, %v5739_v3, -inf  ;;  %v5740_v53 = vmax.f32 %v5612_v2, 0.0  ;;  %v4864_v61 = vadd.f32 %v10243_v33, %v4211_v50  ;;  %v4213_v60 = vpop.f32.mrb[74].mxu0 }
 0x5dc   :  { %v5871_v15 = vmax.f32 %v5869_v21, %v5870_v26  ;;  %v4605_v1 = vadd.f32 %v10239_v11, %v4213_v60  ;;  %v4215_v18 = vpop.f32.mrb[75].mxu0  ;;  %v4732_v44 = vmax.f32 %v4604_v25, 0.0  ;;  %v5876_v10 = vsel %vm2839_vm2, %v5742_v14, -inf }
 0x5dd   :  { %v5872_v34 = vsel %vm2839_vm2, %v5740_v53, -inf  ;;  %6552 = vxpose.xlu0.b32.cont [15/16] (narrow) %v4864_v61, 8  ;;  %v4865_v31 = vadd.f32 %v10243_v33, %v4215_v18 }
 0x5de   :  { %v5873_v51 = vmax.f32 %v5871_v15, %v5872_v34  ;;  %v4733_v19 = vmax.f32 %v4605_v1, 0.0  ;;  %4478 = vmatmul.mubr.bf16.gmra.mrb[180].mxu0 %v10216_v22 }
 0x5df   :  { %4487 = vmatprep.mubr.bf16.mxu0 %v11191_v52 }
 0x5e0   :  { %v5875_v12 = vmax.f32 %v5873_v51, %v5874_v16  ;;  %v4961_v20 = vpack.c.bf16 %v4733_v19, %v4732_v44 }
 0x5e1   :  { %6553 = vxpose.xlu0.b32.end [16/16] (narrow) %v4865_v31, 8  ;;  %v4219_v49 = vpop.f32.mrb[76].mxu0 }
 0x5e2   :  { %v4606_v62 = vadd.f32 %v10239_v11, %v4219_v49  ;;  %v4221_v43 = vpop.f32.mrb[77].mxu0  ;;  %7526 = vmatmul.mubr.bf16.gmra.mrb[112].mxu1 %v4961_v20  ;;  %v5877_v63 = vmax.f32 %v5875_v12, %v5876_v10 }
 0x5e3   :  { %v4866_v6 = vadd.f32 %v10243_v33, %v4221_v43  ;;  %v4223_v22 = vpop.f32.mrb[78].mxu0 }
 0x5e4   :  { %v4607_v17 = vadd.f32 %v10239_v11, %v4223_v22  ;;  %v4225_v35 = vpop.f32.mrb[79].mxu0  ;;  %v4734_v4 = vmax.f32 %v4606_v62, 0.0 }
 0x5e5   :  { %v7475_v38 = vpop.f32.mrb[60].mxu1  ;;  %6570 = vxpose.xlu1.b32.start [1/16] (narrow) %v4866_v6, 8  ;;  %v4867_v8 = vadd.f32 %v10243_v33, %v4225_v35 }
 0x5e6   :  { %v4735_v45 = vmax.f32 %v4607_v17, 0.0  ;;  %4488 = vmatmul.mubr.bf16.gmra.mrb[184].mxu0 %v10214_v40  ;;  %v5124_v32 = vpop.f32.mrb[61].mxu1  ;;  %v5617_v37 = vadd.f32 %v7475_v38, %v10422_v5 }
 0x5e7   :  { %v5615_v21 = vadd.f32 %v10422_v5, %v5124_v32  ;;  %v7476_v9 = vpop.f32.mrb[62].mxu1  ;;  %4497 = vmatprep.mubr.bf16.mxu0 %v11191_v52 }
 0x5e8   :  { %v4962_v55 = vpack.c.bf16 %v4735_v45, %v4734_v4  ;;  %v5127_v28 = vpop.f32.mrb[63].mxu1  ;;  %v5618_v23 = vadd.f32 %v7476_v9, %v10422_v5  ;;  %v5745_v59 = vmax.f32 %v5617_v37, 0.0 }
 0x5e9   :  { %v5743_v39 = vmax.f32 %v5615_v21, 0.0  ;;  %v5616_v13 = vadd.f32 %v10422_v5, %v5127_v28  ;;  %6571 = vxpose.xlu1.b32.cont [2/16] (narrow) %v4867_v8, 8  ;;  %v4229_v29 = vpop.f32.mrb[80].mxu0 }
 0x5ea   :  { %v4608_v40 = vadd.f32 %v10239_v11, %v4229_v29  ;;  %v4231_v30 = vpop.f32.mrb[81].mxu0  ;;  %7529 = vmatprep.mubr.bf16.mxu1 %v4962_v55  ;;  %v5746_v2 = vmax.f32 %v5618_v23, 0.0  ;;  %v5882_v26 = vsel %vm2839_vm2, %v5745_v59, -inf }
 0x5eb   :  { %v5878_v42 = vsel %vm2839_vm2, %v5743_v39, -inf  ;;  %v5744_v41 = vmax.f32 %v5616_v13, 0.0  ;;  %v4868_v7 = vadd.f32 %v10243_v33, %v4231_v30  ;;  %v4233_v58 = vpop.f32.mrb[82].mxu0 }
 0x5ec   :  { %v5879_v46 = vmax.f32 %v5877_v63, %v5878_v42  ;;  %v4609_v3 = vadd.f32 %v10239_v11, %v4233_v58  ;;  %v4235_v54 = vpop.f32.mrb[83].mxu0  ;;  %v4736_v50 = vmax.f32 %v4608_v40, 0.0  ;;  %v5884_v15 = vsel %vm2839_vm2, %v5746_v2, -inf }
 0x5ed   :  { %v5880_v36 = vsel %vm2839_vm2, %v5744_v41, -inf  ;;  %6572 = vxpose.xlu1.b32.cont [3/16] (narrow) %v4868_v7, 8  ;;  %v4869_v53 = vadd.f32 %v10243_v33, %v4235_v54 }
 0x5ee   :  { %v5881_v25 = vmax.f32 %v5879_v46, %v5880_v36  ;;  %v4737_v47 = vmax.f32 %v4609_v3, 0.0  ;;  %4498 = vmatmul.mubr.bf16.gmra.mrb[188].mxu0 %v10228_v0 }
 0x5ef   :  { %4507 = vmatprep.mubr.bf16.mxu0 %v11191_v52 }
 0x5f0   :  { %v5883_v61 = vmax.f32 %v5881_v25, %v5882_v26  ;;  %v4963_v60 = vpack.c.bf16 %v4737_v47, %v4736_v50 }
 0x5f1   :  { %6573 = vxpose.xlu1.b32.cont [4/16] (narrow) %v4869_v53, 8  ;;  %v4239_v1 = vpop.f32.mrb[84].mxu0 }
 0x5f2   :  { %v4610_v18 = vadd.f32 %v10239_v11, %v4239_v1  ;;  %v4241_v14 = vpop.f32.mrb[85].mxu0  ;;  %7530 = vmatmul.mubr.bf16.gmra.mrb[116].mxu1 %v4963_v60  ;;  %v5885_v34 = vmax.f32 %v5883_v61, %v5884_v15 }
 0x5f3   :  { %v4870_v51 = vadd.f32 %v10243_v33, %v4241_v14  ;;  %v4243_v0 = vpop.f32.mrb[86].mxu0 }
 0x5f4   :  { %v4611_v44 = vadd.f32 %v10239_v11, %v4243_v0  ;;  %v4245_v19 = vpop.f32.mrb[87].mxu0  ;;  %v4738_v31 = vmax.f32 %v4610_v18, 0.0 }
 0x5f5   :  { %v7479_v16 = vpop.f32.mrb[64].mxu1  ;;  %6574 = vxpose.xlu1.b32.cont [5/16] (narrow) %v4870_v51, 8  ;;  %v4871_v10 = vadd.f32 %v10243_v33, %v4245_v19 }
 0x5f6   :  { %v4739_v12 = vmax.f32 %v4611_v44, 0.0  ;;  %4508 = vmatmul.mubr.bf16.gmra.mrb[192].mxu0 %v10226_v24  ;;  %v5140_v20 = vpop.f32.mrb[65].mxu1  ;;  %v5621_v49 = vadd.f32 %v7479_v16, %v10422_v5 }
 0x5f7   :  { %v5619_v62 = vadd.f32 %v10422_v5, %v5140_v20  ;;  %v7480_v43 = vpop.f32.mrb[66].mxu1  ;;  %4517 = vmatprep.mubr.bf16.mxu0 %v11191_v52 }
 0x5f8   :  { %v4964_v63 = vpack.c.bf16 %v4739_v12, %v4738_v31  ;;  %v5143_v6 = vpop.f32.mrb[67].mxu1  ;;  %v5622_v17 = vadd.f32 %v7480_v43, %v10422_v5  ;;  %v5749_v45 = vmax.f32 %v5621_v49, 0.0 }
 0x5f9   :  { %v5747_v22 = vmax.f32 %v5619_v62, 0.0  ;;  %v5620_v35 = vadd.f32 %v10422_v5, %v5143_v6  ;;  %6575 = vxpose.xlu1.b32.cont [6/16] (narrow) %v4871_v10, 8  ;;  %v4249_v38 = vpop.f32.mrb[88].mxu0 }
 0x5fa   :  { %v4612_v24 = vadd.f32 %v10239_v11, %v4249_v38  ;;  %v4251_v4 = vpop.f32.mrb[89].mxu0  ;;  %7533 = vmatprep.mubr.bf16.mxu1 %v4964_v63  ;;  %v5750_v39 = vmax.f32 %v5622_v17, 0.0  ;;  %v5890_v30 = vsel %vm2839_vm2, %v5749_v45, -inf }
 0x5fb   :  { %v5886_v32 = vsel %vm2839_vm2, %v5747_v22, -inf  ;;  %v5748_v8 = vmax.f32 %v5620_v35, 0.0  ;;  %v4872_v37 = vadd.f32 %v10243_v33, %v4251_v4  ;;  %v4253_v21 = vpop.f32.mrb[90].mxu0 }
 0x5fc   :  { %v5887_v9 = vmax.f32 %v5885_v34, %v5886_v32  ;;  %v4613_v55 = vadd.f32 %v10239_v11, %v4253_v21  ;;  %v4255_v28 = vpop.f32.mrb[91].mxu0  ;;  %v4740_v29 = vmax.f32 %v4612_v24, 0.0  ;;  %v5892_v7 = vsel %vm2839_vm2, %v5750_v39, -inf }
 0x5fd   :  { %v5888_v23 = vsel %vm2839_vm2, %v5748_v8, -inf  ;;  %6576 = vxpose.xlu1.b32.cont [7/16] (narrow) %v4872_v37, 8  ;;  %v4873_v59 = vadd.f32 %v10243_v33, %v4255_v28 }
 0x5fe   :  { %v5889_v13 = vmax.f32 %v5887_v9, %v5888_v23  ;;  %v4741_v40 = vmax.f32 %v4613_v55, 0.0  ;;  %4518 = vmatmul.mubr.bf16.gmra.mrb[196].mxu0 %v10248_v27 }
 0x5ff   :  { %4527 = vmatprep.mubr.bf16.mxu0 %v11191_v52 }
 0x600   :  { %v5891_v42 = vmax.f32 %v5889_v13, %v5890_v30  ;;  %v4965_v41 = vpack.c.bf16 %v4741_v40, %v4740_v29 }
 0x601   :  { %6577 = vxpose.xlu1.b32.cont [8/16] (narrow) %v4873_v59, 8  ;;  %v4259_v58 = vpop.f32.mrb[92].mxu0 }
 0x602   :  { %v4614_v46 = vadd.f32 %v10239_v11, %v4259_v58  ;;  %v4261_v3 = vpop.f32.mrb[93].mxu0  ;;  %7534 = vmatmul.mubr.bf16.gmra.mrb[120].mxu1 %v4965_v41  ;;  %v5893_v54 = vmax.f32 %v5891_v42, %v5892_v7 }
 0x603   :  { %v4874_v2 = vadd.f32 %v10243_v33, %v4261_v3  ;;  %v4263_v27 = vpop.f32.mrb[94].mxu0 }
 0x604   :  { %v4615_v36 = vadd.f32 %v10239_v11, %v4263_v27  ;;  %v4265_v25 = vpop.f32.mrb[95].mxu0  ;;  %v4742_v47 = vmax.f32 %v4614_v46, 0.0 }
 0x605   :  { %v7483_v50 = vpop.f32.mrb[68].mxu1  ;;  %6578 = vxpose.xlu1.b32.cont [9/16] (narrow) %v4874_v2, 8  ;;  %v4875_v61 = vadd.f32 %v10243_v33, %v4265_v25 }
 0x606   :  { %v4743_v26 = vmax.f32 %v4615_v36, 0.0  ;;  %4528 = vmatmul.mubr.bf16.gmra.mrb[200].mxu0 %v10246_v48  ;;  %v5156_v53 = vpop.f32.mrb[69].mxu1  ;;  %v5625_v60 = vadd.f32 %v7483_v50, %v10422_v5 }
 0x607   :  { %v5623_v15 = vadd.f32 %v10422_v5, %v5156_v53  ;;  %v7484_v1 = vpop.f32.mrb[70].mxu1 }
 0x608   :  { %v4966_v18 = vpack.c.bf16 %v4743_v26, %v4742_v47  ;;  %v5159_v14 = vpop.f32.mrb[71].mxu1  ;;  %v5626_v51 = vadd.f32 %v7484_v1, %v10422_v5  ;;  %v5753_v16 = vmax.f32 %v5625_v60, 0.0 }
 0x609   :  { %v5751_v34 = vmax.f32 %v5623_v15, 0.0  ;;  %v5624_v0 = vadd.f32 %v10422_v5, %v5159_v14  ;;  %6579 = vxpose.xlu1.b32.cont [10/16] (narrow) %v4875_v61, 8  ;;  %v4269_v44 = vpop.f32.mrb[96].mxu0 }
 0x60a   :  { %v4616_v19 = vadd.f32 %v10239_v11, %v4269_v44  ;;  %v4271_v48 = vpop.f32.mrb[97].mxu0  ;;  %7537 = vmatprep.mubr.bf16.mxu1 %v4966_v18  ;;  %v5754_v63 = vmax.f32 %v5626_v51, 0.0  ;;  %v5898_v38 = vsel %vm2839_vm2, %v5753_v16, -inf }
 0x60b   :  { %v5894_v31 = vsel %vm2839_vm2, %v5751_v34, -inf  ;;  %v5752_v12 = vmax.f32 %v5624_v0, 0.0  ;;  %v4876_v20 = vadd.f32 %v10243_v33, %v4271_v48  ;;  %v4273_v10 = vpop.f32.mrb[98].mxu0 }
 0x60c   :  { %v5895_v49 = vmax.f32 %v5893_v54, %v5894_v31  ;;  %v4617_v62 = vadd.f32 %v10239_v11, %v4273_v10  ;;  %v4275_v43 = vpop.f32.mrb[99].mxu0  ;;  %v4744_v17 = vmax.f32 %v4616_v19, 0.0  ;;  %v5900_v32 = vsel %vm2839_vm2, %v5754_v63, -inf }
 0x60d   :  { %v5896_v6 = vsel %vm2839_vm2, %v5752_v12, -inf  ;;  %6580 = vxpose.xlu1.b32.cont [11/16] (narrow) %v4876_v20, 8  ;;  %v4877_v24 = vadd.f32 %v10243_v33, %v4275_v43 }
 0x60e   :  { %v5897_v22 = vmax.f32 %v5895_v49, %v5896_v6  ;;  %v4745_v35 = vmax.f32 %v4617_v62, 0.0 }
 0x610   :  { %v5899_v4 = vmax.f32 %v5897_v22, %v5898_v38  ;;  %v4967_v45 = vpack.c.bf16 %v4745_v35, %v4744_v17 }
 0x611   :  { %6581 = vxpose.xlu1.b32.cont [12/16] (narrow) %v4877_v24, 8  ;;  %v4279_v8 = vpop.f32.mrb[100].mxu0 }
 0x612   :  { %v4618_v37 = vadd.f32 %v10239_v11, %v4279_v8  ;;  %v4281_v21 = vpop.f32.mrb[101].mxu0  ;;  %7538 = vmatmul.mubr.bf16.gmra.mrb[124].mxu1 %v4967_v45  ;;  %v5901_v9 = vmax.f32 %v5899_v4, %v5900_v32 }
 0x613   :  { %v4878_v55 = vadd.f32 %v10243_v33, %v4281_v21  ;;  %v4283_v28 = vpop.f32.mrb[102].mxu0 }
 0x614   :  { %v4619_v39 = vadd.f32 %v10239_v11, %v4283_v28  ;;  %v4285_v23 = vpop.f32.mrb[103].mxu0  ;;  %v4746_v29 = vmax.f32 %v4618_v37, 0.0 }
 0x615   :  { %v7487_v13 = vpop.f32.mrb[72].mxu1  ;;  %6582 = vxpose.xlu1.b32.cont [13/16] (narrow) %v4878_v55, 8  ;;  %v4879_v59 = vadd.f32 %v10243_v33, %v4285_v23 }
 0x616   :  { %v4747_v40 = vmax.f32 %v4619_v39, 0.0  ;;  %v5172_v30 = vpop.f32.mrb[73].mxu1  ;;  %v5629_v42 = vadd.f32 %v7487_v13, %v10422_v5 }
 0x617   :  { %v5627_v41 = vadd.f32 %v10422_v5, %v5172_v30  ;;  %v7488_v7 = vpop.f32.mrb[74].mxu1 }
 0x618   :  { %v4968_v58 = vpack.c.bf16 %v4747_v40, %v4746_v29  ;;  %v5175_v46 = vpop.f32.mrb[75].mxu1  ;;  %v5630_v54 = vadd.f32 %v7488_v7, %v10422_v5  ;;  %v5757_v50 = vmax.f32 %v5629_v42, 0.0 }
 0x619   :  { %v5755_v3 = vmax.f32 %v5627_v41, 0.0  ;;  %v5628_v2 = vadd.f32 %v10422_v5, %v5175_v46  ;;  %6583 = vxpose.xlu1.b32.cont [14/16] (narrow) %v4879_v59, 8  ;;  %v4289_v27 = vpop.f32.mrb[104].mxu0 }
 0x61a   :  { %v4620_v36 = vadd.f32 %v10239_v11, %v4289_v27  ;;  %v4291_v25 = vpop.f32.mrb[105].mxu0  ;;  %7541 = vmatprep.mubr.bf16.mxu1 %v4968_v58  ;;  %v5758_v18 = vmax.f32 %v5630_v54, 0.0  ;;  %v5906_v44 = vsel %vm2839_vm2, %v5757_v50, -inf }
 0x61b   :  { %v5902_v47 = vsel %vm2839_vm2, %v5755_v3, -inf  ;;  %v5756_v26 = vmax.f32 %v5628_v2, 0.0  ;;  %v4880_v53 = vadd.f32 %v10243_v33, %v4291_v25  ;;  %v4293_v61 = vpop.f32.mrb[106].mxu0 }
 0x61c   :  { %v5903_v60 = vmax.f32 %v5901_v9, %v5902_v47  ;;  %v4621_v15 = vadd.f32 %v10239_v11, %v4293_v61  ;;  %v4295_v1 = vpop.f32.mrb[107].mxu0  ;;  %v4748_v51 = vmax.f32 %v4620_v36, 0.0  ;;  %v5908_v31 = vsel %vm2839_vm2, %v5758_v18, -inf }
 0x61d   :  { %v5904_v14 = vsel %vm2839_vm2, %v5756_v26, -inf  ;;  %6584 = vxpose.xlu1.b32.cont [15/16] (narrow) %v4880_v53, 8  ;;  %v4881_v19 = vadd.f32 %v10243_v33, %v4295_v1 }
 0x61e   :  { %v5905_v34 = vmax.f32 %v5903_v60, %v5904_v14  ;;  %v4749_v0 = vmax.f32 %v4621_v15, 0.0 }
 0x620   :  { %v5907_v48 = vmax.f32 %v5905_v34, %v5906_v44  ;;  %v4969_v16 = vpack.c.bf16 %v4749_v0, %v4748_v51 }
 0x621   :  { %6585 = vxpose.xlu1.b32.end [16/16] (narrow) %v4881_v19, 8  ;;  %v4299_v12 = vpop.f32.mrb[108].mxu0 }
 0x622   :  { %v4622_v20 = vadd.f32 %v10239_v11, %v4299_v12  ;;  %v4301_v10 = vpop.f32.mrb[109].mxu0  ;;  %7542 = vmatmul.mubr.bf16.gmra.mrb[128].mxu1 %v4969_v16  ;;  %v5909_v49 = vmax.f32 %v5907_v48, %v5908_v31 }
 0x623   :  { %v4882_v62 = vadd.f32 %v10243_v33, %v4301_v10  ;;  %v4303_v43 = vpop.f32.mrb[110].mxu0 }
 0x624   :  { %v4623_v63 = vadd.f32 %v10239_v11, %v4303_v43  ;;  %v4305_v6 = vpop.f32.mrb[111].mxu0  ;;  %v4750_v17 = vmax.f32 %v4622_v20, 0.0 }
 0x625   :  { %v7491_v22 = vpop.f32.mrb[76].mxu1  ;;  %6602 = vxpose.xlu0.b32.start [1/16] (narrow) %v4882_v62, 8  ;;  %v4883_v24 = vadd.f32 %v10243_v33, %v4305_v6 }
 0x626   :  { %v4751_v35 = vmax.f32 %v4623_v63, 0.0  ;;  %v5188_v38 = vpop.f32.mrb[77].mxu1  ;;  %v5633_v4 = vadd.f32 %v7491_v22, %v10422_v5 }
 0x627   :  { %v5631_v45 = vadd.f32 %v10422_v5, %v5188_v38  ;;  %v7492_v32 = vpop.f32.mrb[78].mxu1 }
 0x628   :  { %v4970_v8 = vpack.c.bf16 %v4751_v35, %v4750_v17  ;;  %v5191_v37 = vpop.f32.mrb[79].mxu1  ;;  %v5634_v9 = vadd.f32 %v7492_v32, %v10422_v5  ;;  %v5761_v13 = vmax.f32 %v5633_v4, 0.0 }
 0x629   :  { %v5759_v21 = vmax.f32 %v5631_v45, 0.0  ;;  %v5632_v55 = vadd.f32 %v10422_v5, %v5191_v37  ;;  %6603 = vxpose.xlu0.b32.cont [2/16] (narrow) %v4883_v24, 8  ;;  %v4309_v28 = vpop.f32.mrb[112].mxu0 }
 0x62a   :  { %v4624_v39 = vadd.f32 %v10239_v11, %v4309_v28  ;;  %v4311_v23 = vpop.f32.mrb[113].mxu0  ;;  %7545 = vmatprep.mubr.bf16.mxu1 %v4970_v8  ;;  %v5762_v58 = vmax.f32 %v5634_v9, 0.0  ;;  %v5914_v27 = vsel %vm2839_vm2, %v5761_v13, -inf }
 0x62b   :  { %v5910_v29 = vsel %vm2839_vm2, %v5759_v21, -inf  ;;  %v5760_v40 = vmax.f32 %v5632_v55, 0.0  ;;  %v4884_v30 = vadd.f32 %v10243_v33, %v4311_v23  ;;  %v4313_v59 = vpop.f32.mrb[114].mxu0 }
 0x62c   :  { %v5911_v42 = vmax.f32 %v5909_v49, %v5910_v29  ;;  %v4625_v41 = vadd.f32 %v10239_v11, %v4313_v59  ;;  %v4315_v7 = vpop.f32.mrb[115].mxu0  ;;  %v4752_v54 = vmax.f32 %v4624_v39, 0.0  ;;  %v5916_v47 = vsel %vm2839_vm2, %v5762_v58, -inf }
 0x62d   :  { %v5912_v46 = vsel %vm2839_vm2, %v5760_v40, -inf  ;;  %6604 = vxpose.xlu0.b32.cont [3/16] (narrow) %v4884_v30, 8  ;;  %v4885_v36 = vadd.f32 %v10243_v33, %v4315_v7 }
 0x62e   :  { %v5913_v3 = vmax.f32 %v5911_v42, %v5912_v46  ;;  %v4753_v2 = vmax.f32 %v4625_v41, 0.0 }
 0x630   :  { %v5915_v25 = vmax.f32 %v5913_v3, %v5914_v27  ;;  %v4971_v50 = vpack.c.bf16 %v4753_v2, %v4752_v54 }
 0x631   :  { %6605 = vxpose.xlu0.b32.cont [4/16] (narrow) %v4885_v36, 8  ;;  %v4319_v26 = vpop.f32.mrb[116].mxu0 }
 0x632   :  { %v4626_v53 = vadd.f32 %v10239_v11, %v4319_v26  ;;  %v4321_v61 = vpop.f32.mrb[117].mxu0  ;;  %7546 = vmatmul.mubr.bf16.gmra.mrb[132].mxu1 %v4971_v50  ;;  %v5917_v60 = vmax.f32 %v5915_v25, %v5916_v47 }
 0x633   :  { %v4886_v15 = vadd.f32 %v10243_v33, %v4321_v61  ;;  %v4323_v1 = vpop.f32.mrb[118].mxu0 }
 0x634   :  { %v4627_v18 = vadd.f32 %v10239_v11, %v4323_v1  ;;  %v4325_v14 = vpop.f32.mrb[119].mxu0  ;;  %v4754_v51 = vmax.f32 %v4626_v53, 0.0 }
 0x635   :  { %v7495_v34 = vpop.f32.mrb[80].mxu1  ;;  %6606 = vxpose.xlu0.b32.cont [5/16] (narrow) %v4886_v15, 8  ;;  %v4887_v19 = vadd.f32 %v10243_v33, %v4325_v14 }
 0x636   :  { %v4755_v0 = vmax.f32 %v4627_v18, 0.0  ;;  %v5204_v44 = vpop.f32.mrb[81].mxu1  ;;  %v5637_v48 = vadd.f32 %v7495_v34, %v10422_v5 }
 0x637   :  { %v5635_v16 = vadd.f32 %v10422_v5, %v5204_v44  ;;  %v7496_v31 = vpop.f32.mrb[82].mxu1 }
 0x638   :  { %v4972_v12 = vpack.c.bf16 %v4755_v0, %v4754_v51  ;;  %v5207_v20 = vpop.f32.mrb[83].mxu1  ;;  %v5638_v49 = vadd.f32 %v7496_v31, %v10422_v5  ;;  %v5765_v22 = vmax.f32 %v5637_v48, 0.0 }
 0x639   :  { %v5763_v10 = vmax.f32 %v5635_v16, 0.0  ;;  %v5636_v62 = vadd.f32 %v10422_v5, %v5207_v20  ;;  %6607 = vxpose.xlu0.b32.cont [6/16] (narrow) %v4887_v19, 8  ;;  %v4329_v43 = vpop.f32.mrb[120].mxu0 }
 0x63a   :  { %v4628_v63 = vadd.f32 %v10239_v11, %v4329_v43  ;;  %v4331_v6 = vpop.f32.mrb[121].mxu0  ;;  %7549 = vmatprep.mubr.bf16.mxu1 %v4972_v12  ;;  %v5766_v8 = vmax.f32 %v5638_v49, 0.0  ;;  %v5922_v28 = vsel %vm2839_vm2, %v5765_v22, -inf }
 0x63b   :  { %v5918_v17 = vsel %vm2839_vm2, %v5763_v10, -inf  ;;  %v5764_v35 = vmax.f32 %v5636_v62, 0.0  ;;  %v4888_v38 = vadd.f32 %v10243_v33, %v4331_v6  ;;  %v4333_v24 = vpop.f32.mrb[122].mxu0 }
 0x63c   :  { %v5919_v4 = vmax.f32 %v5917_v60, %v5918_v17  ;;  %v4629_v45 = vadd.f32 %v10239_v11, %v4333_v24  ;;  %v4335_v32 = vpop.f32.mrb[123].mxu0  ;;  %v4756_v9 = vmax.f32 %v4628_v63, 0.0  ;;  %v5924_v29 = vsel %vm2839_vm2, %v5766_v8, -inf }
 0x63d   :  { %v5920_v37 = vsel %vm2839_vm2, %v5764_v35, -inf  ;;  %6608 = vxpose.xlu0.b32.cont [7/16] (narrow) %v4888_v38, 8  ;;  %v4889_v39 = vadd.f32 %v10243_v33, %v4335_v32 }
 0x63e   :  { %v5921_v21 = vmax.f32 %v5919_v4, %v5920_v37  ;;  %v4757_v55 = vmax.f32 %v4629_v45, 0.0 }
 0x640   :  { %v5923_v23 = vmax.f32 %v5921_v21, %v5922_v28  ;;  %v4973_v13 = vpack.c.bf16 %v4757_v55, %v4756_v9 }
 0x641   :  { %6609 = vxpose.xlu0.b32.cont [8/16] (narrow) %v4889_v39, 8  ;;  %v4339_v40 = vpop.f32.mrb[124].mxu0 }
 0x642   :  { %v10567_v30 = vmax.f32 %v5923_v23, %v5924_v29  ;;  %v4630_v59 = vadd.f32 %v10239_v11, %v4339_v40  ;;  %v4341_v42 = vpop.f32.mrb[125].mxu0  ;;  %7550 = vmatmul.mubr.bf16.gmra.mrb[136].mxu1 %v4973_v13 }
 0x643   :  { %v4890_v41 = vadd.f32 %v10243_v33, %v4341_v42  ;;  %v4343_v7 = vpop.f32.mrb[126].mxu0 }
 0x644   :  { %v4631_v58 = vadd.f32 %v10239_v11, %v4343_v7  ;;  %v4345_v46 = vpop.f32.mrb[127].mxu0  ;;  %v4758_v54 = vmax.f32 %v4630_v59, 0.0  ;;  %v7686_v59 = vld [vmem:[%s11020_s1 + $0x1d0] ss:$8 sps:$4 sm:$0xff]  }
 0x645   :  { %v7499_v3 = vpop.f32.mrb[84].mxu1  ;;  %6610 = vxpose.xlu0.b32.cont [9/16] (narrow) %v4890_v41, 8  ;;  %v4891_v36 = vadd.f32 %v10243_v33, %v4345_v46  ;;  %6267 = vmatpush1.bf16.msra.mxu1 %v7686_v59 }
 0x646   :  { %v4759_v2 = vmax.f32 %v4631_v58, 0.0  ;;  %v5220_v27 = vpop.f32.mrb[85].mxu1  ;;  %v5641_v25 = vadd.f32 %v7499_v3, %v10422_v5  ;;  %6268 = vmatprep.subr.bf16.mxu1 %v11191_v52 }
 0x647   :  { %v5639_v50 = vadd.f32 %v10422_v5, %v5220_v27  ;;  %v7500_v47 = vpop.f32.mrb[86].mxu1 }
 0x648   :  { %v4974_v26 = vpack.c.bf16 %v4759_v2, %v4758_v54  ;;  %v5223_v53 = vpop.f32.mrb[87].mxu1  ;;  %v5642_v60 = vadd.f32 %v7500_v47, %v10422_v5  ;;  %v5769_v34 = vmax.f32 %v5641_v25, 0.0 }
 0x649   :  { %v5767_v61 = vmax.f32 %v5639_v50, 0.0  ;;  %v5640_v15 = vadd.f32 %v10422_v5, %v5223_v53  ;;  %6611 = vxpose.xlu0.b32.cont [10/16] (narrow) %v4891_v36, 8  ;;  %v4349_v1 = vpop.f32.mrb[128].mxu0 }
 0x64a   :  { %v4632_v18 = vadd.f32 %v10239_v11, %v4349_v1  ;;  %v4351_v14 = vpop.f32.mrb[129].mxu0  ;;  %7553 = vmatprep.mubr.bf16.mxu1 %v4974_v26  ;;  %v5770_v31 = vmax.f32 %v5642_v60, 0.0  ;;  %v5935_v62 = vsel %vm2839_vm2, %v5769_v34, -inf }
 0x64b   :  { %v5768_v51 = vmax.f32 %v5640_v15, 0.0  ;;  %v4892_v0 = vadd.f32 %v10243_v33, %v4351_v14  ;;  %v4353_v44 = vpop.f32.mrb[130].mxu0  ;;  %v5932_v16 = vsel %vm2839_vm2, %v5767_v61, -inf }
 0x64c   :  { %v4633_v19 = vadd.f32 %v10239_v11, %v4353_v44  ;;  %v4355_v48 = vpop.f32.mrb[131].mxu0  ;;  %v4760_v10 = vmax.f32 %v4632_v18, 0.0  ;;  %v5937_v22 = vsel %vm2839_vm2, %v5770_v31, -inf }
 0x64d   :  { %v5933_v12 = vsel %vm2839_vm2, %v5768_v51, -inf  ;;  %6612 = vxpose.xlu0.b32.cont [11/16] (narrow) %v4892_v0, 8  ;;  %v4893_v43 = vadd.f32 %v10243_v33, %v4355_v48 }
 0x64e   :  { %v5934_v20 = vmax.f32 %v5932_v16, %v5933_v12  ;;  %v4761_v49 = vmax.f32 %v4633_v19, 0.0 }
 0x650   :  { %v5936_v63 = vmax.f32 %v5934_v20, %v5935_v62  ;;  %v4975_v6 = vpack.c.bf16 %v4761_v49, %v4760_v10 }
 0x651   :  { %6613 = vxpose.xlu0.b32.cont [12/16] (narrow) %v4893_v43, 8  ;;  %v4359_v17 = vpop.f32.mrb[132].mxu0 }
 0x652   :  { %v4634_v35 = vadd.f32 %v10239_v11, %v4359_v17  ;;  %v4361_v38 = vpop.f32.mrb[133].mxu0  ;;  %7554 = vmatmul.mubr.bf16.gmra.mrb[140].mxu1 %v4975_v6  ;;  %v5938_v24 = vmax.f32 %v5936_v63, %v5937_v22 }
 0x653   :  { %v4894_v4 = vadd.f32 %v10243_v33, %v4361_v38  ;;  %v4363_v45 = vpop.f32.mrb[134].mxu0 }
 0x654   :  { %v4635_v32 = vadd.f32 %v10239_v11, %v4363_v45  ;;  %v4365_v8 = vpop.f32.mrb[135].mxu0  ;;  %v4762_v21 = vmax.f32 %v4634_v35, 0.0 }
 0x655   :  { %v7503_v37 = vpop.f32.mrb[88].mxu1  ;;  %6614 = vxpose.xlu0.b32.cont [13/16] (narrow) %v4894_v4, 8  ;;  %v4895_v28 = vadd.f32 %v10243_v33, %v4365_v8 }
 0x656   :  { %v4763_v9 = vmax.f32 %v4635_v32, 0.0  ;;  %v5236_v55 = vpop.f32.mrb[89].mxu1  ;;  %v5645_v39 = vadd.f32 %v7503_v37, %v10422_v5 }
 0x657   :  { %v5643_v23 = vadd.f32 %v10422_v5, %v5236_v55  ;;  %v7504_v13 = vpop.f32.mrb[90].mxu1 }
 0x658   :  { %v4976_v29 = vpack.c.bf16 %v4763_v9, %v4762_v21  ;;  %v5239_v40 = vpop.f32.mrb[91].mxu1  ;;  %v5646_v41 = vadd.f32 %v7504_v13, %v10422_v5  ;;  %v5773_v54 = vmax.f32 %v5645_v39, 0.0 }
 0x659   :  { %v5771_v42 = vmax.f32 %v5643_v23, 0.0  ;;  %v5644_v7 = vadd.f32 %v10422_v5, %v5239_v40  ;;  %6615 = vxpose.xlu0.b32.cont [14/16] (narrow) %v4895_v28, 8  ;;  %v4369_v58 = vpop.f32.mrb[136].mxu0 }
 0x65a   :  { %v4636_v46 = vadd.f32 %v10239_v11, %v4369_v58  ;;  %v4371_v3 = vpop.f32.mrb[137].mxu0  ;;  %7557 = vmatprep.mubr.bf16.mxu1 %v4976_v29  ;;  %v5774_v53 = vmax.f32 %v5646_v41, 0.0  ;;  %v5943_v18 = vsel %vm2839_vm2, %v5773_v54, -inf }
 0x65b   :  { %v5939_v2 = vsel %vm2839_vm2, %v5771_v42, -inf  ;;  %v5772_v27 = vmax.f32 %v5644_v7, 0.0  ;;  %v4896_v36 = vadd.f32 %v10243_v33, %v4371_v3  ;;  %v4373_v25 = vpop.f32.mrb[138].mxu0 }
 0x65c   :  { %v5940_v50 = vmax.f32 %v5938_v24, %v5939_v2  ;;  %v4637_v47 = vadd.f32 %v10239_v11, %v4373_v25  ;;  %v4375_v26 = vpop.f32.mrb[139].mxu0  ;;  %v4764_v15 = vmax.f32 %v4636_v46, 0.0  ;;  %v5945_v0 = vsel %vm2839_vm2, %v5774_v53, -inf }
 0x65d   :  { %v5941_v61 = vsel %vm2839_vm2, %v5772_v27, -inf  ;;  %6616 = vxpose.xlu0.b32.cont [15/16] (narrow) %v4896_v36, 8  ;;  %v4897_v14 = vadd.f32 %v10243_v33, %v4375_v26  ;;  %v7687_v27 = vld [vmem:[%s11020_s1 + $0x1e0] ss:$8 sps:$4 sm:$0xff]  }
 0x65e   :  { %v5942_v60 = vmax.f32 %v5940_v50, %v5941_v61  ;;  %v4765_v1 = vmax.f32 %v4637_v47, 0.0  ;;  %6269 = vmatpush1.bf16.msra.mxu1 %v7687_v27 }
 0x65f   :  { %6270 = vmatprep.subr.bf16.mxu1 %v11191_v52 }
 0x660   :  { %v5944_v34 = vmax.f32 %v5942_v60, %v5943_v18  ;;  %v4977_v51 = vpack.c.bf16 %v4765_v1, %v4764_v15 }
 0x661   :  { %6617 = vxpose.xlu0.b32.end [16/16] (narrow) %v4897_v14, 8  ;;  %v4379_v44 = vpop.f32.mrb[140].mxu0 }
 0x662   :  { %v4638_v19 = vadd.f32 %v10239_v11, %v4379_v44  ;;  %v4381_v48 = vpop.f32.mrb[141].mxu0  ;;  %7558 = vmatmul.mubr.bf16.gmra.mrb[144].mxu1 %v4977_v51  ;;  %v5946_v16 = vmax.f32 %v5944_v34, %v5945_v0 }
 0x663   :  { %v4898_v31 = vadd.f32 %v10243_v33, %v4381_v48  ;;  %v4383_v12 = vpop.f32.mrb[142].mxu0 }
 0x664   :  { %v4639_v20 = vadd.f32 %v10239_v11, %v4383_v12  ;;  %v4385_v10 = vpop.f32.mrb[143].mxu0  ;;  %v4766_v62 = vmax.f32 %v4638_v19, 0.0 }
 0x665   :  { %v7507_v49 = vpop.f32.mrb[92].mxu1  ;;  %6634 = vxpose.xlu1.b32.start [1/16] (narrow) %v4898_v31, 8  ;;  %v4899_v6 = vadd.f32 %v10243_v33, %v4385_v10 }
 0x666   :  { %v4767_v43 = vmax.f32 %v4639_v20, 0.0  ;;  %v5252_v63 = vpop.f32.mrb[93].mxu1  ;;  %v5649_v22 = vadd.f32 %v7507_v49, %v10422_v5 }
 0x667   :  { %v5647_v17 = vadd.f32 %v10422_v5, %v5252_v63  ;;  %v7508_v35 = vpop.f32.mrb[94].mxu1 }
 0x668   :  { %v4978_v38 = vpack.c.bf16 %v4767_v43, %v4766_v62  ;;  %v5255_v24 = vpop.f32.mrb[95].mxu1  ;;  %v5650_v45 = vadd.f32 %v7508_v35, %v10422_v5  ;;  %v5777_v9 = vmax.f32 %v5649_v22, 0.0 }
 0x669   :  { %v5775_v4 = vmax.f32 %v5647_v17, 0.0  ;;  %v5648_v32 = vadd.f32 %v10422_v5, %v5255_v24  ;;  %6635 = vxpose.xlu1.b32.cont [2/16] (narrow) %v4899_v6, 8  ;;  %v4389_v8 = vpop.f32.mrb[144].mxu0 }
 0x66a   :  { %v4640_v37 = vadd.f32 %v10239_v11, %v4389_v8  ;;  %v4391_v21 = vpop.f32.mrb[145].mxu0  ;;  %7561 = vmatprep.mubr.bf16.mxu1 %v4978_v38  ;;  %v5778_v59 = vmax.f32 %v5650_v45, 0.0  ;;  %v5951_v46 = vsel %vm2839_vm2, %v5777_v9, -inf }
 0x66b   :  { %v5947_v55 = vsel %vm2839_vm2, %v5775_v4, -inf  ;;  %v5776_v28 = vmax.f32 %v5648_v32, 0.0  ;;  %v4900_v39 = vadd.f32 %v10243_v33, %v4391_v21  ;;  %v4393_v23 = vpop.f32.mrb[146].mxu0 }
 0x66c   :  { %v5948_v13 = vmax.f32 %v5946_v16, %v5947_v55  ;;  %v4641_v29 = vadd.f32 %v10239_v11, %v4393_v23  ;;  %v4395_v40 = vpop.f32.mrb[147].mxu0  ;;  %v4768_v7 = vmax.f32 %v4640_v37, 0.0  ;;  %v5953_v36 = vsel %vm2839_vm2, %v5778_v59, -inf }
 0x66d   :  { %v5949_v42 = vsel %vm2839_vm2, %v5776_v28, -inf  ;;  %6636 = vxpose.xlu1.b32.cont [3/16] (narrow) %v4900_v39, 8  ;;  %v4901_v3 = vadd.f32 %v10243_v33, %v4395_v40  ;;  %v7688_v39 = vld [vmem:[%s11020_s1 + $0x1f0] ss:$8 sps:$4 sm:$0xff]  }
 0x66e   :  { %v5950_v41 = vmax.f32 %v5948_v13, %v5949_v42  ;;  %v4769_v58 = vmax.f32 %v4641_v29, 0.0  ;;  %6271 = vmatpush1.bf16.msra.mxu1 %v7688_v39 }
 0x66f   :  { %6272 = vmatprep.subr.bf16.mxu1 %v11191_v52 }
 0x670   :  { %v5952_v54 = vmax.f32 %v5950_v41, %v5951_v46  ;;  %v4979_v2 = vpack.c.bf16 %v4769_v58, %v4768_v7 }
 0x671   :  { %6637 = vxpose.xlu1.b32.cont [4/16] (narrow) %v4901_v3, 8  ;;  %v4399_v25 = vpop.f32.mrb[148].mxu0 }
 0x672   :  { %v4642_v50 = vadd.f32 %v10239_v11, %v4399_v25  ;;  %v4401_v47 = vpop.f32.mrb[149].mxu0  ;;  %7562 = vmatmul.mubr.bf16.gmra.mrb[148].mxu1 %v4979_v2  ;;  %v5954_v26 = vmax.f32 %v5952_v54, %v5953_v36 }
 0x673   :  { %v4902_v53 = vadd.f32 %v10243_v33, %v4401_v47  ;;  %v4403_v61 = vpop.f32.mrb[150].mxu0 }
 0x674   :  { %v4643_v60 = vadd.f32 %v10239_v11, %v4403_v61  ;;  %v4405_v15 = vpop.f32.mrb[151].mxu0  ;;  %v4770_v18 = vmax.f32 %v4642_v50, 0.0 }
 0x675   :  { %v7511_v1 = vpop.f32.mrb[96].mxu1  ;;  %6638 = vxpose.xlu1.b32.cont [5/16] (narrow) %v4902_v53, 8  ;;  %v4903_v51 = vadd.f32 %v10243_v33, %v4405_v15 }
 0x676   :  { %v4771_v14 = vmax.f32 %v4643_v60, 0.0  ;;  %v5268_v34 = vpop.f32.mrb[97].mxu1  ;;  %v5653_v0 = vadd.f32 %v7511_v1, %v10422_v5 }
 0x677   :  { %v5651_v44 = vadd.f32 %v10422_v5, %v5268_v34  ;;  %v7512_v19 = vpop.f32.mrb[98].mxu1 }
 0x678   :  { %v4980_v48 = vpack.c.bf16 %v4771_v14, %v4770_v18  ;;  %v5271_v16 = vpop.f32.mrb[99].mxu1  ;;  %v5654_v12 = vadd.f32 %v7512_v19, %v10422_v5  ;;  %v5781_v43 = vmax.f32 %v5653_v0, 0.0 }
 0x679   :  { %v5779_v31 = vmax.f32 %v5651_v44, 0.0  ;;  %v5652_v20 = vadd.f32 %v10422_v5, %v5271_v16  ;;  %6639 = vxpose.xlu1.b32.cont [6/16] (narrow) %v4903_v51, 8  ;;  %v4409_v10 = vpop.f32.mrb[152].mxu0 }
 0x67a   :  { %v4644_v49 = vadd.f32 %v10239_v11, %v4409_v10  ;;  %v4411_v62 = vpop.f32.mrb[153].mxu0  ;;  %7565 = vmatprep.mubr.bf16.mxu1 %v4980_v48  ;;  %v5782_v4 = vmax.f32 %v5654_v12, 0.0  ;;  %v5959_v21 = vsel %vm2839_vm2, %v5781_v43, -inf }
 0x67b   :  { %v5955_v63 = vsel %vm2839_vm2, %v5779_v31, -inf  ;;  %v5780_v6 = vmax.f32 %v5652_v20, 0.0  ;;  %v4904_v22 = vadd.f32 %v10243_v33, %v4411_v62  ;;  %v4413_v17 = vpop.f32.mrb[154].mxu0 }
 0x67c   :  { %v5956_v35 = vmax.f32 %v5954_v26, %v5955_v63  ;;  %v4645_v38 = vadd.f32 %v10239_v11, %v4413_v17  ;;  %v4415_v24 = vpop.f32.mrb[155].mxu0  ;;  %v4772_v8 = vmax.f32 %v4644_v49, 0.0  ;;  %v5961_v23 = vsel %vm2839_vm2, %v5782_v4, -inf }
 0x67d   :  { %v5957_v45 = vsel %vm2839_vm2, %v5780_v6, -inf  ;;  %6640 = vxpose.xlu1.b32.cont [7/16] (narrow) %v4904_v22, 8  ;;  %v4905_v9 = vadd.f32 %v10243_v33, %v4415_v24  ;;  %v7689_v22 = vld [vmem:[%s11020_s1 + $0x200] ss:$8 sps:$4 sm:$0xff]  }
 0x67e   :  { %v5958_v32 = vmax.f32 %v5956_v35, %v5957_v45  ;;  %v4773_v37 = vmax.f32 %v4645_v38, 0.0  ;;  %6273 = vmatpush1.bf16.msra.mxu1 %v7689_v22 }
 0x67f   :  { %6274 = vmatprep.subr.bf16.mxu1 %v11191_v52 }
 0x680   :  { %v5960_v55 = vmax.f32 %v5958_v32, %v5959_v21  ;;  %v4981_v28 = vpack.c.bf16 %v4773_v37, %v4772_v8 }
 0x681   :  { %6641 = vxpose.xlu1.b32.cont [8/16] (narrow) %v4905_v9, 8  ;;  %v4419_v13 = vpop.f32.mrb[156].mxu0 }
 0x682   :  { %v4646_v29 = vadd.f32 %v10239_v11, %v4419_v13  ;;  %v4421_v40 = vpop.f32.mrb[157].mxu0  ;;  %7566 = vmatmul.mubr.bf16.gmra.mrb[152].mxu1 %v4981_v28  ;;  %v5962_v59 = vmax.f32 %v5960_v55, %v5961_v23 }
 0x683   :  { %v4906_v42 = vadd.f32 %v10243_v33, %v4421_v40  ;;  %v4423_v41 = vpop.f32.mrb[158].mxu0 }
 0x684   :  { %v4647_v7 = vadd.f32 %v10239_v11, %v4423_v41  ;;  %v4425_v58 = vpop.f32.mrb[159].mxu0  ;;  %v4774_v3 = vmax.f32 %v4646_v29, 0.0 }
 0x685   :  { %v7515_v46 = vpop.f32.mrb[100].mxu1  ;;  %6642 = vxpose.xlu1.b32.cont [9/16] (narrow) %v4906_v42, 8  ;;  %v4907_v27 = vadd.f32 %v10243_v33, %v4425_v58 }
 0x686   :  { %v4775_v54 = vmax.f32 %v4647_v7, 0.0  ;;  %v5284_v2 = vpop.f32.mrb[101].mxu1  ;;  %v5657_v36 = vadd.f32 %v7515_v46, %v10422_v5 }
 0x687   :  { %v5655_v25 = vadd.f32 %v10422_v5, %v5284_v2  ;;  %v7516_v50 = vpop.f32.mrb[102].mxu1 }
 0x688   :  { %v4982_v47 = vpack.c.bf16 %v4775_v54, %v4774_v3  ;;  %v5287_v26 = vpop.f32.mrb[103].mxu1  ;;  %v5658_v61 = vadd.f32 %v7516_v50, %v10422_v5  ;;  %v5785_v14 = vmax.f32 %v5657_v36, 0.0 }
 0x689   :  { %v5783_v53 = vmax.f32 %v5655_v25, 0.0  ;;  %v5656_v60 = vadd.f32 %v10422_v5, %v5287_v26  ;;  %6643 = vxpose.xlu1.b32.cont [10/16] (narrow) %v4907_v27, 8  ;;  %v4429_v15 = vpop.f32.mrb[160].mxu0 }
 0x68a   :  { %v4648_v1 = vadd.f32 %v10239_v11, %v4429_v15  ;;  %v4431_v18 = vpop.f32.mrb[161].mxu0  ;;  %7569 = vmatprep.mubr.bf16.mxu1 %v4982_v47  ;;  %v5786_v31 = vmax.f32 %v5658_v61, 0.0  ;;  %v5967_v62 = vsel %vm2839_vm2, %v5785_v14, -inf }
 0x68b   :  { %v5963_v34 = vsel %vm2839_vm2, %v5783_v53, -inf  ;;  %v5784_v51 = vmax.f32 %v5656_v60, 0.0  ;;  %v4908_v0 = vadd.f32 %v10243_v33, %v4431_v18  ;;  %v4433_v44 = vpop.f32.mrb[162].mxu0 }
 0x68c   :  { %v5964_v19 = vmax.f32 %v5962_v59, %v5963_v34  ;;  %v4649_v48 = vadd.f32 %v10239_v11, %v4433_v44  ;;  %v4435_v16 = vpop.f32.mrb[163].mxu0  ;;  %v4776_v10 = vmax.f32 %v4648_v1, 0.0  ;;  %v5969_v17 = vsel %vm2839_vm2, %v5786_v31, -inf }
 0x68d   :  { %v5965_v12 = vsel %vm2839_vm2, %v5784_v51, -inf  ;;  %6644 = vxpose.xlu1.b32.cont [11/16] (narrow) %v4908_v0, 8  ;;  %v4909_v43 = vadd.f32 %v10243_v33, %v4435_v16 }
 0x68e   :  { %v5966_v20 = vmax.f32 %v5964_v19, %v5965_v12  ;;  %v4777_v49 = vmax.f32 %v4649_v48, 0.0 }
 0x690   :  { %v5968_v63 = vmax.f32 %v5966_v20, %v5967_v62  ;;  %v4983_v6 = vpack.c.bf16 %v4777_v49, %v4776_v10 }
 0x691   :  { %6645 = vxpose.xlu1.b32.cont [12/16] (narrow) %v4909_v43, 8  ;;  %v4439_v35 = vpop.f32.mrb[164].mxu0 }
 0x692   :  { %v4650_v38 = vadd.f32 %v10239_v11, %v4439_v35  ;;  %v4441_v24 = vpop.f32.mrb[165].mxu0  ;;  %7570 = vmatmul.mubr.bf16.gmra.mrb[156].mxu1 %v4983_v6  ;;  %v5970_v4 = vmax.f32 %v5968_v63, %v5969_v17 }
 0x693   :  { %v4910_v45 = vadd.f32 %v10243_v33, %v4441_v24  ;;  %v4443_v32 = vpop.f32.mrb[166].mxu0 }
 0x694   :  { %v4651_v8 = vadd.f32 %v10239_v11, %v4443_v32  ;;  %v4445_v37 = vpop.f32.mrb[167].mxu0  ;;  %v4778_v9 = vmax.f32 %v4650_v38, 0.0 }
 0x695   :  { %v7519_v21 = vpop.f32.mrb[104].mxu1  ;;  %6646 = vxpose.xlu1.b32.cont [13/16] (narrow) %v4910_v45, 8  ;;  %v4911_v39 = vadd.f32 %v10243_v33, %v4445_v37 }
 0x696   :  { %v4779_v55 = vmax.f32 %v4651_v8, 0.0  ;;  %v5300_v28 = vpop.f32.mrb[105].mxu1  ;;  %v5661_v23 = vadd.f32 %v7519_v21, %v10422_v5 }
 0x697   :  { %v5659_v13 = vadd.f32 %v10422_v5, %v5300_v28  ;;  %v7520_v29 = vpop.f32.mrb[106].mxu1 }
 0x698   :  { %v4984_v40 = vpack.c.bf16 %v4779_v55, %v4778_v9  ;;  %v5303_v59 = vpop.f32.mrb[107].mxu1  ;;  %v5662_v41 = vadd.f32 %v7520_v29, %v10422_v5  ;;  %v5789_v54 = vmax.f32 %v5661_v23, 0.0 }
 0x699   :  { %v5787_v42 = vmax.f32 %v5659_v13, 0.0  ;;  %v5660_v7 = vadd.f32 %v10422_v5, %v5303_v59  ;;  %6647 = vxpose.xlu1.b32.cont [14/16] (narrow) %v4911_v39, 8  ;;  %v4449_v58 = vpop.f32.mrb[168].mxu0 }
 0x69a   :  { %v4652_v46 = vadd.f32 %v10239_v11, %v4449_v58  ;;  %v4451_v3 = vpop.f32.mrb[169].mxu0  ;;  %7573 = vmatprep.mubr.bf16.mxu1 %v4984_v40  ;;  %v5790_v53 = vmax.f32 %v5662_v41, 0.0  ;;  %v5975_v18 = vsel %vm2839_vm2, %v5789_v54, -inf }
 0x69b   :  { %v5971_v2 = vsel %vm2839_vm2, %v5787_v42, -inf  ;;  %v5788_v27 = vmax.f32 %v5660_v7, 0.0  ;;  %v4912_v36 = vadd.f32 %v10243_v33, %v4451_v3  ;;  %v4453_v25 = vpop.f32.mrb[170].mxu0 }
 0x69c   :  { %v5972_v50 = vmax.f32 %v5970_v4, %v5971_v2  ;;  %v4653_v47 = vadd.f32 %v10239_v11, %v4453_v25  ;;  %v4455_v26 = vpop.f32.mrb[171].mxu0  ;;  %v4780_v15 = vmax.f32 %v4652_v46, 0.0  ;;  %v5977_v0 = vsel %vm2839_vm2, %v5790_v53, -inf  ;;  %v7690_v46 = vld [vmem:[%s11020_s1 + $0x210] ss:$8 sps:$4 sm:$0xff]  }
 0x69d   :  { %v5973_v61 = vsel %vm2839_vm2, %v5788_v27, -inf  ;;  %6648 = vxpose.xlu1.b32.cont [15/16] (narrow) %v4912_v36, 8  ;;  %v4913_v14 = vadd.f32 %v10243_v33, %v4455_v26  ;;  %6275 = vmatpush1.bf16.msra.mxu1 %v7690_v46 }
 0x69e   :  { %v5974_v60 = vmax.f32 %v5972_v50, %v5973_v61  ;;  %v4781_v1 = vmax.f32 %v4653_v47, 0.0  ;;  %6276 = vmatprep.subr.bf16.mxu1 %v11191_v52 }
 0x6a0   :  { %v5976_v34 = vmax.f32 %v5974_v60, %v5975_v18  ;;  %v4985_v51 = vpack.c.bf16 %v4781_v1, %v4780_v15 }
 0x6a1   :  { %6649 = vxpose.xlu1.b32.end [16/16] (narrow) %v4913_v14, 8  ;;  %v4459_v44 = vpop.f32.mrb[172].mxu0 }
 0x6a2   :  { %v4654_v19 = vadd.f32 %v10239_v11, %v4459_v44  ;;  %v10682_v48 = vpop.f32.mrb[173].mxu0  ;;  %7574 = vmatmul.mubr.bf16.gmra.mrb[160].mxu1 %v4985_v51  ;;  %v5978_v16 = vmax.f32 %v5976_v34, %v5977_v0  ;;  %v5926_v51 = vrot.slane %v10567_v30, 4 }
 0x6a3   :  { %v4463_v31 = vpop.f32.mrb[174].mxu0 }
 0x6a4   :  { %v4655_v12 = vadd.f32 %v10239_v11, %v4463_v31  ;;  %v10685_v20 = vpop.f32.mrb[175].mxu0  ;;  %v4782_v49 = vmax.f32 %v4654_v19, 0.0 }
 0x6a5   :  { %v7523_v10 = vpop.f32.mrb[108].mxu1 }
 0x6a6   :  { %v4783_v62 = vmax.f32 %v4655_v12, 0.0  ;;  %v5316_v43 = vpop.f32.mrb[109].mxu1  ;;  %v5665_v63 = vadd.f32 %v7523_v10, %v10422_v5 }
 0x6a7   :  { %v5663_v6 = vadd.f32 %v10422_v5, %v5316_v43  ;;  %v7524_v22 = vpop.f32.mrb[110].mxu1 }
 0x6a8   :  { %v4986_v17 = vpack.c.bf16 %v4783_v62, %v4782_v49  ;;  %v5319_v35 = vpop.f32.mrb[111].mxu1  ;;  %v5666_v24 = vadd.f32 %v7524_v22, %v10422_v5  ;;  %v5793_v37 = vmax.f32 %v5665_v63, 0.0 }
 0x6a9   :  { %v5791_v38 = vmax.f32 %v5663_v6, 0.0  ;;  %v5664_v4 = vadd.f32 %v10422_v5, %v5319_v35  ;;  %v4469_v45 = vpop.f32.mrb[176].mxu0 }
 0x6aa   :  { %v4656_v32 = vadd.f32 %v10239_v11, %v4469_v45  ;;  %v10692_v8 = vpop.f32.mrb[177].mxu0  ;;  %7577 = vmatprep.mubr.bf16.mxu1 %v4986_v17  ;;  %v5794_v13 = vmax.f32 %v5666_v24, 0.0  ;;  %v5983_v41 = vsel %vm2839_vm2, %v5793_v37, -inf  ;;  %v5927_v17 = vmax.f32 %v10567_v30, %v5926_v51 }
 0x6ab   :  { %v5979_v21 = vsel %vm2839_vm2, %v5791_v38, -inf  ;;  %v5792_v9 = vmax.f32 %v5664_v4, 0.0  ;;  %v4473_v55 = vpop.f32.mrb[178].mxu0 }
 0x6ac   :  { %v5980_v28 = vmax.f32 %v5978_v16, %v5979_v21  ;;  %v4657_v39 = vadd.f32 %v10239_v11, %v4473_v55  ;;  %v10696_v23 = vpop.f32.mrb[179].mxu0  ;;  %v4784_v59 = vmax.f32 %v4656_v32, 0.0  ;;  %v5985_v3 = vsel %vm2839_vm2, %v5794_v13, -inf }
 0x6ad   :  { %v5981_v29 = vsel %vm2839_vm2, %v5792_v9, -inf  ;;  %v5928_v9 = vrot.slane %v5927_v17, 2 }
 0x6ae   :  { %v5982_v40 = vmax.f32 %v5980_v28, %v5981_v29  ;;  %v4785_v42 = vmax.f32 %v4657_v39, 0.0 }
 0x6b0   :  { %v5984_v7 = vmax.f32 %v5982_v40, %v5983_v41  ;;  %v4987_v58 = vpack.c.bf16 %v4785_v42, %v4784_v59  ;;  %v5929_v41 = vmax.f32 %v5927_v17, %v5928_v9 }
 0x6b1   :  { %v4479_v54 = vpop.f32.mrb[180].mxu0 }
 0x6b2   :  { %v4658_v2 = vadd.f32 %v10239_v11, %v4479_v54  ;;  %v10705_v27 = vpop.f32.mrb[181].mxu0  ;;  %7578 = vmatmul.mubr.bf16.gmra.mrb[164].mxu1 %v4987_v58  ;;  %v5986_v36 = vmax.f32 %v5984_v7, %v5985_v3 }
 0x6b3   :  { %v4483_v25 = vpop.f32.mrb[182].mxu0 }
 0x6b4   :  { %v4659_v50 = vadd.f32 %v10239_v11, %v4483_v25  ;;  %v10708_v47 = vpop.f32.mrb[183].mxu0  ;;  %v4786_v53 = vmax.f32 %v4658_v2, 0.0 }
 0x6b5   :  { %v7527_v26 = vpop.f32.mrb[112].mxu1 }
 0x6b6   :  { %v4787_v61 = vmax.f32 %v4659_v50, 0.0  ;;  %v5332_v60 = vpop.f32.mrb[113].mxu1  ;;  %v5669_v15 = vadd.f32 %v7527_v26, %v10422_v5 }
 0x6b7   :  { %v5667_v1 = vadd.f32 %v10422_v5, %v5332_v60  ;;  %v7528_v18 = vpop.f32.mrb[114].mxu1 }
 0x6b8   :  { %v4988_v14 = vpack.c.bf16 %v4787_v61, %v4786_v53  ;;  %v5335_v34 = vpop.f32.mrb[115].mxu1  ;;  %v5670_v44 = vadd.f32 %v7528_v18, %v10422_v5  ;;  %v5797_v10 = vmax.f32 %v5669_v15, 0.0  ;;  %v5930_v61 = vrot.slane %v5929_v41, 1 }
 0x6b9   :  { %v5795_v0 = vmax.f32 %v5667_v1, 0.0  ;;  %v5668_v19 = vadd.f32 %v10422_v5, %v5335_v34  ;;  %v4489_v16 = vpop.f32.mrb[184].mxu0 }
 0x6ba   :  { %v4660_v31 = vadd.f32 %v10239_v11, %v4489_v16  ;;  %v10717_v12 = vpop.f32.mrb[185].mxu0  ;;  %7581 = vmatprep.mubr.bf16.mxu1 %v4988_v14  ;;  %v5798_v35 = vmax.f32 %v5670_v44, 0.0  ;;  %v5991_v32 = vsel %vm2839_vm2, %v5797_v10, -inf }
 0x6bb   :  { %v5987_v49 = vsel %vm2839_vm2, %v5795_v0, -inf  ;;  %v5796_v62 = vmax.f32 %v5668_v19, 0.0  ;;  %v4493_v43 = vpop.f32.mrb[186].mxu0 }
 0x6bc   :  { %v5988_v63 = vmax.f32 %v5986_v36, %v5987_v49  ;;  %v4661_v6 = vadd.f32 %v10239_v11, %v4493_v43  ;;  %v10721_v22 = vpop.f32.mrb[187].mxu0  ;;  %v4788_v4 = vmax.f32 %v4660_v31, 0.0  ;;  %v5993_v55 = vsel %vm2839_vm2, %v5798_v35, -inf }
 0x6bd   :  { %v5989_v38 = vsel %vm2839_vm2, %v5796_v62, -inf  ;;  %v5931_v49 = vmax.f32 %v5929_v41, %v5930_v61 }
 0x6be   :  { %v5990_v24 = vmax.f32 %v5988_v63, %v5989_v38  ;;  %v4789_v45 = vmax.f32 %v4661_v6, 0.0 }
 0x6c0   :  { %v5992_v37 = vmax.f32 %v5990_v24, %v5991_v32  ;;  %v4989_v21 = vpack.c.bf16 %v4789_v45, %v4788_v4 }
 0x6c1   :  { %v4499_v28 = vpop.f32.mrb[188].mxu0 }
 0x6c2   :  { %v5994_v39 = vmax.f32 %v5992_v37, %v5993_v55  ;;  %v4662_v13 = vadd.f32 %v10239_v11, %v4499_v28  ;;  %v10728_v29 = vpop.f32.mrb[189].mxu0  ;;  %7582 = vmatmul.mubr.bf16.gmra.mrb[168].mxu1 %v4989_v21  ;;  %v7691_v37 = vld [vmem:[%s11020_s1 + $0x220] ss:$8 sps:$4 sm:$0xff]  }
 0x6c3   :  { %v4503_v30 = vpop.f32.mrb[190].mxu0  ;;  %6277 = vmatpush1.bf16.msra.mxu1 %v7691_v37 }
 0x6c4   :  { %v5995_v40 = vrot.slane %v5994_v39, 4  ;;  %v4663_v59 = vadd.f32 %v10239_v11, %v4503_v30  ;;  %v10731_v42 = vpop.f32.mrb[191].mxu0  ;;  %v4790_v46 = vmax.f32 %v4662_v13, 0.0  ;;  %v7692_v30 = vld [vmem:[%s11020_s1 + $0x230] ss:$8 sps:$4 sm:$0xff]   ;;  %6278 = vmatprep.subr.bf16.mxu1 %v11191_v52 }
 0x6c5   :  { %v7531_v7 = vpop.f32.mrb[116].mxu1 }
 0x6c6   :  { %v5996_v58 = vmax.f32 %v5994_v39, %v5995_v40  ;;  %v4791_v3 = vmax.f32 %v4663_v59, 0.0  ;;  %v5348_v54 = vpop.f32.mrb[117].mxu1  ;;  %v5673_v2 = vadd.f32 %v7531_v7, %v10422_v5 }
 0x6c7   :  { %v5671_v36 = vadd.f32 %v10422_v5, %v5348_v54  ;;  %v7532_v25 = vpop.f32.mrb[118].mxu1  ;;  %6279 = vmatpush1.bf16.msra.mxu1 %v7692_v30 }
 0x6c8   :  { %v5997_v50 = vrot.slane %v5996_v58, 2  ;;  %v4990_v26 = vpack.c.bf16 %v4791_v3, %v4790_v46  ;;  %v5351_v53 = vpop.f32.mrb[119].mxu1  ;;  %v5674_v15 = vadd.f32 %v7532_v25, %v10422_v5  ;;  %v5801_v0 = vmax.f32 %v5673_v2, 0.0  ;;  %6280 = vmatprep.subr.bf16.mxu1 %v11191_v52 }
 0x6c9   :  { %v5799_v60 = vmax.f32 %v5671_v36, 0.0  ;;  %v5672_v1 = vadd.f32 %v10422_v5, %v5351_v53  ;;  %v4509_v18 = vpop.f32.mrb[192].mxu0 }
 0x6ca   :  { %v5998_v14 = vmax.f32 %v5996_v58, %v5997_v50  ;;  %v4664_v34 = vadd.f32 %v10239_v11, %v4509_v18  ;;  %v10738_v51 = vpop.f32.mrb[193].mxu0  ;;  %7585 = vmatprep.mubr.bf16.mxu1 %v4990_v26  ;;  %v5802_v43 = vmax.f32 %v5674_v15, 0.0  ;;  %v6004_v24 = vsel %vm2839_vm2, %v5801_v0, -inf }
 0x6cb   :  { %v5800_v44 = vmax.f32 %v5672_v1, 0.0  ;;  %v4513_v19 = vpop.f32.mrb[194].mxu0  ;;  %v6001_v62 = vsel %vm2839_vm2, %v5799_v60, -inf }
 0x6cc   :  { %v5999_v16 = vrot.slane %v5998_v14, 1  ;;  %v4665_v31 = vadd.f32 %v10239_v11, %v4513_v19  ;;  %v10741_v10 = vpop.f32.mrb[195].mxu0  ;;  %v4792_v35 = vmax.f32 %v4664_v34, 0.0  ;;  %v6006_v21 = vsel %vm2839_vm2, %v5802_v43, -inf }
 0x6cd   :  { %v6002_v63 = vsel %vm2839_vm2, %v5800_v44, -inf }
 0x6ce   :  { %v6000_v6 = vmax.f32 %v5998_v14, %v5999_v16  ;;  %v6003_v17 = vmax.f32 %v6001_v62, %v6002_v63  ;;  %v4793_v38 = vmax.f32 %v4665_v31, 0.0 }
 0x6d0   :  { %v10747_v4 = vsel %vm6143_vm3, %v6000_v6, %v5931_v49  ;;  %v6005_v45 = vmax.f32 %v6003_v17, %v6004_v24  ;;  %v4991_v32 = vpack.c.bf16 %v4793_v38, %v4792_v35  ;;  %v10776_v49 = vpop.permute.xlu0 %6157 }
 0x6d1   :  { %v4519_v9 = vpop.f32.mrb[196].mxu0  ;;  %v6162_v38 = vpack.c.bf16 %v10776_v49, %v10776_v49 }
 0x6d2   :  { %v4666_v55 = vadd.f32 %v10239_v11, %v4519_v9  ;;  %v10754_v28 = vpop.f32.mrb[197].mxu0  ;;  %7586 = vmatmul.mubr.bf16.gmra.mrb[172].mxu1 %v4991_v32  ;;  %v6007_v39 = vmax.f32 %v6005_v45, %v6006_v21 }
 0x6d3   :  { %v4523_v13 = vpop.f32.mrb[198].mxu0 }
 0x6d4   :  { %v4667_v40 = vadd.f32 %v10239_v11, %v4523_v13  ;;  %v10760_v59 = vpop.f32.mrb[199].mxu0  ;;  %v4794_v7 = vmax.f32 %v4666_v55, 0.0 }
 0x6d5   :  { %v7535_v41 = vpop.f32.mrb[120].mxu1 }
 0x6d6   :  { %v4795_v58 = vmax.f32 %v4667_v40, 0.0  ;;  %v5364_v46 = vpop.f32.mrb[121].mxu1  ;;  %v5677_v3 = vadd.f32 %v7535_v41, %v10422_v5 }
 0x6d7   :  { %v5675_v54 = vadd.f32 %v10422_v5, %v5364_v46  ;;  %v7536_v2 = vpop.f32.mrb[122].mxu1 }
 0x6d8   :  { %v4992_v36 = vpack.c.bf16 %v4795_v58, %v4794_v7  ;;  %v5367_v25 = vpop.f32.mrb[123].mxu1  ;;  %v5678_v26 = vadd.f32 %v7536_v2, %v10422_v5  ;;  %v5805_v1 = vmax.f32 %v5677_v3, 0.0 }
 0x6d9   :  { %v5803_v50 = vmax.f32 %v5675_v54, 0.0  ;;  %v5676_v53 = vadd.f32 %v10422_v5, %v5367_v25  ;;  %v4529_v61 = vpop.f32.mrb[200].mxu0  ;;  %v7693_v25 = vld [vmem:[%s11020_s1 + $0x240] ss:$8 sps:$4 sm:$0xff]  }
 0x6da   :  { %v4668_v60 = vadd.f32 %v10239_v11, %v4529_v61  ;;  %v10769_v15 = vpop.f32.mrb[201].mxu0  ;;  %7589 = vmatprep.mubr.bf16.mxu1 %v4992_v36  ;;  %v5806_v16 = vmax.f32 %v5678_v26, 0.0  ;;  %v6012_v6 = vsel %vm2839_vm2, %v5805_v1, -inf  ;;  %6281 = vmatpush1.bf16.msra.mxu1 %v7693_v25 }
 0x6db   :  { %v6008_v18 = vsel %vm2839_vm2, %v5803_v50, -inf  ;;  %v5804_v14 = vmax.f32 %v5676_v53, 0.0  ;;  %v4533_v34 = vpop.f32.mrb[202].mxu0  ;;  %6282 = vmatprep.subr.bf16.mxu1 %v11191_v52 }
 0x6dc   :  { %v6009_v0 = vmax.f32 %v6007_v39, %v6008_v18  ;;  %v4669_v44 = vadd.f32 %v10239_v11, %v4533_v34  ;;  %v10773_v19 = vpop.f32.mrb[203].mxu0  ;;  %v4796_v43 = vmax.f32 %v4668_v60, 0.0  ;;  %v6014_v24 = vsel %vm2839_vm2, %v5806_v16, -inf }
 0x6dd   :  { %v6010_v31 = vsel %vm2839_vm2, %v5804_v14, -inf }
 0x6de   :  { %v6011_v62 = vmax.f32 %v6009_v0, %v6010_v31  ;;  %v4797_v63 = vmax.f32 %v4669_v44, 0.0 }
 0x6e0   :  { %v6013_v17 = vmax.f32 %v6011_v62, %v6012_v6  ;;  %v4993_v35 = vpack.c.bf16 %v4797_v63, %v4796_v43 }
 0x6e2   :  { %7590 = vmatmul.mubr.bf16.gmra.mrb[176].mxu1 %v4993_v35  ;;  %v6015_v11 = vmax.f32 %v6013_v17, %v6014_v24  ;;  %v7694_v24 = vld [vmem:[%s11020_s1 + $0x250] ss:$8 sps:$4 sm:$0xff]  }
 0x6e3   :  { %6960 = vmatprep.mubr.msk.bf16.mxu1 %vm2839_vm2, %v6162_v38  ;;  %6283 = vmatpush1.bf16.msra.mxu1 %v7694_v24 }
 0x6e4   :  { %6284 = vmatprep.subr.bf16.mxu1 %v11191_v52 }
 0x6e5   :  { %v7539_v45 = vpop.f32.mrb[124].mxu1 }
 0x6e6   :  { %v5380_v32 = vpop.f32.mrb[125].mxu1  ;;  %v5681_v37 = vadd.f32 %v7539_v45, %v10422_v5 }
 0x6e7   :  { %v5679_v21 = vadd.f32 %v10422_v5, %v5380_v32  ;;  %v7540_v9 = vpop.f32.mrb[126].mxu1 }
 0x6e8   :  { %v5383_v55 = vpop.f32.mrb[127].mxu1  ;;  %v5682_v13 = vadd.f32 %v7540_v9, %v10422_v5  ;;  %v5809_v40 = vmax.f32 %v5681_v37, 0.0 }
 0x6e9   :  { %v5807_v39 = vmax.f32 %v5679_v21, 0.0  ;;  %v5680_v30 = vadd.f32 %v10422_v5, %v5383_v55 }
 0x6ea   :  { %v5810_v46 = vmax.f32 %v5682_v13, 0.0  ;;  %v6020_v2 = vsel %vm2839_vm2, %v5809_v40, -inf }
 0x6eb   :  { %v6016_v41 = vsel %vm2839_vm2, %v5807_v39, -inf  ;;  %v5808_v7 = vmax.f32 %v5680_v30, 0.0 }
 0x6ec   :  { %v6017_v58 = vmax.f32 %v6015_v11, %v6016_v41  ;;  %v6022_v50 = vsel %vm2839_vm2, %v5810_v46, -inf }
 0x6ed   :  { %v6018_v3 = vsel %vm2839_vm2, %v5808_v7, -inf }
 0x6ee   :  { %v6019_v54 = vmax.f32 %v6017_v58, %v6018_v3 }
 0x6f0   :  { %v6021_v36 = vmax.f32 %v6019_v54, %v6020_v2 }
 0x6f2   :  { %v6023_v26 = vmax.f32 %v6021_v36, %v6022_v50  ;;  %v7695_v50 = vld [vmem:[%s11020_s1 + $0x260] ss:$8 sps:$4 sm:$0xff]  }
 0x6f3   :  { %6285 = vmatpush1.bf16.msra.mxu1 %v7695_v50  ;;  %v7696_v50 = vld [vmem:[%s11020_s1 + $0x270] ss:$8 sps:$4 sm:$0xff]  }
 0x6f4   :  { %6286 = vmatprep.subr.bf16.mxu1 %v11191_v52 }
 0x6f5   :  { %v7543_v53 = vpop.f32.mrb[128].mxu1 }
 0x6f6   :  { %v5396_v61 = vpop.f32.mrb[129].mxu1  ;;  %v5685_v60 = vadd.f32 %v7543_v53, %v10422_v5 }
 0x6f7   :  { %v5683_v1 = vadd.f32 %v10422_v5, %v5396_v61  ;;  %v7544_v18 = vpop.f32.mrb[130].mxu1  ;;  %6287 = vmatpush1.bf16.msra.mxu1 %v7696_v50 }
 0x6f8   :  { %v5399_v14 = vpop.f32.mrb[131].mxu1  ;;  %v5686_v0 = vadd.f32 %v7544_v18, %v10422_v5  ;;  %v5813_v16 = vmax.f32 %v5685_v60, 0.0  ;;  %6288 = vmatprep.subr.bf16.mxu1 %v11191_v52 }
 0x6f9   :  { %v5811_v34 = vmax.f32 %v5683_v1, 0.0  ;;  %v5684_v44 = vadd.f32 %v10422_v5, %v5399_v14 }
 0x6fa   :  { %v5814_v63 = vmax.f32 %v5686_v0, 0.0  ;;  %v6028_v35 = vsel %vm2839_vm2, %v5813_v16, -inf }
 0x6fb   :  { %v6024_v31 = vsel %vm2839_vm2, %v5811_v34, -inf  ;;  %v5812_v62 = vmax.f32 %v5684_v44, 0.0 }
 0x6fc   :  { %v6025_v43 = vmax.f32 %v6023_v26, %v6024_v31  ;;  %v6030_v11 = vsel %vm2839_vm2, %v5814_v63, -inf }
 0x6fd   :  { %v6026_v6 = vsel %vm2839_vm2, %v5812_v62, -inf }
 0x6fe   :  { %v6027_v17 = vmax.f32 %v6025_v43, %v6026_v6 }
 0x700   :  { %v6029_v38 = vmax.f32 %v6027_v17, %v6028_v35 }
 0x702   :  { %v6031_v45 = vmax.f32 %v6029_v38, %v6030_v11 }
 0x705   :  { %v7547_v32 = vpop.f32.mrb[132].mxu1 }
 0x706   :  { %v5412_v37 = vpop.f32.mrb[133].mxu1  ;;  %v5689_v21 = vadd.f32 %v7547_v32, %v10422_v5 }
 0x707   :  { %v5687_v9 = vadd.f32 %v10422_v5, %v5412_v37  ;;  %v7548_v55 = vpop.f32.mrb[134].mxu1 }
 0x708   :  { %v5415_v39 = vpop.f32.mrb[135].mxu1  ;;  %v5690_v30 = vadd.f32 %v7548_v55, %v10422_v5  ;;  %v5817_v41 = vmax.f32 %v5689_v21, 0.0 }
 0x709   :  { %v5815_v13 = vmax.f32 %v5687_v9, 0.0  ;;  %v5688_v40 = vadd.f32 %v10422_v5, %v5415_v39 }
 0x70a   :  { %v5818_v3 = vmax.f32 %v5690_v30, 0.0  ;;  %v6036_v36 = vsel %vm2839_vm2, %v5817_v41, -inf }
 0x70b   :  { %v6032_v7 = vsel %vm2839_vm2, %v5815_v13, -inf  ;;  %v5816_v58 = vmax.f32 %v5688_v40, 0.0 }
 0x70c   :  { %v6033_v46 = vmax.f32 %v6031_v45, %v6032_v7  ;;  %v6038_v26 = vsel %vm2839_vm2, %v5818_v3, -inf }
 0x70d   :  { %v6034_v54 = vsel %vm2839_vm2, %v5816_v58, -inf }
 0x70e   :  { %v6035_v2 = vmax.f32 %v6033_v46, %v6034_v54 }
 0x710   :  { %v6037_v25 = vmax.f32 %v6035_v2, %v6036_v36 }
 0x712   :  { %v6039_v53 = vmax.f32 %v6037_v25, %v6038_v26 }
 0x715   :  { %v7551_v61 = vpop.f32.mrb[136].mxu1 }
 0x716   :  { %v5428_v60 = vpop.f32.mrb[137].mxu1  ;;  %v5693_v1 = vadd.f32 %v7551_v61, %v10422_v5 }
 0x717   :  { %v5691_v18 = vadd.f32 %v10422_v5, %v5428_v60  ;;  %v7552_v14 = vpop.f32.mrb[138].mxu1 }
 0x718   :  { %v5431_v34 = vpop.f32.mrb[139].mxu1  ;;  %v5694_v44 = vadd.f32 %v7552_v14, %v10422_v5  ;;  %v5821_v31 = vmax.f32 %v5693_v1, 0.0 }
 0x719   :  { %v5819_v0 = vmax.f32 %v5691_v18, 0.0  ;;  %v5692_v16 = vadd.f32 %v10422_v5, %v5431_v34 }
 0x71a   :  { %v5822_v6 = vmax.f32 %v5694_v44, 0.0  ;;  %v6044_v38 = vsel %vm2839_vm2, %v5821_v31, -inf }
 0x71b   :  { %v6040_v62 = vsel %vm2839_vm2, %v5819_v0, -inf  ;;  %v5820_v43 = vmax.f32 %v5692_v16, 0.0 }
 0x71c   :  { %v6041_v63 = vmax.f32 %v6039_v53, %v6040_v62  ;;  %v6046_v11 = vsel %vm2839_vm2, %v5822_v6, -inf }
 0x71d   :  { %v6042_v17 = vsel %vm2839_vm2, %v5820_v43, -inf }
 0x71e   :  { %v6043_v35 = vmax.f32 %v6041_v63, %v6042_v17 }
 0x720   :  { %v6045_v24 = vmax.f32 %v6043_v35, %v6044_v38 }
 0x722   :  { %v6047_v45 = vmax.f32 %v6045_v24, %v6046_v11 }
 0x725   :  { %v7555_v32 = vpop.f32.mrb[140].mxu1 }
 0x726   :  { %v5444_v37 = vpop.f32.mrb[141].mxu1  ;;  %v5697_v21 = vadd.f32 %v7555_v32, %v10422_v5 }
 0x727   :  { %v5695_v9 = vadd.f32 %v10422_v5, %v5444_v37  ;;  %v7556_v55 = vpop.f32.mrb[142].mxu1 }
 0x728   :  { %v5447_v39 = vpop.f32.mrb[143].mxu1  ;;  %v5698_v30 = vadd.f32 %v7556_v55, %v10422_v5  ;;  %v5825_v41 = vmax.f32 %v5697_v21, 0.0 }
 0x729   :  { %v5823_v13 = vmax.f32 %v5695_v9, 0.0  ;;  %v5696_v40 = vadd.f32 %v10422_v5, %v5447_v39 }
 0x72a   :  { %v5826_v3 = vmax.f32 %v5698_v30, 0.0  ;;  %v6052_v36 = vsel %vm2839_vm2, %v5825_v41, -inf }
 0x72b   :  { %v6048_v7 = vsel %vm2839_vm2, %v5823_v13, -inf  ;;  %v5824_v58 = vmax.f32 %v5696_v40, 0.0 }
 0x72c   :  { %v6049_v46 = vmax.f32 %v6047_v45, %v6048_v7  ;;  %v6054_v26 = vsel %vm2839_vm2, %v5826_v3, -inf }
 0x72d   :  { %v6050_v54 = vsel %vm2839_vm2, %v5824_v58, -inf }
 0x72e   :  { %v6051_v2 = vmax.f32 %v6049_v46, %v6050_v54 }
 0x730   :  { %v6053_v25 = vmax.f32 %v6051_v2, %v6052_v36 }
 0x732   :  { %v6055_v53 = vmax.f32 %v6053_v25, %v6054_v26 }
 0x735   :  { %v7559_v61 = vpop.f32.mrb[144].mxu1 }
 0x736   :  { %v5460_v60 = vpop.f32.mrb[145].mxu1  ;;  %v5701_v1 = vadd.f32 %v7559_v61, %v10422_v5  ;;  %v7697_v61 = vld [vmem:[%s11020_s1 + $0x280] ss:$8 sps:$4 sm:$0xff]  }
 0x737   :  { %v5699_v18 = vadd.f32 %v10422_v5, %v5460_v60  ;;  %v7560_v14 = vpop.f32.mrb[146].mxu1  ;;  %6289 = vmatpush1.bf16.msra.mxu1 %v7697_v61 }
 0x738   :  { %v5463_v34 = vpop.f32.mrb[147].mxu1  ;;  %v5702_v44 = vadd.f32 %v7560_v14, %v10422_v5  ;;  %v5829_v31 = vmax.f32 %v5701_v1, 0.0 }
 0x739   :  { %v5827_v0 = vmax.f32 %v5699_v18, 0.0  ;;  %v5700_v16 = vadd.f32 %v10422_v5, %v5463_v34 }
 0x73a   :  { %v5830_v6 = vmax.f32 %v5702_v44, 0.0  ;;  %v6060_v35 = vsel %vm2839_vm2, %v5829_v31, -inf }
 0x73b   :  { %v6056_v62 = vsel %vm2839_vm2, %v5827_v0, -inf  ;;  %v5828_v43 = vmax.f32 %v5700_v16, 0.0  ;;  %v7761_v0 = vmov 0.0  }
 0x73c   :  { %v6057_v63 = vmax.f32 %v6055_v53, %v6056_v62  ;;  %v6062_v24 = vsel %vm2839_vm2, %v5830_v6, -inf  ;;  %7593 = vmatprep.subr.bf16.mxu1 %v7761_v0 }
 0x73d   :  { %v6058_v52 = vsel %vm2839_vm2, %v5828_v43, -inf }
 0x73e   :  { %v6059_v17 = vmax.f32 %v6057_v63, %v6058_v52 }
 0x740   :  { %v6061_v38 = vmax.f32 %v6059_v17, %v6060_v35 }
 0x742   :  { %v6063_v11 = vmax.f32 %v6061_v38, %v6062_v24 }
 0x744   :  { %v6064_v45 = vrot.slane %v6063_v11, 4 }
 0x745   :  { %v7563_v32 = vpop.f32.mrb[148].mxu1 }
 0x746   :  { %v6065_v37 = vmax.f32 %v6063_v11, %v6064_v45  ;;  %v5476_v21 = vpop.f32.mrb[149].mxu1  ;;  %v5705_v9 = vadd.f32 %v7563_v32, %v10422_v5 }
 0x747   :  { %v5703_v55 = vadd.f32 %v10422_v5, %v5476_v21  ;;  %v7564_v39 = vpop.f32.mrb[150].mxu1 }
 0x748   :  { %v6066_v13 = vrot.slane %v6065_v37, 2  ;;  %v5479_v30 = vpop.f32.mrb[151].mxu1  ;;  %v5706_v41 = vadd.f32 %v7564_v39, %v10422_v5  ;;  %v5833_v46 = vmax.f32 %v5705_v9, 0.0 }
 0x749   :  { %v5831_v40 = vmax.f32 %v5703_v55, 0.0  ;;  %v5704_v7 = vadd.f32 %v10422_v5, %v5479_v30 }
 0x74a   :  { %v6067_v58 = vmax.f32 %v6065_v37, %v6066_v13  ;;  %v5834_v36 = vmax.f32 %v5706_v41, 0.0  ;;  %v6073_v53 = vsel %vm2839_vm2, %v5833_v46, -inf }
 0x74b   :  { %v5832_v3 = vmax.f32 %v5704_v7, 0.0  ;;  %v6070_v2 = vsel %vm2839_vm2, %v5831_v40, -inf }
 0x74c   :  { %v6068_v54 = vrot.slane %v6067_v58, 1  ;;  %v6075_v18 = vsel %vm2839_vm2, %v5834_v36, -inf }
 0x74d   :  { %v6071_v25 = vsel %vm2839_vm2, %v5832_v3, -inf }
 0x74e   :  { %v6069_v50 = vmax.f32 %v6067_v58, %v6068_v54  ;;  %v6072_v26 = vmax.f32 %v6070_v2, %v6071_v25 }
 0x750   :  { %v10859_v60 = vsel %vm6145_vm4, %v6069_v50, %v10747_v4  ;;  %v6074_v1 = vmax.f32 %v6072_v26, %v6073_v53 }
 0x752   :  { %v6076_v14 = vmax.f32 %v6074_v1, %v6075_v18 }
 0x755   :  { %v7567_v34 = vpop.f32.mrb[152].mxu1 }
 0x756   :  { %v5492_v44 = vpop.f32.mrb[153].mxu1  ;;  %v5709_v16 = vadd.f32 %v7567_v34, %v10422_v5 }
 0x757   :  { %v5707_v31 = vadd.f32 %v10422_v5, %v5492_v44  ;;  %v7568_v62 = vpop.f32.mrb[154].mxu1 }
 0x758   :  { %v5495_v43 = vpop.f32.mrb[155].mxu1  ;;  %v5710_v4 = vadd.f32 %v7568_v62, %v10422_v5  ;;  %v5837_v52 = vmax.f32 %v5709_v16, 0.0 }
 0x759   :  { %v5835_v63 = vmax.f32 %v5707_v31, 0.0  ;;  %v5708_v6 = vadd.f32 %v10422_v5, %v5495_v43 }
 0x75a   :  { %v5838_v24 = vmax.f32 %v5710_v4, 0.0  ;;  %v6081_v32 = vsel %vm2839_vm2, %v5837_v52, -inf }
 0x75b   :  { %v6077_v17 = vsel %vm2839_vm2, %v5835_v63, -inf  ;;  %v5836_v35 = vmax.f32 %v5708_v6, 0.0 }
 0x75c   :  { %v6078_v38 = vmax.f32 %v6076_v14, %v6077_v17  ;;  %v6083_v21 = vsel %vm2839_vm2, %v5838_v24, -inf }
 0x75d   :  { %v6079_v11 = vsel %vm2839_vm2, %v5836_v35, -inf }
 0x75e   :  { %v6080_v45 = vmax.f32 %v6078_v38, %v6079_v11 }
 0x760   :  { %v6082_v37 = vmax.f32 %v6080_v45, %v6081_v32 }
 0x762   :  { %v6084_v9 = vmax.f32 %v6082_v37, %v6083_v21 }
 0x765   :  { %v7571_v55 = vpop.f32.mrb[156].mxu1 }
 0x766   :  { %v5508_v39 = vpop.f32.mrb[157].mxu1  ;;  %v5713_v13 = vadd.f32 %v7571_v55, %v10422_v5 }
 0x767   :  { %v5711_v30 = vadd.f32 %v10422_v5, %v5508_v39  ;;  %v7572_v40 = vpop.f32.mrb[158].mxu1 }
 0x768   :  { %v5511_v41 = vpop.f32.mrb[159].mxu1  ;;  %v5714_v58 = vadd.f32 %v7572_v40, %v10422_v5  ;;  %v5841_v3 = vmax.f32 %v5713_v13, 0.0 }
 0x769   :  { %v5839_v7 = vmax.f32 %v5711_v30, 0.0  ;;  %v5712_v46 = vadd.f32 %v10422_v5, %v5511_v41 }
 0x76a   :  { %v5842_v25 = vmax.f32 %v5714_v58, 0.0  ;;  %v6089_v53 = vsel %vm2839_vm2, %v5841_v3, -inf }
 0x76b   :  { %v6085_v54 = vsel %vm2839_vm2, %v5839_v7, -inf  ;;  %v5840_v2 = vmax.f32 %v5712_v46, 0.0 }
 0x76c   :  { %v6086_v36 = vmax.f32 %v6084_v9, %v6085_v54  ;;  %v6091_v1 = vsel %vm2839_vm2, %v5842_v25, -inf }
 0x76d   :  { %v6087_v50 = vsel %vm2839_vm2, %v5840_v2, -inf }
 0x76e   :  { %v6088_v26 = vmax.f32 %v6086_v36, %v6087_v50 }
 0x770   :  { %v6090_v61 = vmax.f32 %v6088_v26, %v6089_v53 }
 0x772   :  { %v6092_v18 = vmax.f32 %v6090_v61, %v6091_v1 }
 0x775   :  { %v7575_v14 = vpop.f32.mrb[160].mxu1 }
 0x776   :  { %v5524_v34 = vpop.f32.mrb[161].mxu1  ;;  %v5717_v44 = vadd.f32 %v7575_v14, %v10422_v5 }
 0x777   :  { %v5715_v16 = vadd.f32 %v10422_v5, %v5524_v34  ;;  %v7576_v31 = vpop.f32.mrb[162].mxu1 }
 0x778   :  { %v5527_v62 = vpop.f32.mrb[163].mxu1  ;;  %v5718_v63 = vadd.f32 %v7576_v31, %v10422_v5  ;;  %v5845_v6 = vmax.f32 %v5717_v44, 0.0 }
 0x779   :  { %v5843_v43 = vmax.f32 %v5715_v16, 0.0  ;;  %v5716_v4 = vadd.f32 %v10422_v5, %v5527_v62 }
 0x77a   :  { %v5846_v38 = vmax.f32 %v5718_v63, 0.0  ;;  %v6097_v45 = vsel %vm2839_vm2, %v5845_v6, -inf }
 0x77b   :  { %v6093_v52 = vsel %vm2839_vm2, %v5843_v43, -inf  ;;  %v5844_v17 = vmax.f32 %v5716_v4, 0.0 }
 0x77c   :  { %v6094_v35 = vmax.f32 %v6092_v18, %v6093_v52  ;;  %v6099_v37 = vsel %vm2839_vm2, %v5846_v38, -inf }
 0x77d   :  { %v6095_v24 = vsel %vm2839_vm2, %v5844_v17, -inf }
 0x77e   :  { %v6096_v11 = vmax.f32 %v6094_v35, %v6095_v24 }
 0x780   :  { %v6098_v32 = vmax.f32 %v6096_v11, %v6097_v45 }
 0x782   :  { %v6100_v21 = vmax.f32 %v6098_v32, %v6099_v37 }
 0x785   :  { %v7579_v9 = vpop.f32.mrb[164].mxu1 }
 0x786   :  { %v5540_v55 = vpop.f32.mrb[165].mxu1  ;;  %v5721_v39 = vadd.f32 %v7579_v9, %v10422_v5 }
 0x787   :  { %v5719_v13 = vadd.f32 %v10422_v5, %v5540_v55  ;;  %v7580_v30 = vpop.f32.mrb[166].mxu1 }
 0x788   :  { %v5543_v40 = vpop.f32.mrb[167].mxu1  ;;  %v5722_v7 = vadd.f32 %v7580_v30, %v10422_v5  ;;  %v5849_v46 = vmax.f32 %v5721_v39, 0.0 }
 0x789   :  { %v5847_v41 = vmax.f32 %v5719_v13, 0.0  ;;  %v5720_v58 = vadd.f32 %v10422_v5, %v5543_v40 }
 0x78a   :  { %v5850_v36 = vmax.f32 %v5722_v7, 0.0  ;;  %v6105_v26 = vsel %vm2839_vm2, %v5849_v46, -inf }
 0x78b   :  { %v6101_v3 = vsel %vm2839_vm2, %v5847_v41, -inf  ;;  %v5848_v54 = vmax.f32 %v5720_v58, 0.0 }
 0x78c   :  { %v6102_v2 = vmax.f32 %v6100_v21, %v6101_v3  ;;  %v6107_v61 = vsel %vm2839_vm2, %v5850_v36, -inf }
 0x78d   :  { %v6103_v25 = vsel %vm2839_vm2, %v5848_v54, -inf }
 0x78e   :  { %v6104_v50 = vmax.f32 %v6102_v2, %v6103_v25 }
 0x790   :  { %v6106_v53 = vmax.f32 %v6104_v50, %v6105_v26 }
 0x792   :  { %v6108_v1 = vmax.f32 %v6106_v53, %v6107_v61 }
 0x795   :  { %v7583_v18 = vpop.f32.mrb[168].mxu1 }
 0x796   :  { %v5556_v14 = vpop.f32.mrb[169].mxu1  ;;  %v5725_v34 = vadd.f32 %v7583_v18, %v10422_v5 }
 0x797   :  { %v5723_v44 = vadd.f32 %v10422_v5, %v5556_v14  ;;  %v7584_v16 = vpop.f32.mrb[170].mxu1 }
 0x798   :  { %v5559_v31 = vpop.f32.mrb[171].mxu1  ;;  %v5726_v43 = vadd.f32 %v7584_v16, %v10422_v5  ;;  %v5853_v4 = vmax.f32 %v5725_v34, 0.0 }
 0x799   :  { %v5851_v62 = vmax.f32 %v5723_v44, 0.0  ;;  %v5724_v63 = vadd.f32 %v10422_v5, %v5559_v31 }
 0x79a   :  { %v5854_v35 = vmax.f32 %v5726_v43, 0.0  ;;  %v6113_v11 = vsel %vm2839_vm2, %v5853_v4, -inf }
 0x79b   :  { %v6109_v6 = vsel %vm2839_vm2, %v5851_v62, -inf  ;;  %v5852_v52 = vmax.f32 %v5724_v63, 0.0 }
 0x79c   :  { %v6110_v17 = vmax.f32 %v6108_v1, %v6109_v6  ;;  %v6115_v32 = vsel %vm2839_vm2, %v5854_v35, -inf }
 0x79d   :  { %v6111_v38 = vsel %vm2839_vm2, %v5852_v52, -inf }
 0x79e   :  { %v6112_v24 = vmax.f32 %v6110_v17, %v6111_v38 }
 0x7a0   :  { %v6114_v45 = vmax.f32 %v6112_v24, %v6113_v11 }
 0x7a2   :  { %v6116_v37 = vmax.f32 %v6114_v45, %v6115_v32 }
 0x7a5   :  { %v7587_v21 = vpop.f32.mrb[172].mxu1 }
 0x7a6   :  { %v5572_v9 = vpop.f32.mrb[173].mxu1  ;;  %v5729_v55 = vadd.f32 %v7587_v21, %v10422_v5 }
 0x7a7   :  { %v5727_v39 = vadd.f32 %v10422_v5, %v5572_v9  ;;  %v7588_v13 = vpop.f32.mrb[174].mxu1 }
 0x7a8   :  { %v5575_v30 = vpop.f32.mrb[175].mxu1  ;;  %v5730_v41 = vadd.f32 %v7588_v13, %v10422_v5  ;;  %v5857_v58 = vmax.f32 %v5729_v55, 0.0 }
 0x7a9   :  { %v5855_v40 = vmax.f32 %v5727_v39, 0.0  ;;  %v5728_v7 = vadd.f32 %v10422_v5, %v5575_v30 }
 0x7aa   :  { %v5858_v2 = vmax.f32 %v5730_v41, 0.0  ;;  %v6121_v50 = vsel %vm2839_vm2, %v5857_v58, -inf  ;;  %v7702_v58 = vld [vmem:[%s11020_s1 + $0x2d0] ss:$8 sps:$4 sm:$0xff]  }
 0x7ab   :  { %v6117_v46 = vsel %vm2839_vm2, %v5855_v40, -inf  ;;  %v5856_v3 = vmax.f32 %v5728_v7, 0.0  ;;  %v7698_v40 = vld [vmem:[%s11020_s1 + $0x290] ss:$8 sps:$4 sm:$0xff]   ;;  %v7699_v7 = vld [vmem:[%s11020_s1 + $0x2a0] ss:$8 sps:$4 sm:$0xff]  }
 0x7ac   :  { %v6118_v54 = vmax.f32 %v6116_v37, %v6117_v46  ;;  %v6123_v53 = vsel %vm2839_vm2, %v5858_v2, -inf  ;;  %v7703_v46 = vld [vmem:[%s11020_s1 + $0x2e0] ss:$8 sps:$4 sm:$0xff]   ;;  %v6189_v2 = vsub.s32 5, %v9106_v56 }
 0x7ad   :  { %v6119_v36 = vsel %vm2839_vm2, %v5856_v3, -inf  ;;  %v7704_v3 = vld [vmem:[%s11020_s1 + $0x2f0] ss:$8 sps:$4 sm:$0xff]  }
 0x7ae   :  { %v6120_v25 = vmax.f32 %v6118_v54, %v6119_v36  ;;  %v7705_v54 = vld [vmem:[%s11020_s1 + $0x300] ss:$8 sps:$4 sm:$0xff]   ;;  %v6190_v36 = vrot.slane %v9111_v57, %v6189_v2 }
 0x7b0   :  { %v6122_v26 = vmax.f32 %v6120_v25, %v6121_v50 }
 0x7b2   :  { %v6124_v61 = vmax.f32 %v6122_v26, %v6123_v53 }
 0x7b5   :  { %v7591_v1 = vpop.f32.mrb[176].mxu1 }
 0x7b6   :  { %v5588_v18 = vpop.f32.mrb[177].mxu1  ;;  %v5733_v14 = vadd.f32 %v7591_v1, %v10422_v5 }
 0x7b7   :  { %v5731_v34 = vadd.f32 %v10422_v5, %v5588_v18  ;;  %v7592_v44 = vpop.f32.mrb[178].mxu1 }
 0x7b8   :  { %v5591_v16 = vpop.f32.mrb[179].mxu1  ;;  %v5734_v62 = vadd.f32 %v7592_v44, %v10422_v5  ;;  %v5861_v63 = vmax.f32 %v5733_v14, 0.0  ;;  %v10957_v14 = vpop.permute.xlu1 %6438 }
 0x7b9   :  { %v5859_v31 = vmax.f32 %v5731_v34, 0.0  ;;  %v5732_v43 = vadd.f32 %v10422_v5, %v5591_v16  ;;  %v6490_v44 = vpop.trf.xlu0 }
 0x7ba   :  { %v5862_v17 = vmax.f32 %v5734_v62, 0.0  ;;  %v6129_v24 = vsel %vm2839_vm2, %v5861_v63, -inf }
 0x7bb   :  { %v6125_v4 = vsel %vm2839_vm2, %v5859_v31, -inf  ;;  %v5860_v6 = vmax.f32 %v5732_v43, 0.0 }
 0x7bc   :  { %v6126_v52 = vmax.f32 %v6124_v61, %v6125_v4  ;;  %v6131_v45 = vsel %vm2839_vm2, %v5862_v17, -inf  ;;  %v6458_v34 = vpop.trf.xlu1 }
 0x7bd   :  { %v6127_v35 = vsel %vm2839_vm2, %v5860_v6, -inf  ;;  %v6706_v16 = vcombine.low %v6458_v34, %v6490_v44  ;;  %v6554_v31 = vpop.trf.xlu0  ;;  %v6326_v6 = vsub.s32 6, %v9106_v56 }
 0x7be   :  { %v6128_v38 = vmax.f32 %v6126_v52, %v6127_v35 }
 0x7bf   :  { %6714 = vst [vmem:[%s11021_s2] sm:$0x77] %v6706_v16  ;;  %v6327_v52 = vrot.slane %v9111_v57, %v6326_v6  ;;  %v4916_v57 = vadd.f32 %v10243_v33, %v10692_v8  ;;  %v4921_v8 = vadd.f32 %v10243_v33, %v10721_v22  ;;  %v4926_v22 = vadd.f32 %v10243_v33, %v10754_v28 }
 0x7c0   :  { %v6130_v11 = vmax.f32 %v6128_v38, %v6129_v24 }
 0x7c1   :  { %v6618_v63 = vpop.trf.xlu0 }
 0x7c2   :  { %v6132_v32 = vmax.f32 %v6130_v11, %v6131_v45 }
 0x7c4   :  { %v6133_v37 = vrot.slane %v6132_v32, 4 }
 0x7c6   :  { %v6134_v21 = vmax.f32 %v6132_v32, %v6133_v37  ;;  %v4914_v37 = vadd.f32 %v10243_v33, %v10682_v48  ;;  %v4919_v48 = vadd.f32 %v10243_v33, %v10708_v47  ;;  %v4924_v47 = vadd.f32 %v10243_v33, %v10738_v51 }
 0x7c7   :  { %v4929_v51 = vadd.f32 %v10243_v33, %v10773_v19 }
 0x7c8   :  { %v6135_v9 = vrot.slane %v6134_v21, 2 }
 0x7ca   :  { %v6136_v55 = vmax.f32 %v6134_v21, %v6135_v9  ;;  %v4915_v21 = vadd.f32 %v10243_v33, %v10685_v20  ;;  %v4917_v9 = vadd.f32 %v10243_v33, %v10696_v23  ;;  %v4920_v20 = vadd.f32 %v10243_v33, %v10717_v12 }
 0x7cb   :  { %v4922_v23 = vadd.f32 %v10243_v33, %v10728_v29  ;;  %v4925_v12 = vadd.f32 %v10243_v33, %v10741_v10  ;;  %v4927_v29 = vadd.f32 %v10243_v33, %v10760_v59  ;;  %v7763_v59 = vmov 1966171168  }
 0x7cc   :  { %v6137_v5 = vrot.slane %v6136_v55, 1 }
 0x7ce   :  { %v6138_v39 = vmax.f32 %v6136_v55, %v6137_v5  ;;  %v4918_v55 = vadd.f32 %v10243_v33, %v10705_v27  ;;  %v4923_v27 = vadd.f32 %v10243_v33, %v10731_v42  ;;  %v4928_v42 = vadd.f32 %v10243_v33, %v10769_v15 }
 0x7d0   :  { %v6148_v13 = vsel %vm6147_vm5, %v6138_v39, %v10859_v60  ;;  %v7700_v60 = vld [vmem:[%s11020_s1 + $0x2b0] ss:$8 sps:$4 sm:$0xff]  }
 0x7d1   :  { %v6160_v30 = vsel %vm2839_vm2, %v6148_v13, %v10776_v49  ;;  %v7701_v49 = vld [vmem:[%s11020_s1 + $0x2c0] ss:$8 sps:$4 sm:$0xff]  }
 0x7d2   :  { %v6161_v41 = vpack.c.bf16 %v6160_v30, %v6160_v30 }
 0x7d4   :  { %6299 = vmatmul.mubr.bf16.vlgmr.msra.gmra.mrb[180].mxu1 %v6161_v41  ;;  %v6724_v41 = vunpack.c.l.s4 %v7763_v59 }
 0x7d5   :  { %7594 = vmatpush3.bf16.msra.mxu1 %v7698_v40  ;;  %7609 = vmatprep.mubr.msk.bf16.mxu1 %vm7762_vm6, %v7761_v0 }
 0x7d6   :  { %7595 = vmatprep.subr.bf16.mxu1 %v7761_v0 }
 0x7d9   :  { %7596 = vmatpush3.bf16.msra.mxu1 %v7699_v7  ;;  %v6725_v7 = vunpack.c.0.s8 %v6724_v41 }
 0x7da   :  { %7597 = vmatprep.subr.bf16.mxu1 %v7761_v0 }
 0x7db   :  { %v6728_v19 = vsub.s32 %v6725_v7, %v9106_v56 }
 0x7dd   :  { %7598 = vmatpush3.bf16.msra.mxu1 %v7700_v60 }
 0x7de   :  { %7599 = vmatprep.subr.bf16.mxu1 %v7761_v0 }
 0x7e1   :  { %7600 = vmatpush3.bf16.msra.mxu1 %v7701_v49 }
 0x7e2   :  { %7601 = vmatprep.subr.bf16.mxu1 %v7761_v0 }
 0x7e5   :  { %7602 = vmatpush3.bf16.msra.mxu1 %v7702_v58 }
 0x7e6   :  { %7603 = vmatprep.subr.bf16.mxu1 %v7761_v0 }
 0x7e9   :  { %7604 = vmatpush3.bf16.msra.mxu1 %v7703_v46 }
 0x7ea   :  { %7605 = vmatprep.subr.bf16.mxu1 %v7761_v0 }
 0x7ed   :  { %7606 = vmatpush3.bf16.msra.mxu1 %v7704_v3 }
 0x7ee   :  { %7607 = vmatprep.subr.bf16.mxu1 %v7761_v0  ;;  %v6522_v0 = vpop.trf.xlu1 }
 0x7ef   :  { %v6707_v62 = vcombine.low %v6522_v0, %v6554_v31 }
 0x7f1   :  { %7608 = vmatpush3.bf16.msra.mxu1 %v7705_v54  ;;  %6715 = vst [vmem:[%s11021_s2 + $0x8] sm:$0x77] %v6707_v62 }
 0x7f2   :  { %v6586_v43 = vpop.trf.xlu1 }
 0x7f3   :  { %v6708_v4 = vcombine.low %v6586_v43, %v6618_v63 }
 0x7f5   :  { %6716 = vst [vmem:[%s11021_s2 + $0x10] sm:$0x77] %v6708_v4 }
 0x7f6   :  { %v6650_v49 = vpop.trf.xlu1 }
 0x8a7   :  { %v6300_v25 = vpop.f32.mrb[180].mxu1 }
 0x8a8   :  { %v6301_v50 = vadd.f32 %v6300_v25, %v6190_v36  ;;  %v6302_v26 = vpop.f32.mrb[181].mxu1 }
 0x8a9   :  { %v6303_v53 = vpop.f32.mrb[182].mxu1 }
 0x8aa   :  { %v6306_v61 = vmax.f32 %v6301_v50, 0.0  ;;  %v6304_v1 = vpop.f32.mrb[183].mxu1 }
 0x8ac   :  { %v6307_v18 = vpack.c.bf16 %v6306_v61, %v6306_v61 }
 0x8ae   :  { %7610 = vmatmul.mubr.bf16.vlgmr.msra.gmra.mrb[184].mxu1 %v6307_v18 }
 0x981   :  { %v6410_v17 = vpop.f32.mrb[184].mxu1 }
 0x982   :  { %v6411_v35 = vadd.f32 %v6410_v17, %v6327_v52  ;;  %v7611_v38 = vpop.f32.mrb[185].mxu1 }
 0x983   :  { %v6413_v24 = vpop.f32.mrb[186].mxu1 }
 0x984   :  { %v7612_v11 = vpop.f32.mrb[187].mxu1  ;;  %v6416_v45 = vmul.f32 %v6411_v35, %v6411_v35  ;;  %v6441_v60 = vadd.f32 %v10957_v14, %v6411_v35 }
 0x986   :  { %v6418_v32 = vsel %vm6417_vm7, %v6416_v45, 0.0 }
 0x987   :  { %6419 = vadd.xlane.f32.xlu0 %v6418_v32 }
 0x9b4   :  { %6666 = vxpose.xlu0.b32.start [1/16] (narrow) %v4914_v37, 8 }
 0x9b8   :  { %6667 = vxpose.xlu0.b32.cont [2/16] (narrow) %v4915_v21, 8 }
 0x9bc   :  { %6668 = vxpose.xlu0.b32.cont [3/16] (narrow) %v4916_v57, 8 }
 0x9c0   :  { %6669 = vxpose.xlu0.b32.cont [4/16] (narrow) %v4917_v9, 8 }
 0x9c4   :  { %6670 = vxpose.xlu0.b32.cont [5/16] (narrow) %v4918_v55, 8 }
 0x9c8   :  { %6671 = vxpose.xlu0.b32.cont [6/16] (narrow) %v4919_v48, 8 }
 0x9cc   :  { %6672 = vxpose.xlu0.b32.cont [7/16] (narrow) %v4920_v20, 8 }
 0x9d0   :  { %6673 = vxpose.xlu0.b32.cont [8/16] (narrow) %v4921_v8, 8 }
 0x9d4   :  { %6674 = vxpose.xlu0.b32.cont [9/16] (narrow) %v4922_v23, 8 }
 0x9d8   :  { %6675 = vxpose.xlu0.b32.cont [10/16] (narrow) %v4923_v27, 8 }
 0x9dc   :  { %6676 = vxpose.xlu0.b32.cont [11/16] (narrow) %v4924_v47, 8 }
 0x9e0   :  { %6677 = vxpose.xlu0.b32.cont [12/16] (narrow) %v4925_v12, 8 }
 0x9e4   :  { %6678 = vxpose.xlu0.b32.cont [13/16] (narrow) %v4926_v22, 8 }
 0x9e8   :  { %6679 = vxpose.xlu0.b32.cont [14/16] (narrow) %v4927_v29, 8 }
 0x9ec   :  { %6680 = vxpose.xlu0.b32.cont [15/16] (narrow) %v4928_v42, 8 }
 0x9f0   :  { %6681 = vxpose.xlu0.b32.end [16/16] (narrow) %v4929_v51, 8 }
 0xa14   :  { %v6420_v5 = vpop.xlane.xlu0 %6419 }
 0xa15   :  { %7706 = vrsqrt.f32 %v6420_v5  ;;  %vm6423_vm8 = vcmp.eq.f32.partialorder %v6420_v5, inf  ;;  %v6426_v13 = vand.u32 2147483648, %v6420_v5  ;;  %vm6425_vm9 = vcmp.eq.f32.partialorder %v6420_v5, 0.0 }
 0xa1f   :  { %v7707_v10 = vpop.eup %7706 }
 0xa20   :  { %v6422_v39 = vmul.f32 %v7707_v10, %v6420_v5 }
 0xa22   :  { %v6424_v28 = vsel %vm6423_vm8, %v6420_v5, %v6422_v39 }
 0xa23   :  { %v6427_v30 = vsel %vm6425_vm9, %v6426_v13, %v6424_v28 }
 0xa24   :  { %v6428_v40 = vadd.f32 1e-06, %v6427_v30 }
 0xa26   :  { %7708 = vrcp.f32 %v6428_v40 }
 0xa30   :  { %v7709_v15 = vpop.eup %7708 }
 0xa31   :  { %v6430_v33 = vmul.f32 %v7709_v15, %v6411_v35 }
 0xa33   :  { %v6719_v58 = vsel %vm6718_vm10, %v6430_v33, %v6441_v60 }
 0xa34   :  { %v6682_v46 = vpop.trf.xlu0  ;;  %v6721_v3 = vsel %vm6720_vm11, %v6719_v58, 0.0 }
 0xa35   :  { %v6709_v54 = vcombine.low %v6650_v49, %v6682_v46  ;;  %v6729_v2 = vrot.slane %v6721_v3, %v6728_v19 }
 0xa37   :  { %6717 = vst [vmem:[%s11021_s2 + $0x18] sm:$0x77] %v6709_v54  ;;  %v6730_v36 = vcombine.high %v6729_v2, %v6729_v2  ;;  %v6737_v25 = vrot.slane %v6729_v2, %v6728_v19 }
 0xa39   :  { %v6744_v50 = vrot.slane %v6730_v36, %v6728_v19  ;;  %v6745_v26 = vcombine.high %v6737_v25, %v6737_v25  ;;  %6752 = vst.msk [vmem:[#allocation2] sm:$0x1] %vm6751_vm12, %v6737_v25 }
 0xa3b   :  { %v6746_v56 = vcombine.high %v6744_v50, %v6744_v50  ;;  %6753 = vst.msk [vmem:[#allocation2 + $0x1] sm:$0x1] %vm6751_vm12, %v6744_v50  ;;  %6754 = vst.msk [vmem:[#allocation2 + $0x2] sm:$0x1] %vm6751_vm12, %v6745_v26 }
 0xa3d   :  { %6755 = vst.msk [vmem:[#allocation2 + $0x3] sm:$0x1] %vm6751_vm12, %v6746_v56 }
 0xa3e   :  { %7745 = shalt.err (!%p7742_p4)
}
 0xa3f   :  { %s7746_s25 = scalar_lea.hbm %s11022_s3, 64 }
 0xa40   :  { %p7747_p5 = scmp.ne.s32.totalorder %s11022_s3, %s7746_s25  ;;  %p7750_p6 = scmp.lt.u32.totalorder %s7746_s25, %s11022_s3 }
 0xa42   :  { %p7752_p7 = pnand %p7750_p6, %p7747_p5 }
 0xa44   :  { %7755 = shalt.err (!%p7752_p7)
}
 0xa45   :  { %s7765_s29 = smov 16   ;;  %s7766_s30 = smov 1  }
 0xa46   :  { %6769 = dma.vmem_to_hbm [thread:$0]  %s6764_s22, 64, %s11022_s3, [#allocation3], %s7765_s29, %s7765_s29, %s7766_s30  }
 0xa47   :  { %7756 = dma.done.wait [#allocation3], 64  }
 0xa48   :  { %7757 = vsyncadd [#allocation3], 4294967232 }
 0xa49   :  { %6775 = vsyncpa [#allocation3], 1 }

</bundles_post_ra>
